<compile_context>
chip_gen: v6e
topology: v6e:2x2x1
jax: 0.10.0
libtpu: 0.0.40
codegen_flags: <defaults>
</compile_context>

<pallas_src>
import functools
import math

import jax
import jax.numpy as jnp
import numpy as np
from jax import lax
from jax.experimental import pallas as pl
from jax.experimental.pallas import tpu as pltpu

D_IN = 2          # input / latent / output feature width
HID = 100         # hidden width of each head
PAD = 128         # lane offset of the "std" head inside a fused 256-wide pair
HALF_LOG_2PI = 0.5 * math.log(2.0 * math.pi)


def _softplus(u):
    # numerically stable torch.nn.Softplus(beta=1, threshold=20)
    s = jnp.maximum(u, 0.0) + jnp.log(1.0 + jnp.exp(-jnp.abs(u)))
    return jnp.where(u > 20.0, u, s)


def _round_up(n, m):
    return ((n + m - 1) // m) * m


def vae_kernel(x_ref, eps_ref, w1_ref, b1_ref, w2_ref, b2_ref,
               stats_ref, xmu0_ref, xstd0_ref, z0_ref, zmu_ref, zstd_ref,
               *, beta, switch, iw, n_valid, tile):
    x = x_ref[...]                                        # (tile, 2)

    def pair_mlp(v, p):
        """Fused (mu|std) head pair: Linear(2,100)+ReLU+Linear(100,2) for both heads.

        First layer as 2 VPU broadcast-FMAs (only 2 real contraction rows);
        second layer is one (., 256) @ (256, 256) block-diagonal MXU matmul.
        mu head lives in lanes [0,128), std head in lanes [128,256).
        """
        w1 = w1_ref[p]                                    # (2, 256)
        h = v[:, 0:1] * w1[0:1, :] + v[:, 1:2] * w1[1:2, :] + b1_ref[p]
        h = jnp.maximum(h, 0.0)                           # (M, 256)
        return jnp.dot(h, w2_ref[p],
                       preferred_element_type=jnp.float32) + b2_ref[p]

    def rep(a):  # replicate a (tile, k) block once per IW sample along sublanes
        return jnp.concatenate([a] * iw, axis=0) if iw > 1 else a

    # ---------------- encoder: both heads in one fused pass ----------------
    enc = pair_mlp(x, 0)                                  # (tile, 256)
    z_mu = enc[:, 0:D_IN]                                 # (tile, 2)
    z_std = _softplus(enc[:, PAD:PAD + D_IN])             # (tile, 2)
    zmu_ref[...] = z_mu
    zstd_ref[...] = z_std

    # -------- rsample: all IW samples stacked along the sublane axis --------
    z_list = [z_mu + z_std * eps_ref[i] for i in range(iw)]
    z_all = jnp.concatenate(z_list, axis=0) if iw > 1 else z_list[0]   # (iw*tile, 2)
    z0_ref[...] = z_list[0]

    # ---------------- decoder: fused heads, batched over IW -----------------
    dec = pair_mlp(z_all, 1)                              # (iw*tile, 256)
    x_mu = dec[:, 0:D_IN]
    x_std = switch * _softplus(dec[:, PAD:PAD + D_IN]) + (1.0 - switch) * (0.02 ** 2)
    xmu0_ref[...] = x_mu[:tile]
    xstd0_ref[...] = x_std[:tile]

    # -------------- log-probs (Independent Normal over D_IN) ----------------
    x_all = rep(x)
    zmu_all = rep(z_mu)
    zstd_all = rep(z_std)

    log_px = jnp.sum(-0.5 * ((x_all - x_mu) / x_std) ** 2
                     - jnp.log(x_std) - HALF_LOG_2PI,
                     axis=-1, keepdims=True)              # (iw*tile, 1)
    lq = jnp.sum(-0.5 * ((z_all - zmu_all) / zstd_all) ** 2
                 - jnp.log(zstd_all) - HALF_LOG_2PI,
                 axis=-1, keepdims=True)
    lp = jnp.sum(-0.5 * z_all * z_all - HALF_LOG_2PI, axis=-1, keepdims=True)
    kl = lq - lp                                          # (iw*tile, 1)
    elbo = log_px - beta * kl

    # logsumexp over the IW axis (IW is small & static; static sublane slices).
    # TODO(synk): switch to an online (running max/sum) logsumexp if IW gets large.
    e_list = [elbo[i * tile:(i + 1) * tile] for i in range(iw)]
    m = functools.reduce(jnp.maximum, e_list)
    sexp = functools.reduce(lambda a, b: a + b, [jnp.exp(e - m) for e in e_list])
    iw_elbo = m + jnp.log(sexp) - math.log(float(iw))     # (tile, 1)

    # -------- per-block partial sums (padded batch rows masked out) ---------
    row = pl.program_id(0) * tile + lax.broadcasted_iota(jnp.int32, (tile, 1), 0)
    rmask = (row < n_valid).astype(jnp.float32)           # (tile, 1)
    rmask_all = rep(rmask)

    s_elbo = jnp.sum(iw_elbo * rmask)
    s_lpx = jnp.sum(log_px * rmask_all)
    s_kl = jnp.sum(kl * rmask_all)

    srow = lax.broadcasted_iota(jnp.int32, (8, PAD), 0)
    stats_ref[0] = jnp.where(srow == 0, s_elbo,
                      jnp.where(srow == 1, s_lpx,
                         jnp.where(srow == 2, s_kl, 0.0)))


def pack_params(raw):
    """Pack the 4 raw heads [(w1,b1,w2,b2) for enc_mu, enc_std, dec_mu, dec_std] into
    the fused, zero-padded tensors the kernel expects.  Re-apply this whenever new
    (e.g. trained) weights are loaded: correctness relies on the zero padding."""
    W1 = np.zeros((2, D_IN, 2 * PAD), np.float32)
    B1 = np.zeros((2, 1, 2 * PAD), np.float32)
    W2 = np.zeros((2, 2 * PAD, 2 * PAD), np.float32)
    B2 = np.zeros((2, 1, 2 * PAD), np.float32)
    for p, (i_mu, i_std) in enumerate(((0, 1), (2, 3))):
        w1m, b1m, w2m, b2m = [np.asarray(a) for a in raw[i_mu]]
        w1s, b1s, w2s, b2s = [np.asarray(a) for a in raw[i_std]]
        W1[p, :, :HID] = w1m
        W1[p, :, PAD:PAD + HID] = w1s
        B1[p, 0, :HID] = b1m
        B1[p, 0, PAD:PAD + HID] = b1s
        W2[p, :HID, :D_IN] = w2m
        W2[p, PAD:PAD + HID, PAD:PAD + D_IN] = w2s
        B2[p, 0, :D_IN] = b2m
        B2[p, 0, PAD:PAD + D_IN] = b2s
    return tuple(jnp.asarray(a) for a in (W1, B1, W2, B2))


def init_params(key):
    """Deterministic params for the 4 MLP heads (enc_mu, enc_std, dec_mu, dec_std)."""
    def linear(k, fin, fout):
        k1, k2 = jax.random.split(k)
        bound = 1.0 / math.sqrt(fin)
        w = jax.random.uniform(k1, (fin, fout), jnp.float32, -bound, bound)
        b = jax.random.uniform(k2, (fout,), jnp.float32, -bound, bound)
        return w, b

    keys = jax.random.split(key, 8)
    raw = []
    for m in range(4):
        w1, b1 = linear(keys[2 * m], D_IN, HID)
        w2, b2 = linear(keys[2 * m + 1], HID, D_IN)
        raw.append((w1, b1, w2, b2))
    return pack_params(raw), raw


def vae_forward(x, eps, params, beta=1.0, switch=1.0, block_rows=512):
    n = x.shape[0]
    iw = eps.shape[0]
    W1, B1, W2, B2 = params

    tile = _round_up(min(block_rows, _round_up(n, 8)), 8)
    n_pad = _round_up(n, tile)
    grid = n_pad // tile

    # feature-dense (no lane padding); only the batch is padded up to the tile.
    x_p = jnp.zeros((n_pad, D_IN), jnp.float32).at[:n].set(x)
    eps_p = jnp.zeros((iw, n_pad, D_IN), jnp.float32).at[:, :n].set(eps)

    kernel = functools.partial(vae_kernel, beta=float(beta), switch=float(switch),
                               iw=int(iw), n_valid=int(n), tile=int(tile))

    def row_block():
        return pl.BlockSpec((tile, D_IN), lambda i: (i, 0))

    const3 = lambda i: (0, 0, 0)
    in_specs = [
        row_block(),                                            # x
        pl.BlockSpec((iw, tile, D_IN), lambda i: (0, i, 0)),    # eps (all IW samples)
        pl.BlockSpec(W1.shape, const3),                         # fused first-layer weights
        pl.BlockSpec(B1.shape, const3),
        pl.BlockSpec(W2.shape, const3),                         # fused block-diag 2nd layer
        pl.BlockSpec(B2.shape, const3),
    ]
    out_specs = (
        pl.BlockSpec((1, 8, PAD), lambda i: (i, 0, 0)),         # per-block partial sums
        row_block(), row_block(), row_block(), row_block(), row_block(),
    )
    out_shapes = (
        jax.ShapeDtypeStruct((grid, 8, PAD), jnp.float32),      # [elbo, log_px, kl] sums
        jax.ShapeDtypeStruct((n_pad, D_IN), jnp.float32),       # x_mu[0]
        jax.ShapeDtypeStruct((n_pad, D_IN), jnp.float32),       # x_std[0]
        jax.ShapeDtypeStruct((n_pad, D_IN), jnp.float32),       # z[0]
        jax.ShapeDtypeStruct((n_pad, D_IN), jnp.float32),       # z_mu
        jax.ShapeDtypeStruct((n_pad, D_IN), jnp.float32),       # z_std
    )

    stats, xmu0, xstd0, z0, zmu, zstd = pl.pallas_call(
        kernel,
        out_shape=out_shapes,
        grid=(grid,),
        in_specs=in_specs,
        out_specs=out_specs,
        compiler_params=pltpu.CompilerParams(
            dimension_semantics=("parallel",),      # batch blocks are independent
            vmem_limit_bytes=32 * 1024 * 1024),
    )(x_p, eps_p, W1, B1, W2, B2)

    s_elbo = jnp.sum(stats[:, 0, 0])
    s_lpx = jnp.sum(stats[:, 1, 0])
    s_kl = jnp.sum(stats[:, 2, 0])
    return (s_elbo / n, s_lpx / (iw * n), s_kl / (iw * n),
            xmu0[:n], xstd0[:n], z0[:n], zmu[:n], zstd[:n])


def reference(x, eps, raw, beta=1.0, switch=1.0):
    """Pure-JAX replica of VAE_full.forward (same eps, same softplus)."""
    def mlp(v, p):
        w1, b1, w2, b2 = p
        h = jnp.maximum(v @ w1 + b1, 0.0)
        return h @ w2 + b2

    z_mu = mlp(x, raw[0])
    z_std = _softplus(mlp(x, raw[1]))
    z = z_mu[None] + z_std[None] * eps                 # (IW, N, 2)
    iw, n, _ = z.shape
    zf = z.reshape(iw * n, D_IN)
    x_mu = mlp(zf, raw[2]).reshape(iw, n, D_IN)
    x_std = _softplus(mlp(zf, raw[3])).reshape(iw, n, D_IN)
    x_std = switch * x_std + (1.0 - switch) * (0.02 ** 2)

    c = HALF_LOG_2PI
    log_px = jnp.sum(-0.5 * ((x[None] - x_mu) / x_std) ** 2 - jnp.log(x_std) - c, axis=-1)
    lq = jnp.sum(-0.5 * ((z - z_mu[None]) / z_std[None]) ** 2 - jnp.log(z_std[None]) - c,
                 axis=-1)
    lp = jnp.sum(-0.5 * z ** 2 - c, axis=-1)
    kl = lq - lp
    elbo = log_px - beta * kl
    iw_elbo = jax.scipy.special.logsumexp(elbo, axis=0) - math.log(float(iw))
    return (iw_elbo.mean(), log_px.mean(), kl.mean(),
            x_mu[0], x_std[0], z[0], z_mu, z_std)


if __name__ == "__main__":
    N = 200          # batch (not a tile multiple: exercises the row-mask path)
    IW = 2           # iw_samples
    key = jax.random.PRNGKey(0)
    kx, keps, kp = jax.random.split(key, 3)
    x = jax.random.normal(kx, (N, D_IN), jnp.float32)
    eps = jax.random.normal(keps, (IW, N, D_IN), jnp.float32)
    params, raw = init_params(kp)

    # small block_rows so the demo exercises a multi-step (grid=2) pipeline
    outs = vae_forward(x, eps, params, beta=1.0, switch=1.0, block_rows=128)
    outs = jax.block_until_ready(outs)

    refs = reference(x, eps, raw, beta=1.0, switch=1.0)
    for o, r in zip(outs, refs):
        np.testing.assert_allclose(np.asarray(o), np.asarray(r), rtol=5e-3, atol=5e-3)

    print("KERNEL_OK")
</pallas_src>

<mosaic_0001>
module attributes {stable_mosaic.version = 11 : i64} {
  func.func @vae_kernel(%arg0: i32, %arg1: memref<128x2xf32, #tpu.memory_space<vmem>>, %arg2: memref<2x128x2xf32, #tpu.memory_space<vmem>>, %arg3: memref<2x2x256xf32, #tpu.memory_space<vmem>>, %arg4: memref<2x1x256xf32, #tpu.memory_space<vmem>>, %arg5: memref<2x256x256xf32, #tpu.memory_space<vmem>>, %arg6: memref<2x1x256xf32, #tpu.memory_space<vmem>>, %arg7: memref<1x8x128xf32, #tpu.memory_space<vmem>>, %arg8: memref<128x2xf32, #tpu.memory_space<vmem>>, %arg9: memref<128x2xf32, #tpu.memory_space<vmem>>, %arg10: memref<128x2xf32, #tpu.memory_space<vmem>>, %arg11: memref<128x2xf32, #tpu.memory_space<vmem>>, %arg12: memref<128x2xf32, #tpu.memory_space<vmem>>) attributes {dimension_semantics = [#tpu.dimension_semantics<parallel>], iteration_bounds = array<i64: 2>, scalar_prefetch = 0 : i64, scratch_operands = 0 : i64, tpu.core_type = #tpu.core_type<tc>, window_params = [{transform_indices = @transform_0, window_bounds = array<i64: 128, 2>}, {transform_indices = @transform_1, window_bounds = array<i64: 2, 128, 2>}, {pipeline_mode = #tpu.pipeline_mode<synchronous>, transform_indices = @transform_2, window_bounds = array<i64: 2, 2, 256>}, {pipeline_mode = #tpu.pipeline_mode<synchronous>, transform_indices = @transform_3, window_bounds = array<i64: 2, 1, 256>}, {pipeline_mode = #tpu.pipeline_mode<synchronous>, transform_indices = @transform_4, window_bounds = array<i64: 2, 256, 256>}, {pipeline_mode = #tpu.pipeline_mode<synchronous>, transform_indices = @transform_5, window_bounds = array<i64: 2, 1, 256>}, {transform_indices = @transform_6, window_bounds = array<i64: 1, 8, 128>}, {transform_indices = @transform_7, window_bounds = array<i64: 128, 2>}, {transform_indices = @transform_8, window_bounds = array<i64: 128, 2>}, {transform_indices = @transform_9, window_bounds = array<i64: 128, 2>}, {transform_indices = @transform_10, window_bounds = array<i64: 128, 2>}, {transform_indices = @transform_11, window_bounds = array<i64: 128, 2>}]} {
    %c0 = arith.constant 0 : index
    %c0_0 = arith.constant 0 : index
    %0 = vector.load %arg1[%c0, %c0_0] : memref<128x2xf32, #tpu.memory_space<vmem>>, vector<128x2xf32>
    %c0_1 = arith.constant 0 : index
    %c0_2 = arith.constant 0 : index
    %c0_3 = arith.constant 0 : index
    %1 = vector.load %arg3[%c0_1, %c0_2, %c0_3] : memref<2x2x256xf32, #tpu.memory_space<vmem>>, vector<1x2x256xf32>
    %2 = vector.shape_cast %1 : vector<1x2x256xf32> to vector<2x256xf32>
    %3 = vector.extract_strided_slice %0 {offsets = [0, 0], sizes = [128, 1], strides = [1, 1]} : vector<128x2xf32> to vector<128x1xf32>
    %4 = vector.extract_strided_slice %2 {offsets = [0, 0], sizes = [1, 256], strides = [1, 1]} : vector<2x256xf32> to vector<1x256xf32>
    %5 = vector.broadcast %3 : vector<128x1xf32> to vector<128x256xf32>
    %6 = vector.broadcast %4 : vector<1x256xf32> to vector<128x256xf32>
    %7 = arith.mulf %5, %6 : vector<128x256xf32>
    %8 = vector.extract_strided_slice %0 {offsets = [0, 1], sizes = [128, 1], strides = [1, 1]} : vector<128x2xf32> to vector<128x1xf32>
    %9 = vector.extract_strided_slice %2 {offsets = [1, 0], sizes = [1, 256], strides = [1, 1]} : vector<2x256xf32> to vector<1x256xf32>
    %10 = vector.broadcast %8 : vector<128x1xf32> to vector<128x256xf32>
    %11 = vector.broadcast %9 : vector<1x256xf32> to vector<128x256xf32>
    %12 = arith.mulf %10, %11 : vector<128x256xf32>
    %13 = arith.addf %7, %12 : vector<128x256xf32>
    %c0_4 = arith.constant 0 : index
    %c0_5 = arith.constant 0 : index
    %c0_6 = arith.constant 0 : index
    %14 = vector.load %arg4[%c0_4, %c0_5, %c0_6] : memref<2x1x256xf32, #tpu.memory_space<vmem>>, vector<1x1x256xf32>
    %15 = vector.shape_cast %14 : vector<1x1x256xf32> to vector<1x256xf32>
    %16 = vector.broadcast %15 : vector<1x256xf32> to vector<128x256xf32>
    %17 = arith.addf %13, %16 : vector<128x256xf32>
    %cst = arith.constant 0.000000e+00 : f32
    %18 = vector.broadcast %cst : f32 to vector<128x256xf32>
    %19 = arith.maximumf %17, %18 : vector<128x256xf32>
    %c0_7 = arith.constant 0 : index
    %c0_8 = arith.constant 0 : index
    %c0_9 = arith.constant 0 : index
    %20 = vector.load %arg5[%c0_7, %c0_8, %c0_9] : memref<2x256x256xf32, #tpu.memory_space<vmem>>, vector<1x256x256xf32>
    %21 = vector.shape_cast %20 : vector<1x256x256xf32> to vector<256x256xf32>
    %cst_10 = arith.constant dense<0.000000e+00> : vector<128x256xf32>
    %22 = tpu.matmul %19, %21, %cst_10 {dimension_numbers = #tpu.dot_dimension_numbers<[1], [0], [0], [1], [0, 0, 1, 1], [], []>} : vector<128x256xf32>, vector<256x256xf32>, vector<128x256xf32> -> vector<128x256xf32>
    %c0_11 = arith.constant 0 : index
    %c0_12 = arith.constant 0 : index
    %c0_13 = arith.constant 0 : index
    %23 = vector.load %arg6[%c0_11, %c0_12, %c0_13] : memref<2x1x256xf32, #tpu.memory_space<vmem>>, vector<1x1x256xf32>
    %24 = vector.shape_cast %23 : vector<1x1x256xf32> to vector<1x256xf32>
    %25 = vector.broadcast %24 : vector<1x256xf32> to vector<128x256xf32>
    %26 = arith.addf %22, %25 : vector<128x256xf32>
    %27 = vector.extract_strided_slice %26 {offsets = [0, 0], sizes = [128, 2], strides = [1, 1]} : vector<128x256xf32> to vector<128x2xf32>
    %28 = vector.extract_strided_slice %26 {offsets = [0, 128], sizes = [128, 2], strides = [1, 1]} : vector<128x256xf32> to vector<128x2xf32>
    %cst_14 = arith.constant 0.000000e+00 : f32
    %29 = vector.broadcast %cst_14 : f32 to vector<128x2xf32>
    %30 = arith.maximumf %28, %29 : vector<128x2xf32>
    %31 = math.absf %28 : vector<128x2xf32>
    %cst_15 = arith.constant 0.000000e+00 : f32
    %32 = vector.broadcast %cst_15 : f32 to vector<128x2xf32>
    %33 = arith.subf %32, %31 : vector<128x2xf32>
    %34 = math.exp %33 : vector<128x2xf32>
    %cst_16 = arith.constant 1.000000e+00 : f32
    %35 = vector.broadcast %cst_16 : f32 to vector<128x2xf32>
    %36 = arith.addf %35, %34 : vector<128x2xf32>
    %37 = math.log %36 : vector<128x2xf32>
    %38 = arith.addf %30, %37 : vector<128x2xf32>
    %cst_17 = arith.constant 2.000000e+01 : f32
    %39 = vector.broadcast %cst_17 : f32 to vector<128x2xf32>
    %40 = arith.cmpf ogt, %28, %39 : vector<128x2xf32>
    %41 = arith.select %40, %28, %38 : vector<128x2xi1>, vector<128x2xf32>
    %c0_18 = arith.constant 0 : index
    %c0_19 = arith.constant 0 : index
    %42 = vector.load %arg11[%c0_18, %c0_19] : memref<128x2xf32, #tpu.memory_space<vmem>>, vector<128x2xf32>
    tpu.vector_store %arg11[%c0_18, %c0_19], %27 {strides = array<i32>} : memref<128x2xf32, #tpu.memory_space<vmem>>, vector<128x2xf32>,
    %c0_20 = arith.constant 0 : index
    %c0_21 = arith.constant 0 : index
    %43 = vector.load %arg12[%c0_20, %c0_21] : memref<128x2xf32, #tpu.memory_space<vmem>>, vector<128x2xf32>
    tpu.vector_store %arg12[%c0_20, %c0_21], %41 {strides = array<i32>} : memref<128x2xf32, #tpu.memory_space<vmem>>, vector<128x2xf32>,
    %c0_22 = arith.constant 0 : index
    %c0_23 = arith.constant 0 : index
    %c0_24 = arith.constant 0 : index
    %44 = vector.load %arg2[%c0_22, %c0_23, %c0_24] : memref<2x128x2xf32, #tpu.memory_space<vmem>>, vector<1x128x2xf32>
    %45 = vector.shape_cast %44 : vector<1x128x2xf32> to vector<128x2xf32>
    %46 = arith.mulf %41, %45 : vector<128x2xf32>
    %47 = arith.addf %27, %46 : vector<128x2xf32>
    %c1 = arith.constant 1 : index
    %c0_25 = arith.constant 0 : index
    %c0_26 = arith.constant 0 : index
    %48 = vector.load %arg2[%c1, %c0_25, %c0_26] : memref<2x128x2xf32, #tpu.memory_space<vmem>>, vector<1x128x2xf32>
    %49 = vector.shape_cast %48 : vector<1x128x2xf32> to vector<128x2xf32>
    %50 = arith.mulf %41, %49 : vector<128x2xf32>
    %51 = arith.addf %27, %50 : vector<128x2xf32>
    %52 = tpu.concatenate %47, %51 in 0 : vector<128x2xf32>, vector<128x2xf32> -> vector<256x2xf32>
    %c0_27 = arith.constant 0 : index
    %c0_28 = arith.constant 0 : index
    %53 = vector.load %arg10[%c0_27, %c0_28] : memref<128x2xf32, #tpu.memory_space<vmem>>, vector<128x2xf32>
    tpu.vector_store %arg10[%c0_27, %c0_28], %47 {strides = array<i32>} : memref<128x2xf32, #tpu.memory_space<vmem>>, vector<128x2xf32>,
    %c1_29 = arith.constant 1 : index
    %c0_30 = arith.constant 0 : index
    %c0_31 = arith.constant 0 : index
    %54 = vector.load %arg3[%c1_29, %c0_30, %c0_31] : memref<2x2x256xf32, #tpu.memory_space<vmem>>, vector<1x2x256xf32>
    %55 = vector.shape_cast %54 : vector<1x2x256xf32> to vector<2x256xf32>
    %56 = vector.extract_strided_slice %52 {offsets = [0, 0], sizes = [256, 1], strides = [1, 1]} : vector<256x2xf32> to vector<256x1xf32>
    %57 = vector.extract_strided_slice %55 {offsets = [0, 0], sizes = [1, 256], strides = [1, 1]} : vector<2x256xf32> to vector<1x256xf32>
    %58 = vector.broadcast %56 : vector<256x1xf32> to vector<256x256xf32>
    %59 = vector.broadcast %57 : vector<1x256xf32> to vector<256x256xf32>
    %60 = arith.mulf %58, %59 : vector<256x256xf32>
    %61 = vector.extract_strided_slice %52 {offsets = [0, 1], sizes = [256, 1], strides = [1, 1]} : vector<256x2xf32> to vector<256x1xf32>
    %62 = vector.extract_strided_slice %55 {offsets = [1, 0], sizes = [1, 256], strides = [1, 1]} : vector<2x256xf32> to vector<1x256xf32>
    %63 = vector.broadcast %61 : vector<256x1xf32> to vector<256x256xf32>
    %64 = vector.broadcast %62 : vector<1x256xf32> to vector<256x256xf32>
    %65 = arith.mulf %63, %64 : vector<256x256xf32>
    %66 = arith.addf %60, %65 : vector<256x256xf32>
    %c1_32 = arith.constant 1 : index
    %c0_33 = arith.constant 0 : index
    %c0_34 = arith.constant 0 : index
    %67 = vector.load %arg4[%c1_32, %c0_33, %c0_34] : memref<2x1x256xf32, #tpu.memory_space<vmem>>, vector<1x1x256xf32>
    %68 = vector.shape_cast %67 : vector<1x1x256xf32> to vector<1x256xf32>
    %69 = vector.broadcast %68 : vector<1x256xf32> to vector<256x256xf32>
    %70 = arith.addf %66, %69 : vector<256x256xf32>
    %cst_35 = arith.constant 0.000000e+00 : f32
    %71 = vector.broadcast %cst_35 : f32 to vector<256x256xf32>
    %72 = arith.maximumf %70, %71 : vector<256x256xf32>
    %c1_36 = arith.constant 1 : index
    %c0_37 = arith.constant 0 : index
    %c0_38 = arith.constant 0 : index
    %73 = vector.load %arg5[%c1_36, %c0_37, %c0_38] : memref<2x256x256xf32, #tpu.memory_space<vmem>>, vector<1x256x256xf32>
    %74 = vector.shape_cast %73 : vector<1x256x256xf32> to vector<256x256xf32>
    %cst_39 = arith.constant dense<0.000000e+00> : vector<256x256xf32>
    %75 = tpu.matmul %72, %74, %cst_39 {dimension_numbers = #tpu.dot_dimension_numbers<[1], [0], [0], [1], [0, 0, 1, 1], [], []>} : vector<256x256xf32>, vector<256x256xf32>, vector<256x256xf32> -> vector<256x256xf32>
    %c1_40 = arith.constant 1 : index
    %c0_41 = arith.constant 0 : index
    %c0_42 = arith.constant 0 : index
    %76 = vector.load %arg6[%c1_40, %c0_41, %c0_42] : memref<2x1x256xf32, #tpu.memory_space<vmem>>, vector<1x1x256xf32>
    %77 = vector.shape_cast %76 : vector<1x1x256xf32> to vector<1x256xf32>
    %78 = vector.broadcast %77 : vector<1x256xf32> to vector<256x256xf32>
    %79 = arith.addf %75, %78 : vector<256x256xf32>
    %80 = vector.extract_strided_slice %79 {offsets = [0, 0], sizes = [256, 2], strides = [1, 1]} : vector<256x256xf32> to vector<256x2xf32>
    %81 = vector.extract_strided_slice %79 {offsets = [0, 128], sizes = [256, 2], strides = [1, 1]} : vector<256x256xf32> to vector<256x2xf32>
    %cst_43 = arith.constant 0.000000e+00 : f32
    %82 = vector.broadcast %cst_43 : f32 to vector<256x2xf32>
    %83 = arith.maximumf %81, %82 : vector<256x2xf32>
    %84 = math.absf %81 : vector<256x2xf32>
    %cst_44 = arith.constant 0.000000e+00 : f32
    %85 = vector.broadcast %cst_44 : f32 to vector<256x2xf32>
    %86 = arith.subf %85, %84 : vector<256x2xf32>
    %87 = math.exp %86 : vector<256x2xf32>
    %cst_45 = arith.constant 1.000000e+00 : f32
    %88 = vector.broadcast %cst_45 : f32 to vector<256x2xf32>
    %89 = arith.addf %88, %87 : vector<256x2xf32>
    %90 = math.log %89 : vector<256x2xf32>
    %91 = arith.addf %83, %90 : vector<256x2xf32>
    %cst_46 = arith.constant 2.000000e+01 : f32
    %92 = vector.broadcast %cst_46 : f32 to vector<256x2xf32>
    %93 = arith.cmpf ogt, %81, %92 : vector<256x2xf32>
    %94 = arith.select %93, %81, %91 : vector<256x2xi1>, vector<256x2xf32>
    %cst_47 = arith.constant 1.000000e+00 : f32
    %95 = vector.broadcast %cst_47 : f32 to vector<256x2xf32>
    %96 = arith.mulf %95, %94 : vector<256x2xf32>
    %cst_48 = arith.constant 0.000000e+00 : f32
    %97 = vector.broadcast %cst_48 : f32 to vector<256x2xf32>
    %98 = arith.addf %96, %97 : vector<256x2xf32>
    %99 = vector.extract_strided_slice %80 {offsets = [0, 0], sizes = [128, 2], strides = [1, 1]} : vector<256x2xf32> to vector<128x2xf32>
    %c0_49 = arith.constant 0 : index
    %c0_50 = arith.constant 0 : index
    %100 = vector.load %arg8[%c0_49, %c0_50] : memref<128x2xf32, #tpu.memory_space<vmem>>, vector<128x2xf32>
    tpu.vector_store %arg8[%c0_49, %c0_50], %99 {strides = array<i32>} : memref<128x2xf32, #tpu.memory_space<vmem>>, vector<128x2xf32>,
    %101 = vector.extract_strided_slice %98 {offsets = [0, 0], sizes = [128, 2], strides = [1, 1]} : vector<256x2xf32> to vector<128x2xf32>
    %c0_51 = arith.constant 0 : index
    %c0_52 = arith.constant 0 : index
    %102 = vector.load %arg9[%c0_51, %c0_52] : memref<128x2xf32, #tpu.memory_space<vmem>>, vector<128x2xf32>
    tpu.vector_store %arg9[%c0_51, %c0_52], %101 {strides = array<i32>} : memref<128x2xf32, #tpu.memory_space<vmem>>, vector<128x2xf32>,
    %103 = tpu.concatenate %0, %0 in 0 : vector<128x2xf32>, vector<128x2xf32> -> vector<256x2xf32>
    %104 = tpu.concatenate %27, %27 in 0 : vector<128x2xf32>, vector<128x2xf32> -> vector<256x2xf32>
    %105 = tpu.concatenate %41, %41 in 0 : vector<128x2xf32>, vector<128x2xf32> -> vector<256x2xf32>
    %106 = arith.subf %103, %80 : vector<256x2xf32>
    %107 = arith.divf %106, %98 : vector<256x2xf32>
    %108 = arith.mulf %107, %107 : vector<256x2xf32>
    %cst_53 = arith.constant -5.000000e-01 : f32
    %109 = vector.broadcast %cst_53 : f32 to vector<256x2xf32>
    %110 = arith.mulf %109, %108 : vector<256x2xf32>
    %111 = math.log %98 : vector<256x2xf32>
    %112 = arith.subf %110, %111 : vector<256x2xf32>
    %cst_54 = arith.constant 0.918938517 : f32
    %113 = vector.broadcast %cst_54 : f32 to vector<256x2xf32>
    %114 = arith.subf %112, %113 : vector<256x2xf32>
    %cst_55 = arith.constant dense<0.000000e+00> : vector<256xf32>
    %115 = vector.multi_reduction <add>, %114, %cst_55 [1] : vector<256x2xf32> to vector<256xf32>
    %116 = vector.shape_cast %115 : vector<256xf32> to vector<256x1xf32>
    %117 = arith.subf %52, %104 : vector<256x2xf32>
    %118 = arith.divf %117, %105 : vector<256x2xf32>
    %119 = arith.mulf %118, %118 : vector<256x2xf32>
    %cst_56 = arith.constant -5.000000e-01 : f32
    %120 = vector.broadcast %cst_56 : f32 to vector<256x2xf32>
    %121 = arith.mulf %120, %119 : vector<256x2xf32>
    %122 = math.log %105 : vector<256x2xf32>
    %123 = arith.subf %121, %122 : vector<256x2xf32>
    %cst_57 = arith.constant 0.918938517 : f32
    %124 = vector.broadcast %cst_57 : f32 to vector<256x2xf32>
    %125 = arith.subf %123, %124 : vector<256x2xf32>
    %cst_58 = arith.constant dense<0.000000e+00> : vector<256xf32>
    %126 = vector.multi_reduction <add>, %125, %cst_58 [1] : vector<256x2xf32> to vector<256xf32>
    %127 = vector.shape_cast %126 : vector<256xf32> to vector<256x1xf32>
    %cst_59 = arith.constant -5.000000e-01 : f32
    %128 = vector.broadcast %cst_59 : f32 to vector<256x2xf32>
    %129 = arith.mulf %128, %52 : vector<256x2xf32>
    %130 = arith.mulf %129, %52 : vector<256x2xf32>
    %cst_60 = arith.constant 0.918938517 : f32
    %131 = vector.broadcast %cst_60 : f32 to vector<256x2xf32>
    %132 = arith.subf %130, %131 : vector<256x2xf32>
    %cst_61 = arith.constant dense<0.000000e+00> : vector<256xf32>
    %133 = vector.multi_reduction <add>, %132, %cst_61 [1] : vector<256x2xf32> to vector<256xf32>
    %134 = vector.shape_cast %133 : vector<256xf32> to vector<256x1xf32>
    %135 = arith.subf %127, %134 : vector<256x1xf32>
    %cst_62 = arith.constant 1.000000e+00 : f32
    %136 = vector.broadcast %cst_62 : f32 to vector<256x1xf32>
    %137 = arith.mulf %136, %135 : vector<256x1xf32>
    %138 = arith.subf %116, %137 : vector<256x1xf32>
    %139 = vector.extract_strided_slice %138 {offsets = [0, 0], sizes = [128, 1], strides = [1, 1]} : vector<256x1xf32> to vector<128x1xf32>
    %140 = vector.extract_strided_slice %138 {offsets = [128, 0], sizes = [128, 1], strides = [1, 1]} : vector<256x1xf32> to vector<128x1xf32>
    %141 = arith.maximumf %139, %140 : vector<128x1xf32>
    %142 = arith.subf %139, %141 : vector<128x1xf32>
    %143 = math.exp %142 : vector<128x1xf32>
    %144 = arith.subf %140, %141 : vector<128x1xf32>
    %145 = math.exp %144 : vector<128x1xf32>
    %146 = arith.addf %143, %145 : vector<128x1xf32>
    %147 = math.log %146 : vector<128x1xf32>
    %148 = arith.addf %141, %147 : vector<128x1xf32>
    %cst_63 = arith.constant 0.693147182 : f32
    %149 = vector.broadcast %cst_63 : f32 to vector<128x1xf32>
    %150 = arith.subf %148, %149 : vector<128x1xf32>
    %c128_i32 = arith.constant 128 : i32
    %151 = arith.muli %arg0, %c128_i32 : i32
    %152 = tpu.iota {dimensions = array<i32: 0>} : vector<128x1xi32>
    %153 = vector.broadcast %151 : i32 to vector<128x1xi32>
    %154 = arith.addi %153, %152 : vector<128x1xi32>
    %c200_i32 = arith.constant 200 : i32
    %155 = vector.broadcast %c200_i32 : i32 to vector<128x1xi32>
    %156 = arith.cmpi slt, %154, %155 : vector<128x1xi32>
    %157 = arith.extui %156 : vector<128x1xi1> to vector<128x1xi32>
    %158 = arith.sitofp %157 : vector<128x1xi32> to vector<128x1xf32>
    %159 = tpu.concatenate %158, %158 in 0 : vector<128x1xf32>, vector<128x1xf32> -> vector<256x1xf32>
    %160 = arith.mulf %150, %158 : vector<128x1xf32>
    %161 = vector.shape_cast %160 : vector<128x1xf32> to vector<1x128x1xf32>
    %cst_64 = arith.constant dense<0.000000e+00> : vector<1xf32>
    %162 = vector.multi_reduction <add>, %161, %cst_64 [1, 2] : vector<1x128x1xf32> to vector<1xf32>
    %163 = vector.shape_cast %162 : vector<1xf32> to vector<1x1x1xf32>
    %164 = vector.extract %163[0, 0, 0] : f32 from vector<1x1x1xf32>
    %165 = arith.mulf %116, %159 : vector<256x1xf32>
    %166 = vector.shape_cast %165 : vector<256x1xf32> to vector<1x256x1xf32>
    %cst_65 = arith.constant dense<0.000000e+00> : vector<1xf32>
    %167 = vector.multi_reduction <add>, %166, %cst_65 [1, 2] : vector<1x256x1xf32> to vector<1xf32>
    %168 = vector.shape_cast %167 : vector<1xf32> to vector<1x1x1xf32>
    %169 = vector.extract %168[0, 0, 0] : f32 from vector<1x1x1xf32>
    %170 = arith.mulf %135, %159 : vector<256x1xf32>
    %171 = vector.shape_cast %170 : vector<256x1xf32> to vector<1x256x1xf32>
    %cst_66 = arith.constant dense<0.000000e+00> : vector<1xf32>
    %172 = vector.multi_reduction <add>, %171, %cst_66 [1, 2] : vector<1x256x1xf32> to vector<1xf32>
    %173 = vector.shape_cast %172 : vector<1xf32> to vector<1x1x1xf32>
    %174 = vector.extract %173[0, 0, 0] : f32 from vector<1x1x1xf32>
    %175 = tpu.iota {dimensions = array<i32: 0>} : vector<8x128xi32>
    %c0_i32 = arith.constant 0 : i32
    %176 = vector.broadcast %c0_i32 : i32 to vector<8x128xi32>
    %177 = arith.cmpi eq, %175, %176 : vector<8x128xi32>
    %c1_i32 = arith.constant 1 : i32
    %178 = vector.broadcast %c1_i32 : i32 to vector<8x128xi32>
    %179 = arith.cmpi eq, %175, %178 : vector<8x128xi32>
    %c2_i32 = arith.constant 2 : i32
    %180 = vector.broadcast %c2_i32 : i32 to vector<8x128xi32>
    %181 = arith.cmpi eq, %175, %180 : vector<8x128xi32>
    %cst_67 = arith.constant 0.000000e+00 : f32
    %182 = vector.broadcast %174 : f32 to vector<8x128xf32>
    %183 = vector.broadcast %cst_67 : f32 to vector<8x128xf32>
    %184 = arith.select %181, %182, %183 : vector<8x128xi1>, vector<8x128xf32>
    %185 = vector.broadcast %169 : f32 to vector<8x128xf32>
    %186 = arith.select %179, %185, %184 : vector<8x128xi1>, vector<8x128xf32>
    %187 = vector.broadcast %164 : f32 to vector<8x128xf32>
    %188 = arith.select %177, %187, %186 : vector<8x128xi1>, vector<8x128xf32>
    %c0_68 = arith.constant 0 : index
    %c0_69 = arith.constant 0 : index
    %c0_70 = arith.constant 0 : index
    %189 = vector.load %arg7[%c0_68, %c0_69, %c0_70] : memref<1x8x128xf32, #tpu.memory_space<vmem>>, vector<1x8x128xf32>
    %190 = vector.shape_cast %189 : vector<1x8x128xf32> to vector<8x128xf32>
    %191 = vector.shape_cast %188 : vector<8x128xf32> to vector<1x8x128xf32>
    tpu.vector_store %arg7[%c0_68, %c0_69, %c0_70], %191 {strides = array<i32>} : memref<1x8x128xf32, #tpu.memory_space<vmem>>, vector<1x8x128xf32>,
    return
  }
  func.func @transform_0(%arg0: i32) -> (i32, i32) {
    %c0_i32 = arith.constant 0 : i32
    %c0_i32_0 = arith.constant 0 : i32
    return %arg0, %c0_i32 : i32, i32
  }
  func.func @transform_1(%arg0: i32) -> (i32, i32, i32) {
    %c0_i32 = arith.constant 0 : i32
    %c0_i32_0 = arith.constant 0 : i32
    %c0_i32_1 = arith.constant 0 : i32
    return %c0_i32, %arg0, %c0_i32_0 : i32, i32, i32
  }
  func.func @transform_2(%arg0: i32) -> (i32, i32, i32) {
    %c0_i32 = arith.constant 0 : i32
    %c0_i32_0 = arith.constant 0 : i32
    %c0_i32_1 = arith.constant 0 : i32
    %c0_i32_2 = arith.constant 0 : i32
    return %c0_i32, %c0_i32_0, %c0_i32_1 : i32, i32, i32
  }
  func.func @transform_3(%arg0: i32) -> (i32, i32, i32) {
    %c0_i32 = arith.constant 0 : i32
    %c0_i32_0 = arith.constant 0 : i32
    %c0_i32_1 = arith.constant 0 : i32
    %c0_i32_2 = arith.constant 0 : i32
    return %c0_i32, %c0_i32_0, %c0_i32_1 : i32, i32, i32
  }
  func.func @transform_4(%arg0: i32) -> (i32, i32, i32) {
    %c0_i32 = arith.constant 0 : i32
    %c0_i32_0 = arith.constant 0 : i32
    %c0_i32_1 = arith.constant 0 : i32
    %c0_i32_2 = arith.constant 0 : i32
    return %c0_i32, %c0_i32_0, %c0_i32_1 : i32, i32, i32
  }
  func.func @transform_5(%arg0: i32) -> (i32, i32, i32) {
    %c0_i32 = arith.constant 0 : i32
    %c0_i32_0 = arith.constant 0 : i32
    %c0_i32_1 = arith.constant 0 : i32
    %c0_i32_2 = arith.constant 0 : i32
    return %c0_i32, %c0_i32_0, %c0_i32_1 : i32, i32, i32
  }
  func.func @transform_6(%arg0: i32) -> (i32, i32, i32) {
    %c0_i32 = arith.constant 0 : i32
    %c0_i32_0 = arith.constant 0 : i32
    %c0_i32_1 = arith.constant 0 : i32
    return %arg0, %c0_i32, %c0_i32_0 : i32, i32, i32
  }
  func.func @transform_7(%arg0: i32) -> (i32, i32) {
    %c0_i32 = arith.constant 0 : i32
    %c0_i32_0 = arith.constant 0 : i32
    return %arg0, %c0_i32 : i32, i32
  }
  func.func @transform_8(%arg0: i32) -> (i32, i32) {
    %c0_i32 = arith.constant 0 : i32
    %c0_i32_0 = arith.constant 0 : i32
    return %arg0, %c0_i32 : i32, i32
  }
  func.func @transform_9(%arg0: i32) -> (i32, i32) {
    %c0_i32 = arith.constant 0 : i32
    %c0_i32_0 = arith.constant 0 : i32
    return %arg0, %c0_i32 : i32, i32
  }
  func.func @transform_10(%arg0: i32) -> (i32, i32) {
    %c0_i32 = arith.constant 0 : i32
    %c0_i32_0 = arith.constant 0 : i32
    return %arg0, %c0_i32 : i32, i32
  }
  func.func @transform_11(%arg0: i32) -> (i32, i32) {
    %c0_i32 = arith.constant 0 : i32
    %c0_i32_0 = arith.constant 0 : i32
    return %arg0, %c0_i32 : i32, i32
  }
}

</mosaic_0001>

<bundles_post_ra>
// kernel: tpu_custom_call.1
= control target key start
LH: loop header
LB: loop body
LE: loop exit
PB: predicated region body
PF: predicated region fallthrough
CT: control target
= control target key end

     0   :  { %17 = vsyncpa [#allocation4], 0  ;;  %s9333_s0 = inlined_call_operand.vmem [shape: f32[256,2], index: 0, kind: input, shape index: {}]   ;;  %s9334_s1 = inlined_call_operand.vmem [shape: f32[2,256,2], index: 1, kind: input, shape index: {}]   ;;  %s9335_s2 = inlined_call_operand.vmem [shape: f32[2,2,256], index: 2, kind: input, shape index: {}]   ;;  %s9336_s3 = inlined_call_operand.vmem [shape: f32[2,1,256], index: 3, kind: input, shape index: {}]   ;;  %s9337_s4 = inlined_call_operand.hbm [shape: f32[2,256,256], index: 4, kind: input, shape index: {}]   ;;  %s9338_s5 = inlined_call_operand.vmem [shape: f32[2,1,256], index: 5, kind: input, shape index: {}]   ;;  %s9339_s6 = inlined_call_operand.hbm [shape: f32[2,8,128], index: 6, kind: output, shape index: {0}]   ;;  %s9340_s7 = inlined_call_operand.vmem [shape: f32[256,2], index: 7, kind: output, shape index: {1}]   ;;  %s9341_s8 = inlined_call_operand.vmem [shape: f32[256,2], index: 8, kind: output, shape index: {2}]   ;;  %s9342_s9 = inlined_call_operand.vmem [shape: f32[256,2], index: 9, kind: output, shape index: {3}]   ;;  %s9343_s10 = inlined_call_operand.vmem [shape: f32[256,2], index: 10, kind: output, shape index: {4}]   ;;  %s9344_s11 = inlined_call_operand.vmem [shape: f32[256,2], index: 11, kind: output, shape index: {5}]  }
   0x1   :  { %18 = vsyncpa [#allocation5], 0 }
   0x2   :  { %20 = vsyncpa [#allocation5 + $0x1], 0  ;;  %s5769_s17 = smov 0   ;;  %s5771_s18 = smov 0  }
   0x3   :  { %s5773_s19 = smov 0   ;;  %s5775_s20 = smov 0  }
   0x4 LB: > { %s5790_s21 = sadd.s32 4294967295, %s5700_s20   ;;  %s4788_s22 = sadd.s32 4294967294, %s5700_s20   ;;  %s5700_s20 = sphi %s5775_s20, %s10046_s20   ;;  %s5696_s19 = sphi %s5773_s19, %s10050_s19   ;;  %s5692_s18 = sphi %s5771_s18, %s10049_s18   ;;  %s5688_s17 = sphi %s5769_s17, %s10048_s17  }
   0x5   : > { %s5794_s23 = sadd.s32 1, %s5700_s20   ;;  %s59_s24 = sadd.s32 1, %s5696_s19 }
   0x6   : > { %9581 = sst [smem:[#allocation9_spill]] %s5794_s23  ;;  %s56_s25 = ssub.s32 %s5700_s20, %s5794_s23 }
   0x7   : > { %p66_p0 = scmp.ne.s32.totalorder %s5696_s19, %s5692_s18  ;;  %p57_p1 = scmp.eq.s32.totalorder %s56_s25, 0 }
   0x8   : > { %p67_p2 = scmp.eq.s32.totalorder %s5700_s20, 0  ;;  %p180_p3 = scmp.eq.s32.totalorder %s5790_s21, 1 }
   0x9   : > { %p185_p4 = scmp.ne.s32.totalorder %s5692_s18, %s5688_s17  ;;  %p186_p7 = scmp.eq.s32.totalorder %s4788_s22, 1 }
   0xa   : > { %s5806_s26 = scalar_select %p57_p1, %s5696_s19, %s59_s24  }
   0xb   : > { %p5808_p5 = por %p67_p2, %p66_p0  ;;  %p5812_p6 = por %p180_p3, %p66_p0 }
   0xc   : > { %9582 = sst [smem:[#allocation10_spill]] %s5806_s26  ;;  %p4789_p8 = scmp.ge.s32.totalorder %s5700_s20, 1 }
   0xd   : > { %s9584_s28 = scalar_select %p5812_p6, 1, 0 }
   0xe   : > { %p323_p9 = scmp.lt.s32.totalorder %s5700_s20, 3  ;;  %p5818_p10 = por %p186_p7, %p185_p4 }
   0xf   : > { %p5048_p11 = scmp.eq.s32.totalorder %s5790_s21, 0  ;;  %s5702_s12 = smov [#allocation3]  }
  0x10   : > { %s9585_s29 = scalar_select %p5818_p10, 1, 0 }
  0x11   : > { %p5823_p12 = pnand %p4789_p8, %p323_p9  ;;  %s341_s13 = sshll.u32 %s5702_s12, 4  ;;  %s342_s13 = int_to_ptr.vmem [resolvable:$true] %s341_s13 }
  0x12   : > { %9586 = sst [smem:[#allocation11_spill]] %s9585_s29  ;;  %s5621_s14 = scalar_lea.vmem %s342_s13, 16384 }
  0x13   : > { %p5040_p13 = pneg %p5823_p12  ;;  %p5622_p2 = scmp.ne.s32.totalorder %s342_s13, %s5621_s14 }
  0x14   : > { %p5629_p7 = scmp.lt.s32.totalorder %s342_s13, %s342_s13  ;;  %p5630_p10 = scmp.lt.s32.totalorder %s5621_s14, %s5621_s14 }
  0x15   : > { %p5041_p0 = pnand %p5048_p11, %p5040_p13 }
  0x16   : > { %p5631_p6 = por %p5630_p10, %p5629_p7 }
  0x17   : > { %p5612_p1 = pneg %p5041_p0 }
  0x19   : > { %p5624_p3 = pnand %p5622_p2, %p5612_p1 }
  0x1b   : > { %p5625_p4 = pneg %p5624_p3 }
  0x1d   : > { %p5632_p8 = pnand %p5631_p6, %p5625_p4 }
  0x1f   : > { %5635 = shalt.err (!%p5632_p8)
}
  0x20   : > { %s5703_s15 = smov 256   ;;  %s5704_s16 = smov 16  }
  0x21   : > { %5043 = dma.hbm_to_vmem [thread:$0]  (!%p5041_p0), %s9337_s4, 16384, %s342_s13, [#allocation4], %s5703_s15, %s5703_s15, %s5704_s16  }
  0x22   : > { %p4791_p9 = scmp.ge.s32.totalorder %s5700_s20, 2 }
  0x24   : > { %354 = sbr.rel (%p4791_p9) target bundleno = 61 (0x3d), region = 32 }
  0x29   : > { %366 = sbr.rel (!%p5808_p5) target bundleno = 61 (0x3d), region = 40  ;;  %s368_s25 = sand.u32 (%p5808_p5), 1, %s5696_s19  }
  0x2a   : > { %s4963_s12 = sshll.u32 (%p5808_p5), %s5700_s20, 7  ;;  %s4792_s14 = sshll.u32 (%p5808_p5), %s368_s25, 8 }
  0x2b   : > { %s5844_s29 = scalar_lea.vmem (%p5808_p5), %s9334_s1, %s4963_s12  ;;  %s5849_s27 = scalar_lea.vmem (%p5808_p5), [#allocation2], %s4792_s14 }
  0x2c   : > { %v464_v0 = vld [vmem:[%s5844_s29] sm:$0xff] (%p5808_p5)  ;;  %v466_v1 = vld [vmem:[%s5844_s29 + $0x8] sm:$0xff] (%p5808_p5)  ;;  %v468_v2 = vld [vmem:[%s5844_s29 + $0x10] sm:$0xff] (%p5808_p5) }
  0x2d   : > { %465 = vst [vmem:[%s5849_s27] sm:$0xff] (%p5808_p5), %v464_v0  ;;  %467 = vst [vmem:[%s5849_s27 + $0x8] sm:$0xff] (%p5808_p5), %v466_v1  ;;  %v470_v3 = vld [vmem:[%s5844_s29 + $0x18] sm:$0xff] (%p5808_p5)  ;;  %v472_v4 = vld [vmem:[%s5844_s29 + $0x20] sm:$0xff] (%p5808_p5) }
  0x2e   : > { %469 = vst [vmem:[%s5849_s27 + $0x10] sm:$0xff] %v468_v2  ;;  %v474_v5 = vld [vmem:[%s5844_s29 + $0x28] sm:$0xff]  ;;  %471 = vst [vmem:[%s5849_s27 + $0x18] sm:$0xff] %v470_v3  ;;  %v476_v6 = vld [vmem:[%s5844_s29 + $0x30] sm:$0xff] }
  0x2f   : > { %473 = vst [vmem:[%s5849_s27 + $0x20] sm:$0xff] %v472_v4  ;;  %475 = vst [vmem:[%s5849_s27 + $0x28] sm:$0xff] %v474_v5  ;;  %v478_v7 = vld [vmem:[%s5844_s29 + $0x38] sm:$0xff]  ;;  %v480_v8 = vld [vmem:[%s5844_s29 + $0x40] sm:$0xff] }
  0x30   : > { %477 = vst [vmem:[%s5849_s27 + $0x30] sm:$0xff] %v476_v6  ;;  %479 = vst [vmem:[%s5849_s27 + $0x38] sm:$0xff] %v478_v7  ;;  %v482_v9 = vld [vmem:[%s5844_s29 + $0x48] sm:$0xff]  ;;  %v484_v10 = vld [vmem:[%s5844_s29 + $0x50] sm:$0xff] }
  0x31   : > { %481 = vst [vmem:[%s5849_s27 + $0x40] sm:$0xff] %v480_v8  ;;  %v486_v11 = vld [vmem:[%s5844_s29 + $0x58] sm:$0xff]  ;;  %483 = vst [vmem:[%s5849_s27 + $0x48] sm:$0xff] %v482_v9  ;;  %v488_v12 = vld [vmem:[%s5844_s29 + $0x60] sm:$0xff] }
  0x32   : > { %485 = vst [vmem:[%s5849_s27 + $0x50] sm:$0xff] %v484_v10  ;;  %487 = vst [vmem:[%s5849_s27 + $0x58] sm:$0xff] %v486_v11  ;;  %v490_v13 = vld [vmem:[%s5844_s29 + $0x68] sm:$0xff]  ;;  %v492_v14 = vld [vmem:[%s5844_s29 + $0x70] sm:$0xff] }
  0x33   : > { %489 = vst [vmem:[%s5849_s27 + $0x60] sm:$0xff] %v488_v12  ;;  %491 = vst [vmem:[%s5849_s27 + $0x68] sm:$0xff] %v490_v13  ;;  %v494_v15 = vld [vmem:[%s5844_s29 + $0x78] sm:$0xff]  ;;  %v496_v16 = vld [vmem:[%s5844_s29 + $0x100] sm:$0xff] }
  0x34   : > { %493 = vst [vmem:[%s5849_s27 + $0x70] sm:$0xff] %v492_v14  ;;  %v498_v17 = vld [vmem:[%s5844_s29 + $0x108] sm:$0xff]  ;;  %495 = vst [vmem:[%s5849_s27 + $0x78] sm:$0xff] %v494_v15  ;;  %v500_v18 = vld [vmem:[%s5844_s29 + $0x110] sm:$0xff] }
  0x35   : > { %497 = vst [vmem:[%s5849_s27 + $0x80] sm:$0xff] %v496_v16  ;;  %499 = vst [vmem:[%s5849_s27 + $0x88] sm:$0xff] %v498_v17  ;;  %v502_v19 = vld [vmem:[%s5844_s29 + $0x118] sm:$0xff]  ;;  %v504_v20 = vld [vmem:[%s5844_s29 + $0x120] sm:$0xff] }
  0x36   : > { %501 = vst [vmem:[%s5849_s27 + $0x90] sm:$0xff] %v500_v18  ;;  %503 = vst [vmem:[%s5849_s27 + $0x98] sm:$0xff] %v502_v19  ;;  %v506_v21 = vld [vmem:[%s5844_s29 + $0x128] sm:$0xff]  ;;  %v508_v22 = vld [vmem:[%s5844_s29 + $0x130] sm:$0xff] }
  0x37   : > { %505 = vst [vmem:[%s5849_s27 + $0xa0] sm:$0xff] %v504_v20  ;;  %v510_v23 = vld [vmem:[%s5844_s29 + $0x138] sm:$0xff]  ;;  %507 = vst [vmem:[%s5849_s27 + $0xa8] sm:$0xff] %v506_v21  ;;  %v512_v24 = vld [vmem:[%s5844_s29 + $0x140] sm:$0xff] }
  0x38   : > { %509 = vst [vmem:[%s5849_s27 + $0xb0] sm:$0xff] %v508_v22  ;;  %511 = vst [vmem:[%s5849_s27 + $0xb8] sm:$0xff] %v510_v23  ;;  %v514_v25 = vld [vmem:[%s5844_s29 + $0x148] sm:$0xff]  ;;  %v516_v26 = vld [vmem:[%s5844_s29 + $0x150] sm:$0xff] }
  0x39   : > { %513 = vst [vmem:[%s5849_s27 + $0xc0] sm:$0xff] %v512_v24  ;;  %515 = vst [vmem:[%s5849_s27 + $0xc8] sm:$0xff] %v514_v25  ;;  %v518_v27 = vld [vmem:[%s5844_s29 + $0x158] sm:$0xff]  ;;  %v520_v28 = vld [vmem:[%s5844_s29 + $0x160] sm:$0xff] }
  0x3a   : > { %517 = vst [vmem:[%s5849_s27 + $0xd0] sm:$0xff] %v516_v26  ;;  %v522_v29 = vld [vmem:[%s5844_s29 + $0x168] sm:$0xff]  ;;  %519 = vst [vmem:[%s5849_s27 + $0xd8] sm:$0xff] %v518_v27  ;;  %v524_v30 = vld [vmem:[%s5844_s29 + $0x170] sm:$0xff] }
  0x3b   : > { %521 = vst [vmem:[%s5849_s27 + $0xe0] sm:$0xff] %v520_v28  ;;  %523 = vst [vmem:[%s5849_s27 + $0xe8] sm:$0xff] %v522_v29  ;;  %v526_v31 = vld [vmem:[%s5844_s29 + $0x178] sm:$0xff] }
  0x3c   : > { %525 = vst [vmem:[%s5849_s27 + $0xf0] sm:$0xff] %v524_v30  ;;  %527 = vst [vmem:[%s5849_s27 + $0xf8] sm:$0xff] %v526_v31 }
  0x3d PF: > { %536 = sbr.rel (%p5823_p12) target bundleno = 1498 (0x5da), region = 78 }
  0x42   : > { %s5915_s23 = sand.u32 1, %s5692_s18  }
  0x43   : > { %s4796_s26 = sshll.u32 %s5915_s23, 8 }
  0x44   : > { %s5918_s13 = scalar_lea.vmem [#allocation2], %s4796_s26 }
  0x45   : > { %5679 = dma.done.wait (%p5048_p11), [#allocation4], 16384  }
  0x46   : > { %5681 = vsyncadd (%p5048_p11), [#allocation4], 4294950912  ;;  %s4799_s29 = sshll.u32 %s5790_s21, 4  ;;  %v9353_v32 = vmov 0   ;;  %v9351_v35 = vmov 1   ;;  %v1050_v36 = vld [vmem:[#allocation3 + $0xf8] sm:$0xff] }
  0x47   : > { %5091 = vset.pattern.permute.xlu1 %v9353_v32  ;;  %5089 = vset.pattern.permute.xlu0 %v9353_v32  ;;  %p613_p5 = scmp.lt.s32.totalorder %s4799_s29, 31  ;;  %v1049_v37 = vld [vmem:[#allocation3 + $0xf0] sm:$0xff]  ;;  %v1048_v38 = vld [vmem:[#allocation3 + $0xe8] sm:$0xff]  ;;  %v1047_v40 = vld [vmem:[#allocation3 + $0xe0] sm:$0xff]  ;;  %vm1432_vm0 = vcmask 15360   ;;  %s4942_s24 = sshll.u32 %s5790_s21, 7 }
  0x48   : > { %1095 = vmatprep.subr.mxu0 %v1050_v36  ;;  %v1046_v41 = vld [vmem:[#allocation3 + $0xd8] sm:$0xff]  ;;  %v1045_v42 = vld [vmem:[#allocation3 + $0xd0] sm:$0xff]  ;;  %v1044_v44 = vld [vmem:[#allocation3 + $0xc8] sm:$0xff]  ;;  %p10043_p10 = scmp.ne.s32.totalorder %s9584_s28, 0 }
  0x49   : > { %s10052_s29 = smov (!%p613_p5, %s4799_s29), 31  ;;  %1096 = vmatpush1.msra.mxu0 %v1049_v37  ;;  %v1043_v45 = vld [vmem:[#allocation3 + $0xc0] sm:$0xff]  ;;  %v1042_v46 = vld [vmem:[#allocation3 + $0xb8] sm:$0xff]  ;;  %v1041_v47 = vld [vmem:[#allocation3 + $0xb0] sm:$0xff] }
  0x4a   : > { %s5927_s30 = sshll.u32 %s10052_s29, 3  ;;  %1097 = vmatprep.subr.mxu0 %v1048_v38  ;;  %v1040_v49 = vld [vmem:[#allocation3 + $0xa8] sm:$0xff]  ;;  %v1039_v50 = vld [vmem:[#allocation3 + $0xa0] sm:$0xff]  ;;  %v1038_v51 = vld [vmem:[#allocation3 + $0x98] sm:$0xff]  ;;  %s4516_s29 = scalar_lea.sflag [#allocation5], %s5915_s23 }
  0x4b   : > { %s5933_s22 = scalar_lea.vmem %s9333_s0, %s5927_s30  ;;  %1098 = vmatpush1.msra.mxu0 %v1047_v40  ;;  %v1037_v52 = vld [vmem:[#allocation3 + $0x90] sm:$0xff]  ;;  %v1036_v54 = vld [vmem:[#allocation3 + $0x88] sm:$0xff]  ;;  %v1035_v55 = vld [vmem:[#allocation3 + $0x80] sm:$0xff]  ;;  %s6103_s16 = scalar_lea.vmem %s9343_s10, %s5927_s30 }
  0x4c   : > { %v650_v33 = vld [vmem:[%s5933_s22 + $0x8] sm:$0xff]  ;;  %v649_v34 = vld [vmem:[%s5933_s22] sm:$0xff]  ;;  %v651_v39 = vld [vmem:[%s5933_s22 + $0x10] sm:$0xff]  ;;  %1099 = vmatprep.subr.mxu0 %v1046_v41  ;;  %s6213_s12 = scalar_lea.vmem %s9344_s11, %s5927_s30  ;;  %s6238_s26 = scalar_lea.vmem %s9342_s9, %s5927_s30 }
  0x4d   : > { %673 = vperm.xlu1 %5091, %v650_v33   ;;  %668 = vperm.xlu0 %5089, %v649_v34   ;;  %v652_v43 = vld [vmem:[%s5933_s22 + $0x18] sm:$0xff]  ;;  %v653_v48 = vld [vmem:[%s5933_s22 + $0x20] sm:$0xff]  ;;  %v654_v53 = vld [vmem:[%s5933_s22 + $0x28] sm:$0xff]  ;;  %s7792_s15 = scalar_lea.vmem %s9341_s8, %s5927_s30 }
  0x4e   : > { %1100 = vmatpush1.msra.mxu0 %v1045_v42  ;;  %v1034_v56 = vld [vmem:[#allocation3 + $0x78] sm:$0xff]  ;;  %v1033_v57 = vld [vmem:[#allocation3 + $0x70] sm:$0xff]  ;;  %v1032_v59 = vld [vmem:[#allocation3 + $0x68] sm:$0xff] }
  0x4f   : > { %1101 = vmatprep.subr.mxu0 %v1044_v44  ;;  %v655_v58 = vld [vmem:[%s5933_s22 + $0x30] sm:$0xff]  ;;  %v1031_v60 = vld [vmem:[#allocation3 + $0x60] sm:$0xff]  ;;  %v1030_v61 = vld [vmem:[#allocation3 + $0x58] sm:$0xff] }
  0x50   : > { %1102 = vmatpush1.msra.mxu0 %v1043_v45  ;;  %v1029_v62 = vld [vmem:[#allocation3 + $0x50] sm:$0xff]  ;;  %v656_v63 = vld [vmem:[%s5933_s22 + $0x38] sm:$0xff]  ;;  %v1028_v0 = vld [vmem:[#allocation3 + $0x48] sm:$0xff] }
  0x51   : > { %5092 = vset.pattern.permute.xlu1 %v9351_v35  ;;  %5090 = vset.pattern.permute.xlu0 %v9351_v35  ;;  %v1027_v1 = vld [vmem:[#allocation3 + $0x40] sm:$0xff]  ;;  %v1026_v2 = vld [vmem:[#allocation3 + $0x38] sm:$0xff]  ;;  %v1025_v3 = vld [vmem:[#allocation3 + $0x30] sm:$0xff] }
  0x52   : > { %802 = vperm.xlu1 %5092, %v650_v33   ;;  %798 = vperm.xlu0 %5090, %v649_v34   ;;  %v657_v4 = vld [vmem:[%s5933_s22 + $0x40] sm:$0xff]  ;;  %v1024_v5 = vld [vmem:[#allocation3 + $0x28] sm:$0xff]  ;;  %v1022_v7 = vld [vmem:[#allocation3 + $0x18] sm:$0xff] }
  0x53   : > { %1103 = vmatprep.subr.mxu0 %v1042_v46  ;;  %v1023_v6 = vld [vmem:[#allocation3 + $0x20] sm:$0xff]  ;;  %v1021_v8 = vld [vmem:[#allocation3 + $0x10] sm:$0xff]  ;;  %v658_v9 = vld [vmem:[%s5933_s22 + $0x48] sm:$0xff] }
  0x54   : > { %1104 = vmatpush1.msra.mxu0 %v1041_v47  ;;  %v1020_v10 = vld [vmem:[#allocation3 + $0x8] sm:$0xff]  ;;  %v1019_v11 = vld [vmem:[#allocation3] sm:$0xff]  ;;  %v1082_v12 = vld [vmem:[#allocation3 + $0x1f8] sm:$0xff] }
  0x55   : > { %1105 = vmatprep.subr.mxu0 %v1040_v49  ;;  %v1081_v13 = vld [vmem:[#allocation3 + $0x1f0] sm:$0xff]  ;;  %v1080_v15 = vld [vmem:[#allocation3 + $0x1e8] sm:$0xff]  ;;  %v1079_v16 = vld [vmem:[#allocation3 + $0x1e0] sm:$0xff] }
  0x56   : > { %5093 = vset.pattern.permute.xlu1 %v9353_v32  ;;  %806 = vperm.xlu0 %5090, %v651_v39   ;;  %v659_v14 = vld [vmem:[%s5933_s22 + $0x50] sm:$0xff]  ;;  %v1078_v17 = vld [vmem:[#allocation3 + $0x1d8] sm:$0xff]  ;;  %v1076_v20 = vld [vmem:[#allocation3 + $0x1c8] sm:$0xff] }
  0x57   : > { %678 = vperm.xlu1 %5093, %v651_v39   ;;  %1106 = vmatpush1.msra.mxu0 %v1039_v50  ;;  %v1077_v18 = vld [vmem:[#allocation3 + $0x1d0] sm:$0xff]  ;;  %v660_v19 = vld [vmem:[%s5933_s22 + $0x58] sm:$0xff]  ;;  %v1075_v21 = vld [vmem:[#allocation3 + $0x1c0] sm:$0xff] }
  0x58   : > { %1107 = vmatprep.subr.mxu0 %v1038_v51  ;;  %v1074_v22 = vld [vmem:[#allocation3 + $0x1b8] sm:$0xff]  ;;  %v1073_v23 = vld [vmem:[#allocation3 + $0x1b0] sm:$0xff]  ;;  %v661_v24 = vld [vmem:[%s5933_s22 + $0x60] sm:$0xff] }
  0x59   : > { %1108 = vmatpush1.msra.mxu0 %v1037_v52  ;;  %v1072_v25 = vld [vmem:[#allocation3 + $0x1a8] sm:$0xff]  ;;  %v1071_v26 = vld [vmem:[#allocation3 + $0x1a0] sm:$0xff]  ;;  %v1070_v27 = vld [vmem:[#allocation3 + $0x198] sm:$0xff]  ;;  %v747_v52 = vlaneseq }
  0x5a   : > { %810 = vperm.xlu0 %5090, %v652_v43   ;;  %1109 = vmatprep.subr.mxu0 %v1036_v54  ;;  %v1069_v28 = vld [vmem:[#allocation3 + $0x190] sm:$0xff]  ;;  %v662_v29 = vld [vmem:[%s5933_s22 + $0x68] sm:$0xff]  ;;  %v1067_v31 = vld [vmem:[#allocation3 + $0x180] sm:$0xff] }
  0x5b   : > { %683 = vperm.xlu1 %5093, %v652_v43   ;;  %1110 = vmatpush1.msra.mxu0 %v1035_v55  ;;  %v1068_v30 = vld [vmem:[#allocation3 + $0x188] sm:$0xff]  ;;  %v1066_v33 = vld [vmem:[#allocation3 + $0x178] sm:$0xff]  ;;  %v1065_v34 = vld [vmem:[#allocation3 + $0x170] sm:$0xff] }
  0x5c   : > { %1111 = vmatprep.subr.mxu0 %v1034_v56  ;;  %v663_v36 = vld [vmem:[%s5933_s22 + $0x70] sm:$0xff]  ;;  %v1064_v37 = vld [vmem:[#allocation3 + $0x168] sm:$0xff]  ;;  %v1063_v38 = vld [vmem:[#allocation3 + $0x160] sm:$0xff] }
  0x5d   : > { %1112 = vmatpush1.msra.mxu0 %v1033_v57  ;;  %v1062_v39 = vld [vmem:[#allocation3 + $0x158] sm:$0xff]  ;;  %v1061_v40 = vld [vmem:[#allocation3 + $0x150] sm:$0xff]  ;;  %v1060_v42 = vld [vmem:[#allocation3 + $0x148] sm:$0xff] }
  0x5e   : > { %814 = vperm.xlu0 %5090, %v653_v48   ;;  %1113 = vmatprep.subr.mxu0 %v1032_v59  ;;  %v664_v41 = vld [vmem:[%s5933_s22 + $0x78] sm:$0xff]  ;;  %v1059_v43 = vld [vmem:[#allocation3 + $0x140] sm:$0xff]  ;;  %v1057_v45 = vld [vmem:[#allocation3 + $0x130] sm:$0xff] }
  0x5f   : > { %688 = vperm.xlu1 %5093, %v653_v48   ;;  %1114 = vmatpush1.msra.mxu0 %v1031_v60  ;;  %v1058_v44 = vld [vmem:[#allocation3 + $0x138] sm:$0xff]  ;;  %v1056_v46 = vld [vmem:[#allocation3 + $0x128] sm:$0xff]  ;;  %v1055_v47 = vld [vmem:[#allocation3 + $0x120] sm:$0xff] }
  0x60   : > { %1115 = vmatprep.subr.mxu0 %v1030_v61  ;;  %v1054_v48 = vld [vmem:[#allocation3 + $0x118] sm:$0xff]  ;;  %v1053_v49 = vld [vmem:[#allocation3 + $0x110] sm:$0xff]  ;;  %v1052_v50 = vld [vmem:[#allocation3 + $0x108] sm:$0xff] }
  0x61   : > { %1116 = vmatpush1.msra.mxu0 %v1029_v62  ;;  %v1051_v51 = vld [vmem:[#allocation3 + $0x100] sm:$0xff]  ;;  %v2278_v32 = vld [vmem:[#allocation3 + $0x338] sm:$0xff] }
  0x62   : > { %818 = vperm.xlu0 %5090, %v654_v53   ;;  %1117 = vmatprep.subr.mxu0 %v1028_v0  ;;  %v665_v56 = vld [vmem:[%s9335_s2] sm:$0xf] }
  0x63   : > { %693 = vperm.xlu1 %5093, %v654_v53   ;;  %1118 = vmatpush1.msra.mxu0 %v1027_v1  ;;  %v5954_v53 = vshrl.u32 %v747_v52, 7 }
  0x64   : > { %1119 = vmatprep.subr.mxu0 %v1026_v2 }
  0x65   : > { %1120 = vmatpush1.msra.mxu0 %v1025_v3  ;;  %9588 = vst [vmem:[#allocation12_spill] sm:$0xff] %v5954_v53  ;;  %v5957_v54 = vsub.s32 0, %v5954_v53  ;;  %v9350_v55 = vsub.s32 2, %v5954_v53  ;;  %v5964_v57 = vsub.s32 1, %v5954_v53 }
  0x66   : > { %822 = vperm.xlu0 %5090, %v655_v58   ;;  %1121 = vmatprep.subr.mxu0 %v1024_v5  ;;  %v943_v5 = vld [vmem:[%s9336_s3] sm:$0x3] }
  0x67   : > { %698 = vperm.xlu1 %5093, %v655_v58   ;;  %1122 = vmatpush1.msra.mxu0 %v1023_v6  ;;  %9589 = vst [vmem:[#allocation13_spill] sm:$0xff] %v5957_v54  ;;  %9590 = vst [vmem:[#allocation14_spill] sm:$0xff] %v5964_v57  ;;  %v9349_v58 = vsub.s32 3, %v5954_v53  ;;  %v750_v59 = vrot.slane %v665_v56, %v5957_v54  ;;  %v754_v60 = vrot.slane %v665_v56, %v9350_v55 }
  0x68   : > { %1123 = vmatprep.subr.mxu0 %v1022_v7  ;;  %v864_v61 = vrot.slane %v665_v56, %v5964_v57 }
  0x69   : > { %1124 = vmatpush1.msra.mxu0 %v1021_v8  ;;  %v868_v62 = vrot.slane %v665_v56, %v9349_v58  ;;  %v5974_v1 = vrot.slane %v750_v59, %v5957_v54  ;;  %v5977_v2 = vrot.slane %v754_v60, %v5957_v54 }
  0x6a   : > { %826 = vperm.xlu0 %5090, %v656_v63   ;;  %1125 = vmatprep.subr.mxu0 %v1020_v10  ;;  %v5980_v3 = vrot.slane %v864_v61, %v5964_v57 }
  0x6b   : > { %703 = vperm.xlu1 %5093, %v656_v63   ;;  %1126 = vmatpush1.msra.mxu0 %v1019_v11 }
  0x6c   : > { %1127 = vmatprep.subr.mxu0 %v1082_v12  ;;  %v5993_v12 = vrot.slane %v943_v5, %v5957_v54 }
  0x6d   : > { %1128 = vmatpush2.msra.mxu0 %v1081_v13  ;;  %v5996_v13 = vrot.slane %v943_v5, %v5964_v57 }
  0x6e   : > { %830 = vperm.xlu0 %5090, %v657_v4   ;;  %1129 = vmatprep.subr.mxu0 %v1080_v15 }
  0x6f   : > { %708 = vperm.xlu1 %5093, %v657_v4   ;;  %1130 = vmatpush2.msra.mxu0 %v1079_v16  ;;  %v5983_v4 = vrot.slane %v868_v62, %v5964_v57 }
  0x70   : > { %1131 = vmatprep.subr.mxu0 %v1078_v17 }
  0x71   : > { %1132 = vmatpush2.msra.mxu0 %v1077_v18 }
  0x72   : > { %834 = vperm.xlu0 %5090, %v658_v9   ;;  %1133 = vmatprep.subr.mxu0 %v1076_v20 }
  0x73   : > { %713 = vperm.xlu1 %5093, %v658_v9   ;;  %1134 = vmatpush2.msra.mxu0 %v1075_v21 }
  0x74   : > { %1135 = vmatprep.subr.mxu0 %v1074_v22 }
  0x75   : > { %1136 = vmatpush2.msra.mxu0 %v1073_v23 }
  0x76   : > { %838 = vperm.xlu0 %5090, %v659_v14   ;;  %1137 = vmatprep.subr.mxu0 %v1072_v25 }
  0x77   : > { %718 = vperm.xlu1 %5093, %v659_v14   ;;  %1138 = vmatpush2.msra.mxu0 %v1071_v26 }
  0x78   : > { %1139 = vmatprep.subr.mxu0 %v1070_v27 }
  0x79   : > { %1140 = vmatpush2.msra.mxu0 %v1069_v28 }
  0x7a   : > { %842 = vperm.xlu0 %5090, %v660_v19   ;;  %1141 = vmatprep.subr.mxu0 %v1068_v30 }
  0x7b   : > { %723 = vperm.xlu1 %5093, %v660_v19   ;;  %1142 = vmatpush2.msra.mxu0 %v1067_v31 }
  0x7c   : > { %1143 = vmatprep.subr.mxu0 %v1066_v33 }
  0x7d   : > { %1144 = vmatpush2.msra.mxu0 %v1065_v34 }
  0x7e   : > { %846 = vperm.xlu0 %5090, %v661_v24   ;;  %1145 = vmatprep.subr.mxu0 %v1064_v37 }
  0x7f   : > { %728 = vperm.xlu1 %5093, %v661_v24   ;;  %1146 = vmatpush2.msra.mxu0 %v1063_v38 }
  0x80   : > { %1147 = vmatprep.subr.mxu0 %v1062_v39 }
  0x81   : > { %1148 = vmatpush2.msra.mxu0 %v1061_v40 }
  0x82   : > { %850 = vperm.xlu0 %5090, %v662_v29   ;;  %1149 = vmatprep.subr.mxu0 %v1060_v42 }
  0x83   : > { %733 = vperm.xlu1 %5093, %v662_v29   ;;  %1150 = vmatpush2.msra.mxu0 %v1059_v43 }
  0x84   : > { %1151 = vmatprep.subr.mxu0 %v1058_v44 }
  0x85   : > { %1152 = vmatpush2.msra.mxu0 %v1057_v45 }
  0x86   : > { %854 = vperm.xlu0 %5090, %v663_v36   ;;  %1153 = vmatprep.subr.mxu0 %v1056_v46 }
  0x87   : > { %738 = vperm.xlu1 %5093, %v663_v36   ;;  %1154 = vmatpush2.msra.mxu0 %v1055_v47 }
  0x88   : > { %1155 = vmatprep.subr.mxu0 %v1054_v48 }
  0x89   : > { %1156 = vmatpush2.msra.mxu0 %v1053_v49 }
  0x8a   : > { %858 = vperm.xlu0 %5090, %v664_v41   ;;  %1157 = vmatprep.subr.mxu0 %v1052_v50 }
  0x8b   : > { %743 = vperm.xlu1 %5093, %v664_v41   ;;  %1158 = vmatpush2.msra.mxu0 %v1051_v51 }
  0xc8   : > { %v669_v63 = vpop.permute.xlu0 %668  ;;  %v674_v0 = vpop.permute.xlu1 %673 }
  0xc9   : > { %v767_v6 = vmul.f32 %v5974_v1, %v674_v0  ;;  %v768_v7 = vmul.f32 %v5977_v2, %v674_v0  ;;  %v765_v8 = vmul.f32 %v5974_v1, %v669_v63  ;;  %v766_v9 = vmul.f32 %v5977_v2, %v669_v63 }
  0xcd   : > { %v799_v10 = vpop.permute.xlu0 %798  ;;  %v803_v11 = vpop.permute.xlu1 %802 }
  0xce   : > { %v879_v14 = vmul.f32 %v5980_v3, %v799_v10  ;;  %v880_v15 = vmul.f32 %v5983_v4, %v799_v10  ;;  %v881_v16 = vmul.f32 %v5980_v3, %v803_v11  ;;  %v882_v17 = vmul.f32 %v5983_v4, %v803_v11 }
  0xd0   : > { %v911_v18 = vadd.f32 %v879_v14, %v765_v8  ;;  %v913_v19 = vadd.f32 %v881_v16, %v767_v6  ;;  %v914_v20 = vadd.f32 %v882_v17, %v768_v7  ;;  %v912_v21 = vadd.f32 %v880_v15, %v766_v9 }
  0xd1   : > { %v807_v22 = vpop.permute.xlu0 %806 }
  0xd2   : > { %v883_v23 = vmul.f32 %v5980_v3, %v807_v22  ;;  %v884_v24 = vmul.f32 %v5983_v4, %v807_v22  ;;  %v679_v25 = vpop.permute.xlu1 %678  ;;  %v956_v26 = vadd.f32 %v5996_v13, %v912_v21  ;;  %v955_v27 = vadd.f32 %v5993_v12, %v911_v18 }
  0xd3   : > { %v769_v28 = vmul.f32 %v5974_v1, %v679_v25  ;;  %v770_v29 = vmul.f32 %v5977_v2, %v679_v25  ;;  %v958_v30 = vadd.f32 %v5996_v13, %v914_v20  ;;  %v957_v31 = vadd.f32 %v5993_v12, %v913_v19 }
  0xd4   : > { %v988_v33 = vmax.f32 %v956_v26, 0.0  ;;  %v987_v34 = vmax.f32 %v955_v27, 0.0 }
  0xd5   : > { %v915_v36 = vadd.f32 %v883_v23, %v769_v28  ;;  %v916_v37 = vadd.f32 %v884_v24, %v770_v29  ;;  %v811_v38 = vpop.permute.xlu0 %810  ;;  %v990_v39 = vmax.f32 %v958_v30, 0.0  ;;  %v989_v45 = vmax.f32 %v957_v31, 0.0 }
  0xd6   : > { %v885_v40 = vmul.f32 %v5980_v3, %v811_v38  ;;  %v886_v41 = vmul.f32 %v5983_v4, %v811_v38  ;;  %v684_v42 = vpop.permute.xlu1 %683  ;;  %1159 = vmatprep.mubr.f32.mxu0 %v988_v33 }
  0xd7   : > { %v771_v43 = vmul.f32 %v5974_v1, %v684_v42  ;;  %v772_v44 = vmul.f32 %v5977_v2, %v684_v42  ;;  %1160 = vmatmul.mubr.f32.vlgmr.msra.gmra.mxu0 %v987_v34  ;;  %v960_v46 = vadd.f32 %v5996_v13, %v916_v37  ;;  %v959_v51 = vadd.f32 %v5993_v12, %v915_v36 }
  0xd8   : > { %1165 = vmatprep.mubr.f32.mxu0 %v990_v39 }
  0xd9   : > { %v917_v47 = vadd.f32 %v885_v40, %v771_v43  ;;  %v918_v48 = vadd.f32 %v886_v41, %v772_v44  ;;  %v815_v49 = vpop.permute.xlu0 %814  ;;  %v992_v50 = vmax.f32 %v960_v46, 0.0  ;;  %v991_v7 = vmax.f32 %v959_v51, 0.0 }
  0xda   : > { %v887_v52 = vmul.f32 %v5980_v3, %v815_v49  ;;  %v888_v56 = vmul.f32 %v5983_v4, %v815_v49  ;;  %v689_v59 = vpop.permute.xlu1 %688 }
  0xdb   : > { %v773_v60 = vmul.f32 %v5974_v1, %v689_v59  ;;  %v774_v61 = vmul.f32 %v5977_v2, %v689_v59  ;;  %1166 = vmatmul.mubr.f32.gmra.mxu0 %v989_v45  ;;  %v962_v62 = vadd.f32 %v5996_v13, %v918_v48  ;;  %v961_v63 = vadd.f32 %v5993_v12, %v917_v47 }
  0xdc   : > { %1171 = vmatprep.mubr.f32.mxu0 %v992_v50 }
  0xdd   : > { %v919_v0 = vadd.f32 %v887_v52, %v773_v60  ;;  %v920_v5 = vadd.f32 %v888_v56, %v774_v61  ;;  %v819_v6 = vpop.permute.xlu0 %818  ;;  %v994_v8 = vmax.f32 %v962_v62, 0.0  ;;  %v993_v17 = vmax.f32 %v961_v63, 0.0 }
  0xde   : > { %v889_v9 = vmul.f32 %v5980_v3, %v819_v6  ;;  %v890_v10 = vmul.f32 %v5983_v4, %v819_v6  ;;  %v694_v11 = vpop.permute.xlu1 %693 }
  0xdf   : > { %v775_v14 = vmul.f32 %v5974_v1, %v694_v11  ;;  %v776_v15 = vmul.f32 %v5977_v2, %v694_v11  ;;  %1172 = vmatmul.mubr.f32.gmra.mxu0 %v991_v7  ;;  %v964_v16 = vadd.f32 %v5996_v13, %v920_v5  ;;  %v963_v22 = vadd.f32 %v5993_v12, %v919_v0 }
  0xe0   : > { %1177 = vmatprep.mubr.f32.mxu0 %v994_v8 }
  0xe1   : > { %v921_v18 = vadd.f32 %v889_v9, %v775_v14  ;;  %v922_v19 = vadd.f32 %v890_v10, %v776_v15  ;;  %v823_v20 = vpop.permute.xlu0 %822  ;;  %v996_v21 = vmax.f32 %v964_v16, 0.0  ;;  %v995_v34 = vmax.f32 %v963_v22, 0.0 }
  0xe2   : > { %v891_v23 = vmul.f32 %v5980_v3, %v823_v20  ;;  %v892_v24 = vmul.f32 %v5983_v4, %v823_v20  ;;  %v699_v25 = vpop.permute.xlu1 %698 }
  0xe3   : > { %v777_v26 = vmul.f32 %v5974_v1, %v699_v25  ;;  %v778_v27 = vmul.f32 %v5977_v2, %v699_v25  ;;  %1178 = vmatmul.mubr.f32.gmra.mxu0 %v993_v17  ;;  %v966_v28 = vadd.f32 %v5996_v13, %v922_v19  ;;  %v965_v29 = vadd.f32 %v5993_v12, %v921_v18 }
  0xe4   : > { %1183 = vmatprep.mubr.f32.mxu0 %v996_v21 }
  0xe5   : > { %v923_v30 = vadd.f32 %v891_v23, %v777_v26  ;;  %v924_v31 = vadd.f32 %v892_v24, %v778_v27  ;;  %v827_v33 = vpop.permute.xlu0 %826  ;;  %v998_v36 = vmax.f32 %v966_v28, 0.0  ;;  %v997_v43 = vmax.f32 %v965_v29, 0.0 }
  0xe6   : > { %v893_v37 = vmul.f32 %v5980_v3, %v827_v33  ;;  %v894_v38 = vmul.f32 %v5983_v4, %v827_v33  ;;  %v704_v39 = vpop.permute.xlu1 %703 }
  0xe7   : > { %v779_v40 = vmul.f32 %v5974_v1, %v704_v39  ;;  %v780_v41 = vmul.f32 %v5977_v2, %v704_v39  ;;  %1184 = vmatmul.mubr.f32.gmra.mxu0 %v995_v34  ;;  %v968_v42 = vadd.f32 %v5996_v13, %v924_v31  ;;  %v967_v48 = vadd.f32 %v5993_v12, %v923_v30 }
  0xe8   : > { %1189 = vmatprep.mubr.f32.mxu0 %v998_v36 }
  0xe9   : > { %v925_v44 = vadd.f32 %v893_v37, %v779_v40  ;;  %v926_v45 = vadd.f32 %v894_v38, %v780_v41  ;;  %v831_v46 = vpop.permute.xlu0 %830  ;;  %v1000_v47 = vmax.f32 %v968_v42, 0.0  ;;  %v999_v0 = vmax.f32 %v967_v48, 0.0 }
  0xea   : > { %v895_v49 = vmul.f32 %v5980_v3, %v831_v46  ;;  %v896_v50 = vmul.f32 %v5983_v4, %v831_v46  ;;  %v709_v51 = vpop.permute.xlu1 %708 }
  0xeb   : > { %v781_v52 = vmul.f32 %v5974_v1, %v709_v51  ;;  %v782_v56 = vmul.f32 %v5977_v2, %v709_v51  ;;  %1190 = vmatmul.mubr.f32.gmra.mxu0 %v997_v43  ;;  %v970_v59 = vadd.f32 %v5996_v13, %v926_v45  ;;  %v969_v60 = vadd.f32 %v5993_v12, %v925_v44 }
  0xec   : > { %1195 = vmatprep.mubr.f32.mxu0 %v1000_v47 }
  0xed   : > { %v927_v61 = vadd.f32 %v895_v49, %v781_v52  ;;  %v928_v62 = vadd.f32 %v896_v50, %v782_v56  ;;  %v835_v63 = vpop.permute.xlu0 %834  ;;  %v1002_v5 = vmax.f32 %v970_v59, 0.0  ;;  %v1001_v14 = vmax.f32 %v969_v60, 0.0 }
  0xee   : > { %v897_v6 = vmul.f32 %v5980_v3, %v835_v63  ;;  %v898_v7 = vmul.f32 %v5983_v4, %v835_v63  ;;  %v714_v8 = vpop.permute.xlu1 %713 }
  0xef   : > { %v783_v9 = vmul.f32 %v5974_v1, %v714_v8  ;;  %v784_v10 = vmul.f32 %v5977_v2, %v714_v8  ;;  %1196 = vmatmul.mubr.f32.gmra.mxu0 %v999_v0  ;;  %v972_v11 = vadd.f32 %v5996_v13, %v928_v62  ;;  %v971_v19 = vadd.f32 %v5993_v12, %v927_v61 }
  0xf0   : > { %1201 = vmatprep.mubr.f32.mxu0 %v1002_v5 }
  0xf1   : > { %v929_v15 = vadd.f32 %v897_v6, %v783_v9  ;;  %v930_v16 = vadd.f32 %v898_v7, %v784_v10  ;;  %v839_v17 = vpop.permute.xlu0 %838  ;;  %v1004_v18 = vmax.f32 %v972_v11, 0.0  ;;  %v1003_v30 = vmax.f32 %v971_v19, 0.0 }
  0xf2   : > { %v899_v20 = vmul.f32 %v5980_v3, %v839_v17  ;;  %v900_v21 = vmul.f32 %v5983_v4, %v839_v17  ;;  %v719_v22 = vpop.permute.xlu1 %718 }
  0xf3   : > { %v785_v23 = vmul.f32 %v5974_v1, %v719_v22  ;;  %v786_v24 = vmul.f32 %v5977_v2, %v719_v22  ;;  %1202 = vmatmul.mubr.f32.gmra.mxu0 %v1001_v14  ;;  %v974_v25 = vadd.f32 %v5996_v13, %v930_v16  ;;  %v973_v26 = vadd.f32 %v5993_v12, %v929_v15 }
  0xf4   : > { %1207 = vmatprep.mubr.f32.mxu0 %v1004_v18 }
  0xf5   : > { %v931_v27 = vadd.f32 %v899_v20, %v785_v23  ;;  %v932_v28 = vadd.f32 %v900_v21, %v786_v24  ;;  %v843_v29 = vpop.permute.xlu0 %842  ;;  %v1006_v31 = vmax.f32 %v974_v25, 0.0  ;;  %v1005_v40 = vmax.f32 %v973_v26, 0.0 }
  0xf6   : > { %v901_v33 = vmul.f32 %v5980_v3, %v843_v29  ;;  %v902_v34 = vmul.f32 %v5983_v4, %v843_v29  ;;  %v724_v36 = vpop.permute.xlu1 %723 }
  0xf7   : > { %v787_v37 = vmul.f32 %v5974_v1, %v724_v36  ;;  %v788_v38 = vmul.f32 %v5977_v2, %v724_v36  ;;  %1208 = vmatmul.mubr.f32.gmra.mxu0 %v1003_v30  ;;  %v976_v39 = vadd.f32 %v5996_v13, %v932_v28  ;;  %v975_v45 = vadd.f32 %v5993_v12, %v931_v27 }
  0xf8   : > { %1213 = vmatprep.mubr.f32.mxu0 %v1006_v31 }
  0xf9   : > { %v933_v41 = vadd.f32 %v901_v33, %v787_v37  ;;  %v934_v42 = vadd.f32 %v902_v34, %v788_v38  ;;  %v847_v43 = vpop.permute.xlu0 %846  ;;  %v1008_v44 = vmax.f32 %v976_v39, 0.0  ;;  %v1007_v61 = vmax.f32 %v975_v45, 0.0 }
  0xfa   : > { %v903_v46 = vmul.f32 %v5980_v3, %v847_v43  ;;  %v904_v47 = vmul.f32 %v5983_v4, %v847_v43  ;;  %v729_v48 = vpop.permute.xlu1 %728  ;;  %v1083_v43 = vld [vmem:[%s9338_s5] sm:$0x3] }
  0xfb   : > { %v789_v49 = vmul.f32 %v5974_v1, %v729_v48  ;;  %v790_v50 = vmul.f32 %v5977_v2, %v729_v48  ;;  %1214 = vmatmul.mubr.f32.gmra.mxu0 %v1005_v40  ;;  %v978_v51 = vadd.f32 %v5996_v13, %v934_v42  ;;  %v977_v52 = vadd.f32 %v5993_v12, %v933_v41 }
  0xfc   : > { %1219 = vmatprep.mubr.f32.mxu0 %v1008_v44  ;;  %v6094_v44 = vrot.slane %v1083_v43, %v5957_v54  ;;  %v6097_v45 = vrot.slane %v1083_v43, %v5964_v57  ;;  %v2252_v43 = vld [vmem:[#allocation3 + $0x268] sm:$0xff]  ;;  %v1477_v54 = vld [vmem:[%s5918_s13 + $0x60] sm:$0xff] }
  0xfd   : > { %v935_v56 = vadd.f32 %v903_v46, %v789_v49  ;;  %v936_v59 = vadd.f32 %v904_v47, %v790_v50  ;;  %v851_v60 = vpop.permute.xlu0 %850  ;;  %v1010_v62 = vmax.f32 %v978_v51, 0.0  ;;  %v1009_v9 = vmax.f32 %v977_v52, 0.0  ;;  %v2270_v51 = vld [vmem:[#allocation3 + $0x2f8] sm:$0xff]  ;;  %v2269_v52 = vld [vmem:[#allocation3 + $0x2f0] sm:$0xff] }
  0xfe   : > { %v905_v63 = vmul.f32 %v5980_v3, %v851_v60  ;;  %v906_v0 = vmul.f32 %v5983_v4, %v851_v60  ;;  %v734_v5 = vpop.permute.xlu1 %733  ;;  %2316 = vmatprep.subr.mxu0 %v2270_v51  ;;  %v2267_v60 = vld [vmem:[#allocation3 + $0x2e0] sm:$0xff]  ;;  %4964 = vmatprep.subr.mxu1 %v2270_v51 }
  0xff   : > { %v791_v6 = vmul.f32 %v5974_v1, %v734_v5  ;;  %v792_v7 = vmul.f32 %v5977_v2, %v734_v5  ;;  %1220 = vmatmul.mubr.f32.gmra.mxu0 %v1007_v61  ;;  %v980_v8 = vadd.f32 %v5996_v13, %v936_v59  ;;  %v979_v16 = vadd.f32 %v5993_v12, %v935_v56  ;;  %v2268_v59 = vld [vmem:[#allocation3 + $0x2e8] sm:$0xff] }
 0x100   : > { %1225 = vmatprep.mubr.f32.mxu0 %v1010_v62  ;;  %2317 = vmatpush1.msra.mxu0 %v2269_v52 }
 0x101   : > { %v937_v10 = vadd.f32 %v905_v63, %v791_v6  ;;  %v938_v11 = vadd.f32 %v906_v0, %v792_v7  ;;  %v855_v14 = vpop.permute.xlu0 %854  ;;  %v1012_v15 = vmax.f32 %v980_v8, 0.0  ;;  %v1011_v27 = vmax.f32 %v979_v16, 0.0  ;;  %4996 = vmatpush1.msra.mxu1 %v2269_v52  ;;  %2318 = vmatprep.subr.mxu0 %v2268_v59  ;;  %v2266_v8 = vld [vmem:[#allocation3 + $0x2d8] sm:$0xff] }
 0x102   : > { %v907_v17 = vmul.f32 %v5980_v3, %v855_v14  ;;  %v908_v18 = vmul.f32 %v5983_v4, %v855_v14  ;;  %v739_v19 = vpop.permute.xlu1 %738  ;;  %4965 = vmatprep.subr.mxu1 %v2268_v59  ;;  %2319 = vmatpush1.msra.mxu0 %v2267_v60 }
 0x103   : > { %v793_v20 = vmul.f32 %v5974_v1, %v739_v19  ;;  %v794_v21 = vmul.f32 %v5977_v2, %v739_v19  ;;  %1226 = vmatmul.mubr.f32.gmra.mxu0 %v1009_v9  ;;  %v982_v22 = vadd.f32 %v5996_v13, %v938_v11  ;;  %v981_v23 = vadd.f32 %v5993_v12, %v937_v10  ;;  %v2265_v9 = vld [vmem:[#allocation3 + $0x2d0] sm:$0xff]  ;;  %v2264_v10 = vld [vmem:[#allocation3 + $0x2c8] sm:$0xff] }
 0x104   : > { %1231 = vmatprep.mubr.f32.mxu0 %v1012_v15  ;;  %4997 = vmatpush1.msra.mxu1 %v2267_v60  ;;  %v2263_v15 = vld [vmem:[#allocation3 + $0x2c0] sm:$0xff] }
 0x105   : > { %v939_v24 = vadd.f32 %v907_v17, %v793_v20  ;;  %v940_v25 = vadd.f32 %v908_v18, %v794_v21  ;;  %v859_v26 = vpop.permute.xlu0 %858  ;;  %v1014_v28 = vmax.f32 %v982_v22, 0.0  ;;  %v1013_v37 = vmax.f32 %v981_v23, 0.0  ;;  %2320 = vmatprep.subr.mxu0 %v2266_v8  ;;  %4966 = vmatprep.subr.mxu1 %v2266_v8  ;;  %v2262_v21 = vld [vmem:[#allocation3 + $0x2b8] sm:$0xff]  ;;  %v2261_v22 = vld [vmem:[#allocation3 + $0x2b0] sm:$0xff]  ;;  %v2260_v23 = vld [vmem:[#allocation3 + $0x2a8] sm:$0xff] }
 0x106   : > { %v909_v29 = vmul.f32 %v5980_v3, %v859_v26  ;;  %v910_v30 = vmul.f32 %v5983_v4, %v859_v26  ;;  %v744_v31 = vpop.permute.xlu1 %743  ;;  %2321 = vmatpush1.msra.mxu0 %v2265_v9  ;;  %4998 = vmatpush1.msra.mxu1 %v2265_v9  ;;  %v2259_v26 = vld [vmem:[#allocation3 + $0x2a0] sm:$0xff] }
 0x107   : > { %v795_v33 = vmul.f32 %v5974_v1, %v744_v31  ;;  %v796_v34 = vmul.f32 %v5977_v2, %v744_v31  ;;  %1232 = vmatmul.mubr.f32.gmra.mxu0 %v1011_v27  ;;  %v984_v36 = vadd.f32 %v5996_v13, %v940_v25  ;;  %v983_v41 = vadd.f32 %v5993_v12, %v939_v24  ;;  %v2247_v9 = vld [vmem:[#allocation3 + $0x240] sm:$0xff] }
 0x108   : > { %1237 = vmatprep.mubr.f32.mxu0 %v1014_v28  ;;  %2322 = vmatprep.subr.mxu0 %v2264_v10 }
 0x109   : > { %v941_v38 = vadd.f32 %v909_v29, %v795_v33  ;;  %v942_v39 = vadd.f32 %v910_v30, %v796_v34  ;;  %v1016_v40 = vmax.f32 %v984_v36, 0.0  ;;  %v1015_v4 = vmax.f32 %v983_v41, 0.0  ;;  %4967 = vmatprep.subr.mxu1 %v2264_v10  ;;  %2323 = vmatpush1.msra.mxu0 %v2263_v15  ;;  %v2258_v33 = vld [vmem:[#allocation3 + $0x298] sm:$0xff]  ;;  %v2257_v34 = vld [vmem:[#allocation3 + $0x290] sm:$0xff]  ;;  %v2256_v36 = vld [vmem:[#allocation3 + $0x288] sm:$0xff] }
 0x10a   : > { %4999 = vmatpush1.msra.mxu1 %v2263_v15  ;;  %2324 = vmatprep.subr.mxu0 %v2262_v21 }
 0x10b   : > { %1238 = vmatmul.mubr.f32.gmra.mxu0 %v1013_v37  ;;  %v986_v3 = vadd.f32 %v5996_v13, %v942_v39  ;;  %v985_v1 = vadd.f32 %v5993_v12, %v941_v38  ;;  %4968 = vmatprep.subr.mxu1 %v2262_v21  ;;  %v2255_v39 = vld [vmem:[#allocation3 + $0x280] sm:$0xff]  ;;  %v2246_v21 = vld [vmem:[#allocation3 + $0x238] sm:$0xff] }
 0x10c   : > { %1243 = vmatprep.mubr.f32.mxu0 %v1016_v40  ;;  %2325 = vmatpush1.msra.mxu0 %v2261_v22 }
 0x10d   : > { %v1018_v42 = vmax.f32 %v986_v3, 0.0  ;;  %v1017_v2 = vmax.f32 %v985_v1, 0.0  ;;  %5000 = vmatpush1.msra.mxu1 %v2261_v22  ;;  %2326 = vmatprep.subr.mxu0 %v2260_v23  ;;  %v2254_v1 = vld [vmem:[#allocation3 + $0x278] sm:$0xff]  ;;  %v2245_v22 = vld [vmem:[#allocation3 + $0x230] sm:$0xff] }
 0x10e   : > { %4969 = vmatprep.subr.mxu1 %v2260_v23  ;;  %2327 = vmatpush1.msra.mxu0 %v2259_v26  ;;  %v2244_v23 = vld [vmem:[#allocation3 + $0x228] sm:$0xff] }
 0x10f   : > { %1244 = vmatmul.mubr.f32.gmra.mxu0 %v1015_v4  ;;  %5001 = vmatpush1.msra.mxu1 %v2259_v26 }
 0x110   : > { %1249 = vmatprep.mubr.f32.mxu0 %v1018_v42  ;;  %2328 = vmatprep.subr.mxu0 %v2258_v33 }
 0x111   : > { %4970 = vmatprep.subr.mxu1 %v2258_v33  ;;  %2329 = vmatpush1.msra.mxu0 %v2257_v34 }
 0x112   : > { %5002 = vmatpush1.msra.mxu1 %v2257_v34  ;;  %2330 = vmatprep.subr.mxu0 %v2256_v36 }
 0x113   : > { %1250 = vmatmul.mubr.f32.gmra.mxu0 %v1017_v2  ;;  %4971 = vmatprep.subr.mxu1 %v2256_v36  ;;  %v2253_v2 = vld [vmem:[#allocation3 + $0x270] sm:$0xff] }
 0x114   : > { %2331 = vmatpush1.msra.mxu0 %v2255_v39  ;;  %5003 = vmatpush1.msra.mxu1 %v2255_v39  ;;  %v2242_v39 = vld [vmem:[#allocation3 + $0x218] sm:$0xff] }
 0x115   : > { %2332 = vmatprep.subr.mxu0 %v2254_v1  ;;  %4972 = vmatprep.subr.mxu1 %v2254_v1  ;;  %v2239_v1 = vld [vmem:[#allocation3 + $0x200] sm:$0xff] }
 0x116   : > { %2333 = vmatpush1.msra.mxu0 %v2253_v2  ;;  %5004 = vmatpush1.msra.mxu1 %v2253_v2 }
 0x117   : > { %2334 = vmatprep.subr.mxu0 %v2252_v43  ;;  %4973 = vmatprep.subr.mxu1 %v2252_v43 }
 0x197   : > { %v1161_v12 = vpop.f32.mrf.mxu0 }
 0x198   : > { %v6106_v13 = vadd.f32 %v1161_v12, %v6094_v44 }
 0x199   : > { %v1163_v46 = vpop.f32.mrf.mxu0 }
 0x19a   : > { %1433 = vst.msk [vmem:[%s6103_s16] sm:$0xff] %vm1432_vm0, %v6106_v13  ;;  %v6112_v47 = vadd.f32 %v1163_v46, %v6097_v45 }
 0x19b   : > { %v1167_v48 = vpop.f32.mrf.mxu0 }
 0x19c   : > { %v1272_v49 = vand.u32 2147483647, %v6112_v47  ;;  %v6116_v50 = vadd.f32 %v1167_v48, %v6094_v44  ;;  %v2251_v48 = vld [vmem:[#allocation3 + $0x260] sm:$0xff]  ;;  %vm1400_vm1 = vcmp.gt.f32.partialorder %v6112_v47, 20.0 }
 0x19d   : > { %v1169_v56 = vpop.f32.mrf.mxu0  ;;  %2335 = vmatpush1.msra.mxu0 %v2251_v48  ;;  %5005 = vmatpush1.msra.mxu1 %v2251_v48 }
 0x19e   : > { %v1288_v61 = vsub.f32 0.0, %v1272_v49  ;;  %1434 = vst.msk [vmem:[%s6103_s16 + $0x8] sm:$0xff] %vm1432_vm0, %v6116_v50  ;;  %v6122_v62 = vadd.f32 %v1169_v56, %v6097_v45 }
 0x19f   : > { %v1173_v63 = vpop.f32.mrf.mxu0 }
 0x1a0   : > { %v1304_v0 = vmul.f32 1.442695, %v1288_v61  ;;  %v1273_v5 = vand.u32 2147483647, %v6122_v62  ;;  %v6126_v6 = vadd.f32 %v1173_v63, %v6094_v44  ;;  %v2250_v63 = vld [vmem:[#allocation3 + $0x258] sm:$0xff]  ;;  %vm1401_vm2 = vcmp.gt.f32.partialorder %v6122_v62, 20.0 }
 0x1a1   : > { %v1175_v7 = vpop.f32.mrf.mxu0  ;;  %2336 = vmatprep.subr.mxu0 %v2250_v63  ;;  %4974 = vmatprep.subr.mxu1 %v2250_v63 }
 0x1a2   : > { %5114 = vpow2.f32 %v1304_v0  ;;  %v1289_v11 = vsub.f32 0.0, %v1273_v5  ;;  %v6129_v14 = vadd.f32 %v1175_v7, %v6097_v45  ;;  %1435 = vst.msk [vmem:[%s6103_s16 + $0x10] sm:$0xff] %vm1432_vm0, %v6126_v6  ;;  %v2249_v0 = vld [vmem:[#allocation3 + $0x250] sm:$0xff]  ;;  %v2248_v5 = vld [vmem:[#allocation3 + $0x248] sm:$0xff] }
 0x1a3   : > { %v1179_v16 = vpop.f32.mrf.mxu0  ;;  %2337 = vmatpush1.msra.mxu0 %v2249_v0  ;;  %5006 = vmatpush1.msra.mxu1 %v2249_v0 }
 0x1a4   : > { %v1306_v17 = vmul.f32 1.442695, %v1289_v11  ;;  %v1274_v18 = vand.u32 2147483647, %v6129_v14  ;;  %v6136_v19 = vadd.f32 %v1179_v16, %v6094_v44  ;;  %2338 = vmatprep.subr.mxu0 %v2248_v5  ;;  %4975 = vmatprep.subr.mxu1 %v2248_v5  ;;  %v2299_v5 = vld [vmem:[#allocation3 + $0x3e0] sm:$0xff]  ;;  %vm1402_vm3 = vcmp.gt.f32.partialorder %v6129_v14, 20.0 }
 0x1a5   : > { %v1181_v20 = vpop.f32.mrf.mxu0  ;;  %2339 = vmatpush1.msra.mxu0 %v2247_v9  ;;  %5007 = vmatpush1.msra.mxu1 %v2247_v9 }
 0x1a6   : > { %5116 = vpow2.f32 %v1306_v17  ;;  %v1290_v24 = vsub.f32 0.0, %v1274_v18  ;;  %v6139_v25 = vadd.f32 %v1181_v20, %v6097_v45  ;;  %1436 = vst.msk [vmem:[%s6103_s16 + $0x18] sm:$0xff] %vm1432_vm0, %v6136_v19  ;;  %2340 = vmatprep.subr.mxu0 %v2246_v21  ;;  %4976 = vmatprep.subr.mxu1 %v2246_v21 }
 0x1a7   : > { %v1185_v27 = vpop.f32.mrf.mxu0  ;;  %2341 = vmatpush1.msra.mxu0 %v2245_v22  ;;  %5008 = vmatpush1.msra.mxu1 %v2245_v22 }
 0x1a8   : > { %v1308_v28 = vmul.f32 1.442695, %v1290_v24  ;;  %v1275_v29 = vand.u32 2147483647, %v6139_v25  ;;  %v6146_v30 = vadd.f32 %v1185_v27, %v6094_v44  ;;  %v2243_v27 = vld [vmem:[#allocation3 + $0x220] sm:$0xff]  ;;  %2342 = vmatprep.subr.mxu0 %v2244_v23  ;;  %4977 = vmatprep.subr.mxu1 %v2244_v23  ;;  %vm1403_vm4 = vcmp.gt.f32.partialorder %v6139_v25, 20.0 }
 0x1a9   : > { %v1187_v31 = vpop.f32.mrf.mxu0  ;;  %2343 = vmatpush1.msra.mxu0 %v2243_v27  ;;  %5009 = vmatpush1.msra.mxu1 %v2243_v27  ;;  %v2296_v27 = vld [vmem:[#allocation3 + $0x3c8] sm:$0xff] }
 0x1aa   : > { %5118 = vpow2.f32 %v1308_v28  ;;  %v1291_v37 = vsub.f32 0.0, %v1275_v29  ;;  %v6149_v38 = vadd.f32 %v1187_v31, %v6097_v45  ;;  %1437 = vst.msk [vmem:[%s6103_s16 + $0x20] sm:$0xff] %vm1432_vm0, %v6146_v30  ;;  %2344 = vmatprep.subr.mxu0 %v2242_v39  ;;  %4978 = vmatprep.subr.mxu1 %v2242_v39 }
 0x1ab   : > { %v1191_v40 = vpop.f32.mrf.mxu0 }
 0x1ac   : > { %v1310_v41 = vmul.f32 1.442695, %v1291_v37  ;;  %v1276_v3 = vand.u32 2147483647, %v6149_v38  ;;  %v6156_v4 = vadd.f32 %v1191_v40, %v6094_v44  ;;  %v2241_v40 = vld [vmem:[#allocation3 + $0x210] sm:$0xff]  ;;  %vm1404_vm5 = vcmp.gt.f32.partialorder %v6149_v38, 20.0 }
 0x1ad   : > { %v1193_v42 = vpop.f32.mrf.mxu0  ;;  %2345 = vmatpush1.msra.mxu0 %v2241_v40  ;;  %5010 = vmatpush1.msra.mxu1 %v2241_v40  ;;  %v2294_v40 = vld [vmem:[#allocation3 + $0x3b8] sm:$0xff] }
 0x1ae   : > { %5120 = vpow2.f32 %v1310_v41  ;;  %v1292_v12 = vsub.f32 0.0, %v1276_v3  ;;  %v6159_v46 = vadd.f32 %v1193_v42, %v6097_v45  ;;  %1438 = vst.msk [vmem:[%s6103_s16 + $0x28] sm:$0xff] %vm1432_vm0, %v6156_v4  ;;  %v2240_v41 = vld [vmem:[#allocation3 + $0x208] sm:$0xff] }
 0x1af   : > { %v5115_v49 = vpop.eup %5114  ;;  %v1197_v51 = vpop.f32.mrf.mxu0  ;;  %2346 = vmatprep.subr.mxu0 %v2240_v41  ;;  %4979 = vmatprep.subr.mxu1 %v2240_v41 }
 0x1b0   : > { %v1336_v52 = vadd.f32 1.0, %v5115_v49  ;;  %v1312_v56 = vmul.f32 1.442695, %v1292_v12  ;;  %v1277_v59 = vand.u32 2147483647, %v6159_v46  ;;  %v6166_v60 = vadd.f32 %v1197_v51, %v6094_v44  ;;  %v2302_v12 = vld [vmem:[#allocation3 + $0x3f8] sm:$0xff]  ;;  %2347 = vmatpush1.msra.mxu0 %v2239_v1  ;;  %5011 = vmatpush1.msra.mxu1 %v2239_v1 }
 0x1b1   : > { %v1199_v61 = vpop.f32.mrf.mxu0  ;;  %2348 = vmatprep.subr.mxu0 %v2302_v12  ;;  %4980 = vmatprep.subr.mxu1 %v2302_v12  ;;  %v1257_v1 = vmax.f32 %v6122_v62, 0.0  ;;  %v4811_v12 = vld [vmem:[%s5918_s13 + $0x80] sm:$0xff]  ;;  %vm1405_vm6 = vcmp.gt.f32.partialorder %v6159_v46, 20.0 }
 0x1b2   : > { %5122 = vlog2.f32 %v1336_v52  ;;  %v1293_v7 = vsub.f32 0.0, %v1277_v59  ;;  %v6169_v8 = vadd.f32 %v1199_v61, %v6097_v45  ;;  %1439 = vst.msk [vmem:[%s6103_s16 + $0x30] sm:$0xff] %vm1432_vm0, %v6166_v60  ;;  %v2301_v59 = vld [vmem:[#allocation3 + $0x3f0] sm:$0xff]  ;;  %v2300_v61 = vld [vmem:[#allocation3 + $0x3e8] sm:$0xff] }
 0x1b3   : > { %v5117_v10 = vpop.eup %5116  ;;  %5124 = vpow2.f32 %v1312_v56  ;;  %v1203_v11 = vpop.f32.mrf.mxu0  ;;  %2349 = vmatpush2.msra.mxu0 %v2301_v59  ;;  %5012 = vmatpush2.msra.mxu1 %v2301_v59  ;;  %v2292_v59 = vld [vmem:[#allocation3 + $0x3a8] sm:$0xff] }
 0x1b4   : > { %v1337_v15 = vadd.f32 1.0, %v5117_v10  ;;  %v1314_v16 = vmul.f32 1.442695, %v1293_v7  ;;  %v1278_v17 = vand.u32 2147483647, %v6169_v8  ;;  %v6176_v18 = vadd.f32 %v1203_v11, %v6094_v44  ;;  %v2298_v10 = vld [vmem:[#allocation3 + $0x3d8] sm:$0xff]  ;;  %2350 = vmatprep.subr.mxu0 %v2300_v61  ;;  %4981 = vmatprep.subr.mxu1 %v2300_v61 }
 0x1b5   : > { %v1205_v20 = vpop.f32.mrf.mxu0  ;;  %2351 = vmatpush2.msra.mxu0 %v2299_v5  ;;  %5013 = vmatpush2.msra.mxu1 %v2299_v5  ;;  %v1258_v5 = vmax.f32 %v6129_v14, 0.0  ;;  %vm1406_vm7 = vcmp.gt.f32.partialorder %v6169_v8, 20.0 }
 0x1b6   : > { %9591 = vst [vmem:[#allocation15_spill] sm:$0xff] %v6176_v18  ;;  %5126 = vlog2.f32 %v1337_v15  ;;  %v1294_v24 = vsub.f32 0.0, %v1278_v17  ;;  %v6179_v26 = vadd.f32 %v1205_v20, %v6097_v45  ;;  %1440 = vst.msk [vmem:[%s6103_s16 + $0x38] sm:$0xff] %vm1432_vm0, %v6176_v18  ;;  %v1256_v15 = vmax.f32 %v6112_v47, 0.0  ;;  %2352 = vmatprep.subr.mxu0 %v2298_v10  ;;  %4982 = vmatprep.subr.mxu1 %v2298_v10  ;;  %v2291_v10 = vld [vmem:[#allocation3 + $0x3a0] sm:$0xff] }
 0x1b7   : > { %v5119_v28 = vpop.eup %5118  ;;  %5128 = vpow2.f32 %v1314_v16  ;;  %v1209_v29 = vpop.f32.mrf.mxu0 }
 0x1b8   : > { %v1338_v31 = vadd.f32 1.0, %v5119_v28  ;;  %v1316_v33 = vmul.f32 1.442695, %v1294_v24  ;;  %v1279_v34 = vand.u32 2147483647, %v6179_v26  ;;  %v6186_v36 = vadd.f32 %v1209_v29, %v6094_v44  ;;  %v2297_v24 = vld [vmem:[#allocation3 + $0x3d0] sm:$0xff] }
 0x1b9   : > { %v1211_v37 = vpop.f32.mrf.mxu0  ;;  %v1465_v29 = vld [vmem:[%s5918_s13] sm:$0xff]  ;;  %2353 = vmatpush2.msra.mxu0 %v2297_v24  ;;  %5014 = vmatpush2.msra.mxu1 %v2297_v24  ;;  %vm1407_vm8 = vcmp.gt.f32.partialorder %v6179_v26, 20.0 }
 0x1ba   : > { %5130 = vlog2.f32 %v1338_v31  ;;  %v1295_v3 = vsub.f32 0.0, %v1279_v34  ;;  %v6189_v42 = vadd.f32 %v1211_v37, %v6097_v45  ;;  %1441 = vst.msk [vmem:[%s6103_s16 + $0x40] sm:$0xff] %vm1432_vm0, %v6186_v36  ;;  %2354 = vmatprep.subr.mxu0 %v2296_v27  ;;  %4983 = vmatprep.subr.mxu1 %v2296_v27 }
 0x1bb   : > { %v5121_v2 = vpop.eup %5120  ;;  %5132 = vpow2.f32 %v1316_v33  ;;  %v1215_v43 = vpop.f32.mrf.mxu0  ;;  %v2295_v33 = vld [vmem:[#allocation3 + $0x3c0] sm:$0xff] }
 0x1bc   : > { %v1339_v48 = vadd.f32 1.0, %v5121_v2  ;;  %v1318_v49 = vmul.f32 1.442695, %v1295_v3  ;;  %v1280_v51 = vand.u32 2147483647, %v6189_v42  ;;  %v6196_v52 = vadd.f32 %v1215_v43, %v6094_v44  ;;  %2355 = vmatpush2.msra.mxu0 %v2295_v33  ;;  %5015 = vmatpush2.msra.mxu1 %v2295_v33 }
 0x1bd   : > { %v1217_v56 = vpop.f32.mrf.mxu0  ;;  %2356 = vmatprep.subr.mxu0 %v2294_v40  ;;  %4984 = vmatprep.subr.mxu1 %v2294_v40  ;;  %v1259_v40 = vmax.f32 %v6139_v25, 0.0  ;;  %vm1408_vm9 = vcmp.gt.f32.partialorder %v6189_v42, 20.0 }
 0x1be   : > { %5134 = vlog2.f32 %v1339_v48  ;;  %v1296_v63 = vsub.f32 0.0, %v1280_v51  ;;  %v6199_v0 = vadd.f32 %v1217_v56, %v6097_v45  ;;  %1442 = vst.msk [vmem:[%s6103_s16 + $0x48] sm:$0xff] %vm1432_vm0, %v6196_v52  ;;  %v2293_v56 = vld [vmem:[#allocation3 + $0x3b0] sm:$0xff] }
 0x1bf   : > { %v5123_v7 = vpop.eup %5122  ;;  %5136 = vpow2.f32 %v1318_v49  ;;  %v1221_v9 = vpop.f32.mrf.mxu0  ;;  %2357 = vmatpush2.msra.mxu0 %v2293_v56  ;;  %5016 = vmatpush2.msra.mxu1 %v2293_v56 }
 0x1c0   : > { %v5125_v11 = vpop.eup %5124  ;;  %v1353_v16 = vmul.f32 0.6931472, %v5123_v7  ;;  %v1320_v17 = vmul.f32 1.442695, %v1296_v63  ;;  %v1281_v21 = vand.u32 2147483647, %v6199_v0  ;;  %v6207_v22 = vadd.f32 %v1221_v9, %v6094_v44  ;;  %2358 = vmatprep.subr.mxu0 %v2292_v59  ;;  %4985 = vmatprep.subr.mxu1 %v2292_v59 }
 0x1c1   : > { %v1340_v20 = vadd.f32 1.0, %v5125_v11  ;;  %v1223_v23 = vpop.f32.mrf.mxu0  ;;  %v1466_v63 = vld [vmem:[%s5918_s13 + $0x8] sm:$0xff]  ;;  %2359 = vmatpush2.msra.mxu0 %v2291_v10  ;;  %5017 = vmatpush2.msra.mxu1 %v2291_v10  ;;  %vm1409_vm10 = vcmp.gt.f32.partialorder %v6199_v0, 20.0 }
 0x1c2   : > { %v1384_v28 = vadd.f32 %v1353_v16, %v1256_v15  ;;  %5138 = vpow2.f32 %v1320_v17  ;;  %v6217_v31 = vadd.f32 %v1223_v23, %v6097_v45  ;;  %v1297_v37 = vsub.f32 0.0, %v1281_v21  ;;  %1443 = vst.msk [vmem:[%s6103_s16 + $0x50] sm:$0xff] %vm1432_vm0, %v6207_v22  ;;  %v2290_v21 = vld [vmem:[#allocation3 + $0x398] sm:$0xff] }
 0x1c3   : > { %v5127_v34 = vpop.eup %5126  ;;  %5140 = vlog2.f32 %v1340_v20  ;;  %v1227_v39 = vpop.f32.mrf.mxu0  ;;  %2360 = vmatprep.subr.mxu0 %v2290_v21  ;;  %4986 = vmatprep.subr.mxu1 %v2290_v21 }
 0x1c4   : > { %v5129_v41 = vpop.eup %5128  ;;  %v6224_v3 = vsel %vm1400_vm1, %v6112_v47, %v1384_v28  ;;  %v1355_v2 = vmul.f32 0.6931472, %v5127_v34  ;;  %v1282_v43 = vand.u32 2147483647, %v6217_v31  ;;  %v1322_v47 = vmul.f32 1.442695, %v1297_v37 }
 0x1c5   : > { %1449 = vst.msk [vmem:[%s6213_s12] sm:$0xff] %vm1432_vm0, %v6224_v3  ;;  %v1481_v48 = vmul.f32 %v1465_v29, %v6224_v3  ;;  %v1341_v49 = vadd.f32 1.0, %v5129_v41  ;;  %v1229_v51 = vpop.f32.mrf.mxu0  ;;  %v6243_v9 = vadd.f32 %v1227_v39, %v6094_v44  ;;  %v1530_v20 = vmul.f32 %v4811_v12, %v6224_v3  ;;  %v2289_v34 = vld [vmem:[#allocation3 + $0x390] sm:$0xff] }
 0x1c6   : > { %v1385_v61 = vadd.f32 %v1355_v2, %v1257_v1  ;;  %v1298_v7 = vsub.f32 0.0, %v1282_v43  ;;  %v6249_v16 = vadd.f32 %v1229_v51, %v6097_v45  ;;  %v1467_v39 = vld [vmem:[%s5918_s13 + $0x10] sm:$0xff]  ;;  %2361 = vmatpush2.msra.mxu0 %v2289_v34  ;;  %5018 = vmatpush2.msra.mxu1 %v2289_v34  ;;  %vm1410_vm11 = vcmp.gt.f32.partialorder %v6217_v31, 20.0 }
 0x1c7   : > { %v5131_v11 = vpop.eup %5130  ;;  %v6246_v15 = vadd.f32 %v1481_v48, %v6106_v13  ;;  %5142 = vlog2.f32 %v1341_v49  ;;  %v1233_v17 = vpop.f32.mrf.mxu0  ;;  %1444 = vst.msk [vmem:[%s6103_s16 + $0x58] sm:$0xff] %vm1432_vm0, %v6243_v9  ;;  %v6278_v12 = vadd.f32 %v1530_v20, %v6106_v13  ;;  %v2288_v49 = vld [vmem:[#allocation3 + $0x388] sm:$0xff]  ;;  %v2285_v20 = vld [vmem:[#allocation3 + $0x370] sm:$0xff] }
 0x1c8   : > { %v5133_v23 = vpop.eup %5132  ;;  %v6255_v24 = vsel %vm1401_vm2, %v6122_v62, %v1385_v61  ;;  %v1357_v27 = vmul.f32 0.6931472, %v5131_v11  ;;  %5144 = vpow2.f32 %v1322_v47  ;;  %v1324_v28 = vmul.f32 1.442695, %v1298_v7  ;;  %v2287_v47 = vld [vmem:[#allocation3 + $0x380] sm:$0xff]  ;;  %2362 = vmatprep.subr.mxu0 %v2288_v49  ;;  %v2286_v7 = vld [vmem:[#allocation3 + $0x378] sm:$0xff]  ;;  %4987 = vmatprep.subr.mxu1 %v2288_v49 }
 0x1c9   : > { %9592 = vst [vmem:[#allocation16_spill] sm:$0xff] %v6246_v15  ;;  %1562 = vst.msk [vmem:[%s6238_s26] sm:$0xff] %vm1432_vm0, %v6246_v15  ;;  %v1482_v29 = vmul.f32 %v1466_v63, %v6255_v24  ;;  %v1342_v62 = vadd.f32 1.0, %v5133_v23  ;;  %v1235_v33 = vpop.f32.mrf.mxu0  ;;  %v1283_v41 = vand.u32 2147483647, %v6249_v16  ;;  %v6275_v43 = vadd.f32 %v1233_v17, %v6094_v44  ;;  %1888 = vperm.xlu0 %5090, %v6278_v12   ;;  %v1468_v23 = vld [vmem:[%s5918_s13 + $0x18] sm:$0xff] }
 0x1ca   : > { %1450 = vst.msk [vmem:[%s6213_s12 + $0x8] sm:$0xff] %vm1432_vm0, %v6255_v24  ;;  %v1386_v37 = vadd.f32 %v1357_v27, %v1258_v5  ;;  %5146 = vpow2.f32 %v1324_v28  ;;  %9593 = vst [vmem:[#allocation17_spill] sm:$0xff] %v6278_v12  ;;  %v6286_v63 = vadd.f32 %v1235_v33, %v6097_v45  ;;  %v4812_v5 = vld [vmem:[%s5918_s13 + $0x88] sm:$0xff]  ;;  %1662 = vperm.xlu1 %5093, %v6278_v12   ;;  %2363 = vmatpush2.msra.mxu0 %v2287_v47 }
 0x1cb   : > { %v5135_v1 = vpop.eup %5134  ;;  %v6272_v2 = vadd.f32 %v1482_v29, %v6116_v50  ;;  %5148 = vlog2.f32 %v1342_v62  ;;  %v1239_v48 = vpop.f32.mrf.mxu0  ;;  %v1299_v61 = vsub.f32 0.0, %v1283_v41  ;;  %1445 = vst.msk [vmem:[%s6103_s16 + $0x60] sm:$0xff] %vm1432_vm0, %v6275_v43  ;;  %5019 = vmatpush2.msra.mxu1 %v2287_v47  ;;  %v1531_v33 = vmul.f32 %v4812_v5, %v6255_v24  ;;  %2364 = vmatprep.subr.mxu0 %v2286_v7 }
 0x1cc   : > { %v5137_v51 = vpop.eup %5136  ;;  %v6283_v56 = vsel %vm1402_vm3, %v6129_v14, %v1386_v37  ;;  %v1359_v59 = vmul.f32 0.6931472, %v5135_v1  ;;  %v6302_v11 = vadd.f32 %v1239_v48, %v6094_v44  ;;  %v1284_v28 = vand.u32 2147483647, %v6286_v63  ;;  %v2284_v37 = vld [vmem:[#allocation3 + $0x368] sm:$0xff]  ;;  %4988 = vmatprep.subr.mxu1 %v2286_v7  ;;  %2365 = vmatpush2.msra.mxu0 %v2285_v20 }
 0x1cd   : > { %1563 = vst.msk [vmem:[%s6238_s26 + $0x8] sm:$0xff] %vm1432_vm0, %v6272_v2  ;;  %1451 = vst.msk [vmem:[%s6213_s12 + $0x10] sm:$0xff] %vm1432_vm0, %v6283_v56  ;;  %v1483_v10 = vmul.f32 %v1467_v39, %v6283_v56  ;;  %v1343_v14 = vadd.f32 1.0, %v5137_v51  ;;  %v1241_v17 = vpop.f32.mrf.mxu0  ;;  %v1326_v27 = vmul.f32 1.442695, %v1299_v61  ;;  %v2283_v39 = vld [vmem:[#allocation3 + $0x360] sm:$0xff]  ;;  %5020 = vmatpush2.msra.mxu1 %v2285_v20  ;;  %2366 = vmatprep.subr.mxu0 %v2284_v37 }
 0x1ce   : > { %v1387_v21 = vadd.f32 %v1359_v59, %v1259_v40  ;;  %1446 = vst.msk [vmem:[%s6103_s16 + $0x68] sm:$0xff] %vm1432_vm0, %v6302_v11  ;;  %v1300_v48 = vsub.f32 0.0, %v1284_v28  ;;  %v1260_v47 = vmax.f32 %v6149_v38, 0.0  ;;  %1582 = vperm.xlu1 %5093, %v6246_v15   ;;  %v2282_v61 = vld [vmem:[#allocation3 + $0x358] sm:$0xff]  ;;  %v6330_v7 = vadd.f32 %v1241_v17, %v6097_v45  ;;  %2367 = vmatpush2.msra.mxu0 %v2283_v39  ;;  %v2281_v20 = vld [vmem:[#allocation3 + $0x350] sm:$0xff] }
 0x1cf   : > { %v5139_v29 = vpop.eup %5138  ;;  %v6307_v62 = vadd.f32 %v1483_v10, %v6126_v6  ;;  %5150 = vlog2.f32 %v1343_v14  ;;  %v1245_v34 = vpop.f32.mrf.mxu0  ;;  %v4813_v14 = vld [vmem:[%s5918_s13 + $0x90] sm:$0xff]  ;;  %4989 = vmatprep.subr.mxu1 %v2284_v37  ;;  %2368 = vmatprep.subr.mxu0 %v2282_v61  ;;  %vm1411_vm12 = vcmp.gt.f32.partialorder %v6249_v16, 20.0  ;;  %vm1412_vm13 = vcmp.gt.f32.partialorder %v6286_v63, 20.0 }
 0x1d0   : > { %v5141_v40 = vpop.eup %5140  ;;  %v6315_v41 = vsel %vm1403_vm4, %v6139_v25, %v1387_v21  ;;  %v1344_v1 = vadd.f32 1.0, %v5139_v29  ;;  %5152 = vpow2.f32 %v1326_v27  ;;  %v6326_v25 = vadd.f32 %v1531_v33, %v6116_v50  ;;  %v1469_v27 = vld [vmem:[%s5918_s13 + $0x20] sm:$0xff]  ;;  %v2280_v29 = vld [vmem:[#allocation3 + $0x348] sm:$0xff]  ;;  %5021 = vmatpush2.msra.mxu1 %v2283_v39  ;;  %2369 = vmatpush2.msra.mxu0 %v2281_v20 }
 0x1d1   : > { %9594 = vst [vmem:[#allocation18_spill] sm:$0xff] %v6307_v62  ;;  %1564 = vst.msk [vmem:[%s6238_s26 + $0x10] sm:$0xff] %vm1432_vm0, %v6307_v62  ;;  %v1484_v49 = vmul.f32 %v1468_v23, %v6315_v41  ;;  %v1361_v51 = vmul.f32 0.6931472, %v5141_v40  ;;  %v1247_v59 = vpop.f32.mrf.mxu0  ;;  %v1328_v5 = vmul.f32 1.442695, %v1300_v48  ;;  %v6333_v10 = vadd.f32 %v1245_v34, %v6094_v44  ;;  %2370 = vmatprep.subr.mxu0 %v2280_v29 }
 0x1d2   : > { %1452 = vst.msk [vmem:[%s6213_s12 + $0x18] sm:$0xff] %vm1432_vm0, %v6315_v41  ;;  %9595 = vst [vmem:[#allocation19_spill] sm:$0xff] %v6326_v25  ;;  %5154 = vlog2.f32 %v1344_v1  ;;  %1892 = vperm.xlu0 %5090, %v6326_v25   ;;  %v6343_v17 = vadd.f32 %v1247_v59, %v6097_v45  ;;  %v1261_v34 = vmax.f32 %v6159_v46, 0.0  ;;  %v1285_v37 = vand.u32 2147483647, %v6330_v7  ;;  %5094 = vset.pattern.permute.xlu1 %v9351_v35 }
 0x1d3   : > { %9596 = vst [vmem:[#allocation20_spill] sm:$0xff] %v6333_v10  ;;  %v6337_v21 = vadd.f32 %v1484_v49, %v6136_v19  ;;  %v1388_v23 = vadd.f32 %v1361_v51, %v1260_v47  ;;  %v1251_v28 = vpop.f32.mrf.mxu0  ;;  %5156 = vpow2.f32 %v1328_v5  ;;  %1447 = vst.msk [vmem:[%s6103_s16 + $0x70] sm:$0xff] %vm1432_vm0, %v6333_v10  ;;  %v1532_v47 = vmul.f32 %v4813_v14, %v6283_v56 }
 0x1d4   : > { %v5143_v33 = vpop.eup %5142  ;;  %v1286_v49 = vand.u32 2147483647, %v6343_v17  ;;  %v1262_v51 = vmax.f32 %v6169_v8, 0.0  ;;  %v1301_v5 = vsub.f32 0.0, %v1285_v37  ;;  %1824 = vperm.xlu1 %5094, %v6246_v15   ;;  %5158 = vrcp.f32 %v6224_v3  ;;  %4990 = vmatprep.subr.mxu1 %v2282_v61 }
 0x1d5   : > { %v5145_v40 = vpop.eup %5144  ;;  %1565 = vst.msk [vmem:[%s6238_s26 + $0x18] sm:$0xff] %vm1432_vm0, %v6337_v21  ;;  %v6357_v1 = vsel %vm1404_vm5, %v6149_v38, %v1388_v23  ;;  %v1363_v48 = vmul.f32 0.6931472, %v5143_v33  ;;  %v1470_v33 = vld [vmem:[%s5918_s13 + $0x28] sm:$0xff]  ;;  %v6372_v58 = vadd.f32 %v1251_v28, %v6094_v44  ;;  %5022 = vmatpush2.msra.mxu1 %v2281_v20  ;;  %vm1413_vm14 = vcmp.gt.f32.partialorder %v6330_v7, 20.0 }
 0x1d6   : > { %1453 = vst.msk [vmem:[%s6213_s12 + $0x20] sm:$0xff] %vm1432_vm0, %v6357_v1  ;;  %v1485_v39 = vmul.f32 %v1469_v27, %v6357_v1  ;;  %v1345_v59 = vadd.f32 1.0, %v5145_v40  ;;  %1828 = vperm.xlu0 %5090, %v6272_v2   ;;  %v1302_v14 = vsub.f32 0.0, %v1286_v49  ;;  %v1253_v27 = vpop.f32.mrf.mxu0  ;;  %v1330_v35 = vmul.f32 1.442695, %v1301_v5  ;;  %4991 = vmatprep.subr.mxu1 %v2280_v29  ;;  %v2276_v5 = vld [vmem:[#allocation3 + $0x328] sm:$0xff] }
 0x1d7   : > { %v5147_v38 = vpop.eup %5146  ;;  %v1389_v23 = vadd.f32 %v1363_v48, %v1261_v34  ;;  %9597 = vst [vmem:[#allocation21_spill] sm:$0xff] %v6372_v58  ;;  %v4814_v34 = vld [vmem:[%s5918_s13 + $0x98] sm:$0xff]  ;;  %v2279_v48 = vld [vmem:[#allocation3 + $0x340] sm:$0xff]  ;;  %1448 = vst.msk [vmem:[%s6103_s16 + $0x78] sm:$0xff] %vm1432_vm0, %v6372_v58  ;;  %v6387_v49 = vadd.f32 %v1532_v47, %v6126_v6  ;;  %v6397_v20 = vadd.f32 %v1253_v27, %v6097_v45  ;;  %v1263_v27 = vmax.f32 %v6179_v26, 0.0 }
 0x1d8   : > { %v5149_v40 = vpop.eup %5148  ;;  %v6375_v37 = vadd.f32 %v1485_v39, %v6146_v30  ;;  %5160 = vlog2.f32 %v1345_v59  ;;  %v1346_v55 = vadd.f32 1.0, %v5147_v38  ;;  %v1332_v28 = vmul.f32 1.442695, %v1302_v14  ;;  %2371 = vmatpush2.msra.mxu0 %v2279_v48  ;;  %v2277_v39 = vld [vmem:[#allocation3 + $0x330] sm:$0xff]  ;;  %5023 = vmatpush2.msra.mxu1 %v2279_v48 }
 0x1d9   : > { %v6381_v44 = vsel %vm1405_vm6, %v6159_v46, %v1389_v23  ;;  %v1365_v61 = vmul.f32 0.6931472, %v5149_v40  ;;  %9598 = vst [vmem:[#allocation22_spill] sm:$0xff] %v6387_v49  ;;  %v9599_v59 = vmov 0   ;;  %2372 = vmatprep.subr.mxu0 %v2278_v32  ;;  %v1471_v38 = vld [vmem:[%s5918_s13 + $0x30] sm:$0xff]  ;;  %v1533_v29 = vmul.f32 %v4814_v34, %v6315_v41  ;;  %v2275_v23 = vld [vmem:[#allocation3 + $0x320] sm:$0xff]  ;;  %4992 = vmatprep.subr.mxu1 %v2278_v32 }
 0x1da   : > { %1566 = vst.msk [vmem:[%s6238_s26 + $0x20] sm:$0xff] %vm1432_vm0, %v6375_v37  ;;  %1454 = vst.msk [vmem:[%s6213_s12 + $0x28] sm:$0xff] %vm1432_vm0, %v6381_v44  ;;  %v1486_v46 = vmul.f32 %v1470_v33, %v6381_v44  ;;  %5095 = vset.pattern.permute.xlu1 %v9599_v59  ;;  %5162 = vlog2.f32 %v1346_v55  ;;  %1896 = vperm.xlu0 %5090, %v6387_v49   ;;  %v2274_v34 = vld [vmem:[#allocation3 + $0x318] sm:$0xff]  ;;  %vm1414_vm15 = vcmp.gt.f32.partialorder %v6343_v17, 20.0  ;;  %vm1415_vm1 = vcmp.gt.f32.partialorder %v6397_v20, 20.0 }
 0x1db   : > { %v1390_v47 = vadd.f32 %v1365_v61, %v1262_v51  ;;  %1667 = vperm.xlu1 %5095, %v6326_v25   ;;  %5164 = vpow2.f32 %v1330_v35  ;;  %v1287_v51 = vand.u32 2147483647, %v6397_v20  ;;  %2373 = vmatpush2.msra.mxu0 %v2277_v39  ;;  %v2273_v61 = vld [vmem:[#allocation3 + $0x310] sm:$0xff]  ;;  %v1472_v32 = vld [vmem:[%s5918_s13 + $0x38] sm:$0xff] }
 0x1dc   : > { %v5151_v14 = vpop.eup %5150  ;;  %v6405_v45 = vadd.f32 %v1486_v46, %v6156_v4  ;;  %5166 = vpow2.f32 %v1332_v28  ;;  %2374 = vmatprep.subr.mxu0 %v2276_v5  ;;  %5024 = vmatpush2.msra.mxu1 %v2277_v39 }
 0x1dd   : > { %v5153_v55 = vpop.eup %5152  ;;  %v6410_v33 = vsel %vm1406_vm7, %v6169_v8, %v1390_v47  ;;  %v1367_v40 = vmul.f32 0.6931472, %v5151_v14  ;;  %v1303_v48 = vsub.f32 0.0, %v1287_v51  ;;  %2375 = vmatpush2.msra.mxu0 %v2275_v23  ;;  %5168 = vrcp.f32 %v6283_v56  ;;  %4993 = vmatprep.subr.mxu1 %v2276_v5  ;;  %v1473_v5 = vld [vmem:[%s5918_s13 + $0x40] sm:$0xff] }
 0x1de   : > { %1567 = vst.msk [vmem:[%s6238_s26 + $0x28] sm:$0xff] %vm1432_vm0, %v6405_v45  ;;  %1455 = vst.msk [vmem:[%s6213_s12 + $0x30] sm:$0xff] %vm1432_vm0, %v6410_v33  ;;  %v1487_v35 = vmul.f32 %v1471_v38, %v6410_v33  ;;  %v1347_v8 = vadd.f32 1.0, %v5153_v55  ;;  %v1264_v47 = vmax.f32 %v6189_v42, 0.0  ;;  %v6425_v14 = vadd.f32 %v1533_v29, %v6136_v19  ;;  %v2272_v38 = vld [vmem:[#allocation3 + $0x308] sm:$0xff]  ;;  %2376 = vmatprep.subr.mxu0 %v2274_v34 }
 0x1df   : > { %v5155_v28 = vpop.eup %5154  ;;  %v1391_v46 = vadd.f32 %v1367_v40, %v1263_v27  ;;  %1672 = vperm.xlu1 %5095, %v6387_v49   ;;  %v1334_v55 = vmul.f32 1.442695, %v1303_v48  ;;  %v2271_v27 = vld [vmem:[#allocation3 + $0x300] sm:$0xff]  ;;  %2377 = vmatpush2.msra.mxu0 %v2273_v61  ;;  %vm4256_vm7 = vcmask 7168  }
 0x1e0   : > { %9600 = vst [vmem:[#allocation23_spill] sm:$0xff] %v6425_v14  ;;  %v6429_v51 = vadd.f32 %v1487_v35, %v6166_v60  ;;  %v1369_v39 = vmul.f32 0.6931472, %v5155_v28  ;;  %5170 = vlog2.f32 %v1347_v8  ;;  %v5157_v40 = vpop.eup %5156  ;;  %1900 = vperm.xlu0 %5090, %v6425_v14   ;;  %2378 = vmatprep.subr.mxu0 %v2272_v38 }
 0x1e1   : > { %v6434_v57 = vsel %vm1407_vm8, %v6179_v26, %v1391_v46  ;;  %v1348_v8 = vadd.f32 1.0, %v5157_v40  ;;  %5025 = vmatpush2.msra.mxu1 %v2275_v23  ;;  %5172 = vpow2.f32 %v1334_v55  ;;  %2379 = vmatpush2.msra.mxu0 %v2271_v27  ;;  %v6447_v26 = vpop.eup %5158  ;;  %v1474_v40 = vld [vmem:[%s5918_s13 + $0x48] sm:$0xff] }
 0x1e2   : > { %1568 = vst.msk [vmem:[%s6238_s26 + $0x30] sm:$0xff] %vm1432_vm0, %v6429_v51  ;;  %1456 = vst.msk [vmem:[%s6213_s12 + $0x38] sm:$0xff] %vm1432_vm0, %v6434_v57  ;;  %v1488_v29 = vmul.f32 %v1472_v32, %v6434_v57  ;;  %v1392_v35 = vadd.f32 %v1369_v39, %v1264_v47  ;;  %4994 = vmatprep.subr.mxu1 %v2274_v34  ;;  %v1265_v32 = vmax.f32 %v6199_v0, 0.0  ;;  %v9602_v39 = vmov 1  }
 0x1e3   : > { %1592 = vperm.xlu1 %5095, %v6307_v62   ;;  %5174 = vlog2.f32 %v1348_v8  ;;  %5026 = vmatpush2.msra.mxu1 %v2273_v61 }
 0x1e4   : > { %v6450_v48 = vadd.f32 %v1488_v29, %v6176_v18  ;;  %v6453_v28 = vsel %vm1408_vm9, %v6189_v42, %v1392_v35  ;;  %v3389_v42 = vsub.f32 %v6278_v12, %v6106_v13  ;;  %5176 = vlog2.f32 %v6224_v3  ;;  %4995 = vmatprep.subr.mxu1 %v2272_v38 }
 0x1e5   : > { %v5161_v46 = vpop.eup %5160  ;;  %1457 = vst.msk [vmem:[%s6213_s12 + $0x40] sm:$0xff] %vm1432_vm0, %v6453_v28  ;;  %v1489_v23 = vmul.f32 %v1473_v5, %v6453_v28  ;;  %5027 = vmatpush2.msra.mxu1 %v2271_v27  ;;  %v1266_v3 = vmax.f32 %v6217_v31, 0.0  ;;  %v4815_v27 = vld [vmem:[%s5918_s13 + $0xa0] sm:$0xff]  ;;  %5178 = vlog2.f32 %v6283_v56 }
 0x1e6   : > { %1569 = vst.msk [vmem:[%s6238_s26 + $0x38] sm:$0xff] %vm1432_vm0, %v6450_v48  ;;  %v1371_v47 = vmul.f32 0.6931472, %v5161_v46  ;;  %v3437_v29 = vmul.f32 %v6447_v26, %v3389_v42 }
 0x1e7   : > { %v6467_v34 = vadd.f32 %v1489_v23, %v6186_v36  ;;  %5096 = vset.pattern.permute.xlu1 %v9602_v39  ;;  %v5163_v61 = vpop.eup %5162 }
 0x1e8   : > { %v1393_v55 = vadd.f32 %v1371_v47, %v1265_v32  ;;  %1832 = vperm.xlu1 %5096, %v6307_v62   ;;  %v5165_v35 = vpop.eup %5164  ;;  %v1373_v38 = vmul.f32 0.6931472, %v5163_v61  ;;  %v1475_v47 = vld [vmem:[%s5918_s13 + $0x50] sm:$0xff] }
 0x1e9   : > { %9601 = vst [vmem:[#allocation24_spill] sm:$0xff] %v6467_v34  ;;  %1570 = vst.msk [vmem:[%s6238_s26 + $0x40] sm:$0xff] %vm1432_vm0, %v6467_v34  ;;  %1856 = vperm.xlu0 %5090, %v6467_v34   ;;  %v5167_v5 = vpop.eup %5166  ;;  %v1349_v46 = vadd.f32 1.0, %v5165_v35  ;;  %v1267_v35 = vmax.f32 %v6249_v16, 0.0 }
 0x1ea   : > { %v6482_v8 = vsel %vm1409_vm10, %v6199_v0, %v1393_v55  ;;  %v1394_v32 = vadd.f32 %v1373_v38, %v1266_v3  ;;  %v1350_v42 = vadd.f32 1.0, %v5167_v5  ;;  %v6489_v61 = vpop.eup %5168  ;;  %v1534_v0 = vmul.f32 %v4815_v27, %v6357_v1  ;;  %v4816_v27 = vld [vmem:[%s5918_s13 + $0xa8] sm:$0xff] }
 0x1eb   : > { %1458 = vst.msk [vmem:[%s6213_s12 + $0x48] sm:$0xff] %vm1432_vm0, %v6482_v8  ;;  %v1490_v23 = vmul.f32 %v1474_v40, %v6482_v8  ;;  %5180 = vlog2.f32 %v1349_v46  ;;  %v3469_v5 = vmul.f32 %v3437_v29, %v3437_v29  ;;  %v3375_v46 = vsub.f32 %v6307_v62, %v6126_v6 }
 0x1ec   : > { %5097 = vset.pattern.permute.xlu1 %v9599_v59  ;;  %v6498_v40 = vsel %vm1410_vm11, %v6217_v31, %v1394_v32  ;;  %5182 = vlog2.f32 %v1350_v42  ;;  %v1476_v42 = vld [vmem:[%s5918_s13 + $0x58] sm:$0xff]  ;;  %v1268_v62 = vmax.f32 %v6286_v63, 0.0 }
 0x1ed   : > { %v5171_v56 = vpop.eup %5170  ;;  %v6495_v55 = vadd.f32 %v1490_v23, %v6196_v52  ;;  %1677 = vperm.xlu1 %5097, %v6425_v14   ;;  %1459 = vst.msk [vmem:[%s6213_s12 + $0x50] sm:$0xff] %vm1432_vm0, %v6498_v40  ;;  %v1491_v3 = vmul.f32 %v1475_v47, %v6498_v40  ;;  %v6518_v47 = vadd.f32 %v1534_v0, %v6146_v30 }
 0x1ee   : > { %v1375_v38 = vmul.f32 0.6931472, %v5171_v56  ;;  %v5173_v31 = vpop.eup %5172  ;;  %v3410_v29 = vmul.f32 %v6489_v61, %v3375_v46 }
 0x1ef   : > { %9603 = vst [vmem:[#allocation25_spill] sm:$0xff] %v6495_v55  ;;  %1571 = vst.msk [vmem:[%s6238_s26 + $0x48] sm:$0xff] %vm1432_vm0, %v6495_v55  ;;  %1860 = vperm.xlu0 %5090, %v6495_v55   ;;  %v6514_v23 = vadd.f32 %v1491_v3, %v6207_v22  ;;  %v1351_v12 = vadd.f32 1.0, %v5173_v31  ;;  %v1535_v3 = vmul.f32 %v4816_v27, %v6381_v44 }
 0x1f0   : > { %v1395_v32 = vadd.f32 %v1375_v38, %v1267_v35  ;;  %9605 = vst [vmem:[#allocation27_spill] sm:$0xff] %v6518_v47  ;;  %v5175_v56 = vpop.eup %5174  ;;  %v6532_v38 = vmul.f32 -0.5, %v3469_v5  ;;  %v3455_v46 = vmul.f32 %v3410_v29, %v3410_v29 }
 0x1f1   : > { %9604 = vst [vmem:[#allocation26_spill] sm:$0xff] %v6514_v23  ;;  %5098 = vset.pattern.permute.xlu1 %v9602_v39  ;;  %1572 = vst.msk [vmem:[%s6238_s26 + $0x50] sm:$0xff] %vm1432_vm0, %v6514_v23  ;;  %v1377_v0 = vmul.f32 0.6931472, %v5175_v56  ;;  %v5177_v53 = vpop.eup %5176  ;;  %5184 = vlog2.f32 %v1351_v12 }
 0x1f2   : > { %v6529_v35 = vsel %vm1411_vm12, %v6249_v16, %v1395_v32  ;;  %1904 = vperm.xlu1 %5098, %v6518_v47   ;;  %9606 = vst [vmem:[#allocation28_spill] sm:$0xff] %v6532_v38  ;;  %v6540_v16 = vmul.f32 0.6931472, %v5177_v53  ;;  %v6547_v32 = vadd.f32 %v1535_v3, %v6156_v4  ;;  %v6549_v29 = vmul.f32 -0.5, %v3455_v46 }
 0x1f3   : > { %1460 = vst.msk [vmem:[%s6213_s12 + $0x58] sm:$0xff] %vm1432_vm0, %v6529_v35  ;;  %v1492_v31 = vmul.f32 %v1476_v42, %v6529_v35  ;;  %1864 = vperm.xlu0 %5090, %v6514_v23   ;;  %v1396_v27 = vadd.f32 %v1377_v0, %v1268_v62  ;;  %v5179_v42 = vpop.eup %5178  ;;  %5186 = vrcp.f32 %v6255_v24 }
 0x1f4   : > { %9608 = vst [vmem:[#allocation30_spill] sm:$0xff] %v6547_v32  ;;  %9609 = vst [vmem:[#allocation31_spill] sm:$0xff] %v6549_v29  ;;  %v6568_v56 = vmul.f32 0.6931472, %v5179_v42  ;;  %5188 = vlog2.f32 %v6255_v24  ;;  %v1270_v42 = vmax.f32 %v6343_v17, 0.0  ;;  %v1478_v29 = vld [vmem:[%s5918_s13 + $0x68] sm:$0xff] }
 0x1f5   : > { %v6543_v5 = vadd.f32 %v1492_v31, %v6243_v9  ;;  %v6553_v62 = vsel %vm1412_vm13, %v6286_v63, %v1396_v27  ;;  %v4817_v63 = vld [vmem:[%s5918_s13 + $0xb0] sm:$0xff]  ;;  %v1269_v27 = vmax.f32 %v6330_v7, 0.0  ;;  %5190 = vrcp.f32 %v6453_v28 }
 0x1f6   : > { %5099 = vset.pattern.permute.xlu1 %v9599_v59  ;;  %1461 = vst.msk [vmem:[%s6213_s12 + $0x60] sm:$0xff] %vm1432_vm0, %v6553_v62  ;;  %v1493_v12 = vmul.f32 %v1477_v54, %v6553_v62  ;;  %v1536_v53 = vmul.f32 %v4817_v63, %v6410_v33  ;;  %5192 = vrcp.f32 %v6315_v41 }
 0x1f7   : > { %9607 = vst [vmem:[#allocation29_spill] sm:$0xff] %v6543_v5  ;;  %1573 = vst.msk [vmem:[%s6238_s26 + $0x58] sm:$0xff] %vm1432_vm0, %v6543_v5  ;;  %1687 = vperm.xlu1 %5099, %v6547_v32   ;;  %1868 = vperm.xlu0 %5090, %v6543_v5   ;;  %5194 = vlog2.f32 %v6315_v41  ;;  %v3391_v41 = vsub.f32 %v6387_v49, %v6126_v6 }
 0x1f8   : > { %v5181_v3 = vpop.eup %5180  ;;  %v6571_v0 = vadd.f32 %v1493_v12, %v6275_v43  ;;  %5196 = vrcp.f32 %v6482_v8 }
 0x1f9   : > { %v5183_v31 = vpop.eup %5182  ;;  %v1379_v54 = vmul.f32 0.6931472, %v5181_v3  ;;  %v1479_v3 = vld [vmem:[%s5918_s13 + $0x70] sm:$0xff]  ;;  %5198 = vrcp.f32 %v6357_v1 }
 0x1fa   : > { %9610 = vst [vmem:[#allocation32_spill] sm:$0xff] %v6571_v0  ;;  %1574 = vst.msk [vmem:[%s6238_s26 + $0x60] sm:$0xff] %vm1432_vm0, %v6571_v0  ;;  %v1381_v12 = vmul.f32 0.6931472, %v5183_v31  ;;  %v6593_v31 = vadd.f32 %v1536_v53, %v6166_v60  ;;  %5200 = vrcp.f32 %v6381_v44 }
 0x1fb   : > { %5100 = vset.pattern.permute.xlu1 %v9602_v39  ;;  %1872 = vperm.xlu0 %5090, %v6571_v0   ;;  %v1397_v46 = vadd.f32 %v1379_v54, %v1269_v27  ;;  %5202 = vlog2.f32 %v6357_v1 }
 0x1fc   : > { %1908 = vperm.xlu1 %5100, %v6547_v32   ;;  %v1398_v63 = vadd.f32 %v1381_v12, %v1270_v42  ;;  %9611 = vst [vmem:[#allocation33_spill] sm:$0xff] %v6593_v31  ;;  %5204 = vlog2.f32 %v6381_v44 }
 0x1fd   : > { %v6589_v24 = vsel %vm1413_vm14, %v6330_v7, %v1397_v46  ;;  %5206 = vlog2.f32 %v6453_v28 }
 0x1fe   : > { %1462 = vst.msk [vmem:[%s6213_s12 + $0x68] sm:$0xff] %vm1432_vm0, %v6589_v24  ;;  %v1494_v27 = vmul.f32 %v1478_v29, %v6589_v24  ;;  %v6600_v54 = vsel %vm1414_vm15, %v6343_v17, %v1398_v63  ;;  %v5185_v46 = vpop.eup %5184  ;;  %v1271_v29 = vmax.f32 %v6397_v20, 0.0  ;;  %v3373_v63 = vsub.f32 %v6246_v15, %v6106_v13 }
 0x1ff   : > { %1463 = vst.msk [vmem:[%s6213_s12 + $0x70] sm:$0xff] %vm1432_vm0, %v6600_v54  ;;  %v1495_v7 = vmul.f32 %v1479_v3, %v6600_v54  ;;  %v1383_v12 = vmul.f32 0.6931472, %v5185_v46  ;;  %5208 = vrcp.f32 %v6410_v33 }
 0x200   : > { %1912 = vperm.xlu1 %5100, %v6593_v31   ;;  %v6608_v53 = vadd.f32 %v1494_v27, %v6302_v11  ;;  %v6614_v17 = vpop.eup %5186  ;;  %v1480_v27 = vld [vmem:[%s5918_s13 + $0x78] sm:$0xff]  ;;  %v3406_v46 = vmul.f32 %v6447_v26, %v3373_v63  ;;  %5210 = vlog2.f32 %v6410_v33 }
 0x201   : > { %v6611_v42 = vadd.f32 %v1495_v7, %v6333_v10  ;;  %v1399_v3 = vadd.f32 %v1383_v12, %v1271_v29  ;;  %v3390_v7 = vsub.f32 %v6326_v25, %v6116_v50  ;;  %v5189_v12 = vpop.eup %5188  ;;  %5212 = vlog2.f32 %v6482_v8 }
 0x202   : > { %9612 = vst [vmem:[#allocation34_spill] sm:$0xff] %v6608_v53  ;;  %1575 = vst.msk [vmem:[%s6238_s26 + $0x68] sm:$0xff] %vm1432_vm0, %v6608_v53  ;;  %1876 = vperm.xlu0 %5090, %v6608_v53   ;;  %v3453_v38 = vmul.f32 %v3406_v46, %v3406_v46  ;;  %v3439_v46 = vmul.f32 %v6489_v61, %v3391_v41  ;;  %5214 = vrcp.f32 %v6498_v40 }
 0x203   : > { %9613 = vst [vmem:[#allocation35_spill] sm:$0xff] %v6611_v42  ;;  %1576 = vst.msk [vmem:[%s6238_s26 + $0x70] sm:$0xff] %vm1432_vm0, %v6611_v42  ;;  %v6635_v13 = vsel %vm1415_vm1, %v6397_v20, %v1399_v3  ;;  %v3438_v29 = vmul.f32 %v6614_v17, %v3390_v7  ;;  %v6649_v20 = vmul.f32 0.6931472, %v5189_v12  ;;  %5216 = vrcp.f32 %v6434_v57 }
 0x204   : > { %5101 = vset.pattern.permute.xlu1 %v9599_v59  ;;  %1464 = vst.msk [vmem:[%s6213_s12 + $0x78] sm:$0xff] %vm1432_vm0, %v6635_v13  ;;  %v1496_v25 = vmul.f32 %v1480_v27, %v6635_v13  ;;  %v6647_v63 = vmul.f32 -0.5, %v3453_v38  ;;  %v3381_v27 = vsub.f32 %v6467_v34, %v6186_v36  ;;  %v3471_v6 = vmul.f32 %v3439_v46, %v3439_v46  ;;  %v4818_v46 = vld [vmem:[%s5918_s13 + $0xb8] sm:$0xff] }
 0x205   : > { %1622 = vperm.xlu1 %5101, %v6467_v34   ;;  %v3470_v15 = vmul.f32 %v3438_v29, %v3438_v29  ;;  %v3392_v29 = vsub.f32 %v6425_v14, %v6136_v19  ;;  %5218 = vrcp.f32 %v6529_v35  ;;  %v4819_v14 = vld [vmem:[%s5918_s13 + $0xc0] sm:$0xff] }
 0x206   : > { %1880 = vperm.xlu0 %5090, %v6611_v42   ;;  %v6644_v26 = vadd.f32 %v1496_v25, %v6372_v58  ;;  %9615 = vst [vmem:[#allocation37_spill] sm:$0xff] %v6647_v63  ;;  %v6688_v38 = vmul.f32 -0.5, %v3471_v6  ;;  %5220 = vrcp.f32 %v6553_v62 }
 0x207   : > { %v6652_v3 = vmul.f32 -0.5, %v3470_v15  ;;  %v6668_v15 = vpop.eup %5190  ;;  %5222 = vlog2.f32 %v6434_v57 }
 0x208   : > { %9614 = vst [vmem:[#allocation36_spill] sm:$0xff] %v6644_v26  ;;  %1577 = vst.msk [vmem:[%s6238_s26 + $0x78] sm:$0xff] %vm1432_vm0, %v6644_v26  ;;  %v6676_v7 = vpop.eup %5192  ;;  %v3422_v1 = vmul.f32 %v6668_v15, %v3381_v27  ;;  %5224 = vrcp.f32 %v6589_v24  ;;  %s7679_s26 = scalar_lea.vmem %s9340_s7, %s5927_s30  ;;  %s4798_s30 = sshll.u32 %s5915_s23, 3 }
 0x209   : > { %1627 = vperm.xlu1 %5101, %v6495_v55   ;;  %9616 = vst [vmem:[#allocation38_spill] sm:$0xff] %v6652_v3  ;;  %v3440_v44 = vmul.f32 %v6676_v7, %v3392_v29  ;;  %v5195_v12 = vpop.eup %5194  ;;  %9617 = vst [vmem:[#allocation39_spill] sm:$0xff] %v6688_v38  ;;  %v3382_v29 = vsub.f32 %v6495_v55, %v6196_v52  ;;  %v1537_v55 = vmul.f32 %v4818_v46, %v6434_v57  ;;  %s576_s12 = scalar_lea.vmem [#allocation6], %s4798_s30  ;;  %s5708_s30 = smov [#allocation6]  }
 0x20a   : > { %1836 = vperm.xlu0 %5090, %v6337_v21   ;;  %v6690_v61 = vpop.eup %5196  ;;  %v6701_v6 = vmul.f32 0.6931472, %v5195_v12  ;;  %v3461_v3 = vmul.f32 %v3422_v1, %v3422_v1  ;;  %v3394_v1 = vsub.f32 %v6547_v32, %v6156_v4  ;;  %5226 = vlog2.f32 %v6498_v40  ;;  %s4554_s14 = sshll.u32 %s576_s12, 4  ;;  %s4555_s14 = int_to_ptr.vmem [resolvable:$true] %s4554_s14 }
 0x20b   : > { %v3472_v41 = vmul.f32 %v3440_v44, %v3440_v44  ;;  %v6693_v27 = vpop.eup %5198  ;;  %v3393_v44 = vsub.f32 %v6518_v47, %v6146_v30  ;;  %v3424_v63 = vmul.f32 %v6690_v61, %v3382_v29  ;;  %5228 = vlog2.f32 %v6529_v35 }
 0x20c   : > { %9618 = vst [vmem:[#allocation40_spill] sm:$0xff] %v6701_v6  ;;  %v6709_v33 = vpop.eup %5200  ;;  %v6724_v34 = vmul.f32 -0.5, %v3461_v3  ;;  %v1538_v3 = vmul.f32 %v4819_v14, %v6453_v28  ;;  %v3395_v14 = vsub.f32 %v6593_v31, %v6166_v60  ;;  %5230 = vlog2.f32 %v6553_v62 }
 0x20d   : > { %1632 = vperm.xlu1 %5101, %v6514_v23   ;;  %v6703_v25 = vmul.f32 -0.5, %v3472_v41  ;;  %v3441_v41 = vmul.f32 %v6693_v27, %v3393_v44  ;;  %v5203_v38 = vpop.eup %5202  ;;  %v3442_v12 = vmul.f32 %v6709_v33, %v3394_v1  ;;  %v3462_v1 = vmul.f32 %v3424_v63, %v3424_v63  ;;  %v4821_v63 = vld [vmem:[%s5918_s13 + $0xd0] sm:$0xff] }
 0x20e   : > { %1884 = vperm.xlu0 %5090, %v6644_v26   ;;  %9620 = vst [vmem:[#allocation42_spill] sm:$0xff] %v6724_v34  ;;  %v1540_v28 = vmul.f32 %v4821_v63, %v6498_v40  ;;  %5232 = vlog2.f32 %v6589_v24 }
 0x20f   : > { %9619 = vst [vmem:[#allocation41_spill] sm:$0xff] %v6703_v25  ;;  %v3473_v29 = vmul.f32 %v3441_v41, %v3441_v41  ;;  %v6729_v25 = vmul.f32 0.6931472, %v5203_v38  ;;  %v3474_v46 = vmul.f32 %v3442_v12, %v3442_v12  ;;  %v6743_v38 = vadd.f32 %v1537_v55, %v6176_v18 }
 0x210   : > { %v6762_v12 = vmul.f32 -0.5, %v3462_v1  ;;  %5234 = vrcp.f32 %v6600_v54 }
 0x211   : > { %1637 = vperm.xlu1 %5101, %v6543_v5   ;;  %v6731_v49 = vmul.f32 -0.5, %v3473_v29  ;;  %9622 = vst [vmem:[#allocation44_spill] sm:$0xff] %v6743_v38  ;;  %v3396_v63 = vsub.f32 %v6743_v38, %v6176_v18 }
 0x212   : > { %1844 = vperm.xlu0 %5090, %v6405_v45   ;;  %9626 = vst [vmem:[#allocation48_spill] sm:$0xff] %v6762_v12 }
 0x213   : > { %9621 = vst [vmem:[#allocation43_spill] sm:$0xff] %v6731_v49 }
 0x215   : > { %1642 = vperm.xlu1 %5101, %v6571_v0  }
 0x216   : > { %5106 = vset.pattern.permute.xlu0 %v9599_v59 }
 0x217   : > { %1682 = vperm.xlu0 %5106, %v6518_v47   ;;  %v5205_v47 = vpop.eup %5204  ;;  %5236 = vrcp.f32 %v6635_v13 }
 0x218   : > { %v5207_v44 = vpop.eup %5206  ;;  %v6745_v29 = vmul.f32 0.6931472, %v5205_v47  ;;  %v6759_v47 = vadd.f32 %v1538_v3, %v6186_v36  ;;  %5238 = vlog2.f32 %v6600_v54 }
 0x219   : > { %1647 = vperm.xlu1 %5101, %v6608_v53   ;;  %v6735_v41 = vmul.f32 0.6931472, %v5207_v44  ;;  %v6740_v6 = vpop.eup %5208  ;;  %v6749_v44 = vmul.f32 -0.5, %v3474_v46  ;;  %5240 = vlog2.f32 %v6635_v13 }
 0x21a   : > { %9623 = vst [vmem:[#allocation45_spill] sm:$0xff] %v6745_v29  ;;  %v5211_v55 = vpop.eup %5210  ;;  %9625 = vst [vmem:[#allocation47_spill] sm:$0xff] %v6759_v47  ;;  %v3443_v46 = vmul.f32 %v6740_v6, %v3395_v14  ;;  %v3384_v14 = vsub.f32 %v6543_v5, %v6243_v9 }
 0x21b   : > { %1587 = vperm.xlu0 %5106, %v6272_v2   ;;  %9624 = vst [vmem:[#allocation46_spill] sm:$0xff] %v6749_v44  ;;  %v5213_v57 = vpop.eup %5212  ;;  %v4820_v44 = vld [vmem:[%s5918_s13 + $0xc8] sm:$0xff]  ;;  %v6776_v1 = vmul.f32 0.6931472, %v5211_v55 }
 0x21c   : > { %v6766_v32 = vmul.f32 0.6931472, %v5213_v57  ;;  %v6768_v34 = vpop.eup %5214  ;;  %v3383_v57 = vsub.f32 %v6514_v23, %v6207_v22  ;;  %v1539_v55 = vmul.f32 %v4820_v44, %v6482_v8 }
 0x21d   : > { %1652 = vperm.xlu1 %5101, %v6611_v42   ;;  %v6773_v3 = vpop.eup %5216  ;;  %9629 = vst [vmem:[#allocation51_spill] sm:$0xff] %v6776_v1 }
 0x21e   : > { %9627 = vst [vmem:[#allocation49_spill] sm:$0xff] %v6766_v32  ;;  %9628 = vst [vmem:[#allocation50_spill] sm:$0xff] %v6773_v3  ;;  %v3444_v23 = vmul.f32 %v6773_v3, %v3396_v63  ;;  %v6810_v63 = vadd.f32 %v1539_v55, %v6196_v52  ;;  %v4822_v55 = vld [vmem:[%s5918_s13 + $0xd8] sm:$0xff] }
 0x21f   : > { %1692 = vperm.xlu0 %5106, %v6593_v31   ;;  %v3475_v31 = vmul.f32 %v3443_v46, %v3443_v46  ;;  %v6784_v46 = vpop.eup %5218 }
 0x220   : > { %v6796_v12 = vpop.eup %5220  ;;  %v3428_v8 = vmul.f32 %v6784_v46, %v3384_v14  ;;  %v3476_v44 = vmul.f32 %v3444_v23, %v3444_v23  ;;  %9632 = vst [vmem:[#allocation54_spill] sm:$0xff] %v6810_v63  ;;  %v3397_v23 = vsub.f32 %v6759_v47, %v6186_v36  ;;  %v4823_v36 = vld [vmem:[%s5918_s13 + $0xe0] sm:$0xff] }
 0x221   : > { %1657 = vperm.xlu1 %5101, %v6644_v26   ;;  %v6780_v49 = vmul.f32 -0.5, %v3475_v31  ;;  %v3426_v31 = vmul.f32 %v6768_v34, %v3383_v57  ;;  %v5223_v40 = vpop.eup %5222  ;;  %v3385_v57 = vsub.f32 %v6571_v0, %v6275_v43  ;;  %v3386_v0 = vsub.f32 %v6608_v53, %v6302_v11 }
 0x222   : > { %v6815_v29 = vmul.f32 0.6931472, %v5223_v40  ;;  %v3398_v53 = vsub.f32 %v6810_v63, %v6196_v52  ;;  %v3464_v3 = vmul.f32 %v3428_v8, %v3428_v8  ;;  %v1542_v40 = vmul.f32 %v4823_v36, %v6553_v62 }
 0x223   : > { %1597 = vperm.xlu0 %5106, %v6337_v21   ;;  %9630 = vst [vmem:[#allocation52_spill] sm:$0xff] %v6780_v49  ;;  %v6817_v49 = vmul.f32 -0.5, %v3476_v44  ;;  %v3430_v14 = vmul.f32 %v6796_v12, %v3385_v57  ;;  %v3463_v5 = vmul.f32 %v3426_v31, %v3426_v31  ;;  %v3445_v44 = vmul.f32 %v6668_v15, %v3397_v23 }
 0x224   : > { %v1541_v31 = vmul.f32 %v4822_v55, %v6529_v35  ;;  %v3446_v18 = vmul.f32 %v6690_v61, %v3398_v53  ;;  %v6849_v53 = vmul.f32 -0.5, %v3464_v3 }
 0x225   : > { %1697 = vperm.xlu1 %5101, %v6743_v38   ;;  %9633 = vst [vmem:[#allocation55_spill] sm:$0xff] %v6817_v49  ;;  %v3477_v1 = vmul.f32 %v3445_v44, %v3445_v44  ;;  %v6839_v15 = vmul.f32 -0.5, %v3463_v5  ;;  %v3465_v52 = vmul.f32 %v3430_v14, %v3430_v14  ;;  %v6859_v44 = vadd.f32 %v1542_v40, %v6275_v43  ;;  %v4825_v14 = vld [vmem:[%s5918_s13 + $0xf0] sm:$0xff] }
 0x226   : > { %v3478_v8 = vmul.f32 %v3446_v18, %v3446_v18  ;;  %9637 = vst [vmem:[#allocation59_spill] sm:$0xff] %v6849_v53  ;;  %v6854_v61 = vadd.f32 %v1541_v31, %v6243_v9  ;;  %v1544_v40 = vmul.f32 %v4825_v14, %v6600_v54 }
 0x227   : > { %1702 = vperm.xlu0 %5106, %v6759_v47   ;;  %9634 = vst [vmem:[#allocation56_spill] sm:$0xff] %v6839_v15  ;;  %v6841_v23 = vmul.f32 -0.5, %v3477_v1  ;;  %9640 = vst [vmem:[#allocation62_spill] sm:$0xff] %v6859_v44  ;;  %v6868_v36 = vmul.f32 -0.5, %v3465_v52  ;;  %v3401_v14 = vsub.f32 %v6859_v44, %v6275_v43  ;;  %v9681_v15 = vld [vmem:[#allocation45_spill] sm:$0xff] }
 0x228   : > { %9638 = vst [vmem:[#allocation60_spill] sm:$0xff] %v6854_v61  ;;  %v6856_v55 = vmul.f32 -0.5, %v3478_v8  ;;  %v3400_v5 = vsub.f32 %v6854_v61, %v6243_v9  ;;  %v9656_v9 = vld [vmem:[#allocation14_spill] sm:$0xff] }
 0x229   : > { %5102 = vset.pattern.permute.xlu1 %v9602_v39  ;;  %9635 = vst [vmem:[#allocation57_spill] sm:$0xff] %v6841_v23  ;;  %9642 = vst [vmem:[#allocation64_spill] sm:$0xff] %v6868_v36 }
 0x22a   : > { %1916 = vperm.xlu1 %5102, %v6743_v38   ;;  %v6801_v38 = vadd.f32 %v1540_v28, %v6207_v22  ;;  %v6813_v28 = vpop.eup %5224  ;;  %9639 = vst [vmem:[#allocation61_spill] sm:$0xff] %v6856_v55 }
 0x22b   : > { %1607 = vperm.xlu0 %5106, %v6405_v45   ;;  %v3432_v57 = vmul.f32 %v6813_v28, %v3386_v0  ;;  %v5227_v49 = vpop.eup %5226  ;;  %v4824_v0 = vld [vmem:[%s5918_s13 + $0xe8] sm:$0xff] }
 0x22c   : > { %9631 = vst [vmem:[#allocation53_spill] sm:$0xff] %v6801_v38  ;;  %v6847_v35 = vmul.f32 0.6931472, %v5227_v49  ;;  %v5229_v62 = vpop.eup %5228  ;;  %v1543_v18 = vmul.f32 %v4824_v0, %v6589_v24  ;;  %v4826_v49 = vld [vmem:[%s5918_s13 + $0xf8] sm:$0xff]  ;;  %s9296_s13 = scalar_lea.hbm %s9339_s6, %s4942_s24 }
 0x22d   : > { %v3466_v1 = vmul.f32 %v3432_v57, %v3432_v57  ;;  %v6865_v3 = vmul.f32 0.6931472, %v5229_v62  ;;  %v5231_v31 = vpop.eup %5230  ;;  %v3399_v57 = vsub.f32 %v6801_v38, %v6207_v22  ;;  %v6900_v22 = vadd.f32 %v1544_v40, %v6333_v10 }
 0x22e   : > { %5103 = vset.pattern.permute.xlu1 %v9599_v59  ;;  %9636 = vst [vmem:[#allocation58_spill] sm:$0xff] %v6847_v35  ;;  %v6877_v0 = vmul.f32 0.6931472, %v5231_v31  ;;  %v5233_v62 = vpop.eup %5232  ;;  %v6882_v52 = vadd.f32 %v1543_v18, %v6302_v11  ;;  %v3448_v18 = vmul.f32 %v6784_v46, %v3400_v5  ;;  %v1545_v31 = vmul.f32 %v4826_v49, %v6635_v13  ;;  %v4828_v13 = vld [vmem:[%s9336_s3 + $0x2] sm:$0x3]  ;;  %v9679_v35 = vld [vmem:[#allocation23_spill] sm:$0xff] }
 0x22f   : > { %1602 = vperm.xlu1 %5103, %v6375_v37   ;;  %1712 = vperm.xlu0 %5106, %v6801_v38   ;;  %9641 = vst [vmem:[#allocation63_spill] sm:$0xff] %v6865_v3  ;;  %v6879_v8 = vmul.f32 -0.5, %v3466_v1  ;;  %v6891_v55 = vmul.f32 0.6931472, %v5233_v62  ;;  %v3447_v1 = vmul.f32 %v6768_v34, %v3399_v57  ;;  %9647 = vst [vmem:[#allocation69_spill] sm:$0xff] %v6900_v22  ;;  %v9678_v3 = vld [vmem:[#allocation24_spill] sm:$0xff] }
 0x230   : > { %9643 = vst [vmem:[#allocation65_spill] sm:$0xff] %v6877_v0  ;;  %9645 = vst [vmem:[#allocation67_spill] sm:$0xff] %v6882_v52  ;;  %v3480_v24 = vmul.f32 %v3448_v18, %v3448_v18  ;;  %v3402_v34 = vsub.f32 %v6882_v52, %v6302_v11  ;;  %v3449_v46 = vmul.f32 %v6796_v12, %v3401_v14  ;;  %v3717_v53 = vmul.f32 -0.5, %v9678_v3 }
 0x231   : > { %9644 = vst [vmem:[#allocation66_spill] sm:$0xff] %v6879_v8  ;;  %9646 = vst [vmem:[#allocation68_spill] sm:$0xff] %v6891_v55  ;;  %v3479_v62 = vmul.f32 %v3447_v1, %v3447_v1  ;;  %v6919_v49 = vadd.f32 %v1545_v31, %v6372_v58  ;;  %v6954_v31 = vpop.eup %5234 }
 0x232   : > { %v6913_v57 = vmul.f32 -0.5, %v3480_v24  ;;  %v3450_v40 = vmul.f32 %v6813_v28, %v3402_v34  ;;  %v3481_v43 = vmul.f32 %v3449_v46, %v3449_v46  ;;  %v4827_v28 = vld [vmem:[%s9335_s2 + $0x4] sm:$0xf]  ;;  %v9653_v34 = vld [vmem:[#allocation13_spill] sm:$0xff]  ;;  %9658 = vst [vmem:[#allocation75_spill] sm:$0xff] %v6954_v31 }
 0x233   : > { %5104 = vset.pattern.permute.xlu1 %v9602_v39  ;;  %1617 = vperm.xlu0 %5106, %v6450_v48   ;;  %v6911_v5 = vmul.f32 -0.5, %v3479_v62  ;;  %9650 = vst [vmem:[#allocation72_spill] sm:$0xff] %v6919_v49  ;;  %v1744_v46 = vrot.slane %v4827_v28, %v9653_v34  ;;  %v6983_v55 = vrot.slane %v4828_v13, %v9653_v34 }
 0x234   : > { %1840 = vperm.xlu1 %5104, %v6375_v37   ;;  %9649 = vst [vmem:[#allocation71_spill] sm:$0xff] %v6913_v57  ;;  %v3482_v24 = vmul.f32 %v3450_v40, %v3450_v40  ;;  %v6933_v14 = vmul.f32 -0.5, %v3481_v43  ;;  %v9654_v40 = vld [vmem:[#allocation12_spill] sm:$0xff]  ;;  %v1954_v57 = vrot.slane %v4827_v28, %v9656_v9 }
 0x235   : > { %9648 = vst [vmem:[#allocation70_spill] sm:$0xff] %v6911_v5  ;;  %v9655_v12 = vsub.s32 2, %v9654_v40  ;;  %v9657_v43 = vsub.s32 3, %v9654_v40 }
 0x236   : > { %9651 = vst [vmem:[#allocation73_spill] sm:$0xff] %v6933_v14  ;;  %v6938_v62 = vmul.f32 -0.5, %v3482_v24 }
 0x237   : > { %5111 = vset.pattern.permute.xlu0 %v9602_v39  ;;  %v1748_v11 = vrot.slane %v4827_v28, %v9655_v12  ;;  %v1958_v5 = vrot.slane %v4827_v28, %v9657_v43  ;;  %v6957_v12 = vrot.slane %v1744_v46, %v9653_v34  ;;  %v6963_v28 = vrot.slane %v1954_v57, %v9656_v9 }
 0x238   : > { %1920 = vperm.xlu1 %5104, %v6759_v47   ;;  %1852 = vperm.xlu0 %5111, %v6450_v48   ;;  %9652 = vst [vmem:[#allocation74_spill] sm:$0xff] %v6938_v62  ;;  %v3374_v46 = vsub.f32 %v6272_v2, %v6116_v50 }
 0x239   : > { %v6960_v14 = vrot.slane %v1748_v11, %v9653_v34  ;;  %v6966_v43 = vrot.slane %v1958_v5, %v9656_v9  ;;  %v3387_v11 = vsub.f32 %v6611_v42, %v6333_v10 }
 0x23b   : > { %v3434_v50 = vmul.f32 %v6954_v31, %v3387_v11 }
 0x23c   : > { %5105 = vset.pattern.permute.xlu1 %v9599_v59  ;;  %1936 = vperm.xlu0 %5111, %v6859_v44  }
 0x23d   : > { %1707 = vperm.xlu1 %5105, %v6810_v63   ;;  %v3467_v34 = vmul.f32 %v3434_v50, %v3434_v50 }
 0x23f   : > { %v7002_v31 = vmul.f32 -0.5, %v3467_v34 }
 0x240   : > { %1940 = vperm.xlu0 %5111, %v6882_v52  }
 0x241   : > { %5107 = vset.pattern.permute.xlu1 %v9602_v39  ;;  %9660 = vst [vmem:[#allocation77_spill] sm:$0xff] %v7002_v31  ;;  %v9667_v31 = vld [vmem:[#allocation18_spill] sm:$0xff] }
 0x242   : > { %1924 = vperm.xlu1 %5107, %v6810_v63   ;;  %v3408_v63 = vmul.f32 %v6614_v17, %v3374_v46 }
 0x244   : > { %1944 = vperm.xlu0 %5111, %v6900_v22   ;;  %v6931_v18 = vpop.permute.xlu0 %1888  ;;  %v3454_v11 = vmul.f32 %v3408_v63, %v3408_v63 }
 0x245   : > { %v6929_v1 = vpop.permute.xlu1 %1662 }
 0x246   : > { %5108 = vset.pattern.permute.xlu1 %v9599_v59 }
 0x247   : > { %1612 = vperm.xlu1 %5108, %v6429_v51  }
 0x248   : > { %1948 = vperm.xlu0 %5111, %v6919_v49  }
 0x249   : > { %v1583_v8 = vpop.permute.xlu1 %1582 }
 0x24a   : > { %v1759_v40 = vmul.f32 %v6957_v12, %v1583_v8  ;;  %v1760_v57 = vmul.f32 %v6960_v14, %v1583_v8  ;;  %v6991_v8 = vrot.slane %v4828_v13, %v9656_v9 }
 0x24b   : > { %5109 = vset.pattern.permute.xlu1 %v9602_v39 }
 0x24c   : > { %1848 = vperm.xlu1 %5109, %v6429_v51  }
 0x24d   : > { %v6952_v54 = vpop.permute.xlu0 %1892 }
 0x24f   : > { %v1825_v24 = vpop.permute.xlu1 %1824 }
 0x250   : > { %1928 = vperm.xlu1 %5109, %v6801_v38   ;;  %v1969_v5 = vmul.f32 %v6963_v28, %v1825_v24  ;;  %v1970_v62 = vmul.f32 %v6966_v43, %v1825_v24  ;;  %v6980_v38 = vpop.eup %5236  ;;  %v3388_v24 = vsub.f32 %v6644_v26, %v6372_v58  ;;  %v3712_v58 = vmul.f32 -0.5, %v6337_v21 }
 0x251   : > { %9659 = vst [vmem:[#allocation76_spill] sm:$0xff] %v6980_v38  ;;  %v6987_v23 = vpop.permute.xlu0 %1828 }
 0x252   : > { %v2033_v42 = vadd.f32 %v1969_v5, %v1759_v40  ;;  %v2034_v10 = vadd.f32 %v1970_v62, %v1760_v57  ;;  %v3436_v40 = vmul.f32 %v6980_v38, %v3388_v24  ;;  %v5239_v62 = vpop.eup %5238  ;;  %v3486_v24 = vmul.f32 -0.5, %v3454_v11  ;;  %v9668_v38 = vld [vmem:[#allocation28_spill] sm:$0xff] }
 0x253   : > { %v5241_v13 = vpop.eup %5240  ;;  %v3376_v11 = vsub.f32 %v6337_v21, %v6136_v19 }
 0x254   : > { %5110 = vset.pattern.permute.xlu1 %v9599_v59  ;;  %v2110_v0 = vadd.f32 %v6983_v55, %v2033_v42  ;;  %v2111_v46 = vadd.f32 %v6991_v8, %v2034_v10  ;;  %v7009_v42 = vmul.f32 0.6931472, %v5239_v62  ;;  %v3468_v10 = vmul.f32 %v3436_v40, %v3436_v40 }
 0x255   : > { %1717 = vperm.xlu1 %5110, %v6854_v61   ;;  %v7004_v26 = vpop.permute.xlu0 %1896  ;;  %v7011_v63 = vmul.f32 0.6931472, %v5241_v13  ;;  %v3550_v40 = vsub.f32 %v3486_v24, %v6649_v20  ;;  %v3412_v13 = vmul.f32 %v6676_v7, %v3376_v11  ;;  %v3711_v24 = vmul.f32 -0.5, %v9667_v31 }
 0x256   : > { %v6997_v17 = vpop.permute.xlu1 %1667  ;;  %v2174_v57 = vmax.f32 %v2110_v0, 0.0  ;;  %v2175_v5 = vmax.f32 %v2111_v46, 0.0  ;;  %9661 = vst [vmem:[#allocation78_spill] sm:$0xff] %v7009_v42  ;;  %v9666_v46 = vld [vmem:[#allocation17_spill] sm:$0xff]  ;;  %v9669_v7 = vsub.f32 %v9668_v38, %v6540_v16  ;;  %v3713_v38 = vmul.f32 -0.5, %v6375_v37 }
 0x257   : > { %9662 = vst [vmem:[#allocation79_spill] sm:$0xff] %v7011_v63  ;;  %v3456_v42 = vmul.f32 %v3412_v13, %v3412_v13 }
 0x258   : > { %2380 = vmatprep.mubr.f32.mxu0 %v2175_v5  ;;  %v4878_v11 = vadd.f32 -0.9189385, %v9669_v7 }
 0x259   : > { %5112 = vset.pattern.permute.xlu1 %v9602_v39  ;;  %2381 = vmatmul.mubr.f32.vlgmr.msra.gmra.mxu0 %v2174_v57  ;;  %v7015_v39 = vmul.f32 -0.5, %v3468_v10  ;;  %v9665_v57 = vld [vmem:[#allocation16_spill] sm:$0xff] }
 0x25a   : > { %v7006_v50 = vpop.permute.xlu1 %1672  ;;  %1932 = vperm.xlu1 %5112, %v6854_v61   ;;  %v3709_v5 = vmul.f32 -0.5, %v9665_v57 }
 0x25b   : > { %9663 = vst [vmem:[#allocation80_spill] sm:$0xff] %v7015_v39  ;;  %v7024_v62 = vpop.permute.xlu0 %1900  ;;  %v3725_v39 = vmul.f32 -0.5, %v9666_v46 }
 0x25c   : > { %9664 = vst [vmem:[#allocation81_spill] sm:$0xff] %v7024_v62  ;;  %v3741_v63 = vmul.f32 %v3709_v5, %v9665_v57  ;;  %v3378_v57 = vsub.f32 %v6405_v45, %v6156_v4  ;;  %v3743_v5 = vmul.f32 %v3711_v24, %v9667_v31  ;;  %v3744_v31 = vmul.f32 %v3712_v58, %v6337_v21 }
 0x25e   : > { %v7017_v34 = vpop.permute.xlu1 %1592  ;;  %5113 = vset.pattern.permute.xlu1 %v9599_v59  ;;  %v4863_v59 = vadd.f32 -0.9189385, %v3550_v40  ;;  %v3377_v40 = vsub.f32 %v6375_v37, %v6146_v30  ;;  %v3488_v30 = vmul.f32 -0.5, %v3456_v42  ;;  %v4894_v4 = vadd.f32 -0.9189385, %v3741_v63 }
 0x25f   : > { %1722 = vperm.xlu1 %5113, %v6859_v44   ;;  %v3745_v42 = vmul.f32 %v3713_v38, %v6375_v37  ;;  %v3710_v37 = vmul.f32 -0.5, %v6272_v2 }
 0x260   : > { %v3616_v19 = vsel %vm1432_vm0, %v4863_v59, 0.0  ;;  %v3414_v13 = vmul.f32 %v6693_v27, %v3377_v40  ;;  %v3379_v59 = vsub.f32 %v6429_v51, %v6166_v60  ;;  %v4896_v60 = vadd.f32 -0.9189385, %v3743_v5 }
 0x261   : > { %v3805_v21 = vsel %vm1432_vm0, %v4894_v4, 0.0 }
 0x262   : > { %v3418_v27 = vmul.f32 %v6740_v6, %v3379_v59  ;;  %v3457_v40 = vmul.f32 %v3414_v13, %v3414_v13  ;;  %v4897_v6 = vadd.f32 -0.9189385, %v3744_v31  ;;  %v3715_v13 = vmul.f32 -0.5, %v6429_v51 }
 0x263   : > { %v7030_v10 = vpop.permute.xlu1 %1832  ;;  %1727 = vperm.xlu1 %5113, %v6882_v52   ;;  %v3757_v52 = vmul.f32 %v3725_v39, %v9666_v46  ;;  %v3661_v39 = vsel %vm1432_vm0, %v4878_v11, 0.0  ;;  %v3811_v38 = vsel %vm1432_vm0, %v4896_v60, 0.0  ;;  %v9677_v60 = vld [vmem:[#allocation22_spill] sm:$0xff] }
 0x264   : > { %v7033_v0 = vpop.permute.xlu0 %1856  ;;  %v3489_v59 = vmul.f32 -0.5, %v3457_v40  ;;  %v3727_v40 = vmul.f32 -0.5, %v9677_v60  ;;  %v3747_v36 = vmul.f32 %v3715_v13, %v6429_v51 }
 0x265   : > { %v4910_v46 = vadd.f32 -0.9189385, %v3757_v52  ;;  %v3459_v52 = vmul.f32 %v3418_v27, %v3418_v27 }
 0x267   : > { %1732 = vperm.xlu1 %5113, %v6900_v22   ;;  %3617 = vadd.xlane.f32.xlu0 %v3616_v19  ;;  %v3416_v19 = vmul.f32 %v6709_v33, %v3378_v57  ;;  %v3714_v22 = vmul.f32 -0.5, %v6405_v45  ;;  %v9672_v57 = vld [vmem:[#allocation31_spill] sm:$0xff]  ;;  %v3853_v5 = vsel %vm1432_vm0, %v4910_v46, 0.0  ;;  %v7086_v46 = vsel %vm1432_vm0, %v4897_v6, 0.0 }
 0x268   : > { %v7046_v9 = vpop.permute.xlu1 %1677  ;;  %v9673_v11 = vsub.f32 %v9672_v57, %v6568_v56  ;;  %v9675_v57 = vld [vmem:[#allocation19_spill] sm:$0xff] }
 0x269   : > { %9670 = vst [vmem:[#allocation16_spill] sm:$0xff] %v7046_v9  ;;  %v3458_v61 = vmul.f32 %v3416_v19, %v3416_v19  ;;  %v3746_v58 = vmul.f32 %v3714_v22, %v6405_v45  ;;  %v9680_v6 = vld [vmem:[#allocation15_spill] sm:$0xff] }
 0x26a   : > { %v7056_v7 = vpop.permute.xlu0 %1860  ;;  %v4864_v44 = vadd.f32 -0.9189385, %v9673_v11  ;;  %v3491_v11 = vmul.f32 -0.5, %v3459_v52  ;;  %v3380_v52 = vsub.f32 %v6450_v48, %v9680_v6  ;;  %v3759_v6 = vmul.f32 %v3727_v40, %v9677_v60  ;;  %v9690_v60 = vld [vmem:[#allocation27_spill] sm:$0xff] }
 0x26b   : > { %1737 = vperm.xlu1 %5113, %v6919_v49   ;;  %3662 = vadd.xlane.f32.xlu0 %v3661_v39  ;;  %v9674_v49 = vld [vmem:[#allocation40_spill] sm:$0xff]  ;;  %v4898_v39 = vadd.f32 -0.9189385, %v3745_v42  ;;  %v3490_v31 = vmul.f32 -0.5, %v3458_v61  ;;  %v4899_v27 = vadd.f32 -0.9189385, %v3746_v58  ;;  %v3742_v42 = vmul.f32 %v3710_v37, %v6272_v2 }
 0x26c   : > { %v3552_v63 = vsub.f32 %v3488_v30, %v9674_v49  ;;  %v3726_v30 = vmul.f32 -0.5, %v9675_v57  ;;  %v3619_v22 = vsel %vm1432_vm0, %v4864_v44, 0.0  ;;  %v3728_v44 = vmul.f32 -0.5, %v9679_v35  ;;  %v9682_v37 = vld [vmem:[#allocation37_spill] sm:$0xff] }
 0x26d   : > { %v7064_v24 = vpop.permute.xlu1 %1904  ;;  %v3553_v61 = vsub.f32 %v3489_v59, %v6729_v25  ;;  %v3554_v2 = vsub.f32 %v3490_v31, %v9681_v15  ;;  %v9683_v51 = vsub.f32 %v9682_v37, %v6540_v16  ;;  %v7107_v47 = vsel %vm1432_vm0, %v4899_v27, 0.0 }
 0x26e   : > { %9671 = vst [vmem:[#allocation17_spill] sm:$0xff] %v7064_v24  ;;  %v7067_v33 = vpop.permute.xlu0 %1864  ;;  %v4865_v4 = vadd.f32 -0.9189385, %v3552_v63  ;;  %v7096_v63 = vsel %vm1432_vm0, %v4898_v39, 0.0  ;;  %v3758_v58 = vmul.f32 %v3726_v30, %v9675_v57  ;;  %v9685_v39 = vld [vmem:[#allocation51_spill] sm:$0xff]  ;;  %v9686_v24 = vld [vmem:[#allocation50_spill] sm:$0xff]  ;;  %v3749_v16 = vmul.f32 %v3717_v53, %v9678_v3 }
 0x26f   : > { %3806 = vadd.xlane.f32.xlu0 %v3805_v21  ;;  %v3716_v21 = vmul.f32 -0.5, %v6450_v48  ;;  %v4862_v13 = vadd.f32 -0.9189385, %v9683_v51  ;;  %v3420_v57 = vmul.f32 %v9686_v24, %v3380_v52  ;;  %v4895_v31 = vadd.f32 -0.9189385, %v3742_v42  ;;  %v9687_v51 = vld [vmem:[#allocation38_spill] sm:$0xff] }
 0x270   : > { %v4900_v15 = vadd.f32 -0.9189385, %v3747_v36  ;;  %v3760_v27 = vmul.f32 %v3728_v44, %v9679_v35  ;;  %v4866_v37 = vadd.f32 -0.9189385, %v3553_v61  ;;  %v4867_v24 = vadd.f32 -0.9189385, %v3554_v2 }
 0x271   : > { %v3748_v30 = vmul.f32 %v3716_v21, %v6450_v48  ;;  %v7123_v48 = vsel %vm1432_vm0, %v4862_v13, 0.0  ;;  %v9689_v21 = vld [vmem:[#allocation25_spill] sm:$0xff]  ;;  %v3729_v40 = vmul.f32 -0.5, %v9690_v60  ;;  %v3460_v53 = vmul.f32 %v3420_v57, %v3420_v57 }
 0x272   : > { %v7080_v19 = vpop.permute.xlu1 %1687  ;;  %v7082_v45 = vpop.permute.xlu0 %1868  ;;  %v4912_v35 = vadd.f32 -0.9189385, %v3759_v6  ;;  %v7130_v44 = vsel %vm1432_vm0, %v4895_v31, 0.0  ;;  %v4913_v61 = vadd.f32 -0.9189385, %v3760_v27  ;;  %v3625_v2 = vsel %vm1432_vm0, %v4866_v37, 0.0 }
 0x273   : > { %9676 = vst [vmem:[#allocation18_spill] sm:$0xff] %v7080_v19  ;;  %3854 = vadd.xlane.f32.xlu0 %v3853_v5  ;;  %v3622_v5 = vsel %vm1432_vm0, %v4865_v4, 0.0  ;;  %v3555_v19 = vsub.f32 %v3491_v11, %v9685_v39  ;;  %v4911_v39 = vadd.f32 -0.9189385, %v3758_v58  ;;  %v4901_v3 = vadd.f32 -0.9189385, %v3748_v30 }
 0x274   : > { %v9692_v58 = vld [vmem:[#allocation26_spill] sm:$0xff]  ;;  %v9695_v31 = vld [vmem:[#allocation41_spill] sm:$0xff] }
 0x275   : > { %v4868_v36 = vadd.f32 -0.9189385, %v3555_v19  ;;  %v3719_v52 = vmul.f32 -0.5, %v9692_v58  ;;  %v7141_v19 = vsel %vm1432_vm0, %v4911_v39, 0.0  ;;  %v7159_v39 = vsel %vm1432_vm0, %v4901_v3, 0.0 }
 0x276   : > { %v7115_v4 = vpop.permute.xlu0 %1872  ;;  %9697 = vst [vmem:[#allocation40_spill] sm:$0xff] %v7159_v39 }
 0x277   : > { %v7109_v59 = vpop.permute.xlu1 %1908  ;;  %3620 = vadd.xlane.f32.xlu0 %v3619_v22  ;;  %v3718_v22 = vmul.f32 -0.5, %v9689_v21 }
 0x278   : > { %9684 = vst [vmem:[#allocation28_spill] sm:$0xff] %v7109_v59  ;;  %v9688_v59 = vsub.f32 %v9687_v51, %v6649_v20  ;;  %v4902_v20 = vadd.f32 -0.9189385, %v3749_v16  ;;  %v9696_v16 = vsub.f32 %v9695_v31, %v9674_v49  ;;  %v3761_v51 = vmul.f32 %v3729_v40, %v9690_v60 }
 0x279   : > { %v3750_v37 = vmul.f32 %v3718_v22, %v9689_v21  ;;  %v7165_v49 = vsel %vm1432_vm0, %v4868_v36, 0.0  ;;  %v7171_v22 = vsel %vm1432_vm0, %v4913_v61, 0.0  ;;  %v1985_v60 = vmul.f32 %v6963_v28, %v7033_v0 }
 0x27a   : > { %v4879_v11 = vadd.f32 -0.9189385, %v9688_v59  ;;  %v7138_v59 = vsel %vm1432_vm0, %v4900_v15, 0.0  ;;  %v4881_v27 = vadd.f32 -0.9189385, %v9696_v16  ;;  %v7154_v15 = vsel %vm1432_vm0, %v4867_v24, 0.0 }
 0x27b   : > { %v7127_v42 = vpop.permute.xlu1 %1912  ;;  %3812 = vadd.xlane.f32.xlu0 %v3811_v38  ;;  %v9693_v38 = vld [vmem:[#allocation39_spill] sm:$0xff]  ;;  %v7168_v21 = vsel %vm1432_vm0, %v4902_v20, 0.0  ;;  %9700 = vst [vmem:[#allocation24_spill] sm:$0xff] %v7171_v22  ;;  %v3751_v24 = vmul.f32 %v3719_v52, %v9692_v58  ;;  %v1986_v40 = vmul.f32 %v6966_v43, %v7033_v0  ;;  %v4903_v20 = vadd.f32 -0.9189385, %v3750_v37  ;;  %v9705_v16 = vld [vmem:[#allocation32_spill] sm:$0xff] }
 0x27c   : > { %9691 = vst [vmem:[#allocation31_spill] sm:$0xff] %v7127_v42  ;;  %v7135_v13 = vsel %vm1432_vm0, %v4879_v11, 0.0  ;;  %v9694_v30 = vsub.f32 %v9693_v38, %v6568_v56  ;;  %v7156_v11 = vmul.f32 -0.5, %v3460_v53  ;;  %v7162_v42 = vsel %vm1432_vm0, %v4912_v35, 0.0  ;;  %9699 = vst [vmem:[#allocation22_spill] sm:$0xff] %v7168_v21 }
 0x27d   : > { %v7143_v57 = vpop.permute.xlu0 %1876  ;;  %9698 = vst [vmem:[#allocation19_spill] sm:$0xff] %v7162_v42  ;;  %v7186_v35 = vsel %vm1432_vm0, %v4881_v27, 0.0  ;;  %v7188_v61 = vadd.f32 -0.9189385, %v3761_v51  ;;  %v1792_v58 = vmul.f32 %v6960_v14, %v6929_v1  ;;  %v2002_v0 = vmul.f32 %v6966_v43, %v6931_v18 }
 0x27e   : > { %v4880_v6 = vadd.f32 -0.9189385, %v9694_v30  ;;  %9701 = vst [vmem:[#allocation23_spill] sm:$0xff] %v7186_v35  ;;  %v1987_v30 = vmul.f32 %v6963_v28, %v7056_v7  ;;  %v7201_v27 = vadd.f32 -0.9189385, %v3751_v24  ;;  %v3721_v24 = vmul.f32 -0.5, %v9705_v16 }
 0x27f   : > { %3623 = vadd.xlane.f32.xlu0 %v3622_v5  ;;  %v2001_v21 = vmul.f32 %v6963_v28, %v6931_v18 }
 0x280   : > { %v1623_v56 = vpop.permute.xlu1 %1622  ;;  %v7183_v3 = vsel %vm1432_vm0, %v4880_v6, 0.0  ;;  %v1988_v6 = vmul.f32 %v6966_v43, %v7056_v7  ;;  %9702 = vst [vmem:[#allocation15_spill] sm:$0xff] %v7201_v27  ;;  %v2066_v27 = vadd.f32 %v2002_v0, %v1792_v58  ;;  %v7227_v0 = vsel %vm1432_vm0, %v4903_v20, 0.0 }
 0x281   : > { %v1775_v5 = vmul.f32 %v6957_v12, %v1623_v56  ;;  %v1776_v53 = vmul.f32 %v6960_v14, %v1623_v56  ;;  %v7180_v36 = vpop.permute.xlu0 %1880  ;;  %v1992_v20 = vmul.f32 %v6966_v43, %v7082_v45 }
 0x283   : > { %v2049_v52 = vadd.f32 %v1985_v60, %v1775_v5  ;;  %v2050_v38 = vadd.f32 %v1986_v40, %v1776_v53  ;;  %3815 = vadd.xlane.f32.xlu0 %v7086_v46  ;;  %v1791_v40 = vmul.f32 %v6957_v12, %v6929_v1  ;;  %v9703_v46 = vld [vmem:[#allocation29_spill] sm:$0xff]  ;;  %v9704_v53 = vld [vmem:[#allocation30_spill] sm:$0xff]  ;;  %v1990_v1 = vmul.f32 %v6966_v43, %v7067_v33 }
 0x284   : > { %v1628_v31 = vpop.permute.xlu1 %1627  ;;  %v3720_v5 = vmul.f32 -0.5, %v9703_v46  ;;  %v3730_v22 = vmul.f32 -0.5, %v9704_v53 }
 0x285   : > { %v1777_v37 = vmul.f32 %v6957_v12, %v1628_v31  ;;  %v1778_v51 = vmul.f32 %v6960_v14, %v1628_v31  ;;  %v2127_v56 = vadd.f32 %v6991_v8, %v2050_v38  ;;  %v2126_v60 = vadd.f32 %v6983_v55, %v2049_v52  ;;  %v7209_v7 = vpop.permute.xlu0 %1836 }
 0x286   : > { %v1989_v52 = vmul.f32 %v6963_v28, %v7067_v33  ;;  %v7230_v33 = vmul.f32 %v3720_v5, %v9703_v46  ;;  %v7276_v46 = vmul.f32 %v6957_v12, %v6997_v17 }
 0x287   : > { %v2051_v31 = vadd.f32 %v1987_v30, %v1777_v37  ;;  %v2052_v35 = vadd.f32 %v1988_v6, %v1778_v51  ;;  %3626 = vadd.xlane.f32.xlu0 %v3625_v2  ;;  %v2191_v32 = vmax.f32 %v2127_v56, 0.0  ;;  %v2190_v62 = vmax.f32 %v2126_v60, 0.0 }
 0x288   : > { %v1633_v38 = vpop.permute.xlu1 %1632  ;;  %v7233_v2 = vmul.f32 %v3730_v22, %v9704_v53  ;;  %v7236_v30 = vmul.f32 %v3721_v24, %v9705_v16  ;;  %v7238_v6 = vadd.f32 %v2001_v21, %v1791_v40  ;;  %v7241_v51 = vadd.f32 %v6991_v8, %v2066_v27 }
 0x289   : > { %v1779_v42 = vmul.f32 %v6957_v12, %v1633_v38  ;;  %v1780_v9 = vmul.f32 %v6960_v14, %v1633_v38  ;;  %v2129_v39 = vadd.f32 %v6991_v8, %v2052_v35  ;;  %v2128_v18 = vadd.f32 %v6983_v55, %v2051_v31  ;;  %v7224_v58 = vpop.permute.xlu0 %1884  ;;  %2428 = vmatprep.mubr.f32.mxu1 %v2191_v32 }
 0x28a   : > { %2429 = vmatmul.mubr.f32.vlgmr.msra.gmra.mxu1 %v2190_v62  ;;  %v1991_v32 = vmul.f32 %v6963_v28, %v7082_v45  ;;  %v7254_v27 = vmul.f32 %v6963_v28, %v6952_v54  ;;  %v7258_v45 = vmul.f32 %v6966_v43, %v6952_v54  ;;  %v7272_v40 = vmul.f32 %v6966_v43, %v7004_v26 }
 0x28b   : > { %v2053_v35 = vadd.f32 %v1989_v52, %v1779_v42  ;;  %v2054_v37 = vadd.f32 %v1990_v1, %v1780_v9  ;;  %3818 = vadd.xlane.f32.xlu0 %v7096_v63  ;;  %v2193_v56 = vmax.f32 %v2129_v39, 0.0  ;;  %v2192_v16 = vmax.f32 %v2128_v18, 0.0 }
 0x28c   : > { %v1638_v22 = vpop.permute.xlu1 %1637  ;;  %v7262_v63 = vmul.f32 %v6963_v28, %v6987_v23  ;;  %v7266_v39 = vmul.f32 %v6966_v43, %v6987_v23  ;;  %v1993_v53 = vmul.f32 %v6963_v28, %v7115_v4  ;;  %v1994_v23 = vmul.f32 %v6966_v43, %v7115_v4 }
 0x28d   : > { %v1781_v21 = vmul.f32 %v6957_v12, %v1638_v22  ;;  %v1782_v42 = vmul.f32 %v6960_v14, %v1638_v22  ;;  %v2131_v9 = vadd.f32 %v6991_v8, %v2054_v37  ;;  %v2130_v62 = vadd.f32 %v6983_v55, %v2053_v35  ;;  %v7268_v60 = vpop.permute.xlu0 %1844  ;;  %2434 = vmatprep.mubr.f32.mxu1 %v2193_v56 }
 0x28e   : > { %2435 = vmatmul.mubr.f32.gmra.mxu1 %v2192_v16  ;;  %v7290_v37 = vmul.f32 %v6960_v14, %v6997_v17  ;;  %v1763_v4 = vmul.f32 %v6957_v12, %v7017_v34  ;;  %v1764_v17 = vmul.f32 %v6960_v14, %v7017_v34 }
 0x28f   : > { %v2055_v54 = vadd.f32 %v1991_v32, %v1781_v21  ;;  %v2056_v5 = vadd.f32 %v1992_v20, %v1782_v42  ;;  %3629 = vadd.xlane.f32.xlu0 %v7154_v15  ;;  %3614 = vadd.xlane.f32.xlu1 %v7123_v48  ;;  %v2195_v31 = vmax.f32 %v2131_v9, 0.0  ;;  %v2194_v52 = vmax.f32 %v2130_v62, 0.0 }
 0x290   : > { %v1643_v24 = vpop.permute.xlu1 %1642  ;;  %v1973_v48 = vmul.f32 %v6963_v28, %v7030_v10  ;;  %v1974_v15 = vmul.f32 %v6966_v43, %v7030_v10  ;;  %v1995_v21 = vmul.f32 %v6963_v28, %v7143_v57  ;;  %v1996_v42 = vmul.f32 %v6966_v43, %v7143_v57 }
 0x291   : > { %v1783_v1 = vmul.f32 %v6957_v12, %v1643_v24  ;;  %v1784_v38 = vmul.f32 %v6960_v14, %v1643_v24  ;;  %v2133_v18 = vadd.f32 %v6991_v8, %v2056_v5  ;;  %v2132_v35 = vadd.f32 %v6983_v55, %v2055_v54  ;;  %2440 = vmatprep.mubr.f32.mxu1 %v2195_v31 }
 0x292   : > { %v7298_v22 = vpop.permute.xlu0 %1682  ;;  %2441 = vmatmul.mubr.f32.gmra.mxu1 %v2194_v52  ;;  %v7310_v9 = vsel %vm1432_vm0, %v7188_v61, 0.0  ;;  %v7318_v57 = vmul.f32 %v6960_v14, %v7006_v50 }
 0x293   : > { %v2057_v32 = vadd.f32 %v1993_v53, %v1783_v1  ;;  %v2058_v20 = vadd.f32 %v1994_v23, %v1784_v38  ;;  %v2197_v56 = vmax.f32 %v2133_v18, 0.0  ;;  %v2196_v16 = vmax.f32 %v2132_v35, 0.0  ;;  %3821 = vadd.xlane.f32.xlu0 %v7107_v47  ;;  %3665 = vadd.xlane.f32.xlu1 %v7135_v13 }
 0x294   : > { %v1648_v10 = vpop.permute.xlu1 %1647  ;;  %v2037_v47 = vadd.f32 %v1973_v48, %v1763_v4  ;;  %v2038_v13 = vadd.f32 %v1974_v15, %v1764_v17  ;;  %v1997_v53 = vmul.f32 %v6963_v28, %v7180_v36  ;;  %v1998_v1 = vmul.f32 %v6966_v43, %v7180_v36 }
 0x295   : > { %v1785_v62 = vmul.f32 %v6957_v12, %v1648_v10  ;;  %v1786_v54 = vmul.f32 %v6960_v14, %v1648_v10  ;;  %2446 = vmatprep.mubr.f32.mxu1 %v2197_v56  ;;  %v2135_v34 = vadd.f32 %v6991_v8, %v2058_v20  ;;  %v2134_v5 = vadd.f32 %v6983_v55, %v2057_v32 }
 0x296   : > { %v1588_v24 = vpop.permute.xlu0 %1587  ;;  %2447 = vmatmul.mubr.f32.gmra.mxu1 %v2196_v16  ;;  %v9706_v4 = vsub.f32 %v7156_v11, %v6815_v29  ;;  %v2114_v16 = vadd.f32 %v6983_v55, %v2037_v47 }
 0x297   : > { %v2059_v61 = vadd.f32 %v1995_v21, %v1785_v62  ;;  %v2060_v23 = vadd.f32 %v1996_v42, %v1786_v54  ;;  %v2199_v31 = vmax.f32 %v2135_v34, 0.0  ;;  %v2198_v52 = vmax.f32 %v2134_v5, 0.0  ;;  %3632 = vadd.xlane.f32.xlu0 %v7165_v49  ;;  %3809 = vadd.xlane.f32.xlu1 %v7130_v44 }
 0x298   : > { %v1761_v38 = vmul.f32 %v6957_v12, %v1588_v24  ;;  %v1762_v18 = vmul.f32 %v6960_v14, %v1588_v24  ;;  %v1653_v35 = vpop.permute.xlu1 %1652  ;;  %v4869_v48 = vadd.f32 -0.9189385, %v9706_v4  ;;  %v2115_v44 = vadd.f32 %v6991_v8, %v2038_v13 }
 0x299   : > { %v1787_v15 = vmul.f32 %v6957_v12, %v1653_v35  ;;  %v1788_v32 = vmul.f32 %v6960_v14, %v1653_v35  ;;  %2452 = vmatprep.mubr.f32.mxu1 %v2199_v31  ;;  %v2137_v36 = vadd.f32 %v6991_v8, %v2060_v23  ;;  %v2136_v20 = vadd.f32 %v6983_v55, %v2059_v61 }
 0x29a   : > { %v2035_v56 = vadd.f32 %v7262_v63, %v1761_v38  ;;  %v2036_v49 = vadd.f32 %v7266_v39, %v1762_v18  ;;  %v7339_v21 = vpop.permute.xlu0 %1692  ;;  %2453 = vmatmul.mubr.f32.gmra.mxu1 %v2198_v52  ;;  %v1999_v62 = vmul.f32 %v6963_v28, %v7224_v58  ;;  %v2000_v54 = vmul.f32 %v6966_v43, %v7224_v58 }
 0x29b   : > { %v2061_v17 = vadd.f32 %v1997_v53, %v1787_v15  ;;  %v2062_v11 = vadd.f32 %v1998_v1, %v1788_v32  ;;  %v2201_v42 = vmax.f32 %v2137_v36, 0.0  ;;  %v2200_v10 = vmax.f32 %v2136_v20, 0.0  ;;  %3824 = vadd.xlane.f32.xlu0 %v7138_v59  ;;  %3857 = vadd.xlane.f32.xlu1 %v7141_v19  ;;  %v9707_v36 = vld [vmem:[#allocation43_spill] sm:$0xff] }
 0x29c   : > { %v1658_v63 = vpop.permute.xlu1 %1657  ;;  %v3634_v39 = vsel %vm1432_vm0, %v4869_v48, 0.0  ;;  %v2113_v34 = vadd.f32 %v6991_v8, %v2036_v49  ;;  %v2112_v13 = vadd.f32 %v6983_v55, %v2035_v56  ;;  %v1975_v58 = vmul.f32 %v6963_v28, %v7209_v7 }
 0x29d   : > { %v1789_v5 = vmul.f32 %v6957_v12, %v1658_v63  ;;  %v1790_v47 = vmul.f32 %v6960_v14, %v1658_v63  ;;  %2458 = vmatprep.mubr.f32.mxu1 %v2201_v42  ;;  %v2139_v53 = vadd.f32 %v6991_v8, %v2062_v11  ;;  %v2179_v61 = vmax.f32 %v2115_v44, 0.0 }
 0x29e   : > { %v2177_v59 = vmax.f32 %v2113_v34, 0.0  ;;  %v2138_v19 = vadd.f32 %v6983_v55, %v2061_v17  ;;  %v1598_v31 = vpop.permute.xlu0 %1597  ;;  %2459 = vmatmul.mubr.f32.gmra.mxu1 %v2200_v10  ;;  %v2176_v52 = vmax.f32 %v2112_v13, 0.0  ;;  %v1976_v38 = vmul.f32 %v6966_v43, %v7209_v7  ;;  %v9709_v17 = vld [vmem:[#allocation42_spill] sm:$0xff] }
 0x29f   : > { %v2063_v23 = vadd.f32 %v1999_v62, %v1789_v5  ;;  %v2064_v24 = vadd.f32 %v2000_v54, %v1790_v47  ;;  %v2203_v1 = vmax.f32 %v2139_v53, 0.0  ;;  %v1765_v18 = vmul.f32 %v6957_v12, %v1598_v31  ;;  %3635 = vadd.xlane.f32.xlu0 %v3634_v39  ;;  %3668 = vadd.xlane.f32.xlu1 %v7183_v3  ;;  %v9711_v54 = vld [vmem:[#allocation40_spill] sm:$0xff]  ;;  %v9713_v47 = vld [vmem:[#allocation19_spill] sm:$0xff] }
 0x2a0   : > { %v1766_v35 = vmul.f32 %v6960_v14, %v1598_v31  ;;  %2386 = vmatprep.mubr.f32.mxu0 %v2177_v59  ;;  %v7360_v4 = vpop.permute.xlu1 %1697  ;;  %v2202_v48 = vmax.f32 %v2138_v19, 0.0  ;;  %v2068_v15 = vadd.f32 %v7258_v45, %v7290_v37  ;;  %v1795_v32 = vmul.f32 %v6957_v12, %v7006_v50  ;;  %v9712_v5 = vld [vmem:[#allocation16_spill] sm:$0xff] }
 0x2a1   : > { %2387 = vmatmul.mubr.f32.gmra.mxu0 %v2176_v52  ;;  %v2141_v7 = vadd.f32 %v6991_v8, %v2064_v24  ;;  %v9708_v20 = vsub.f32 %v9707_v36, %v6729_v25  ;;  %v2039_v49 = vadd.f32 %v1975_v58, %v1765_v18  ;;  %2464 = vmatprep.mubr.f32.mxu1 %v2203_v1  ;;  %v2178_v3 = vmax.f32 %v2114_v16, 0.0  ;;  %v9714_v58 = vld [vmem:[#allocation81_spill] sm:$0xff] }
 0x2a2   : > { %v2040_v44 = vadd.f32 %v1976_v38, %v1766_v35  ;;  %2392 = vmatprep.mubr.f32.mxu0 %v2179_v61  ;;  %v9710_v11 = vsub.f32 %v9709_v17, %v6735_v41  ;;  %v2140_v37 = vadd.f32 %v6983_v55, %v2063_v23  ;;  %v2005_v50 = vmul.f32 %v6963_v28, %v7004_v26  ;;  %v7387_v16 = vpop.permute.xlu0 %1702  ;;  %v9715_v23 = vld [vmem:[#allocation48_spill] sm:$0xff]  ;;  %v9716_v24 = vld [vmem:[#allocation49_spill] sm:$0xff]  ;;  %v9720_v17 = vld [vmem:[#allocation15_spill] sm:$0xff] }
 0x2a3   : > { %v4882_v56 = vadd.f32 -0.9189385, %v9708_v20  ;;  %2465 = vmatmul.mubr.f32.gmra.mxu1 %v2202_v48  ;;  %v2205_v42 = vmax.f32 %v2141_v7, 0.0  ;;  %v2142_v25 = vadd.f32 %v6983_v55, %v7238_v6  ;;  %v2067_v10 = vadd.f32 %v7254_v27, %v7276_v46  ;;  %3827 = vadd.xlane.f32.xlu0 %v9711_v54  ;;  %v9718_v48 = vld [vmem:[#allocation17_spill] sm:$0xff] }
 0x2a4   : > { %v4870_v45 = vadd.f32 -0.9189385, %v9710_v11  ;;  %v2070_v62 = vadd.f32 %v7272_v40, %v7318_v57  ;;  %v2117_v63 = vadd.f32 %v6991_v8, %v2040_v44  ;;  %v2204_v39 = vmax.f32 %v2140_v37, 0.0  ;;  %3860 = vadd.xlane.f32.xlu1 %v9713_v47 }
 0x2a5   : > { %v2069_v34 = vadd.f32 %v2005_v50, %v1795_v32  ;;  %v1798_v26 = vmul.f32 %v6960_v14, %v9712_v5  ;;  %2393 = vmatmul.mubr.f32.gmra.mxu0 %v2178_v3  ;;  %v7390_v6 = vpop.permute.xlu1 %1916  ;;  %v2116_v27 = vadd.f32 %v6983_v55, %v2039_v49  ;;  %v4905_v40 = vadd.f32 -0.9189385, %v7230_v33  ;;  %2470 = vmatprep.mubr.f32.mxu1 %v2205_v42  ;;  %v9719_v32 = vld [vmem:[#allocation23_spill] sm:$0xff]  ;;  %v9721_v50 = vld [vmem:[#allocation46_spill] sm:$0xff]  ;;  %v9722_v3 = vld [vmem:[#allocation45_spill] sm:$0xff] }
 0x2a6   : > { %v1797_v46 = vmul.f32 %v6957_v12, %v9712_v5  ;;  %v3637_v57 = vsel %vm1432_vm0, %v4870_v45, 0.0  ;;  %v2181_v13 = vmax.f32 %v2117_v63, 0.0  ;;  %v2145_v53 = vadd.f32 %v6991_v8, %v2068_v15  ;;  %v1608_v37 = vpop.permute.xlu0 %1607  ;;  %v9725_v63 = vld [vmem:[#allocation22_spill] sm:$0xff] }
 0x2a7   : > { %v2008_v59 = vmul.f32 %v6966_v43, %v9714_v58  ;;  %v1800_v61 = vmul.f32 %v6960_v14, %v7298_v22  ;;  %2471 = vmatmul.mubr.f32.gmra.mxu1 %v2204_v39  ;;  %v2180_v19 = vmax.f32 %v2116_v27, 0.0  ;;  %v9717_v33 = vsub.f32 %v9715_v23, %v9716_v24  ;;  %3638 = vadd.xlane.f32.xlu0 %v3637_v57 }
 0x2a8   : > { %v2007_v52 = vmul.f32 %v6963_v28, %v9714_v58  ;;  %v2207_v1 = vmax.f32 %v7241_v51, 0.0  ;;  %v2144_v38 = vadd.f32 %v6983_v55, %v2067_v10  ;;  %v2147_v18 = vadd.f32 %v6991_v8, %v2070_v62  ;;  %2398 = vmatprep.mubr.f32.mxu0 %v2181_v13  ;;  %3671 = vadd.xlane.f32.xlu1 %v9719_v32  ;;  %v9724_v62 = vld [vmem:[#allocation34_spill] sm:$0xff]  ;;  %v9728_v58 = vld [vmem:[#allocation28_spill] sm:$0xff] }
 0x2a9   : > { %v4871_v31 = vadd.f32 -0.9189385, %v9717_v33  ;;  %v2072_v35 = vadd.f32 %v2008_v59, %v1798_v26  ;;  %v2010_v15 = vmul.f32 %v6966_v43, %v9718_v48  ;;  %v2206_v7 = vmax.f32 %v2142_v25, 0.0  ;;  %2399 = vmatmul.mubr.f32.gmra.mxu0 %v2180_v19  ;;  %v9727_v13 = vld [vmem:[#allocation18_spill] sm:$0xff] }
 0x2aa   : > { %v2146_v36 = vadd.f32 %v6983_v55, %v2069_v34  ;;  %v2071_v20 = vadd.f32 %v2007_v52, %v1797_v46  ;;  %2476 = vmatprep.mubr.f32.mxu1 %v2207_v1  ;;  %v1603_v49 = vpop.permute.xlu1 %1602  ;;  %v2209_v44 = vmax.f32 %v2145_v53, 0.0  ;;  %v3673_v51 = vsel %vm1432_vm0, %v4882_v56, 0.0 }
 0x2ab   : > { %v7417_v11 = vsel %vm1432_vm0, %v9720_v17, 0.0  ;;  %v2074_v45 = vadd.f32 %v2010_v15, %v1800_v61  ;;  %2477 = vmatmul.mubr.f32.gmra.mxu1 %v2206_v7  ;;  %v9723_v42 = vsub.f32 %v9721_v50, %v9722_v3  ;;  %v7423_v10 = vadd.f32 -0.9189385, %v7233_v2  ;;  %3830 = vadd.xlane.f32.xlu0 %v9725_v63  ;;  %v9726_v2 = vld [vmem:[#allocation24_spill] sm:$0xff]  ;;  %v7467_v3 = vpop.permute.xlu0 %1712 }
 0x2ac   : > { %v7426_v54 = vmul.f32 -0.5, %v9724_v62  ;;  %2482 = vmatprep.mubr.f32.mxu1 %v2209_v44  ;;  %v3640_v56 = vsel %vm1432_vm0, %v4871_v31, 0.0  ;;  %v2208_v39 = vmax.f32 %v2144_v38, 0.0  ;;  %v7431_v34 = vsel %vm1432_vm0, %v4905_v40, 0.0  ;;  %3863 = vadd.xlane.f32.xlu1 %v9726_v2 }
 0x2ad   : > { %v4883_v25 = vadd.f32 -0.9189385, %v9723_v42  ;;  %v7434_v5 = vadd.f32 -0.9189385, %v7236_v30  ;;  %v1799_v26 = vmul.f32 %v6957_v12, %v7298_v22  ;;  %v2211_v47 = vmax.f32 %v2147_v18, 0.0 }
 0x2ae   : > { %v2210_v27 = vmax.f32 %v2146_v36, 0.0  ;;  %v2149_v46 = vadd.f32 %v6991_v8, %v2072_v35  ;;  %v2009_v57 = vmul.f32 %v6963_v28, %v9718_v48  ;;  %v1801_v53 = vmul.f32 %v6957_v12, %v9727_v13 }
 0x2af   : > { %v1770_v40 = vmul.f32 %v6960_v14, %v1608_v37  ;;  %v2148_v30 = vadd.f32 %v6983_v55, %v2071_v20  ;;  %v2011_v59 = vmul.f32 %v6963_v28, %v9728_v58  ;;  %v2012_v22 = vmul.f32 %v6966_v43, %v9728_v58  ;;  %2483 = vmatmul.mubr.f32.gmra.mxu1 %v2208_v39  ;;  %v1841_v19 = vpop.permute.xlu1 %1840  ;;  %v9731_v58 = vld [vmem:[#allocation44_spill] sm:$0xff] }
 0x2b0   : > { %v1980_v61 = vmul.f32 %v6966_v43, %v7268_v60  ;;  %v2151_v23 = vadd.f32 %v6991_v8, %v2074_v45  ;;  %v1767_v33 = vmul.f32 %v6957_v12, %v1603_v49  ;;  %v1768_v31 = vmul.f32 %v6960_v14, %v1603_v49  ;;  %3641 = vadd.xlane.f32.xlu0 %v3640_v56 }
 0x2b1   : > { %v1977_v52 = vmul.f32 %v6963_v28, %v1841_v19  ;;  %v1978_v1 = vmul.f32 %v6966_v43, %v1841_v19  ;;  %v1802_v38 = vmul.f32 %v6960_v14, %v9727_v13  ;;  %v2073_v18 = vadd.f32 %v2009_v57, %v1799_v26  ;;  %3674 = vadd.xlane.f32.xlu1 %v3673_v51  ;;  %v9730_v57 = vld [vmem:[#allocation33_spill] sm:$0xff] }
 0x2b2   : > { %v1769_v35 = vmul.f32 %v6957_v12, %v1608_v37  ;;  %2488 = vmatprep.mubr.f32.mxu1 %v2211_v47  ;;  %v2213_v48 = vmax.f32 %v2149_v46, 0.0  ;;  %v1804_v15 = vmul.f32 %v6960_v14, %v7339_v21  ;;  %v2044_v32 = vadd.f32 %v1980_v61, %v1770_v40  ;;  %v9729_v37 = vld [vmem:[#allocation31_spill] sm:$0xff] }
 0x2b3   : > { %v2041_v7 = vadd.f32 %v1977_v52, %v1767_v33  ;;  %v2042_v36 = vadd.f32 %v1978_v1, %v1768_v31  ;;  %v2076_v20 = vadd.f32 %v2012_v22, %v1802_v38  ;;  %v1979_v49 = vmul.f32 %v6963_v28, %v7268_v60  ;;  %2489 = vmatmul.mubr.f32.gmra.mxu1 %v2210_v27  ;;  %v1921_v44 = vpop.permute.xlu1 %1920  ;;  %v7493_v31 = vpop.permute.xlu0 %1617 }
 0x2b4   : > { %v2212_v17 = vmax.f32 %v2148_v30, 0.0  ;;  %v3676_v45 = vsel %vm1432_vm0, %v4883_v25, 0.0  ;;  %v2075_v50 = vadd.f32 %v2011_v59, %v1801_v53  ;;  %v2014_v51 = vmul.f32 %v6966_v43, %v9729_v37  ;;  %3833 = vadd.xlane.f32.xlu0 %v7227_v0  ;;  %2494 = vmatprep.mubr.f32.mxu1 %v2213_v48 }
 0x2b5   : > { %v2215_v42 = vmax.f32 %v2151_v23, 0.0  ;;  %v2119_v63 = vadd.f32 %v6991_v8, %v2042_v36  ;;  %v1803_v60 = vmul.f32 %v6957_v12, %v7339_v21  ;;  %v2043_v56 = vadd.f32 %v1979_v49, %v1769_v35  ;;  %3866 = vadd.xlane.f32.xlu1 %v7310_v9 }
 0x2b6   : > { %v2118_v25 = vadd.f32 %v6983_v55, %v2041_v7  ;;  %v2150_v39 = vadd.f32 %v6983_v55, %v2073_v18  ;;  %v2078_v26 = vadd.f32 %v2014_v51, %v1804_v15  ;;  %v2016_v2 = vmul.f32 %v6966_v43, %v7390_v6  ;;  %v9732_v15 = vld [vmem:[#allocation52_spill] sm:$0xff] }
 0x2b7   : > { %v2183_v47 = vmax.f32 %v2119_v63, 0.0  ;;  %v2121_v0 = vadd.f32 %v6991_v8, %v2044_v32  ;;  %v2013_v27 = vmul.f32 %v6963_v28, %v9729_v37  ;;  %2495 = vmatmul.mubr.f32.gmra.mxu1 %v2212_v17  ;;  %v2153_v21 = vadd.f32 %v6991_v8, %v2076_v20  ;;  %v9733_v32 = vld [vmem:[#allocation51_spill] sm:$0xff]  ;;  %v1853_v63 = vpop.permute.xlu0 %1852 }
 0x2b8   : > { %v2182_v46 = vmax.f32 %v2118_v25, 0.0  ;;  %v3731_v9 = vmul.f32 -0.5, %v9730_v57  ;;  %v1806_v13 = vmul.f32 %v6960_v14, %v7360_v4  ;;  %3836 = vadd.xlane.f32.xlu0 %v7417_v11  ;;  %2500 = vmatprep.mubr.f32.mxu1 %v2215_v42  ;;  %v1708_v53 = vpop.permute.xlu1 %1707  ;;  %v3868_v40 = vsel %vm1432_vm0, %v7423_v10, 0.0 }
 0x2b9   : > { %v2152_v30 = vadd.f32 %v6983_v55, %v2075_v50  ;;  %v3732_v59 = vmul.f32 -0.5, %v9731_v58  ;;  %v2077_v22 = vadd.f32 %v2013_v27, %v1803_v60  ;;  %v2015_v61 = vmul.f32 %v6963_v28, %v7390_v6  ;;  %3677 = vadd.xlane.f32.xlu1 %v3676_v45  ;;  %2404 = vmatprep.mubr.f32.mxu0 %v2183_v47 }
 0x2ba   : > { %v2214_v19 = vmax.f32 %v2150_v39, 0.0  ;;  %v2120_v23 = vadd.f32 %v6983_v55, %v2043_v56  ;;  %v2080_v33 = vadd.f32 %v2016_v2, %v1806_v13  ;;  %v2018_v11 = vmul.f32 %v6966_v43, %v1921_v44  ;;  %2405 = vmatmul.mubr.f32.gmra.mxu0 %v2182_v46  ;;  %v9735_v39 = vld [vmem:[#allocation47_spill] sm:$0xff] }
 0x2bb   : > { %v2185_v52 = vmax.f32 %v2121_v0, 0.0  ;;  %v2155_v10 = vadd.f32 %v6991_v8, %v2078_v26  ;;  %v1805_v1 = vmul.f32 %v6957_v12, %v7360_v4  ;;  %v2217_v38 = vmax.f32 %v2153_v21, 0.0 }
 0x2bc   : > { %2501 = vmatmul.mubr.f32.gmra.mxu1 %v2214_v19  ;;  %v3754_v6 = vmul.f32 %v7426_v54, %v9724_v62  ;;  %v3763_v18 = vmul.f32 %v3731_v9, %v9730_v57  ;;  %v1808_v35 = vmul.f32 %v6960_v14, %v7387_v16  ;;  %3839 = vadd.xlane.f32.xlu0 %v7431_v34  ;;  %v2216_v48 = vmax.f32 %v2152_v30, 0.0  ;;  %v9736_v30 = vld [vmem:[#allocation56_spill] sm:$0xff]  ;;  %v9739_v19 = vld [vmem:[#allocation55_spill] sm:$0xff] }
 0x2bd   : > { %2410 = vmatprep.mubr.f32.mxu0 %v2185_v52  ;;  %v9734_v7 = vsub.f32 %v9732_v15, %v9733_v32  ;;  %v3764_v4 = vmul.f32 %v3732_v59, %v9731_v58  ;;  %v2079_v20 = vadd.f32 %v2015_v61, %v1805_v1  ;;  %v2017_v49 = vmul.f32 %v6963_v28, %v1921_v44  ;;  %v1925_v62 = vpop.permute.xlu1 %1924  ;;  %v9737_v58 = vld [vmem:[#allocation58_spill] sm:$0xff]  ;;  %v9742_v52 = vld [vmem:[#allocation63_spill] sm:$0xff] }
 0x2be   : > { %3869 = vadd.xlane.f32.xlu1 %v3868_v40  ;;  %2506 = vmatprep.mubr.f32.mxu1 %v2217_v38  ;;  %v2184_v54 = vmax.f32 %v2120_v23, 0.0  ;;  %v2154_v17 = vadd.f32 %v6983_v55, %v2077_v22  ;;  %v2082_v45 = vadd.f32 %v2018_v11, %v1808_v35  ;;  %v2020_v34 = vmul.f32 %v6966_v43, %v1925_v62  ;;  %v9741_v11 = vld [vmem:[#allocation59_spill] sm:$0xff] }
 0x2bf   : > { %v4884_v36 = vadd.f32 -0.9189385, %v9734_v7  ;;  %v2219_v50 = vmax.f32 %v2155_v10, 0.0  ;;  %v2157_v37 = vadd.f32 %v6991_v8, %v2080_v33  ;;  %v1807_v51 = vmul.f32 %v6957_v12, %v7387_v16 }
 0x2c0   : > { %2411 = vmatmul.mubr.f32.gmra.mxu0 %v2184_v54  ;;  %v3841_v42 = vsel %vm1432_vm0, %v7434_v5, 0.0  ;;  %2507 = vmatmul.mubr.f32.gmra.mxu1 %v2216_v48  ;;  %v4907_v44 = vadd.f32 -0.9189385, %v3754_v6  ;;  %v1810_v60 = vmul.f32 %v6960_v14, %v1708_v53  ;;  %v4916_v25 = vadd.f32 -0.9189385, %v3763_v18 }
 0x2c1   : > { %3842 = vadd.xlane.f32.xlu0 %v3841_v42  ;;  %v3679_v56 = vsel %vm1432_vm0, %v4884_v36, 0.0  ;;  %2512 = vmatprep.mubr.f32.mxu1 %v2219_v50  ;;  %v3733_v26 = vmul.f32 -0.5, %v9735_v39  ;;  %v2081_v2 = vadd.f32 %v2017_v49, %v1807_v51  ;;  %v2019_v47 = vmul.f32 %v6963_v28, %v1925_v62 }
 0x2c2   : > { %3680 = vadd.xlane.f32.xlu1 %v3679_v56  ;;  %v2218_v16 = vmax.f32 %v2154_v17, 0.0  ;;  %v2156_v0 = vadd.f32 %v6983_v55, %v2079_v20  ;;  %v2084_v5 = vadd.f32 %v2020_v34, %v1810_v60  ;;  %v1613_v27 = vpop.permute.xlu1 %1612  ;;  %v2221_v46 = vmax.f32 %v2157_v37, 0.0  ;;  %v9745_v60 = vld [vmem:[#allocation65_spill] sm:$0xff] }
 0x2c3   : > { %v2159_v21 = vadd.f32 %v6991_v8, %v2082_v45  ;;  %v4917_v57 = vadd.f32 -0.9189385, %v3764_v4  ;;  %v1984_v9 = vmul.f32 %v6966_v43, %v1853_v63  ;;  %v1809_v13 = vmul.f32 %v6957_v12, %v1708_v53 }
 0x2c4   : > { %v3844_v40 = vsel %vm1432_vm0, %v4907_v44, 0.0  ;;  %2513 = vmatmul.mubr.f32.gmra.mxu1 %v2218_v16  ;;  %v9738_v59 = vsub.f32 %v9736_v30, %v9737_v58  ;;  %v3871_v61 = vsel %vm1432_vm0, %v4916_v25, 0.0  ;;  %v9740_v23 = vsub.f32 %v9739_v19, %v6815_v29 }
 0x2c5   : > { %3845 = vadd.xlane.f32.xlu0 %v3844_v40  ;;  %2518 = vmatprep.mubr.f32.mxu1 %v2221_v46  ;;  %v9743_v10 = vsub.f32 %v9741_v11, %v9742_v52  ;;  %v1774_v53 = vmul.f32 %v6960_v14, %v7493_v31  ;;  %v2083_v38 = vadd.f32 %v2019_v47, %v1809_v13  ;;  %v2220_v6 = vmax.f32 %v2156_v0, 0.0 }
 0x2c6   : > { %v4872_v22 = vadd.f32 -0.9189385, %v9738_v59  ;;  %v4885_v33 = vadd.f32 -0.9189385, %v9740_v23  ;;  %3872 = vadd.xlane.f32.xlu1 %v3871_v61  ;;  %v2158_v18 = vadd.f32 %v6983_v55, %v2081_v2  ;;  %v2223_v35 = vmax.f32 %v2159_v21, 0.0  ;;  %v9750_v23 = vld [vmem:[#allocation66_spill] sm:$0xff] }
 0x2c7   : > { %v4873_v1 = vadd.f32 -0.9189385, %v9743_v10  ;;  %v3874_v48 = vsel %vm1432_vm0, %v4917_v57, 0.0  ;;  %v2161_v15 = vadd.f32 %v6991_v8, %v2084_v5  ;;  %v3765_v29 = vmul.f32 %v3733_v26, %v9735_v39  ;;  %v1849_v20 = vpop.permute.xlu1 %1848  ;;  %v9747_v5 = vld [vmem:[#allocation57_spill] sm:$0xff] }
 0x2c8   : > { %v1983_v32 = vmul.f32 %v6963_v28, %v1853_v63  ;;  %v2048_v7 = vadd.f32 %v1984_v9, %v1774_v53  ;;  %v1771_v36 = vmul.f32 %v6957_v12, %v1613_v27  ;;  %v3643_v4 = vsel %vm1432_vm0, %v4872_v22, 0.0  ;;  %2519 = vmatmul.mubr.f32.gmra.mxu1 %v2220_v6  ;;  %v9744_v63 = vld [vmem:[#allocation64_spill] sm:$0xff]  ;;  %v9749_v9 = vld [vmem:[#allocation54_spill] sm:$0xff] }
 0x2c9   : > { %v1772_v49 = vmul.f32 %v6960_v14, %v1613_v27  ;;  %3644 = vadd.xlane.f32.xlu0 %v3643_v4  ;;  %v3682_v62 = vsel %vm1432_vm0, %v4885_v33, 0.0  ;;  %v1981_v54 = vmul.f32 %v6963_v28, %v1849_v20  ;;  %v1982_v17 = vmul.f32 %v6966_v43, %v1849_v20  ;;  %2524 = vmatprep.mubr.f32.mxu1 %v2223_v35  ;;  %v9751_v33 = vld [vmem:[#allocation68_spill] sm:$0xff]  ;;  %v1937_v35 = vpop.permute.xlu0 %1936  ;;  %v9753_v4 = vld [vmem:[#allocation61_spill] sm:$0xff] }
 0x2ca   : > { %v1773_v45 = vmul.f32 %v6957_v12, %v7493_v31  ;;  %3683 = vadd.xlane.f32.xlu1 %v3682_v62  ;;  %v3646_v34 = vsel %vm1432_vm0, %v4873_v1, 0.0  ;;  %v2222_v50 = vmax.f32 %v2158_v18, 0.0  ;;  %v2160_v37 = vadd.f32 %v6983_v55, %v2083_v38  ;;  %v9755_v62 = vld [vmem:[#allocation53_spill] sm:$0xff] }
 0x2cb   : > { %v2045_v51 = vadd.f32 %v1981_v54, %v1771_v36  ;;  %v2046_v42 = vadd.f32 %v1982_v17, %v1772_v49  ;;  %v2225_v44 = vmax.f32 %v2161_v15, 0.0  ;;  %v9746_v56 = vsub.f32 %v9744_v63, %v9745_v60  ;;  %v1929_v2 = vpop.permute.xlu1 %1928 }
 0x2cc   : > { %v1811_v39 = vmul.f32 %v6957_v12, %v7467_v3  ;;  %v1812_v26 = vmul.f32 %v6960_v14, %v7467_v3  ;;  %v2047_v31 = vadd.f32 %v1983_v32, %v1773_v45  ;;  %2525 = vmatmul.mubr.f32.gmra.mxu1 %v2222_v50  ;;  %v2125_v47 = vadd.f32 %v6991_v8, %v2048_v7 }
 0x2cd   : > { %v4874_v25 = vadd.f32 -0.9189385, %v9746_v56  ;;  %3647 = vadd.xlane.f32.xlu0 %v3646_v34  ;;  %v2021_v16 = vmul.f32 %v6963_v28, %v1929_v2  ;;  %v2022_v0 = vmul.f32 %v6966_v43, %v1929_v2  ;;  %2530 = vmatprep.mubr.f32.mxu1 %v2225_v44  ;;  %v9748_v27 = vsub.f32 %v9747_v5, %v6735_v41  ;;  %v9756_v34 = vld [vmem:[#allocation60_spill] sm:$0xff]  ;;  %v1941_v63 = vpop.permute.xlu0 %1940 }
 0x2ce   : > { %v2123_v21 = vadd.f32 %v6991_v8, %v2046_v42  ;;  %3875 = vadd.xlane.f32.xlu1 %v3874_v48  ;;  %v2224_v57 = vmax.f32 %v2160_v37, 0.0  ;;  %v2122_v3 = vadd.f32 %v6983_v55, %v2045_v51  ;;  %v3734_v13 = vmul.f32 -0.5, %v9749_v9 }
 0x2cf   : > { %v4886_v46 = vadd.f32 -0.9189385, %v9748_v27  ;;  %v2085_v40 = vadd.f32 %v2021_v16, %v1811_v39  ;;  %v2086_v30 = vadd.f32 %v2022_v0, %v1812_v26  ;;  %v4918_v22 = vadd.f32 -0.9189385, %v3765_v29 }
 0x2d0   : > { %v2187_v59 = vmax.f32 %v2123_v21, 0.0  ;;  %v3649_v61 = vsel %vm1432_vm0, %v4874_v25, 0.0  ;;  %2531 = vmatmul.mubr.f32.gmra.mxu1 %v2224_v57  ;;  %v2186_v19 = vmax.f32 %v2122_v3, 0.0  ;;  %v9752_v41 = vsub.f32 %v9750_v23, %v9751_v33  ;;  %v1718_v53 = vpop.permute.xlu1 %1717 }
 0x2d1   : > { %v2124_v10 = vadd.f32 %v6983_v55, %v2047_v31  ;;  %3650 = vadd.xlane.f32.xlu0 %v3649_v61  ;;  %v3685_v1 = vsel %vm1432_vm0, %v4886_v46, 0.0  ;;  %v2189_v38 = vmax.f32 %v2125_v47, 0.0  ;;  %v2163_v6 = vadd.f32 %v6991_v8, %v2086_v30 }
 0x2d2   : > { %v4875_v11 = vadd.f32 -0.9189385, %v9752_v41  ;;  %2416 = vmatprep.mubr.f32.mxu0 %v2187_v59  ;;  %v2162_v18 = vadd.f32 %v6983_v55, %v2085_v40  ;;  %3686 = vadd.xlane.f32.xlu1 %v3685_v1  ;;  %v3766_v48 = vmul.f32 %v3734_v13, %v9749_v9  ;;  %v3877_v36 = vsel %vm1432_vm0, %v4918_v22, 0.0  ;;  %v9757_v9 = vld [vmem:[#allocation62_spill] sm:$0xff]  ;;  %v1945_v40 = vpop.permute.xlu0 %1944 }
 0x2d3   : > { %2417 = vmatmul.mubr.f32.gmra.mxu0 %v2186_v19  ;;  %v2227_v15 = vmax.f32 %v2163_v6, 0.0  ;;  %v2188_v7 = vmax.f32 %v2124_v10, 0.0  ;;  %v9754_v20 = vsub.f32 %v9753_v4, %v9716_v24  ;;  %v3735_v54 = vmul.f32 -0.5, %v9755_v62  ;;  %v9758_v6 = vld [vmem:[#allocation67_spill] sm:$0xff] }
 0x2d4   : > { %2422 = vmatprep.mubr.f32.mxu0 %v2189_v38  ;;  %v2226_v29 = vmax.f32 %v2162_v18, 0.0  ;;  %v3652_v32 = vsel %vm1432_vm0, %v4875_v11, 0.0  ;;  %v4919_v45 = vadd.f32 -0.9189385, %v3766_v48  ;;  %v3736_v50 = vmul.f32 -0.5, %v9756_v34 }
 0x2d5   : > { %3653 = vadd.xlane.f32.xlu0 %v3652_v32  ;;  %2536 = vmatprep.mubr.f32.mxu1 %v2227_v15  ;;  %v4887_v49 = vadd.f32 -0.9189385, %v9754_v20  ;;  %v1933_v17 = vpop.permute.xlu1 %1932  ;;  %v1813_v37 = vmul.f32 %v6957_v12, %v1718_v53  ;;  %v1814_v51 = vmul.f32 %v6960_v14, %v1718_v53  ;;  %v3767_v39 = vmul.f32 %v3735_v54, %v9755_v62 }
 0x2d6   : > { %3878 = vadd.xlane.f32.xlu1 %v3877_v36  ;;  %v2023_v42 = vmul.f32 %v6963_v28, %v1933_v17  ;;  %v2024_v44 = vmul.f32 %v6966_v43, %v1933_v17  ;;  %2537 = vmatmul.mubr.f32.gmra.mxu1 %v2226_v29  ;;  %v3880_v31 = vsel %vm1432_vm0, %v4919_v45, 0.0  ;;  %v3768_v16 = vmul.f32 %v3736_v50, %v9756_v34  ;;  %v1949_v4 = vpop.permute.xlu0 %1948 }
 0x2d7   : > { %2423 = vmatmul.mubr.f32.gmra.mxu0 %v2188_v7  ;;  %v3688_v25 = vsel %vm1432_vm0, %v4887_v49, 0.0  ;;  %v2025_v0 = vmul.f32 %v6963_v28, %v1937_v35  ;;  %v2026_v5 = vmul.f32 %v6966_v43, %v1937_v35  ;;  %v4920_v57 = vadd.f32 -0.9189385, %v3767_v39 }
 0x2d8   : > { %v2087_v24 = vadd.f32 %v2023_v42, %v1813_v37  ;;  %v2088_v56 = vadd.f32 %v2024_v44, %v1814_v51  ;;  %v3737_v13 = vmul.f32 -0.5, %v9757_v9  ;;  %v2027_v22 = vmul.f32 %v6963_v28, %v1941_v63 }
 0x2d9   : > { %v2028_v61 = vmul.f32 %v6966_v43, %v1941_v63  ;;  %v3883_v1 = vsel %vm1432_vm0, %v4920_v57, 0.0  ;;  %v4921_v53 = vadd.f32 -0.9189385, %v3768_v16  ;;  %v3738_v18 = vmul.f32 -0.5, %v9758_v6 }
 0x2da   : > { %3689 = vadd.xlane.f32.xlu1 %v3688_v25  ;;  %v1723_v26 = vpop.permute.xlu1 %1722  ;;  %v2165_v2 = vadd.f32 %v6991_v8, %v2088_v56  ;;  %v2164_v47 = vadd.f32 %v6983_v55, %v2087_v24  ;;  %v3769_v38 = vmul.f32 %v3737_v13, %v9757_v9  ;;  %v2029_v32 = vmul.f32 %v6963_v28, %v1945_v40  ;;  %v9761_v9 = vld [vmem:[#allocation71_spill] sm:$0xff] }
 0x2db   : > { %v1815_v27 = vmul.f32 %v6957_v12, %v1723_v26  ;;  %v1816_v46 = vmul.f32 %v6960_v14, %v1723_v26  ;;  %v2030_v7 = vmul.f32 %v6966_v43, %v1945_v40  ;;  %v3886_v17 = vsel %vm1432_vm0, %v4921_v53, 0.0 }
 0x2dc   : > { %v2229_v21 = vmax.f32 %v2165_v2, 0.0  ;;  %v2228_v3 = vmax.f32 %v2164_v47, 0.0  ;;  %v4922_v45 = vadd.f32 -0.9189385, %v3769_v38  ;;  %v3770_v34 = vmul.f32 %v3738_v18, %v9758_v6 }
 0x2dd   : > { %v2089_v30 = vadd.f32 %v2025_v0, %v1815_v27  ;;  %v2090_v59 = vadd.f32 %v2026_v5, %v1816_v46  ;;  %v2031_v44 = vmul.f32 %v6963_v28, %v1949_v4  ;;  %v2032_v63 = vmul.f32 %v6966_v43, %v1949_v4  ;;  %v9759_v5 = vld [vmem:[#allocation70_spill] sm:$0xff] }
 0x2de   : > { %3881 = vadd.xlane.f32.xlu1 %v3880_v31  ;;  %v1728_v19 = vpop.permute.xlu1 %1727  ;;  %2542 = vmatprep.mubr.f32.mxu1 %v2229_v21  ;;  %v3889_v31 = vsel %vm1432_vm0, %v4922_v45, 0.0  ;;  %v4923_v2 = vadd.f32 -0.9189385, %v3770_v34  ;;  %v9760_v27 = vsub.f32 %v9759_v5, %v9737_v58  ;;  %v9762_v13 = vsub.f32 %v9761_v9, %v9742_v52 }
 0x2df   : > { %v1817_v23 = vmul.f32 %v6957_v12, %v1728_v19  ;;  %v1818_v41 = vmul.f32 %v6960_v14, %v1728_v19  ;;  %2543 = vmatmul.mubr.f32.gmra.mxu1 %v2228_v3  ;;  %v2167_v11 = vadd.f32 %v6991_v8, %v2090_v59  ;;  %v2166_v10 = vadd.f32 %v6983_v55, %v2089_v30  ;;  %v9763_v30 = vld [vmem:[#allocation73_spill] sm:$0xff]  ;;  %v9765_v19 = vld [vmem:[#allocation74_spill] sm:$0xff] }
 0x2e0   : > { %v4888_v46 = vadd.f32 -0.9189385, %v9760_v27  ;;  %v9764_v58 = vsub.f32 %v9763_v30, %v9745_v60 }
 0x2e1   : > { %v2091_v35 = vadd.f32 %v2027_v22, %v1817_v23  ;;  %v2092_v48 = vadd.f32 %v2028_v61, %v1818_v41  ;;  %v2231_v15 = vmax.f32 %v2167_v11, 0.0  ;;  %v2230_v29 = vmax.f32 %v2166_v10, 0.0 }
 0x2e2   : > { %3884 = vadd.xlane.f32.xlu1 %v3883_v1  ;;  %v1733_v36 = vpop.permute.xlu1 %1732  ;;  %v3691_v3 = vsel %vm1432_vm0, %v4888_v46, 0.0  ;;  %v4890_v59 = vadd.f32 -0.9189385, %v9764_v58  ;;  %v9766_v23 = vsub.f32 %v9765_v19, %v9751_v33  ;;  %v9770_v33 = vld [vmem:[#allocation12_spill] sm:$0xff] }
 0x2e3   : > { %v1819_v20 = vmul.f32 %v6957_v12, %v1733_v36  ;;  %v1820_v49 = vmul.f32 %v6960_v14, %v1733_v36  ;;  %2548 = vmatprep.mubr.f32.mxu1 %v2231_v15  ;;  %v2169_v62 = vadd.f32 %v6991_v8, %v2092_v48  ;;  %v2168_v54 = vadd.f32 %v6983_v55, %v2091_v35 }
 0x2e4   : > { %2549 = vmatmul.mubr.f32.gmra.mxu1 %v2230_v29  ;;  %v3697_v61 = vsel %vm1432_vm0, %v4890_v59, 0.0  ;;  %v4891_v41 = vadd.f32 -0.9189385, %v9766_v23  ;;  %v4161_v15 = vadd.s32 16, %v9770_v33  ;;  %v4160_v4 = vadd.s32 8, %v9770_v33 }
 0x2e5   : > { %v2093_v50 = vadd.f32 %v2029_v32, %v1819_v20  ;;  %v2094_v37 = vadd.f32 %v2030_v7, %v1820_v49  ;;  %v2233_v51 = vmax.f32 %v2169_v62, 0.0  ;;  %v2232_v42 = vmax.f32 %v2168_v54, 0.0  ;;  %v4829_v32 = vld [vmem:[%s9338_s5 + $0x2] sm:$0x3]  ;;  %v9773_v62 = vld [vmem:[#allocation13_spill] sm:$0xff] }
 0x2e6   : > { %3887 = vadd.xlane.f32.xlu1 %v3886_v17  ;;  %v1738_v24 = vpop.permute.xlu1 %1737  ;;  %v3700_v11 = vsel %vm1432_vm0, %v4891_v41, 0.0  ;;  %v7658_v7 = vstv %s4942_s24  ;;  %v4162_v20 = vadd.s32 24, %v9770_v33  ;;  %v4163_v49 = vadd.s32 32, %v9770_v33 }
 0x2e7   : > { %v1821_v56 = vmul.f32 %v6957_v12, %v1738_v24  ;;  %v1822_v25 = vmul.f32 %v6960_v14, %v1738_v24  ;;  %2554 = vmatprep.mubr.f32.mxu1 %v2233_v51  ;;  %v2171_v39 = vadd.f32 %v6991_v8, %v2094_v37  ;;  %v2170_v26 = vadd.f32 %v6983_v55, %v2093_v50 }
 0x2e8   : > { %2555 = vmatmul.mubr.f32.gmra.mxu1 %v2232_v42  ;;  %v3892_v14 = vsel %vm1432_vm0, %v4923_v2, 0.0  ;;  %9771 = vst [vmem:[#allocation25_spill] sm:$0xff] %v7658_v7  ;;  %v7666_v54 = vrot.slane %v4829_v32, %v9773_v62  ;;  %v4176_v17 = vadd.s32 %v7658_v7, %v9770_v33  ;;  %v4178_v45 = vadd.s32 %v7658_v7, %v4161_v15 }
 0x2e9   : > { %v2095_v47 = vadd.f32 %v2031_v44, %v1821_v56  ;;  %v2096_v16 = vadd.f32 %v2032_v63, %v1822_v25  ;;  %v2235_v28 = vmax.f32 %v2171_v39, 0.0  ;;  %v2234_v0 = vmax.f32 %v2170_v26, 0.0  ;;  %v9775_v63 = vld [vmem:[#allocation14_spill] sm:$0xff] }
 0x2ea   : > { %3890 = vadd.xlane.f32.xlu1 %v3889_v31  ;;  %v4177_v51 = vadd.s32 %v7658_v7, %v4160_v4  ;;  %v4179_v42 = vadd.s32 %v7658_v7, %v4162_v20  ;;  %v7682_v24 = vrot.slane %v4829_v32, %v9775_v63  ;;  %v4180_v56 = vadd.s32 %v7658_v7, %v4163_v49 }
 0x2eb   : > { %2560 = vmatprep.mubr.f32.mxu1 %v2235_v28  ;;  %v2173_v43 = vadd.f32 %v6991_v8, %v2096_v16  ;;  %v2172_v12 = vadd.f32 %v6983_v55, %v2095_v47  ;;  %v4889_v8 = vadd.f32 -0.9189385, %v9762_v13  ;;  %v4164_v39 = vadd.s32 40, %v9770_v33 }
 0x2ec   : > { %2561 = vmatmul.mubr.f32.gmra.mxu1 %v2234_v0  ;;  %vm4192_vm2 = vcmp.lt.s32.totalorder %v4176_v17, 200  ;;  %vm4194_vm3 = vcmp.lt.s32.totalorder %v4178_v45, 200  ;;  %v4165_v2 = vadd.s32 48, %v9770_v33  ;;  %vm4193_vm4 = vcmp.lt.s32.totalorder %v4177_v51, 200 }
 0x2ed   : > { %v2237_v21 = vmax.f32 %v2173_v43, 0.0  ;;  %v2236_v57 = vmax.f32 %v2172_v12, 0.0  ;;  %v3694_v40 = vsel %vm1432_vm0, %v4889_v8, 0.0  ;;  %vm4195_vm5 = vcmp.lt.s32.totalorder %v4179_v42, 200 }
 0x2ee   : > { %3893 = vadd.xlane.f32.xlu1 %v3892_v14  ;;  %v9472_v0 = vmov 0.0   ;;  %vm4196_vm6 = vcmp.lt.s32.totalorder %v4180_v56, 200  ;;  %v4181_v14 = vadd.s32 %v7658_v7, %v4164_v39  ;;  %v4167_v49 = vadd.s32 64, %v9770_v33 }
 0x2ef   : > { %2566 = vmatprep.mubr.f32.mxu1 %v2237_v21  ;;  %v7699_v43 = vsel %vm4192_vm2, 1.0, %v9472_v0  ;;  %v7702_v12 = vsel %vm4194_vm3, 1.0, %v9472_v0  ;;  %v7707_v46 = vsel %vm4193_vm4, 1.0, %v9472_v0  ;;  %v7712_v9 = vsel %vm4195_vm5, 1.0, %v9472_v0 }
 0x2f0   : > { %2567 = vmatmul.mubr.f32.gmra.mxu1 %v2236_v57  ;;  %v7634_v55 = vpop.xlane.xlu0 %3617  ;;  %9777 = vst [vmem:[#allocation41_spill] sm:$0xff] %v7699_v43  ;;  %9778 = vst [vmem:[#allocation29_spill] sm:$0xff] %v7702_v12  ;;  %v4182_v57 = vadd.s32 %v7658_v7, %v4165_v2  ;;  %v7722_v58 = vsel %vm4196_vm6, 1.0, %v9472_v0  ;;  %vm4197_vm8 = vcmp.lt.s32.totalorder %v4181_v14, 200  ;;  %v4184_v56 = vadd.s32 %v7658_v7, %v4167_v49 }
 0x2f1   : > { %9779 = vst [vmem:[#allocation30_spill] sm:$0xff] %v7707_v46  ;;  %9780 = vst [vmem:[#allocation32_spill] sm:$0xff] %v7712_v9 }
 0x2f2   : > { %3692 = vadd.xlane.f32.xlu1 %v3691_v3  ;;  %v4166_v3 = vadd.s32 56, %v9770_v33  ;;  %9782 = vst [vmem:[#allocation42_spill] sm:$0xff] %v7722_v58  ;;  %vm4198_vm9 = vcmp.lt.s32.totalorder %v4182_v57, 200  ;;  %vm4200_vm11 = vcmp.lt.s32.totalorder %v4184_v56, 200  ;;  %v4169_v56 = vadd.s32 80, %v9770_v33 }
 0x2f3   : > { %v7742_v15 = vsel %vm4198_vm9, 1.0, %v9472_v0 }
 0x2f4   : > { %v3663_v22 = vpop.xlane.xlu0 %3662  ;;  %v4183_v23 = vadd.s32 %v7658_v7, %v4166_v3  ;;  %9786 = vst [vmem:[#allocation81_spill] sm:$0xff] %v7742_v15 }
 0x2f6   : > { %3695 = vadd.xlane.f32.xlu1 %v3694_v40  ;;  %vm4199_vm10 = vcmp.lt.s32.totalorder %v4183_v23, 200 }
 0x2f8   : > { %v3807_v52 = vpop.xlane.xlu0 %3806 }
 0x2fa   : > { %3698 = vadd.xlane.f32.xlu1 %v3697_v61 }
 0x2fc   : > { %v3855_v10 = vpop.xlane.xlu0 %3854 }
 0x2fd   : > { %v7645_v1 = vsub.f32 %v3663_v22, %v3855_v10 }
 0x2fe   : > { %3701 = vadd.xlane.f32.xlu1 %v3700_v11 }
 0x2ff   : > { %9767 = vst [vmem:[#allocation37_spill] sm:$0xff] %v7645_v1 }
 0x300   : > { %v3621_v60 = vpop.xlane.xlu0 %3620 }
 0x304   : > { %v3813_v53 = vpop.xlane.xlu0 %3812 }
 0x305   : > { %v7647_v38 = vsub.f32 %v3621_v60, %v3813_v53  ;;  %v7736_v60 = vsel %vm4197_vm8, 1.0, %v9472_v0 }
 0x306   : > { %9785 = vst [vmem:[#allocation19_spill] sm:$0xff] %v7736_v60 }
 0x307   : > { %9768 = vst [vmem:[#allocation50_spill] sm:$0xff] %v7647_v38  ;;  %v4403_v30 = vmul.f32 %v7702_v12, %v7647_v38 }
 0x308   : > { %v3624_v6 = vpop.xlane.xlu0 %3623 }
 0x30c   : > { %v3816_v18 = vpop.xlane.xlu0 %3815 }
 0x30d   : > { %v7649_v35 = vsub.f32 %v3624_v6, %v3816_v18  ;;  %v4436_v6 = vsel %vm4256_vm7, %v4403_v30, 0.0 }
 0x30f   : > { %9769 = vst [vmem:[#allocation38_spill] sm:$0xff] %v7649_v35  ;;  %v4404_v22 = vmul.f32 %v7712_v9, %v7649_v35  ;;  %v9828_v35 = vld [vmem:[#allocation72_spill] sm:$0xff] }
 0x310   : > { %v3627_v48 = vpop.xlane.xlu0 %3626 }
 0x311   : > { %v4438_v32 = vsel %vm4256_vm7, %v4404_v22, 0.0 }
 0x314   : > { %v3819_v29 = vpop.xlane.xlu0 %3818 }
 0x315   : > { %v7660_v36 = vsub.f32 %v3627_v48, %v3819_v29 }
 0x317   : > { %9772 = vst [vmem:[#allocation27_spill] sm:$0xff] %v7660_v36  ;;  %v4405_v18 = vmul.f32 %v7722_v58, %v7660_v36 }
 0x318   : > { %v3630_v34 = vpop.xlane.xlu0 %3629  ;;  %v3615_v50 = vpop.xlane.xlu1 %3614 }
 0x319   : > { %v7671_v37 = vsub.f32 %v3615_v50, %v3807_v52  ;;  %v2382_v44 = vpop.f32.mrf.mxu0  ;;  %v4440_v17 = vsel %vm4256_vm7, %v4405_v18, 0.0  ;;  %v7752_v50 = vsel %vm4199_vm10, 1.0, %v9472_v0 }
 0x31a   : > { %v7686_v25 = vadd.f32 %v2382_v44, %v7666_v54  ;;  %9787 = vst [vmem:[#allocation48_spill] sm:$0xff] %v7752_v50 }
 0x31b   : > { %9774 = vst [vmem:[#allocation26_spill] sm:$0xff] %v7671_v37  ;;  %v2384_v16 = vpop.f32.mrf.mxu0  ;;  %v4401_v13 = vmul.f32 %v7699_v43, %v7671_v37 }
 0x31c   : > { %v3822_v26 = vpop.xlane.xlu0 %3821  ;;  %v3666_v31 = vpop.xlane.xlu1 %3665  ;;  %2957 = vst.msk [vmem:[%s7679_s26] sm:$0xff] %vm1432_vm0, %v7686_v25  ;;  %v7696_v28 = vadd.f32 %v2384_v16, %v7682_v24 }
 0x31d   : > { %v7693_v47 = vsub.f32 %v3630_v34, %v3822_v26  ;;  %v4433_v41 = vsel %vm4256_vm7, %v4401_v13, 0.0 }
 0x31e   : > { %v2605_v5 = vand.u32 2147483647, %v7696_v28  ;;  %vm2861_vm13 = vcmp.gt.f32.partialorder %v7696_v28, 20.0 }
 0x31f   : > { %9776 = vst [vmem:[#allocation39_spill] sm:$0xff] %v7693_v47  ;;  %v4406_v4 = vmul.f32 %v7736_v60, %v7693_v47 }
 0x320   : > { %v3633_v27 = vpop.xlane.xlu0 %3632  ;;  %v3810_v21 = vpop.xlane.xlu1 %3809  ;;  %v2637_v40 = vsub.f32 0.0, %v2605_v5 }
 0x321   : > { %v7717_v8 = vsub.f32 %v7634_v55, %v3810_v21  ;;  %v4442_v42 = vsel %vm4256_vm7, %v4406_v4, 0.0  ;;  %v4168_v21 = vadd.s32 72, %v9770_v33 }
 0x322   : > { %v2669_v61 = vmul.f32 1.442695, %v2637_v40  ;;  %v7766_v40 = vsel %vm4200_vm11, 1.0, %v9472_v0 }
 0x323   : > { %9781 = vst [vmem:[#allocation43_spill] sm:$0xff] %v7717_v8  ;;  %v4402_v59 = vmul.f32 %v7707_v46, %v7717_v8  ;;  %9790 = vst [vmem:[#allocation23_spill] sm:$0xff] %v7766_v40 }
 0x324   : > { %v3825_v19 = vpop.xlane.xlu0 %3824  ;;  %v3858_v55 = vpop.xlane.xlu1 %3857  ;;  %5242 = vpow2.f32 %v2669_v61  ;;  %v4185_v61 = vadd.s32 %v7658_v7, %v4168_v21 }
 0x325   : > { %v4434_v52 = vsel %vm4256_vm7, %v4402_v59, 0.0  ;;  %v7731_v11 = vsub.f32 %v3633_v27, %v3825_v19  ;;  %v7733_v10 = vsub.f32 %v3666_v31, %v3858_v55 }
 0x326   : > { %v4435_v53 = vadd.f32 %v4434_v52, %v4433_v41  ;;  %vm4201_vm12 = vcmp.lt.s32.totalorder %v4185_v61, 200 }
 0x327   : > { %9783 = vst [vmem:[#allocation40_spill] sm:$0xff] %v7731_v11  ;;  %9784 = vst [vmem:[#allocation16_spill] sm:$0xff] %v7733_v10  ;;  %v4407_v45 = vmul.f32 %v7742_v15, %v7731_v11  ;;  %v9822_v11 = vld [vmem:[#allocation20_spill] sm:$0xff] }
 0x328   : > { %v4437_v48 = vadd.f32 %v4436_v6, %v4435_v53  ;;  %v3636_v29 = vpop.xlane.xlu0 %3635  ;;  %v3669_v20 = vpop.xlane.xlu1 %3668  ;;  %v7777_v6 = vsel %vm4201_vm12, 1.0, %v9472_v0 }
 0x329   : > { %v4444_v31 = vsel %vm4256_vm7, %v4407_v45, 0.0  ;;  %9793 = vst [vmem:[#allocation45_spill] sm:$0xff] %v7777_v6 }
 0x32a   : > { %v4439_v62 = vadd.f32 %v4438_v32, %v4437_v48 }
 0x32c   : > { %v4441_v34 = vadd.f32 %v4440_v17, %v4439_v62  ;;  %v3828_v51 = vpop.xlane.xlu0 %3827 }
 0x32d   : > { %v7755_v44 = vsub.f32 %v3636_v29, %v3828_v51  ;;  %v3861_v63 = vpop.xlane.xlu1 %3860 }
 0x32e   : > { %v4443_v39 = vadd.f32 %v4442_v42, %v4441_v34  ;;  %v7758_v26 = vsub.f32 %v3669_v20, %v3861_v63  ;;  %v2573_v34 = vmax.f32 %v7696_v28, 0.0 }
 0x32f   : > { %9788 = vst [vmem:[#allocation49_spill] sm:$0xff] %v7755_v44  ;;  %v4408_v2 = vmul.f32 %v7752_v50, %v7755_v44 }
 0x330   : > { %9789 = vst [vmem:[#allocation17_spill] sm:$0xff] %v7758_v26  ;;  %v4445_v16 = vadd.f32 %v4444_v31, %v4443_v39  ;;  %v3639_v14 = vpop.xlane.xlu0 %3638 }
 0x331   : > { %v4446_v5 = vsel %vm4256_vm7, %v4408_v2, 0.0  ;;  %v3672_v27 = vpop.xlane.xlu1 %3671  ;;  %v5243_v3 = vpop.eup %5242 }
 0x332   : > { %v4447_v57 = vadd.f32 %v4446_v5, %v4445_v16  ;;  %v2733_v13 = vadd.f32 1.0, %v5243_v3  ;;  %v4186_v5 = vadd.s32 %v7658_v7, %v4169_v56 }
 0x334   : > { %v3831_v30 = vpop.xlane.xlu0 %3830  ;;  %5244 = vlog2.f32 %v2733_v13  ;;  %vm4202_vm14 = vcmp.lt.s32.totalorder %v4186_v5, 200 }
 0x335   : > { %v7768_v59 = vsub.f32 %v3639_v14, %v3831_v30  ;;  %v3864_v22 = vpop.xlane.xlu1 %3863  ;;  %v4171_v30 = vadd.s32 96, %v9770_v33 }
 0x336   : > { %v7771_v19 = vsub.f32 %v3672_v27, %v3864_v22  ;;  %v4170_v27 = vadd.s32 88, %v9770_v33 }
 0x337   : > { %9791 = vst [vmem:[#allocation15_spill] sm:$0xff] %v7768_v59  ;;  %v4409_v55 = vmul.f32 %v7766_v40, %v7768_v59 }
 0x338   : > { %9792 = vst [vmem:[#allocation46_spill] sm:$0xff] %v7771_v19  ;;  %v4187_v61 = vadd.s32 %v7658_v7, %v4170_v27  ;;  %v9827_v19 = vld [vmem:[#allocation21_spill] sm:$0xff] }
 0x339   : > { %v3642_v23 = vpop.xlane.xlu0 %3641  ;;  %v4448_v41 = vsel %vm4256_vm7, %v4409_v55, 0.0 }
 0x33a   : > { %v3675_v52 = vpop.xlane.xlu1 %3674  ;;  %v4449_v53 = vadd.f32 %v4448_v41, %v4447_v57  ;;  %vm4203_vm15 = vcmp.lt.s32.totalorder %v4187_v61, 200 }
 0x33d   : > { %v3834_v18 = vpop.xlane.xlu0 %3833 }
 0x33e   : > { %v7779_v48 = vsub.f32 %v3642_v23, %v3834_v18  ;;  %v3867_v29 = vpop.xlane.xlu1 %3866 }
 0x33f   : > { %v7781_v32 = vsub.f32 %v3675_v52, %v3867_v29 }
 0x340   : > { %9794 = vst [vmem:[#allocation34_spill] sm:$0xff] %v7779_v48  ;;  %v4410_v4 = vmul.f32 %v7777_v6, %v7779_v48 }
 0x341   : > { %9795 = vst [vmem:[#allocation22_spill] sm:$0xff] %v7781_v32  ;;  %v3837_v20 = vpop.xlane.xlu0 %3836  ;;  %v5245_v45 = vpop.eup %5244 }
 0x342   : > { %v4450_v49 = vsel %vm4256_vm7, %v4410_v4, 0.0  ;;  %v3678_v62 = vpop.xlane.xlu1 %3677  ;;  %v2766_v51 = vmul.f32 0.6931472, %v5245_v45  ;;  %v4188_v4 = vadd.s32 %v7658_v7, %v4171_v30 }
 0x343   : > { %v4451_v17 = vadd.f32 %v4450_v49, %v4449_v53  ;;  %v7824_v53 = vsel %vm4202_vm14, 1.0, %v9472_v0  ;;  %v4172_v49 = vadd.s32 104, %v9770_v33 }
 0x344   : > { %v2829_v39 = vadd.f32 %v2766_v51, %v2573_v34  ;;  %9800 = vst [vmem:[#allocation33_spill] sm:$0xff] %v7824_v53  ;;  %vm4204_vm1 = vcmp.lt.s32.totalorder %v4188_v4, 200 }
 0x345   : > { %v3840_v42 = vpop.xlane.xlu0 %3839 }
 0x346   : > { %v2893_v2 = vsel %vm2861_vm13, %v7696_v28, %v2829_v39 }
 0x347   : > { %v3870_v63 = vpop.xlane.xlu1 %3869  ;;  %2973 = vst.msk [vmem:[%s7792_s15] sm:$0xff] %vm1432_vm0, %v2893_v2  ;;  %5246 = vrcp.f32 %v2893_v2 }
 0x348   : > { %v7794_v31 = vsub.f32 %v3678_v62, %v3870_v63  ;;  %5248 = vlog2.f32 %v2893_v2 }
 0x34a   : > { %9796 = vst [vmem:[#allocation24_spill] sm:$0xff] %v7794_v31  ;;  %v7798_v16 = vpop.xlane.xlu0 %3842  ;;  %v2430_v21 = vpop.f32.mrf.mxu1  ;;  %v9825_v31 = vld [vmem:[#allocation75_spill] sm:$0xff] }
 0x34b   : > { %v3681_v14 = vpop.xlane.xlu1 %3680  ;;  %v7805_v57 = vadd.f32 %v2430_v21, %v7666_v54 }
 0x34c   : > { %v2432_v13 = vpop.f32.mrf.mxu1 }
 0x34d   : > { %9797 = vst [vmem:[#allocation18_spill] sm:$0xff] %v7805_v57  ;;  %2965 = vst.msk [vmem:[%s7679_s26 + $0x40] sm:$0xff] %vm1432_vm0, %v7805_v57  ;;  %v7814_v22 = vadd.f32 %v2432_v13, %v7682_v24  ;;  %v4189_v13 = vadd.s32 %v7658_v7, %v4172_v49 }
 0x34e   : > { %v7807_v3 = vpop.xlane.xlu0 %3845  ;;  %v2436_v23 = vpop.f32.mrf.mxu1 }
 0x34f   : > { %v3873_v28 = vpop.xlane.xlu1 %3872  ;;  %v2613_v41 = vand.u32 2147483647, %v7814_v22  ;;  %v7821_v52 = vadd.f32 %v2436_v23, %v7666_v54  ;;  %vm4205_vm2 = vcmp.lt.s32.totalorder %v4189_v13, 200  ;;  %vm2869_vm3 = vcmp.gt.f32.partialorder %v7814_v22, 20.0 }
 0x350   : > { %v7817_v55 = vsub.f32 %v3681_v14, %v3873_v28  ;;  %v2438_v29 = vpop.f32.mrf.mxu1 }
 0x351   : > { %9799 = vst [vmem:[#allocation31_spill] sm:$0xff] %v7821_v52  ;;  %v2645_v62 = vsub.f32 0.0, %v2613_v41  ;;  %2966 = vst.msk [vmem:[%s7679_s26 + $0x48] sm:$0xff] %vm1432_vm0, %v7821_v52  ;;  %v7834_v51 = vadd.f32 %v2438_v29, %v7682_v24  ;;  %v7850_v41 = vld [vmem:[%s5933_s22] sm:$0xff] }
 0x352   : > { %9798 = vst [vmem:[#allocation28_spill] sm:$0xff] %v7817_v55  ;;  %v3645_v18 = vpop.xlane.xlu0 %3644  ;;  %v2442_v63 = vpop.f32.mrf.mxu1  ;;  %9805 = vst [vmem:[#allocation56_spill] sm:$0xff] %v7850_v41 }
 0x353   : > { %v7831_v45 = vsub.f32 %v3645_v18, %v3837_v20  ;;  %v3684_v34 = vpop.xlane.xlu1 %3683  ;;  %v2685_v56 = vmul.f32 1.442695, %v2645_v62  ;;  %v2614_v14 = vand.u32 2147483647, %v7834_v51  ;;  %v7840_v5 = vadd.f32 %v2442_v63, %v7666_v54 }
 0x354   : > { %v7843_v20 = vsel %vm4203_vm15, 1.0, %v9472_v0  ;;  %v2444_v21 = vpop.f32.mrf.mxu1  ;;  %v5247_v23 = vpop.eup %5246  ;;  %v2989_v18 = vsub.f32 %v7850_v41, %v7686_v25  ;;  %vm2870_vm4 = vcmp.gt.f32.partialorder %v7834_v51, 20.0 }
 0x355   : > { %9801 = vst [vmem:[#allocation44_spill] sm:$0xff] %v7831_v45  ;;  %v4411_v39 = vmul.f32 %v7824_v53, %v7831_v45  ;;  %9802 = vst [vmem:[#allocation52_spill] sm:$0xff] %v7840_v5  ;;  %5250 = vpow2.f32 %v2685_v56  ;;  %v2646_v30 = vsub.f32 0.0, %v2614_v14  ;;  %v7860_v49 = vadd.f32 %v2444_v21, %v7682_v24  ;;  %v5249_v6 = vpop.eup %5248 }
 0x356   : > { %9803 = vst [vmem:[#allocation51_spill] sm:$0xff] %v7843_v20  ;;  %v3648_v27 = vpop.xlane.xlu0 %3647  ;;  %2967 = vst.msk [vmem:[%s7679_s26 + $0x50] sm:$0xff] %vm1432_vm0, %v7840_v5  ;;  %v2448_v63 = vpop.f32.mrf.mxu1  ;;  %v8230_v5 = vld [vmem:[%s5933_s22 + $0x18] sm:$0xff] }
 0x357   : > { %v4452_v2 = vsel %vm4256_vm7, %v4411_v39, 0.0  ;;  %v7847_v28 = vsub.f32 %v3648_v27, %v3840_v42  ;;  %v3876_v61 = vpop.xlane.xlu1 %3875  ;;  %v2687_v42 = vmul.f32 1.442695, %v2646_v30  ;;  %v7865_v39 = vadd.f32 %v2448_v63, %v7666_v54 }
 0x358   : > { %v4453_v29 = vadd.f32 %v4452_v2, %v4451_v17  ;;  %v7857_v62 = vsub.f32 %v3684_v34, %v3876_v61  ;;  %v2615_v25 = vand.u32 2147483647, %v7860_v49  ;;  %v7870_v17 = vsel %vm4204_vm1, 1.0, %v9472_v0  ;;  %v2450_v34 = vpop.f32.mrf.mxu1 }
 0x359   : > { %9804 = vst [vmem:[#allocation47_spill] sm:$0xff] %v7847_v28  ;;  %v4412_v56 = vmul.f32 %v7843_v20, %v7847_v28  ;;  %9807 = vst [vmem:[#allocation55_spill] sm:$0xff] %v7865_v39  ;;  %v3022_v27 = vmul.f32 %v5247_v23, %v2989_v18  ;;  %5252 = vpow2.f32 %v2687_v42  ;;  %v7880_v4 = vadd.f32 %v2450_v34, %v7682_v24 }
 0x35a   : > { %9806 = vst [vmem:[#allocation58_spill] sm:$0xff] %v7857_v62  ;;  %9808 = vst [vmem:[#allocation59_spill] sm:$0xff] %v7870_v17  ;;  %v3651_v14 = vpop.xlane.xlu0 %3650  ;;  %v2647_v63 = vsub.f32 0.0, %v2615_v25  ;;  %v2454_v0 = vpop.f32.mrf.mxu1  ;;  %vm2871_vm5 = vcmp.gt.f32.partialorder %v7860_v49, 20.0 }
 0x35b   : > { %v4454_v21 = vsel %vm4256_vm7, %v4412_v56, 0.0  ;;  %2968 = vst.msk [vmem:[%s7679_s26 + $0x58] sm:$0xff] %vm1432_vm0, %v7865_v39  ;;  %v7877_v2 = vsub.f32 %v3651_v14, %v7798_v16  ;;  %v3687_v30 = vpop.xlane.xlu1 %3686  ;;  %v7885_v18 = vadd.f32 %v2454_v0, %v7666_v54  ;;  %v2616_v56 = vand.u32 2147483647, %v7880_v4 }
 0x35c   : > { %v4455_v61 = vadd.f32 %v4454_v21, %v4453_v29  ;;  %v2689_v42 = vmul.f32 1.442695, %v2647_v63  ;;  %v9811_v16 = vmov 0.0   ;;  %v2456_v13 = vpop.f32.mrf.mxu1  ;;  %v3085_v29 = vmul.f32 %v3022_v27, %v3022_v27 }
 0x35d   : > { %9809 = vst [vmem:[#allocation63_spill] sm:$0xff] %v7877_v2  ;;  %v4413_v23 = vmul.f32 %v7870_v17, %v7877_v2  ;;  %9810 = vst [vmem:[#allocation64_spill] sm:$0xff] %v7885_v18  ;;  %v7889_v14 = vsel %vm4205_vm2, 1.0, %v9811_v16  ;;  %v7899_v0 = vadd.f32 %v2456_v13, %v7682_v24  ;;  %v2648_v17 = vsub.f32 0.0, %v2616_v56 }
 0x35e   : > { %9812 = vst [vmem:[#allocation65_spill] sm:$0xff] %v7889_v14  ;;  %v3654_v20 = vpop.xlane.xlu0 %3653  ;;  %2969 = vst.msk [vmem:[%s7679_s26 + $0x60] sm:$0xff] %vm1432_vm0, %v7885_v18  ;;  %5254 = vpow2.f32 %v2689_v42  ;;  %v2460_v53 = vpop.f32.mrf.mxu1  ;;  %v3117_v42 = vmul.f32 -0.5, %v3085_v29  ;;  %vm2872_vm6 = vcmp.gt.f32.partialorder %v7880_v4, 20.0 }
 0x35f   : > { %v4456_v25 = vsel %vm4256_vm7, %v4413_v23, 0.0  ;;  %v7896_v34 = vsub.f32 %v3654_v20, %v7807_v3  ;;  %v3879_v21 = vpop.xlane.xlu1 %3878  ;;  %v2617_v23 = vand.u32 2147483647, %v7899_v0  ;;  %v2691_v40 = vmul.f32 1.442695, %v2648_v17 }
 0x360   : > { %v4457_v63 = vadd.f32 %v4456_v25, %v4455_v61  ;;  %v7901_v16 = vsub.f32 %v3687_v30, %v3879_v21  ;;  %v7907_v3 = vadd.f32 %v2460_v53, %v7666_v54  ;;  %v2462_v13 = vpop.f32.mrf.mxu1  ;;  %v2585_v38 = vmax.f32 %v7899_v0, 0.0 }
 0x361   : > { %9813 = vst [vmem:[#allocation57_spill] sm:$0xff] %v7896_v34  ;;  %v4414_v27 = vmul.f32 %v7889_v14, %v7896_v34  ;;  %v2388_v20 = vpop.f32.mrf.mxu0  ;;  %v2649_v30 = vsub.f32 0.0, %v2617_v23  ;;  %v7914_v21 = vadd.f32 %v2462_v13, %v7682_v24  ;;  %5256 = vpow2.f32 %v2691_v40 }
 0x362   : > { %9814 = vst [vmem:[#allocation54_spill] sm:$0xff] %v7901_v16  ;;  %9815 = vst [vmem:[#allocation66_spill] sm:$0xff] %v7907_v3  ;;  %v7911_v56 = vadd.f32 %v2388_v20, %v7666_v54  ;;  %v5251_v14 = vpop.eup %5250  ;;  %v3150_v34 = vmul.f32 0.6931472, %v5249_v6  ;;  %vm2873_vm8 = vcmp.gt.f32.partialorder %v7899_v0, 20.0 }
 0x363   : > { %v4458_v61 = vsel %vm4256_vm7, %v4414_v27, 0.0  ;;  %v3690_v25 = vpop.xlane.xlu1 %3689  ;;  %2970 = vst.msk [vmem:[%s7679_s26 + $0x68] sm:$0xff] %vm1432_vm0, %v7907_v3  ;;  %v2390_v53 = vpop.f32.mrf.mxu0  ;;  %v2741_v7 = vadd.f32 1.0, %v5251_v14  ;;  %v2693_v27 = vmul.f32 1.442695, %v2649_v30  ;;  %vm2874_vm9 = vcmp.gt.f32.partialorder %v7914_v21, 20.0 }
 0x364   : > { %v7916_v17 = vadd.f32 %v4458_v61, %v4457_v63  ;;  %v2466_v29 = vpop.f32.mrf.mxu1  ;;  %2958 = vst.msk [vmem:[%s7679_s26 + $0x8] sm:$0xff] %vm1432_vm0, %v7911_v56  ;;  %v2618_v23 = vand.u32 2147483647, %v7914_v21  ;;  %v7926_v20 = vadd.f32 %v2390_v53, %v7682_v24  ;;  %v3213_v13 = vsub.f32 %v3117_v42, %v3150_v34 }
 0x365   : > { %v2394_v40 = vpop.f32.mrf.mxu0  ;;  %5258 = vlog2.f32 %v2741_v7  ;;  %v7929_v61 = vadd.f32 %v2466_v29, %v7666_v54 }
 0x366   : > { %9816 = vst [vmem:[#allocation68_spill] sm:$0xff] %v7916_v17  ;;  %v2468_v63 = vpop.f32.mrf.mxu1  ;;  %v7932_v6 = vadd.f32 %v2394_v40, %v7666_v54  ;;  %v5253_v17 = vpop.eup %5252  ;;  %5260 = vpow2.f32 %v2693_v27  ;;  %v2650_v53 = vsub.f32 0.0, %v2618_v23  ;;  %v2606_v34 = vand.u32 2147483647, %v7926_v20 }
 0x367   : > { %9817 = vst [vmem:[#allocation61_spill] sm:$0xff] %v7929_v61  ;;  %v3882_v14 = vpop.xlane.xlu1 %3881  ;;  %v7935_v30 = vadd.f32 %v2468_v63, %v7682_v24  ;;  %v2396_v42 = vpop.f32.mrf.mxu0  ;;  %v2742_v2 = vadd.f32 1.0, %v5253_v17  ;;  %v4830_v33 = vadd.f32 -0.9189385, %v3213_v13  ;;  %2971 = vst.msk [vmem:[%s7679_s26 + $0x70] sm:$0xff] %vm1432_vm0, %v7929_v61  ;;  %vm2862_vm10 = vcmp.gt.f32.partialorder %v7926_v20, 20.0 }
 0x368   : > { %v2472_v37 = vpop.f32.mrf.mxu1  ;;  %2959 = vst.msk [vmem:[%s7679_s26 + $0x10] sm:$0xff] %vm1432_vm0, %v7932_v6  ;;  %v2695_v7 = vmul.f32 1.442695, %v2650_v53  ;;  %v2638_v29 = vsub.f32 0.0, %v2606_v34  ;;  %v7944_v40 = vsub.f32 %v3690_v25, %v3882_v14  ;;  %v7953_v25 = vadd.f32 %v2396_v42, %v7682_v24 }
 0x369   : > { %5262 = vlog2.f32 %v2742_v2  ;;  %v3277_v27 = vsel %vm1432_vm0, %v4830_v33, 0.0  ;;  %v2619_v23 = vand.u32 2147483647, %v7935_v30  ;;  %v2400_v28 = vpop.f32.mrf.mxu0  ;;  %v7956_v2 = vadd.f32 %v2472_v37, %v7666_v54 }
 0x36a   : > { %9818 = vst [vmem:[#allocation53_spill] sm:$0xff] %v7944_v40  ;;  %v2474_v63 = vpop.f32.mrf.mxu1  ;;  %5264 = vpow2.f32 %v2695_v7  ;;  %v2671_v17 = vmul.f32 1.442695, %v2638_v29  ;;  %3278 = vadd.xlane.f32.xlu0 %v3277_v27  ;;  %v7959_v33 = vadd.f32 %v2400_v28, %v7666_v54  ;;  %v2607_v50 = vand.u32 2147483647, %v7953_v25 }
 0x36b   : > { %v7948_v45 = vpop.xlane.xlu1 %3884  ;;  %v5255_v53 = vpop.eup %5254  ;;  %v2651_v34 = vsub.f32 0.0, %v2619_v23  ;;  %9819 = vst [vmem:[#allocation60_spill] sm:$0xff] %v7956_v2  ;;  %v7962_v7 = vadd.f32 %v2474_v63, %v7682_v24  ;;  %2972 = vst.msk [vmem:[%s7679_s26 + $0x78] sm:$0xff] %vm1432_vm0, %v7956_v2  ;;  %v2581_v40 = vmax.f32 %v7814_v22, 0.0  ;;  %vm2875_vm11 = vcmp.gt.f32.partialorder %v7935_v30, 20.0 }
 0x36c   : > { %v7950_v13 = vpop.f32.mrf.mxu1  ;;  %v2743_v14 = vadd.f32 1.0, %v5255_v53  ;;  %5266 = vpow2.f32 %v2671_v17  ;;  %2960 = vst.msk [vmem:[%s7679_s26 + $0x18] sm:$0xff] %vm1432_vm0, %v7959_v33  ;;  %v2402_v37 = vpop.f32.mrf.mxu0  ;;  %v2639_v63 = vsub.f32 0.0, %v2607_v50  ;;  %vm2863_vm12 = vcmp.gt.f32.partialorder %v7953_v25, 20.0 }
 0x36d   : > { %v2697_v27 = vmul.f32 1.442695, %v2651_v34  ;;  %v2620_v17 = vand.u32 2147483647, %v7962_v7  ;;  %v7977_v34 = vadd.f32 %v2402_v37, %v7682_v24  ;;  %vm2876_vm13 = vcmp.gt.f32.partialorder %v7962_v7, 20.0 }
 0x36e   : > { %v2480_v29 = vpop.f32.mrf.mxu1  ;;  %5268 = vlog2.f32 %v2743_v14  ;;  %v5257_v23 = vpop.eup %5256  ;;  %v2673_v58 = vmul.f32 1.442695, %v2639_v63 }
 0x36f   : > { %v7971_v42 = vpop.xlane.xlu1 %3887  ;;  %5270 = vpow2.f32 %v2697_v27  ;;  %v2744_v53 = vadd.f32 1.0, %v5257_v23  ;;  %v7980_v15 = vadd.f32 %v2480_v29, %v7682_v24  ;;  %v2652_v9 = vsub.f32 0.0, %v2620_v17 }
 0x370   : > { %v7973_v28 = vpop.f32.mrf.mxu1  ;;  %v2608_v50 = vand.u32 2147483647, %v7977_v34  ;;  %vm2864_vm14 = vcmp.gt.f32.partialorder %v7977_v34, 20.0 }
 0x371   : > { %5272 = vlog2.f32 %v2744_v53  ;;  %v2699_v37 = vmul.f32 1.442695, %v2652_v9  ;;  %v2621_v17 = vand.u32 2147483647, %v7980_v15  ;;  %vm2877_vm15 = vcmp.gt.f32.partialorder %v7980_v15, 20.0 }
 0x372   : > { %v2486_v60 = vpop.f32.mrf.mxu1  ;;  %v5259_v14 = vpop.eup %5258  ;;  %5274 = vpow2.f32 %v2673_v58  ;;  %v2640_v63 = vsub.f32 0.0, %v2608_v50  ;;  %v2582_v50 = vmax.f32 %v7834_v51, 0.0 }
 0x373   : > { %v7982_v48 = vpop.xlane.xlu1 %3890  ;;  %v5261_v23 = vpop.eup %5260  ;;  %v2782_v59 = vmul.f32 0.6931472, %v5259_v14  ;;  %v7989_v29 = vadd.f32 %v2486_v60, %v7682_v24  ;;  %5276 = vpow2.f32 %v2699_v37  ;;  %v2653_v58 = vsub.f32 0.0, %v2621_v17 }
 0x374   : > { %v7986_v27 = vpop.f32.mrf.mxu1  ;;  %v2745_v16 = vadd.f32 1.0, %v5261_v23  ;;  %v2675_v14 = vmul.f32 1.442695, %v2640_v63 }
 0x375   : > { %v2837_v46 = vadd.f32 %v2782_v59, %v2581_v40  ;;  %v2622_v59 = vand.u32 2147483647, %v7989_v29  ;;  %v2701_v37 = vmul.f32 1.442695, %v2653_v58  ;;  %v8246_v39 = vadd.f32 %v7986_v27, %v7666_v54 }
 0x376   : > { %v2492_v12 = vpop.f32.mrf.mxu1  ;;  %v5263_v43 = vpop.eup %5262  ;;  %5278 = vlog2.f32 %v2745_v16  ;;  %vm2878_vm1 = vcmp.gt.f32.partialorder %v7989_v29, 20.0 }
 0x377   : > { %v7992_v53 = vpop.xlane.xlu1 %3893  ;;  %v5265_v60 = vpop.eup %5264  ;;  %v7998_v23 = vsel %vm2869_vm3, %v7814_v22, %v2837_v46  ;;  %v2784_v1 = vmul.f32 0.6931472, %v5263_v43  ;;  %5280 = vpow2.f32 %v2675_v14  ;;  %v2654_v17 = vsub.f32 0.0, %v2622_v59  ;;  %9849 = vst [vmem:[#allocation89_spill] sm:$0xff] %v8246_v39 }
 0x378   : > { %9820 = vst [vmem:[#allocation62_spill] sm:$0xff] %v7992_v53  ;;  %v7995_v9 = vpop.f32.mrf.mxu1  ;;  %9821 = vst [vmem:[#allocation67_spill] sm:$0xff] %v7998_v23  ;;  %v2746_v40 = vadd.f32 1.0, %v5265_v60  ;;  %v8006_v44 = vadd.f32 %v2492_v12, %v7682_v24  ;;  %v9823_v60 = vld [vmem:[#allocation69_spill] sm:$0xff]  ;;  %v2583_v14 = vmax.f32 %v7860_v49, 0.0 }
 0x379   : > { %2981 = vst.msk [vmem:[%s7792_s15 + $0x40] sm:$0xff] %vm1432_vm0, %v7998_v23  ;;  %v5267_v16 = vpop.eup %5266  ;;  %v2838_v63 = vadd.f32 %v2784_v1, %v2582_v50  ;;  %v3403_v58 = vsub.f32 %v9823_v60, %v9822_v11  ;;  %v2703_v59 = vmul.f32 1.442695, %v2654_v17 }
 0x37a   : > { %v2498_v53 = vpop.f32.mrf.mxu1  ;;  %5282 = vlog2.f32 %v2746_v40  ;;  %v2734_v43 = vadd.f32 1.0, %v5267_v16  ;;  %v2406_v22 = vpop.f32.mrf.mxu0  ;;  %v2623_v40 = vand.u32 2147483647, %v8006_v44  ;;  %vm2879_vm2 = vcmp.gt.f32.partialorder %v8006_v44, 20.0 }
 0x37b   : > { %v3693_v46 = vpop.xlane.xlu1 %3692  ;;  %v5269_v55 = vpop.eup %5268  ;;  %v8014_v1 = vsel %vm2870_vm4, %v7834_v51, %v2838_v63  ;;  %5284 = vpow2.f32 %v2701_v37  ;;  %v3451_v47 = vmul.f32 %v9825_v31, %v3403_v58  ;;  %v3739_v51 = vmul.f32 -0.5, %v9823_v60 }
 0x37c   : > { %v8009_v62 = vpop.f32.mrf.mxu1  ;;  %9824 = vst [vmem:[#allocation70_spill] sm:$0xff] %v8014_v1  ;;  %v5271_v12 = vpop.eup %5270  ;;  %2982 = vst.msk [vmem:[%s7792_s15 + $0x48] sm:$0xff] %vm1432_vm0, %v8014_v1  ;;  %v2786_v50 = vmul.f32 0.6931472, %v5269_v55  ;;  %5286 = vlog2.f32 %v2734_v43  ;;  %v8023_v32 = vsub.f32 %v3693_v46, %v7948_v45  ;;  %v2655_v37 = vsub.f32 0.0, %v2623_v40 }
 0x37d   : > { %v2747_v11 = vadd.f32 1.0, %v5271_v12  ;;  %v8027_v36 = vadd.f32 %v2498_v53, %v7682_v24  ;;  %v2408_v55 = vpop.f32.mrf.mxu0  ;;  %v3404_v31 = vsub.f32 %v9828_v35, %v9827_v19  ;;  %v2584_v45 = vmax.f32 %v7880_v4, 0.0 }
 0x37e   : > { %v2504_v16 = vpop.f32.mrf.mxu1  ;;  %9826 = vst [vmem:[#allocation71_spill] sm:$0xff] %v8023_v32  ;;  %v2839_v63 = vadd.f32 %v2786_v50, %v2583_v14  ;;  %v5273_v43 = vpop.eup %5272  ;;  %v8036_v46 = vadd.f32 %v2406_v22, %v7666_v54  ;;  %v2705_v12 = vmul.f32 1.442695, %v2655_v37  ;;  %v9830_v32 = vld [vmem:[#allocation76_spill] sm:$0xff] }
 0x37f   : > { %5288 = vlog2.f32 %v2747_v11  ;;  %v5275_v58 = vpop.eup %5274  ;;  %v2788_v14 = vmul.f32 0.6931472, %v5273_v43  ;;  %v2624_v40 = vand.u32 2147483647, %v8027_v36  ;;  %v3696_v22 = vpop.xlane.xlu1 %3695  ;;  %v3483_v11 = vmul.f32 %v3451_v47, %v3451_v47 }
 0x380   : > { %v8029_v17 = vpop.f32.mrf.mxu1  ;;  %v8039_v53 = vsel %vm2871_vm5, %v7860_v49, %v2839_v63  ;;  %5290 = vpow2.f32 %v2703_v59  ;;  %v2735_v19 = vadd.f32 1.0, %v5275_v58  ;;  %2961 = vst.msk [vmem:[%s7679_s26 + $0x20] sm:$0xff] %vm1432_vm0, %v8036_v46  ;;  %v3452_v26 = vmul.f32 %v9830_v32, %v3404_v31  ;;  %v5277_v49 = vpop.eup %5276 }
 0x381   : > { %9829 = vst [vmem:[#allocation73_spill] sm:$0xff] %v8039_v53  ;;  %2983 = vst.msk [vmem:[%s7792_s15 + $0x50] sm:$0xff] %vm1432_vm0, %v8039_v53  ;;  %v2840_v63 = vadd.f32 %v2788_v14, %v2584_v45  ;;  %5292 = vpow2.f32 %v2705_v12  ;;  %v2412_v59 = vpop.f32.mrf.mxu0  ;;  %v3771_v43 = vmul.f32 %v3739_v51, %v9823_v60  ;;  %v2748_v10 = vadd.f32 1.0, %v5277_v49 }
 0x382   : > { %v8041_v50 = vpop.f32.mrf.mxu1  ;;  %5294 = vlog2.f32 %v2735_v19  ;;  %v2656_v8 = vsub.f32 0.0, %v2624_v40  ;;  %v8060_v31 = vadd.f32 %v2408_v55, %v7682_v24  ;;  %v8063_v45 = vsub.f32 %v3696_v22, %v7971_v42 }
 0x383   : > { %v5279_v58 = vpop.eup %5278  ;;  %v8057_v47 = vsel %vm2872_vm6, %v7880_v4, %v2840_v63  ;;  %v8071_v51 = vadd.f32 %v2504_v16, %v7682_v24  ;;  %v8074_v4 = vadd.f32 %v2412_v59, %v7666_v54  ;;  %v3484_v12 = vmul.f32 %v3452_v26, %v3452_v26  ;;  %v2414_v3 = vpop.f32.mrf.mxu0 }
 0x384   : > { %v8052_v37 = vpop.f32.mrf.mxu1  ;;  %9832 = vst [vmem:[#allocation13_spill] sm:$0xff] %v8057_v47  ;;  %v2790_v32 = vmul.f32 0.6931472, %v5279_v58  ;;  %9833 = vst [vmem:[#allocation14_spill] sm:$0xff] %v8063_v45  ;;  %v2707_v60 = vmul.f32 1.442695, %v2656_v8  ;;  %v5281_v19 = vpop.eup %5280  ;;  %5296 = vlog2.f32 %v2748_v10 }
 0x385   : > { %9831 = vst [vmem:[#allocation74_spill] sm:$0xff] %v8052_v37  ;;  %2984 = vst.msk [vmem:[%s7792_s15 + $0x58] sm:$0xff] %vm1432_vm0, %v8057_v47  ;;  %v2609_v42 = vand.u32 2147483647, %v8060_v31  ;;  %v8079_v22 = vmul.f32 -0.5, %v3483_v11  ;;  %v2736_v8 = vadd.f32 1.0, %v5281_v19 }
 0x386   : > { %v8065_v14 = vpop.f32.mrf.mxu1  ;;  %v2841_v55 = vadd.f32 %v2790_v32, %v2585_v38  ;;  %5298 = vpow2.f32 %v2707_v60  ;;  %2962 = vst.msk [vmem:[%s7679_s26 + $0x28] sm:$0xff] %vm1432_vm0, %v8074_v4  ;;  %v3740_v26 = vmul.f32 -0.5, %v9828_v35  ;;  %v2586_v10 = vmax.f32 %v7914_v21, 0.0 }
 0x387   : > { %v5283_v49 = vpop.eup %5282  ;;  %v2641_v59 = vsub.f32 0.0, %v2609_v42  ;;  %v2625_v58 = vand.u32 2147483647, %v8071_v51  ;;  %v4924_v32 = vadd.f32 -0.9189385, %v3771_v43  ;;  %v8096_v60 = vmul.f32 -0.5, %v3484_v12 }
 0x388   : > { %v8077_v40 = vpop.f32.mrf.mxu1  ;;  %v5285_v16 = vpop.eup %5284  ;;  %v8087_v38 = vsel %vm2873_vm8, %v7899_v0, %v2841_v55  ;;  %v2792_v63 = vmul.f32 0.6931472, %v5283_v49  ;;  %5300 = vlog2.f32 %v2736_v8  ;;  %v2574_v42 = vmax.f32 %v7926_v20, 0.0  ;;  %v9837_v12 = vld [vmem:[#allocation78_spill] sm:$0xff] }
 0x389   : > { %9834 = vst [vmem:[#allocation20_spill] sm:$0xff] %v8077_v40  ;;  %9835 = vst [vmem:[#allocation69_spill] sm:$0xff] %v8087_v38  ;;  %v5287_v19 = vpop.eup %5286  ;;  %v2749_v0 = vadd.f32 1.0, %v5285_v16  ;;  %v2677_v55 = vmul.f32 1.442695, %v2641_v59  ;;  %v2657_v61 = vsub.f32 0.0, %v2625_v58  ;;  %v3699_v40 = vpop.xlane.xlu1 %3698  ;;  %v3579_v8 = vsub.f32 %v8079_v22, %v9837_v12 }
 0x38a   : > { %v8090_v11 = vpop.f32.mrf.mxu1  ;;  %2985 = vst.msk [vmem:[%s7792_s15 + $0x60] sm:$0xff] %vm1432_vm0, %v8087_v38  ;;  %v2842_v45 = vadd.f32 %v2792_v63, %v2586_v10  ;;  %v2768_v49 = vmul.f32 0.6931472, %v5287_v19  ;;  %v3772_v16 = vmul.f32 %v3740_v26, %v9828_v35  ;;  %v2587_v59 = vmax.f32 %v7935_v30, 0.0 }
 0x38b   : > { %5302 = vpow2.f32 %v2677_v55  ;;  %v2709_v19 = vmul.f32 1.442695, %v2657_v61  ;;  %v8126_v61 = vadd.f32 %v8041_v50, %v7682_v24  ;;  %vm2865_vm3 = vcmp.gt.f32.partialorder %v8060_v31, 20.0 }
 0x38c   : > { %v8098_v2 = vpop.f32.mrf.mxu1  ;;  %v5289_v37 = vpop.eup %5288  ;;  %v8103_v43 = vsel %vm2874_vm9, %v7914_v21, %v2842_v45  ;;  %v2830_v63 = vadd.f32 %v2768_v49, %v2574_v42  ;;  %5304 = vlog2.f32 %v2749_v0  ;;  %v8114_v21 = vadd.f32 %v2414_v3, %v7682_v24  ;;  %v9840_v49 = vld [vmem:[#allocation79_spill] sm:$0xff] }
 0x38d   : > { %9836 = vst [vmem:[#allocation75_spill] sm:$0xff] %v8103_v43  ;;  %v5291_v10 = vpop.eup %5290  ;;  %2986 = vst.msk [vmem:[%s7792_s15 + $0x68] sm:$0xff] %vm1432_vm0, %v8103_v43  ;;  %v2794_v58 = vmul.f32 0.6931472, %v5289_v37  ;;  %v8117_v45 = vsub.f32 %v3699_v40, %v7982_v48  ;;  %5306 = vpow2.f32 %v2709_v19  ;;  %v4925_v40 = vadd.f32 -0.9189385, %v3772_v16 }
 0x38e   : > { %v8119_v35 = vpop.f32.mrf.mxu1  ;;  %v5293_v22 = vpop.eup %5292  ;;  %v8122_v26 = vsel %vm2862_vm10, %v7926_v20, %v2830_v63  ;;  %v2750_v48 = vadd.f32 1.0, %v5291_v10  ;;  %v2610_v3 = vand.u32 2147483647, %v8114_v21  ;;  %v2575_v20 = vmax.f32 %v7953_v25, 0.0 }
 0x38f   : > { %9838 = vst [vmem:[#allocation21_spill] sm:$0xff] %v8117_v45  ;;  %v2843_v55 = vadd.f32 %v2794_v58, %v2587_v59  ;;  %v5295_v37 = vpop.eup %5294  ;;  %2974 = vst.msk [vmem:[%s7792_s15 + $0x8] sm:$0xff] %vm1432_vm0, %v8122_v26  ;;  %v3580_v50 = vsub.f32 %v8096_v60, %v9840_v49  ;;  %v2751_v63 = vadd.f32 1.0, %v5293_v22  ;;  %v2626_v58 = vand.u32 2147483647, %v8126_v61 }
 0x390   : > { %v2770_v42 = vmul.f32 0.6931472, %v5295_v37  ;;  %v2642_v59 = vsub.f32 0.0, %v2610_v3  ;;  %v8143_v10 = vpop.f32.mrf.mxu1  ;;  %v4892_v16 = vadd.f32 -0.9189385, %v3579_v8  ;;  %v8148_v37 = vsel %vm1432_vm0, %v4924_v32, 0.0 }
 0x391   : > { %v8134_v0 = vsel %vm2875_vm11, %v7935_v30, %v2843_v55  ;;  %v5297_v19 = vpop.eup %5296  ;;  %v2588_v55 = vmax.f32 %v7962_v7, 0.0  ;;  %9841 = vst [vmem:[#allocation76_spill] sm:$0xff] %v8148_v37  ;;  %5308 = vlog2.f32 %v2750_v48  ;;  %v2658_v3 = vsub.f32 0.0, %v2626_v58 }
 0x392   : > { %9839 = vst [vmem:[#allocation72_spill] sm:$0xff] %v8134_v0  ;;  %2987 = vst.msk [vmem:[%s7792_s15 + $0x70] sm:$0xff] %vm1432_vm0, %v8134_v0  ;;  %v2831_v30 = vadd.f32 %v2770_v42, %v2575_v20  ;;  %v2796_v45 = vmul.f32 0.6931472, %v5297_v19  ;;  %v2679_v22 = vmul.f32 1.442695, %v2642_v59  ;;  %v8155_v8 = vadd.f32 %v8065_v14, %v7682_v24  ;;  %v2534_v32 = vpop.f32.mrf.mxu1 }
 0x393   : > { %v5299_v60 = vpop.eup %5298  ;;  %v4893_v20 = vadd.f32 -0.9189385, %v3580_v50  ;;  %5310 = vlog2.f32 %v2751_v63  ;;  %v8161_v48 = vsel %vm1432_vm0, %v4892_v16, 0.0  ;;  %v2711_v14 = vmul.f32 1.442695, %v2658_v3  ;;  %v8175_v19 = vld [vmem:[%s5933_s22 + $0x40] sm:$0xff]  ;;  %v2418_v0 = vpop.f32.mrf.mxu0 }
 0x394   : > { %v8151_v49 = vsel %vm2863_vm12, %v7953_v25, %v2831_v30  ;;  %v2752_v12 = vadd.f32 1.0, %v5299_v60  ;;  %v2844_v42 = vadd.f32 %v2796_v45, %v2588_v55  ;;  %9842 = vst [vmem:[#allocation82_spill] sm:$0xff] %v8161_v48  ;;  %v8164_v25 = vsel %vm1432_vm0, %v4925_v40, 0.0  ;;  %v8185_v60 = vld [vmem:[%s5933_s22 + $0x50] sm:$0xff]  ;;  %v8196_v3 = vld [vmem:[%s5933_s22 + $0x58] sm:$0xff] }
 0x395   : > { %2975 = vst.msk [vmem:[%s7792_s15 + $0x10] sm:$0xff] %vm1432_vm0, %v8151_v49  ;;  %9843 = vst [vmem:[#allocation83_spill] sm:$0xff] %v8164_v25  ;;  %v5301_v59 = vpop.eup %5300  ;;  %v2627_v45 = vand.u32 2147483647, %v8155_v8  ;;  %v2576_v63 = vmax.f32 %v7977_v34, 0.0  ;;  %v8202_v55 = vadd.f32 %v7950_v13, %v7666_v54  ;;  %v8259_v27 = vadd.f32 %v2534_v32, %v7682_v24 }
 0x396   : > { %5312 = vlog2.f32 %v2752_v12  ;;  %v8169_v50 = vsel %vm2876_vm13, %v7962_v7, %v2844_v42  ;;  %v2772_v58 = vmul.f32 0.6931472, %v5301_v59  ;;  %v8172_v16 = vpop.f32.mrf.mxu1  ;;  %v8180_v12 = vld [vmem:[%s5933_s22 + $0x48] sm:$0xff]  ;;  %9846 = vst [vmem:[#allocation86_spill] sm:$0xff] %v8196_v3  ;;  %v2577_v3 = vmax.f32 %v8060_v31, 0.0 }
 0x397   : > { %9844 = vst [vmem:[#allocation84_spill] sm:$0xff] %v8169_v50  ;;  %5314 = vpow2.f32 %v2679_v22  ;;  %2988 = vst.msk [vmem:[%s7792_s15 + $0x78] sm:$0xff] %vm1432_vm0, %v8169_v50  ;;  %v8193_v22 = vsel %vm1432_vm0, %v4893_v20, 0.0  ;;  %v2659_v20 = vsub.f32 0.0, %v2627_v45  ;;  %v8207_v50 = vadd.f32 %v8090_v11, %v7682_v24  ;;  %v8225_v11 = vld [vmem:[%s5933_s22 + $0x10] sm:$0xff] }
 0x398   : > { %v5303_v40 = vpop.eup %5302  ;;  %9845 = vst [vmem:[#allocation85_spill] sm:$0xff] %v8193_v22  ;;  %v2832_v59 = vadd.f32 %v2772_v58, %v2576_v63  ;;  %9847 = vst [vmem:[#allocation87_spill] sm:$0xff] %v8202_v55  ;;  %5316 = vpow2.f32 %v2711_v14  ;;  %v8210_v63 = vld [vmem:[%s5933_s22 + $0x60] sm:$0xff]  ;;  %v8215_v58 = vld [vmem:[%s5933_s22 + $0x8] sm:$0xff]  ;;  %v8222_v45 = vpop.f32.mrf.mxu1  ;;  %vm2880_vm4 = vcmp.gt.f32.partialorder %v8027_v36, 20.0  ;;  %vm2881_vm5 = vcmp.gt.f32.partialorder %v8071_v51, 20.0 }
 0x399   : > { %v2737_v30 = vadd.f32 1.0, %v5303_v40  ;;  %v5305_v7 = vpop.eup %5304  ;;  %9848 = vst [vmem:[#allocation88_spill] sm:$0xff] %v8210_v63  ;;  %v2628_v40 = vand.u32 2147483647, %v8207_v50  ;;  %v2713_v52 = vmul.f32 1.442695, %v2659_v20 }
 0x39a   : > { %v5307_v42 = vpop.eup %5306  ;;  %v8220_v14 = vsel %vm2864_vm14, %v7977_v34, %v2832_v59  ;;  %v8239_v34 = vadd.f32 %v7973_v28, %v7666_v54  ;;  %v2798_v18 = vmul.f32 0.6931472, %v5305_v7  ;;  %v8254_v28 = vadd.f32 %v8119_v35, %v7682_v24 }
 0x39b   : > { %5318 = vlog2.f32 %v2737_v30  ;;  %2976 = vst.msk [vmem:[%s7792_s15 + $0x18] sm:$0xff] %vm1432_vm0, %v8220_v14  ;;  %v2753_v30 = vadd.f32 1.0, %v5307_v42  ;;  %v2420_v42 = vpop.f32.mrf.mxu0  ;;  %v2589_v59 = vmax.f32 %v7980_v15, 0.0  ;;  %v2660_v55 = vsub.f32 0.0, %v2628_v40 }
 0x39c   : > { %5320 = vrcp.f32 %v7998_v23  ;;  %v2629_v20 = vand.u32 2147483647, %v8254_v28  ;;  %v2590_v35 = vmax.f32 %v7989_v29, 0.0  ;;  %v8274_v7 = vadd.f32 %v7995_v9, %v7666_v54 }
 0x39d   : > { %5322 = vrcp.f32 %v8014_v1  ;;  %v2715_v40 = vmul.f32 1.442695, %v2660_v55  ;;  %v2845_v1 = vadd.f32 %v2798_v18, %v2589_v59  ;;  %v8278_v55 = vadd.f32 %v2418_v0, %v7666_v54 }
 0x39e   : > { %5324 = vrcp.f32 %v8039_v53  ;;  %v5309_v41 = vpop.eup %5308  ;;  %v2630_v53 = vand.u32 2147483647, %v8259_v27  ;;  %v2591_v18 = vmax.f32 %v8006_v44, 0.0  ;;  %v8283_v9 = vadd.f32 %v2420_v42, %v7682_v24 }
 0x39f   : > { %v8249_v13 = vpop.f32.mrf.mxu1  ;;  %5326 = vlog2.f32 %v2753_v30  ;;  %v2661_v30 = vsub.f32 0.0, %v2629_v20  ;;  %v2800_v23 = vmul.f32 0.6931472, %v5309_v41  ;;  %9850 = vst [vmem:[#allocation90_spill] sm:$0xff] %v8278_v55  ;;  %2963 = vst.msk [vmem:[%s7679_s26 + $0x30] sm:$0xff] %vm1432_vm0, %v8278_v55  ;;  %vm2866_vm6 = vcmp.gt.f32.partialorder %v8114_v21, 20.0 }
 0x3a0   : > { %5328 = vrcp.f32 %v8057_v47  ;;  %v5311_v32 = vpop.eup %5310  ;;  %v2424_v47 = vpop.f32.mrf.mxu0  ;;  %v2662_v41 = vsub.f32 0.0, %v2630_v53  ;;  %vm2882_vm8 = vcmp.gt.f32.partialorder %v8126_v61, 20.0  ;;  %vm2883_vm9 = vcmp.gt.f32.partialorder %v8155_v8, 20.0 }
 0x3a1   : > { %v8269_v57 = vpop.f32.mrf.mxu1  ;;  %5330 = vpow2.f32 %v2713_v52  ;;  %v2717_v59 = vmul.f32 1.442695, %v2661_v30  ;;  %v2802_v20 = vmul.f32 0.6931472, %v5311_v32  ;;  %v2611_v30 = vand.u32 2147483647, %v8283_v9 }
 0x3a2   : > { %5332 = vpow2.f32 %v2715_v40  ;;  %v2592_v40 = vmax.f32 %v8027_v36, 0.0  ;;  %v2426_v42 = vpop.f32.mrf.mxu0  ;;  %v2846_v53 = vadd.f32 %v2800_v23, %v2590_v35  ;;  %v2719_v37 = vmul.f32 1.442695, %v2662_v41 }
 0x3a3   : > { %v5313_v63 = vpop.eup %5312  ;;  %5334 = vrcp.f32 %v8087_v38  ;;  %v2643_v48 = vsub.f32 0.0, %v2611_v30  ;;  %v8301_v32 = vadd.f32 %v2424_v47, %v7666_v54  ;;  %v8316_v47 = vadd.f32 %v8222_v45, %v7682_v24 }
 0x3a4   : > { %v5315_v25 = vpop.eup %5314  ;;  %5336 = vrcp.f32 %v8103_v43  ;;  %v8290_v0 = vpop.f32.mrf.mxu1  ;;  %v8298_v43 = vsel %vm2877_vm15, %v7980_v15, %v2845_v1  ;;  %v2847_v1 = vadd.f32 %v2802_v20, %v2591_v18  ;;  %v8330_v20 = vadd.f32 %v8009_v62, %v7666_v54 }
 0x3a5   : > { %v2738_v52 = vadd.f32 1.0, %v5315_v25  ;;  %9851 = vst [vmem:[#allocation91_spill] sm:$0xff] %v8290_v0  ;;  %5338 = vrcp.f32 %v8122_v26  ;;  %v5317_v38 = vpop.eup %5316  ;;  %9852 = vst [vmem:[#allocation92_spill] sm:$0xff] %v8298_v43  ;;  %v2804_v25 = vmul.f32 0.6931472, %v5313_v63  ;;  %v8306_v0 = vadd.f32 %v2426_v42, %v7682_v24 }
 0x3a6   : > { %v2552_v15 = vpop.f32.mrf.mxu1  ;;  %v2681_v63 = vmul.f32 1.442695, %v2643_v48  ;;  %2964 = vst.msk [vmem:[%s7679_s26 + $0x38] sm:$0xff] %vm1432_vm0, %v8301_v32  ;;  %9856 = vst [vmem:[#allocation96_spill] sm:$0xff] %v8330_v20  ;;  %vm2884_vm10 = vcmp.gt.f32.partialorder %v8207_v50, 20.0  ;;  %vm2885_vm11 = vcmp.gt.f32.partialorder %v8254_v28, 20.0 }
 0x3a7   : > { %5340 = vlog2.f32 %v2738_v52  ;;  %v2754_v52 = vadd.f32 1.0, %v5317_v38  ;;  %v2848_v48 = vadd.f32 %v2804_v25, %v2592_v40  ;;  %v2612_v45 = vand.u32 2147483647, %v8306_v0  ;;  %v8350_v40 = vld [vmem:[%s5933_s22 + $0x20] sm:$0xff] }
 0x3a8   : > { %v5319_v22 = vpop.eup %5318  ;;  %5342 = vpow2.f32 %v2717_v59  ;;  %vm2867_vm12 = vcmp.gt.f32.partialorder %v8283_v9, 20.0  ;;  %vm2868_vm13 = vcmp.gt.f32.partialorder %v8306_v0, 20.0  ;;  %vm2886_vm14 = vcmp.gt.f32.partialorder %v8259_v27, 20.0 }
 0x3a9   : > { %5344 = vrcp.f32 %v8151_v49  ;;  %v2774_v39 = vmul.f32 0.6931472, %v5319_v22  ;;  %v8308_v23 = vpop.eup %5320  ;;  %v2910_v22 = vsel %vm2878_vm1, %v7989_v29, %v2846_v53  ;;  %v8336_v29 = vpop.f32.mrf.mxu1  ;;  %v2644_v62 = vsub.f32 0.0, %v2612_v45 }
 0x3aa   : > { %9853 = vst [vmem:[#allocation93_spill] sm:$0xff] %v8308_v23  ;;  %5346 = vrcp.f32 %v8220_v14  ;;  %v8318_v35 = vpop.eup %5322  ;;  %v8356_v53 = vadd.f32 %v8269_v57, %v7682_v24  ;;  %v2912_v25 = vsel %vm2880_vm4, %v8027_v36, %v2848_v48  ;;  %v2593_v57 = vmax.f32 %v8071_v51, 0.0 }
 0x3ab   : > { %9854 = vst [vmem:[#allocation94_spill] sm:$0xff] %v8318_v35  ;;  %5348 = vrcp.f32 %v8298_v43  ;;  %v2833_v59 = vadd.f32 %v2774_v39, %v2577_v3  ;;  %v8324_v18 = vpop.eup %5324  ;;  %v2631_v39 = vand.u32 2147483647, %v8316_v47  ;;  %v2558_v42 = vpop.f32.mrf.mxu1  ;;  %v8372_v48 = vadd.f32 %v8029_v17, %v7666_v54 }
 0x3ac   : > { %9855 = vst [vmem:[#allocation95_spill] sm:$0xff] %v8324_v18  ;;  %5350 = vpow2.f32 %v2719_v37  ;;  %v5327_v41 = vpop.eup %5326  ;;  %v2911_v37 = vsel %vm2879_vm2, %v8006_v44, %v2847_v1  ;;  %vm2887_vm15 = vcmp.gt.f32.partialorder %v8316_v47, 20.0  ;;  %vm2888_vm1 = vcmp.gt.f32.partialorder %v8356_v53, 20.0 }
 0x3ad   : > { %v8333_v30 = vsel %vm2865_vm3, %v8060_v31, %v2833_v59  ;;  %5352 = vpow2.f32 %v2681_v63  ;;  %v8338_v38 = vpop.eup %5328  ;;  %v2806_v1 = vmul.f32 0.6931472, %v5327_v41  ;;  %v2663_v43 = vsub.f32 0.0, %v2631_v39  ;;  %9860 = vst [vmem:[#allocation100_spill] sm:$0xff] %v8372_v48  ;;  %v8381_v18 = vpop.f32.mrf.mxu1 }
 0x3ae   : > { %9857 = vst [vmem:[#allocation97_spill] sm:$0xff] %v8338_v38  ;;  %5354 = vrcp.f32 %v2910_v22  ;;  %2977 = vst.msk [vmem:[%s7792_s15 + $0x20] sm:$0xff] %vm1432_vm0, %v8333_v30  ;;  %v5331_v31 = vpop.eup %5330  ;;  %v2683_v38 = vmul.f32 1.442695, %v2644_v62  ;;  %v8375_v41 = vadd.f32 %v2552_v15, %v7682_v24 }
 0x3af   : > { %5356 = vlog2.f32 %v2754_v52  ;;  %v5333_v44 = vpop.eup %5332  ;;  %v2755_v63 = vadd.f32 1.0, %v5331_v31  ;;  %v2849_v31 = vadd.f32 %v2806_v1, %v2593_v57  ;;  %9862 = vst [vmem:[#allocation102_spill] sm:$0xff] %v8381_v18 }
 0x3b0   : > { %5358 = vlog2.f32 %v2910_v22  ;;  %v8359_v59 = vpop.eup %5334  ;;  %v2756_v3 = vadd.f32 1.0, %v5333_v44  ;;  %v2632_v22 = vand.u32 2147483647, %v8356_v53  ;;  %v2633_v1 = vand.u32 2147483647, %v8375_v41 }
 0x3b1   : > { %9858 = vst [vmem:[#allocation98_spill] sm:$0xff] %v8359_v59  ;;  %5360 = vrcp.f32 %v2911_v37  ;;  %v8363_v52 = vpop.eup %5336  ;;  %v8379_v59 = vadd.f32 %v2558_v42, %v7682_v24  ;;  %vm2889_vm2 = vcmp.gt.f32.partialorder %v8375_v41, 20.0 }
 0x3b2   : > { %9859 = vst [vmem:[#allocation99_spill] sm:$0xff] %v8363_v52  ;;  %5362 = vlog2.f32 %v2911_v37  ;;  %v8367_v36 = vpop.eup %5338  ;;  %v2578_v37 = vmax.f32 %v8114_v21, 0.0  ;;  %v2664_v62 = vsub.f32 0.0, %v2632_v22  ;;  %v2721_v52 = vmul.f32 1.442695, %v2663_v43  ;;  %v9866_v43 = vld [vmem:[#allocation20_spill] sm:$0xff] }
 0x3b3   : > { %5364 = vrcp.f32 %v2912_v25  ;;  %9861 = vst [vmem:[#allocation101_spill] sm:$0xff] %v8379_v59  ;;  %v8407_v23 = vadd.f32 %v9866_v43, %v7666_v54 }
 0x3b4   : > { %v5341_v39 = vpop.eup %5340  ;;  %5366 = vlog2.f32 %v2755_v63  ;;  %v2723_v35 = vmul.f32 1.442695, %v2664_v62  ;;  %v8389_v63 = vld [vmem:[%s5933_s22 + $0x28] sm:$0xff] }
 0x3b5   : > { %v5343_v44 = vpop.eup %5342  ;;  %v2776_v45 = vmul.f32 0.6931472, %v5341_v39  ;;  %5368 = vlog2.f32 %v2756_v3  ;;  %9867 = vst [vmem:[#allocation20_spill] sm:$0xff] %v8407_v23 }
 0x3b6   : > { %v8383_v17 = vpop.eup %5344  ;;  %v2757_v15 = vadd.f32 1.0, %v5343_v44  ;;  %5370 = vpow2.f32 %v2683_v38  ;;  %v9864_v38 = vld [vmem:[#allocation74_spill] sm:$0xff] }
 0x3b7   : > { %v8386_v57 = vpop.eup %5346  ;;  %5372 = vlog2.f32 %v2912_v25  ;;  %v2834_v42 = vadd.f32 %v2776_v45, %v2578_v37  ;;  %v8400_v39 = vadd.f32 %v9864_v38, %v7666_v54  ;;  %v2665_v25 = vsub.f32 0.0, %v2633_v1  ;;  %v2564_v37 = vpop.f32.mrf.mxu1 }
 0x3b8   : > { %v8395_v22 = vpop.eup %5348  ;;  %5374 = vlog2.f32 %v2757_v15  ;;  %v2634_v45 = vand.u32 2147483647, %v8379_v59  ;;  %v8413_v38 = vsel %vm2881_vm5, %v8071_v51, %v2849_v31  ;;  %v8421_v15 = vadd.f32 %v8098_v2, %v7666_v54  ;;  %v8428_v31 = vld [vmem:[%s5933_s22 + $0x30] sm:$0xff] }
 0x3b9   : > { %9863 = vst [vmem:[#allocation103_spill] sm:$0xff] %v8395_v22  ;;  %9865 = vst [vmem:[#allocation74_spill] sm:$0xff] %v8400_v39  ;;  %v5351_v62 = vpop.eup %5350  ;;  %v8403_v44 = vsel %vm2866_vm6, %v8114_v21, %v2834_v42  ;;  %5376 = vpow2.f32 %v2721_v52  ;;  %v2594_v21 = vmax.f32 %v8126_v61, 0.0  ;;  %v8434_v2 = vadd.f32 %v8143_v10, %v7666_v54  ;;  %v8447_v18 = vpop.f32.mrf.mxu1 }
 0x3ba   : > { %v5353_v3 = vpop.eup %5352  ;;  %2978 = vst.msk [vmem:[%s7792_s15 + $0x28] sm:$0xff] %vm1432_vm0, %v8403_v44  ;;  %9868 = vst [vmem:[#allocation104_spill] sm:$0xff] %v8421_v15  ;;  %5378 = vpow2.f32 %v2723_v35  ;;  %v2758_v1 = vadd.f32 1.0, %v5351_v62  ;;  %v2666_v42 = vsub.f32 0.0, %v2634_v45  ;;  %v2725_v35 = vmul.f32 1.442695, %v2665_v25 }
 0x3bb   : > { %v8423_v52 = vpop.eup %5354  ;;  %v2739_v43 = vadd.f32 1.0, %v5353_v3  ;;  %5380 = vlog2.f32 %v8122_v26  ;;  %9869 = vst [vmem:[#allocation105_spill] sm:$0xff] %v8434_v2  ;;  %v8440_v62 = vld [vmem:[%s5933_s22 + $0x38] sm:$0xff]  ;;  %v8445_v45 = vadd.f32 %v2564_v37, %v7682_v24  ;;  %9870 = vst [vmem:[#allocation106_spill] sm:$0xff] %v8447_v18  ;;  %v2596_v10 = vmax.f32 %v8207_v50, 0.0 }
 0x3bc   : > { %v5357_v51 = vpop.eup %5356  ;;  %5382 = vrcp.f32 %v8333_v30  ;;  %v9871_v25 = vsub.f32 %v8215_v58, %v7911_v56  ;;  %v2727_v26 = vmul.f32 1.442695, %v2666_v42  ;;  %v2597_v59 = vmax.f32 %v8254_v28, 0.0 }
 0x3bd   : > { %v8436_v48 = vpop.eup %5358  ;;  %5384 = vlog2.f32 %v2739_v43  ;;  %v2808_v37 = vmul.f32 0.6931472, %v5357_v51  ;;  %v2635_v23 = vand.u32 2147483647, %v8445_v45  ;;  %v8473_v51 = vadd.f32 %v8172_v16, %v7666_v54 }
 0x3be   : > { %v8449_v22 = vpop.eup %5360  ;;  %5386 = vrcp.f32 %v8413_v38  ;;  %v3024_v3 = vmul.f32 %v8367_v36, %v9871_v25  ;;  %v2570_v25 = vpop.f32.mrf.mxu1  ;;  %v2579_v15 = vmax.f32 %v8283_v9, 0.0  ;;  %v9872_v16 = vsub.f32 %v8225_v11, %v7932_v6 }
 0x3bf   : > { %v8458_v43 = vpop.eup %5362  ;;  %5388 = vlog2.f32 %v2758_v1  ;;  %v2667_v1 = vsub.f32 0.0, %v2635_v23  ;;  %v2850_v2 = vadd.f32 %v2808_v37, %v2594_v21  ;;  %vm2891_vm4 = vcmp.gt.f32.partialorder %v8445_v45, 20.0 }
 0x3c0   : > { %v8463_v39 = vpop.eup %5364  ;;  %5390 = vpow2.f32 %v2725_v35  ;;  %v3086_v56 = vmul.f32 %v3024_v3, %v3024_v3  ;;  %v3026_v42 = vmul.f32 %v8383_v17, %v9872_v16  ;;  %v9873_v3 = vsub.f32 %v8230_v5, %v7959_v33 }
 0x3c1   : > { %v5367_v36 = vpop.eup %5366  ;;  %5392 = vlog2.f32 %v8151_v49  ;;  %v2729_v49 = vmul.f32 1.442695, %v2667_v1 }
 0x3c2   : > { %v5369_v18 = vpop.eup %5368  ;;  %5394 = vpow2.f32 %v2727_v26  ;;  %v2810_v55 = vmul.f32 0.6931472, %v5367_v36  ;;  %v3028_v21 = vmul.f32 %v8386_v57, %v9873_v3  ;;  %v8493_v26 = vadd.f32 %v2570_v25, %v7682_v24 }
 0x3c3   : > { %v5371_v35 = vpop.eup %5370  ;;  %5396 = vlog2.f32 %v8220_v14  ;;  %v2812_v37 = vmul.f32 0.6931472, %v5369_v18  ;;  %v8503_v24 = vadd.f32 %v8249_v13, %v7666_v54  ;;  %v2914_v57 = vsel %vm2882_vm8, %v8126_v61, %v2850_v2 }
 0x3c4   : > { %v8485_v23 = vpop.eup %5372  ;;  %v2740_v20 = vadd.f32 1.0, %v5371_v35  ;;  %5398 = vpow2.f32 %v2729_v49  ;;  %v3118_v25 = vmul.f32 -0.5, %v3086_v56  ;;  %v3087_v35 = vmul.f32 %v3026_v42, %v3026_v42 }
 0x3c5   : > { %v5375_v6 = vpop.eup %5374  ;;  %v9874_v49 = vmax.f32 %v8155_v8, 0.0  ;;  %v9875_v13 = vsub.f32 %v8215_v58, %v8239_v34  ;;  %vm2892_vm5 = vcmp.gt.f32.partialorder %v8493_v26, 20.0 }
 0x3c6   : > { %v5377_v36 = vpop.eup %5376  ;;  %v2814_v1 = vmul.f32 0.6931472, %v5375_v6  ;;  %5400 = vlog2.f32 %v2740_v20  ;;  %v3088_v20 = vmul.f32 %v3028_v21, %v3028_v21  ;;  %v2636_v6 = vand.u32 2147483647, %v8493_v26 }
 0x3c7   : > { %v5379_v18 = vpop.eup %5378  ;;  %5402 = vlog2.f32 %v8413_v38  ;;  %v2851_v3 = vadd.f32 %v2810_v55, %v9874_v49  ;;  %v3056_v14 = vmul.f32 %v8423_v52, %v9875_v13  ;;  %v2852_v38 = vadd.f32 %v2812_v37, %v2596_v10  ;;  %v9876_v55 = vld [vmem:[#allocation91_spill] sm:$0xff] }
 0x3c8   : > { %v5381_v16 = vpop.eup %5380  ;;  %5404 = vrcp.f32 %v8403_v44  ;;  %v2759_v61 = vadd.f32 1.0, %v5377_v36  ;;  %v2853_v42 = vadd.f32 %v2814_v1, %v2597_v59  ;;  %v2760_v17 = vadd.f32 1.0, %v5379_v18 }
 0x3c9   : > { %v8516_v33 = vpop.eup %5382  ;;  %v3152_v2 = vmul.f32 0.6931472, %v5381_v16  ;;  %5406 = vrcp.f32 %v2914_v57  ;;  %v8521_v21 = vadd.f32 %v9876_v55, %v7666_v54  ;;  %v3119_v52 = vmul.f32 -0.5, %v3087_v35 }
 0x3ca   : > { %v5385_v56 = vpop.eup %5384  ;;  %5408 = vlog2.f32 %v2914_v57  ;;  %v8528_v10 = vsel %vm2883_vm9, %v8155_v8, %v2851_v3  ;;  %v3120_v37 = vmul.f32 -0.5, %v3088_v20  ;;  %v2668_v36 = vsub.f32 0.0, %v2636_v6 }
 0x3cb   : > { %v8523_v49 = vpop.eup %5386  ;;  %v2778_v58 = vmul.f32 0.6931472, %v5385_v56  ;;  %v3214_v34 = vsub.f32 %v3118_v25, %v3152_v2  ;;  %v3102_v59 = vmul.f32 %v3056_v14, %v3056_v14  ;;  %v8533_v18 = vsel %vm2884_vm10, %v8207_v50, %v2852_v38  ;;  %v9877_v14 = vld [vmem:[#allocation89_spill] sm:$0xff] }
 0x3cc   : > { %v5389_v13 = vpop.eup %5388  ;;  %5410 = vlog2.f32 %v2759_v61  ;;  %v8538_v35 = vsel %vm2885_vm11, %v8254_v28, %v2853_v42  ;;  %v9878_v3 = vsub.f32 %v8225_v11, %v9877_v14  ;;  %v9879_v42 = vld [vmem:[#allocation86_spill] sm:$0xff] }
 0x3cd   : > { %v5391_v1 = vpop.eup %5390  ;;  %v2835_v16 = vadd.f32 %v2778_v58, %v2579_v15  ;;  %v4831_v57 = vadd.f32 -0.9189385, %v3214_v34  ;;  %5412 = vlog2.f32 %v2760_v17  ;;  %v3134_v38 = vmul.f32 -0.5, %v3102_v59 }
 0x3ce   : > { %v5393_v25 = vpop.eup %5392  ;;  %v2761_v8 = vadd.f32 1.0, %v5391_v1  ;;  %v3058_v20 = vmul.f32 %v8449_v22, %v9878_v3  ;;  %5414 = vrcp.f32 %v8528_v10  ;;  %v2731_v22 = vmul.f32 1.442695, %v2668_v36 }
 0x3cf   : > { %v5395_v6 = vpop.eup %5394  ;;  %v8548_v50 = vsel %vm2867_vm12, %v8283_v9, %v2835_v16  ;;  %v3280_v28 = vsel %vm1432_vm0, %v4831_v57, 0.0  ;;  %v3154_v15 = vmul.f32 0.6931472, %v5393_v25  ;;  %5416 = vrcp.f32 %v8533_v18 }
 0x3d0   : > { %v5397_v17 = vpop.eup %5396  ;;  %2979 = vst.msk [vmem:[%s7792_s15 + $0x30] sm:$0xff] %vm1432_vm0, %v8548_v50  ;;  %3281 = vadd.xlane.f32.xlu1 %v3280_v28  ;;  %v2762_v11 = vadd.f32 1.0, %v5395_v6  ;;  %5418 = vrcp.f32 %v8538_v35  ;;  %v2816_v9 = vmul.f32 0.6931472, %v5389_v13  ;;  %v3016_v55 = vsub.f32 %v9879_v42, %v8503_v24  ;;  %v9918_v24 = vld [vmem:[#allocation94_spill] sm:$0xff] }
 0x3d1   : > { %v3215_v61 = vsub.f32 %v3119_v52, %v3154_v15  ;;  %v3156_v2 = vmul.f32 0.6931472, %v5397_v17  ;;  %v5399_v56 = vpop.eup %5398  ;;  %5420 = vlog2.f32 %v2761_v8  ;;  %v3184_v58 = vmul.f32 0.6931472, %v8436_v48  ;;  %v9880_v52 = vld [vmem:[#allocation82_spill] sm:$0xff] }
 0x3d2   : > { %v3103_v34 = vmul.f32 %v3058_v20, %v3058_v20  ;;  %5422 = vlog2.f32 %v2762_v11  ;;  %v2763_v25 = vadd.f32 1.0, %v5399_v56  ;;  %v2600_v13 = vmax.f32 %v8356_v53, 0.0 }
 0x3d3   : > { %v5401_v1 = vpop.eup %5400  ;;  %v4832_v16 = vadd.f32 -0.9189385, %v3215_v61  ;;  %v3216_v57 = vsub.f32 %v3120_v37, %v3156_v2  ;;  %5424 = vpow2.f32 %v2731_v22  ;;  %v3230_v14 = vsub.f32 %v3134_v38, %v3184_v58 }
 0x3d4   : > { %v8561_v36 = vpop.eup %5402  ;;  %v2780_v59 = vmul.f32 0.6931472, %v5401_v1  ;;  %3704 = vadd.xlane.f32.xlu1 %v9880_v52  ;;  %v9881_v3 = vmax.f32 %v8259_v27, 0.0  ;;  %5426 = vlog2.f32 %v2763_v25  ;;  %v9882_v37 = vmax.f32 %v8306_v0, 0.0 }
 0x3d5   : > { %v3283_v48 = vsel %vm1432_vm0, %v4832_v16, 0.0  ;;  %v4833_v20 = vadd.f32 -0.9189385, %v3216_v57  ;;  %v5405_v6 = vpop.eup %5404  ;;  %v3135_v15 = vmul.f32 -0.5, %v3103_v34  ;;  %v9883_v17 = vsub.f32 %v8350_v40, %v8036_v46 }
 0x3d6   : > { %v2854_v8 = vadd.f32 %v2816_v9, %v9881_v3  ;;  %v2836_v28 = vadd.f32 %v2780_v59, %v9882_v37  ;;  %3284 = vadd.xlane.f32.xlu0 %v3283_v48  ;;  %5428 = vlog2.f32 %v8333_v30  ;;  %v5407_v22 = vpop.eup %5406  ;;  %v8579_v38 = vadd.f32 %v8336_v29, %v7666_v54  ;;  %v9885_v29 = vld [vmem:[#allocation76_spill] sm:$0xff] }
 0x3d7   : > { %v3030_v11 = vmul.f32 %v8516_v33, %v9883_v17  ;;  %v3286_v9 = vsel %vm1432_vm0, %v4833_v20, 0.0  ;;  %v9884_v61 = vsub.f32 %v8230_v5, %v8274_v7  ;;  %5430 = vlog2.f32 %v8403_v44  ;;  %v8587_v46 = vpop.eup %5408 }
 0x3d8   : > { %v8592_v30 = vsel %vm2868_vm13, %v8306_v0, %v2836_v28  ;;  %v2601_v33 = vmax.f32 %v8375_v41, 0.0  ;;  %3896 = vadd.xlane.f32.xlu1 %v9885_v29  ;;  %v4847_v56 = vadd.f32 -0.9189385, %v3230_v14  ;;  %v3186_v58 = vmul.f32 0.6931472, %v8458_v43  ;;  %v9889_v43 = vld [vmem:[#allocation101_spill] sm:$0xff] }
 0x3d9   : > { %v3060_v2 = vmul.f32 %v8463_v39, %v9884_v61  ;;  %5432 = vlog2.f32 %v8528_v10  ;;  %v2918_v5 = vsel %vm2886_vm14, %v8259_v27, %v2854_v8  ;;  %2980 = vst.msk [vmem:[%s7792_s15 + $0x38] sm:$0xff] %vm1432_vm0, %v8592_v30  ;;  %v9886_v7 = vsub.f32 %v8389_v63, %v8074_v4  ;;  %v9887_v39 = vld [vmem:[#allocation96_spill] sm:$0xff]  ;;  %v5411_v1 = vpop.eup %5410  ;;  %v9890_v4 = vld [vmem:[#allocation102_spill] sm:$0xff]  ;;  %v9891_v14 = vld [vmem:[#allocation85_spill] sm:$0xff]  ;;  %s5636_s15 = scalar_lea.vmem %s4555_s14, 128 }
 0x3da   : > { %v9888_v44 = vsub.f32 %v8350_v40, %v9887_v39  ;;  %5434 = vlog2.f32 %v8533_v18  ;;  %v2602_v10 = vmax.f32 %v9889_v43, 0.0  ;;  %3287 = vadd.xlane.f32.xlu0 %v3286_v9  ;;  %v3231_v16 = vsub.f32 %v3135_v15, %v3186_v58  ;;  %v5413_v57 = vpop.eup %5412  ;;  %v9893_v29 = vld [vmem:[#allocation100_spill] sm:$0xff]  ;;  %p5637_p6 = scmp.ne.s32.totalorder %s4555_s14, %s5636_s15 }
 0x3db   : > { %v3032_v0 = vmul.f32 %v5405_v6, %v9886_v7  ;;  %v3089_v27 = vmul.f32 %v3030_v11, %v3030_v11  ;;  %5436 = vlog2.f32 %v8538_v35  ;;  %v2818_v25 = vmul.f32 0.6931472, %v5411_v1  ;;  %v5415_v40 = vpop.eup %5414 }
 0x3dc   : > { %v3062_v34 = vmul.f32 %v8523_v49, %v9888_v44  ;;  %v8616_v59 = vadd.f32 %v9890_v4, %v7666_v54  ;;  %v3104_v52 = vmul.f32 %v3060_v2, %v3060_v2  ;;  %5438 = vrcp.f32 %v2918_v5  ;;  %3707 = vadd.xlane.f32.xlu1 %v9891_v14  ;;  %v5417_v8 = vpop.eup %5416  ;;  %p5638_p11 = pnand %p5637_p6, %p10043_p10 }
 0x3dd   : > { %v2820_v49 = vmul.f32 0.6931472, %v5413_v57  ;;  %v2603_v18 = vmax.f32 %v8445_v45, 0.0  ;;  %v3328_v3 = vsel %vm1432_vm0, %v4847_v56, 0.0  ;;  %5440 = vlog2.f32 %v2918_v5  ;;  %v5419_v37 = vpop.eup %5418 }
 0x3de   : > { %v9892_v35 = vmax.f32 %v8316_v47, 0.0  ;;  %v3090_v20 = vmul.f32 %v3032_v0, %v3032_v0  ;;  %v3105_v6 = vmul.f32 %v3062_v34, %v3062_v34  ;;  %5442 = vrcp.f32 %v8548_v50  ;;  %v5421_v11 = vpop.eup %5420  ;;  %v9895_v0 = vld [vmem:[#allocation83_spill] sm:$0xff]  ;;  %p5639_p12 = pneg %p5638_p11 }
 0x3df   : > { %v2856_v28 = vadd.f32 %v2820_v49, %v2600_v13  ;;  %vm2890_vm3 = vcmp.gt.f32.partialorder %v9889_v43, 20.0  ;;  %v4848_v15 = vadd.f32 -0.9189385, %v3231_v16  ;;  %v3121_v17 = vmul.f32 -0.5, %v3089_v27  ;;  %v5423_v5 = vpop.eup %5422 }
 0x3e0   : > { %v2855_v48 = vadd.f32 %v2818_v25, %v9892_v35  ;;  %v3136_v61 = vmul.f32 -0.5, %v3104_v52  ;;  %v3188_v2 = vmul.f32 0.6931472, %v8485_v23  ;;  %v9894_v56 = vsub.f32 %v8389_v63, %v9893_v29  ;;  %3899 = vadd.xlane.f32.xlu1 %v9895_v0  ;;  %v5425_v23 = vpop.eup %5424 }
 0x3e1   : > { %5444 = vrcp.f32 %v8592_v30  ;;  %v8637_v13 = vsel %vm2888_vm1, %v8356_v53, %v2856_v28  ;;  %v2822_v7 = vmul.f32 0.6931472, %v5421_v11  ;;  %v2824_v34 = vmul.f32 0.6931472, %v5423_v5  ;;  %v5427_v57 = vpop.eup %5426 }
 0x3e2   : > { %v2919_v9 = vsel %vm2887_vm15, %v8316_v47, %v2855_v48  ;;  %v3064_v58 = vmul.f32 %v5407_v22, %v9894_v56  ;;  %v9896_v47 = vld [vmem:[#allocation74_spill] sm:$0xff]  ;;  %v3122_v1 = vmul.f32 -0.5, %v3090_v20  ;;  %v3137_v63 = vmul.f32 -0.5, %v3105_v6  ;;  %v9898_v22 = vld [vmem:[#allocation20_spill] sm:$0xff] }
 0x3e3   : > { %v9897_v39 = vsub.f32 %v8428_v31, %v9896_v47  ;;  %v9899_v16 = vsub.f32 %v8440_v62, %v9898_v22  ;;  %5446 = vrcp.f32 %v2919_v9  ;;  %v2857_v25 = vadd.f32 %v2822_v7, %v2601_v33  ;;  %v5429_v52 = vpop.eup %5428 }
 0x3e4   : > { %v2764_v53 = vadd.f32 1.0, %v5425_v23  ;;  %v3190_v4 = vmul.f32 0.6931472, %v8561_v36  ;;  %5448 = vrcp.f32 %v8637_v13  ;;  %v2858_v49 = vadd.f32 %v2824_v34, %v2602_v10  ;;  %v5431_v35 = vpop.eup %5430  ;;  %3329 = vadd.xlane.f32.xlu1 %v3328_v3 }
 0x3e5   : > { %v3066_v44 = vmul.f32 %v5415_v40, %v9897_v39  ;;  %v3068_v27 = vmul.f32 %v5417_v8, %v9899_v16  ;;  %v3232_v14 = vsub.f32 %v3136_v61, %v3188_v2  ;;  %v3106_v40 = vmul.f32 %v3064_v58, %v3064_v58  ;;  %v9900_v8 = vld [vmem:[#allocation104_spill] sm:$0xff] }
 0x3e6   : > { %5450 = vlog2.f32 %v2764_v53  ;;  %v3158_v48 = vmul.f32 0.6931472, %v5429_v52  ;;  %v9901_v6 = vsub.f32 %v8175_v19, %v9900_v8  ;;  %v8655_v36 = vsel %vm2889_vm2, %v8375_v41, %v2857_v25  ;;  %v5433_v61 = vpop.eup %5432  ;;  %v9906_v8 = vld [vmem:[#allocation90_spill] sm:$0xff] }
 0x3e7   : > { %v3107_v20 = vmul.f32 %v3066_v44, %v3066_v44  ;;  %v2826_v28 = vmul.f32 0.6931472, %v5427_v57  ;;  %v3160_v10 = vmul.f32 0.6931472, %v5431_v35  ;;  %v3108_v11 = vmul.f32 %v3068_v27, %v3068_v27  ;;  %v5435_v58 = vpop.eup %5434  ;;  %v9904_v35 = vld [vmem:[#allocation67_spill] sm:$0xff] }
 0x3e8   : > { %v3070_v33 = vmul.f32 %v5419_v37, %v9901_v6  ;;  %v3331_v2 = vsel %vm1432_vm0, %v4848_v15, 0.0  ;;  %v3217_v29 = vsub.f32 %v3121_v17, %v3158_v48  ;;  %v3233_v56 = vsub.f32 %v3137_v63, %v3190_v4  ;;  %v5437_v0 = vpop.eup %5436 }
 0x3e9   : > { %v3192_v3 = vmul.f32 0.6931472, %v8587_v46  ;;  %v8662_v37 = vsel %vm2890_vm3, %v9889_v43, %v2858_v49  ;;  %v4849_v5 = vadd.f32 -0.9189385, %v3232_v14  ;;  %v3218_v7 = vsub.f32 %v3122_v1, %v3160_v10  ;;  %3332 = vadd.xlane.f32.xlu1 %v3331_v2  ;;  %v5439_v17 = vpop.eup %5438  ;;  %v9902_v49 = vld [vmem:[#allocation105_spill] sm:$0xff]  ;;  %v9908_v2 = vld [vmem:[#allocation106_spill] sm:$0xff] }
 0x3ea   : > { %v3138_v41 = vmul.f32 -0.5, %v3106_v40  ;;  %5452 = vrcp.f32 %v8655_v36  ;;  %v4834_v47 = vadd.f32 -0.9189385, %v3217_v29  ;;  %v3139_v39 = vmul.f32 -0.5, %v3107_v20  ;;  %v8667_v34 = vpop.eup %5440  ;;  %v8686_v20 = vld [vmem:[%s5933_s22 + $0x68] sm:$0xff] }
 0x3eb   : > { %v3109_v15 = vmul.f32 %v3070_v33, %v3070_v33  ;;  %5454 = vlog2.f32 %v2919_v9  ;;  %v2859_v46 = vadd.f32 %v2826_v28, %v2603_v18  ;;  %v4835_v44 = vadd.f32 -0.9189385, %v3218_v7  ;;  %v5443_v22 = vpop.eup %5442  ;;  %v8694_v28 = vld [vmem:[%s5933_s22 + $0x70] sm:$0xff] }
 0x3ec   : > { %v3140_v23 = vmul.f32 -0.5, %v3108_v11  ;;  %5456 = vrcp.f32 %v8662_v37  ;;  %v3289_v43 = vsel %vm1432_vm0, %v4834_v47, 0.0  ;;  %v3194_v1 = vmul.f32 0.6931472, %v5433_v61  ;;  %v9910_v47 = vld [vmem:[#allocation70_spill] sm:$0xff] }
 0x3ed   : > { %v3196_v63 = vmul.f32 0.6931472, %v5435_v58  ;;  %3290 = vadd.xlane.f32.xlu0 %v3289_v43  ;;  %v3334_v16 = vsel %vm1432_vm0, %v4849_v5, 0.0  ;;  %v4850_v27 = vadd.f32 -0.9189385, %v3233_v56  ;;  %v3234_v9 = vsub.f32 %v3138_v41, %v3192_v3 }
 0x3ee   : > { %5458 = vlog2.f32 %v8548_v50  ;;  %3335 = vadd.xlane.f32.xlu1 %v3334_v16  ;;  %v3292_v18 = vsel %vm1432_vm0, %v4835_v44, 0.0  ;;  %v3235_v57 = vsub.f32 %v3139_v39, %v3194_v1  ;;  %v3141_v25 = vmul.f32 -0.5, %v3109_v15  ;;  %v5445_v53 = vpop.eup %5444  ;;  %v9905_v50 = vld [vmem:[#allocation88_spill] sm:$0xff]  ;;  %v9914_v44 = vld [vmem:[#allocation93_spill] sm:$0xff] }
 0x3ef   : > { %5460 = vlog2.f32 %v8592_v30  ;;  %v2923_v4 = vsel %vm2891_vm4, %v8445_v45, %v2859_v46  ;;  %v3236_v52 = vsub.f32 %v3140_v23, %v3196_v63  ;;  %v9903_v14 = vsub.f32 %v8180_v12, %v9902_v49 }
 0x3f0   : > { %5462 = vlog2.f32 %v9904_v35  ;;  %v3017_v48 = vsub.f32 %v9905_v50, %v8521_v21  ;;  %v3018_v30 = vsub.f32 %v8686_v20, %v8579_v38  ;;  %v9907_v45 = vsub.f32 %v8428_v31, %v9906_v8  ;;  %v5447_v33 = vpop.eup %5446  ;;  %v9927_v38 = vld [vmem:[#allocation92_spill] sm:$0xff] }
 0x3f1   : > { %v3072_v40 = vmul.f32 %v5439_v17, %v9903_v14  ;;  %5464 = vlog2.f32 %v8637_v13  ;;  %v3019_v10 = vsub.f32 %v8694_v28, %v8616_v59  ;;  %3293 = vadd.xlane.f32.xlu0 %v3292_v18  ;;  %v3337_v13 = vsel %vm1432_vm0, %v4850_v27, 0.0  ;;  %v5449_v61 = vpop.eup %5448  ;;  %v9912_v17 = vld [vmem:[#allocation18_spill] sm:$0xff] }
 0x3f2   : > { %v3034_v6 = vmul.f32 %v5443_v22, %v9907_v45  ;;  %v4851_v11 = vadd.f32 -0.9189385, %v3234_v9  ;;  %v3198_v21 = vmul.f32 0.6931472, %v5437_v0  ;;  %5466 = vrcp.f32 %v2923_v4  ;;  %3338 = vadd.xlane.f32.xlu1 %v3337_v13  ;;  %v9915_v9 = vld [vmem:[#allocation73_spill] sm:$0xff] }
 0x3f3   : > { %v8701_v29 = vadd.f32 %v9908_v2, %v7666_v54  ;;  %v4852_v31 = vadd.f32 -0.9189385, %v3235_v57  ;;  %v9909_v56 = vsub.f32 %v8440_v62, %v8301_v32  ;;  %v5451_v58 = vpop.eup %5450  ;;  %v4853_v5 = vadd.f32 -0.9189385, %v3236_v52 }
 0x3f4   : > { %v3237_v7 = vsub.f32 %v3141_v25, %v3198_v21  ;;  %v3110_v41 = vmul.f32 %v3072_v40, %v3072_v40  ;;  %5468 = vlog2.f32 %v9910_v47  ;;  %v2604_v0 = vmax.f32 %v8493_v26, 0.0  ;;  %v9916_v25 = vld [vmem:[#allocation31_spill] sm:$0xff] }
 0x3f5   : > { %v3036_v3 = vmul.f32 %v5445_v53, %v9909_v56  ;;  %5470 = vlog2.f32 %v8655_v36  ;;  %v2828_v39 = vmul.f32 0.6931472, %v5451_v58  ;;  %v3091_v15 = vmul.f32 %v3034_v6, %v3034_v6  ;;  %v9925_v58 = vld [vmem:[#allocation97_spill] sm:$0xff] }
 0x3f6   : > { %v3340_v54 = vsel %vm1432_vm0, %v4851_v11, 0.0  ;;  %v9911_v32 = vsub.f32 %v8185_v60, %v8473_v51  ;;  %v9913_v46 = vsub.f32 %v8175_v19, %v9912_v17  ;;  %v3343_v36 = vsel %vm1432_vm0, %v4852_v31, 0.0  ;;  %v9922_v31 = vld [vmem:[#allocation95_spill] sm:$0xff] }
 0x3f7   : > { %v2860_v43 = vadd.f32 %v2828_v39, %v2604_v0  ;;  %3341 = vadd.xlane.f32.xlu1 %v3340_v54  ;;  %v3092_v1 = vmul.f32 %v3036_v3, %v3036_v3  ;;  %v3076_v63 = vmul.f32 %v5449_v61, %v3016_v55  ;;  %v5453_v22 = vpop.eup %5452  ;;  %v3346_v16 = vsel %vm1432_vm0, %v4853_v5, 0.0 }
 0x3f8   : > { %v3074_v62 = vmul.f32 %v5447_v33, %v9911_v32  ;;  %v3038_v23 = vmul.f32 %v9914_v44, %v9913_v46  ;;  %v4854_v27 = vadd.f32 -0.9189385, %v3237_v7  ;;  %v3142_v51 = vmul.f32 -0.5, %v3110_v41  ;;  %v5455_v18 = vpop.eup %5454 }
 0x3f9   : > { %5472 = vlog2.f32 %v9915_v9  ;;  %v2924_v19 = vsel %vm2892_vm5, %v8493_v26, %v2860_v43  ;;  %v3123_v57 = vmul.f32 -0.5, %v3091_v15  ;;  %v9917_v53 = vsub.f32 %v8180_v12, %v9916_v25  ;;  %v5457_v52 = vpop.eup %5456  ;;  %v9919_v12 = vld [vmem:[#allocation13_spill] sm:$0xff] }
 0x3fa   : > { %5474 = vlog2.f32 %v8662_v37  ;;  %v3200_v49 = vmul.f32 0.6931472, %v8667_v34  ;;  %v3111_v14 = vmul.f32 %v3074_v62, %v3074_v62  ;;  %v3093_v40 = vmul.f32 %v3038_v23, %v3038_v23  ;;  %v9920_v34 = vld [vmem:[#allocation52_spill] sm:$0xff] }
 0x3fb   : > { %v3040_v55 = vmul.f32 %v9918_v24, %v9917_v53  ;;  %5476 = vrcp.f32 %v2924_v19  ;;  %v5459_v35 = vpop.eup %5458  ;;  %3344 = vadd.xlane.f32.xlu1 %v3343_v36  ;;  %v3124_v37 = vmul.f32 -0.5, %v3092_v1  ;;  %v3112_v8 = vmul.f32 %v3076_v63, %v3076_v63 }
 0x3fc   : > { %5478 = vlog2.f32 %v2923_v4  ;;  %v3078_v45 = vmul.f32 %v5453_v22, %v3017_v48  ;;  %v5461_v6 = vpop.eup %5460  ;;  %v3349_v26 = vsel %vm1432_vm0, %v4854_v27, 0.0  ;;  %v3162_v33 = vmul.f32 0.6931472, %v5459_v35  ;;  %v9923_v4 = vld [vmem:[#allocation55_spill] sm:$0xff]  ;;  %v9930_v35 = vld [vmem:[#allocation98_spill] sm:$0xff] }
 0x3fd   : > { %v3238_v13 = vsub.f32 %v3142_v51, %v3200_v49  ;;  %5480 = vlog2.f32 %v9919_v12  ;;  %v5463_v11 = vpop.eup %5462  ;;  %v3164_v21 = vmul.f32 0.6931472, %v5461_v6  ;;  %v3094_v61 = vmul.f32 %v3040_v55, %v3040_v55 }
 0x3fe   : > { %v9921_v2 = vsub.f32 %v8185_v60, %v9920_v34  ;;  %v9924_v3 = vsub.f32 %v9879_v42, %v9923_v4  ;;  %v5465_v5 = vpop.eup %5464  ;;  %v3219_v7 = vsub.f32 %v3123_v57, %v3162_v33  ;;  %v3143_v41 = vmul.f32 -0.5, %v3111_v14  ;;  %v9926_v42 = vld [vmem:[#allocation69_spill] sm:$0xff]  ;;  %v9928_v14 = vld [vmem:[#allocation64_spill] sm:$0xff]  ;;  %v9932_v34 = vld [vmem:[#allocation75_spill] sm:$0xff] }
 0x3ff   : > { %v3202_v47 = vmul.f32 0.6931472, %v5455_v18  ;;  %v3125_v0 = vmul.f32 -0.5, %v3093_v40  ;;  %3347 = vadd.xlane.f32.xlu1 %v3346_v16  ;;  %v3220_v39 = vsub.f32 %v3124_v37, %v3164_v21  ;;  %v3144_v15 = vmul.f32 -0.5, %v3112_v8  ;;  %v5467_v32 = vpop.eup %5466  ;;  %v8750_v18 = vld [vmem:[%s5933_s22 + $0x78] sm:$0xff] }
 0x400   : > { %v3042_v56 = vmul.f32 %v9922_v31, %v9921_v2  ;;  %v3044_v48 = vmul.f32 %v9925_v58, %v9924_v3  ;;  %v3113_v54 = vmul.f32 %v3078_v45, %v3078_v45  ;;  %v3080_v60 = vmul.f32 %v5457_v52, %v3018_v30  ;;  %v9933_v3 = vld [vmem:[#allocation56_spill] sm:$0xff]  ;;  %v9934_v58 = vld [vmem:[#allocation87_spill] sm:$0xff] }
 0x401   : > { %v4836_v62 = vadd.f32 -0.9189385, %v3219_v7  ;;  %v4855_v17 = vadd.f32 -0.9189385, %v3238_v13  ;;  %v3166_v46 = vmul.f32 0.6931472, %v5463_v11  ;;  %5482 = vlog2.f32 %v9926_v42  ;;  %v5469_v44 = vpop.eup %5468 }
 0x402   : > { %v4837_v23 = vadd.f32 -0.9189385, %v3220_v39  ;;  %v3126_v43 = vmul.f32 -0.5, %v3094_v61  ;;  %v3204_v36 = vmul.f32 0.6931472, %v5465_v5  ;;  %v3095_v1 = vmul.f32 %v3042_v56, %v3042_v56  ;;  %v5471_v63 = vpop.eup %5470  ;;  %v9931_v13 = vld [vmem:[#allocation72_spill] sm:$0xff] }
 0x403   : > { %5484 = vlog2.f32 %v2924_v19  ;;  %v3295_v22 = vsel %vm1432_vm0, %v4836_v62, 0.0  ;;  %v3239_v16 = vsub.f32 %v3143_v41, %v3202_v47  ;;  %v3221_v27 = vsub.f32 %v3125_v0, %v3166_v46  ;;  %3350 = vadd.xlane.f32.xlu1 %v3349_v26  ;;  %v9936_v5 = vld [vmem:[#allocation103_spill] sm:$0xff] }
 0x404   : > { %5486 = vlog2.f32 %v9927_v38  ;;  %3296 = vadd.xlane.f32.xlu0 %v3295_v22  ;;  %v3240_v30 = vsub.f32 %v3144_v15, %v3204_v36  ;;  %v3145_v51 = vmul.f32 -0.5, %v3113_v54  ;;  %v3114_v9 = vmul.f32 %v3080_v60, %v3080_v60  ;;  %v9937_v15 = vld [vmem:[#allocation66_spill] sm:$0xff]  ;;  %v9938_v36 = vld [vmem:[#allocation99_spill] sm:$0xff] }
 0x405   : > { %v3020_v57 = vsub.f32 %v8750_v18, %v8701_v29  ;;  %v3298_v25 = vsel %vm1432_vm0, %v4837_v23, 0.0  ;;  %v3168_v53 = vmul.f32 0.6931472, %v5469_v44  ;;  %v3082_v19 = vmul.f32 %v5467_v32, %v3019_v10 }
 0x406   : > { %v5473_v24 = vpop.eup %5472  ;;  %v3127_v55 = vmul.f32 -0.5, %v3095_v1  ;;  %v3206_v52 = vmul.f32 0.6931472, %v5471_v63  ;;  %v3096_v49 = vmul.f32 %v3044_v48, %v3044_v48  ;;  %v9929_v40 = vsub.f32 %v9905_v50, %v9928_v14 }
 0x407   : > { %v5475_v8 = vpop.eup %5474  ;;  %v3352_v45 = vsel %vm1432_vm0, %v4855_v17, 0.0  ;;  %v4856_v29 = vadd.f32 -0.9189385, %v3239_v16  ;;  %v4838_v6 = vadd.f32 -0.9189385, %v3221_v27  ;;  %v3222_v26 = vsub.f32 %v3126_v43, %v3168_v53 }
 0x408   : > { %v3046_v37 = vmul.f32 %v9930_v35, %v9929_v40  ;;  %v5477_v33 = vpop.eup %5476  ;;  %5488 = vrcp.f32 %v9931_v13  ;;  %3353 = vadd.xlane.f32.xlu1 %v3352_v45  ;;  %3299 = vadd.xlane.f32.xlu0 %v3298_v25  ;;  %v4857_v59 = vadd.f32 -0.9189385, %v3240_v30  ;;  %v3241_v10 = vsub.f32 %v3145_v51, %v3206_v52 }
 0x409   : > { %v3146_v12 = vmul.f32 -0.5, %v3114_v9  ;;  %v5479_v11 = vpop.eup %5478  ;;  %v3170_v21 = vmul.f32 0.6931472, %v5473_v24  ;;  %v3115_v61 = vmul.f32 %v3082_v19, %v3082_v19  ;;  %v3084_v50 = vmul.f32 %v5477_v33, %v3020_v57 }
 0x40a   : > { %5490 = vlog2.f32 %v9932_v34  ;;  %v5481_v2 = vpop.eup %5480  ;;  %v3128_v31 = vmul.f32 -0.5, %v3096_v49  ;;  %v3208_v56 = vmul.f32 0.6931472, %v5475_v8  ;;  %v3097_v4 = vmul.f32 %v3046_v37, %v3046_v37 }
 0x40b   : > { %v9935_v48 = vsub.f32 %v9933_v3, %v9934_v58  ;;  %v3355_v41 = vsel %vm1432_vm0, %v4856_v29, 0.0  ;;  %v3301_v47 = vsel %vm1432_vm0, %v4838_v6, 0.0  ;;  %v4839_v0 = vadd.f32 -0.9189385, %v3222_v26  ;;  %v9939_v29 = vld [vmem:[#allocation84_spill] sm:$0xff]  ;;  %v9941_v3 = vld [vmem:[#allocation35_spill] sm:$0xff] }
 0x40c   : > { %v3223_v39 = vsub.f32 %v3127_v55, %v3170_v21  ;;  %v3002_v54 = vsub.f32 %v8686_v20, %v9937_v15  ;;  %3356 = vadd.xlane.f32.xlu1 %v3355_v41  ;;  %3302 = vadd.xlane.f32.xlu0 %v3301_v47  ;;  %v3358_v60 = vsel %vm1432_vm0, %v4857_v59, 0.0  ;;  %v3242_v32 = vsub.f32 %v3146_v12, %v3208_v56  ;;  %v9942_v41 = vld [vmem:[#allocation77_spill] sm:$0xff]  ;;  %v9943_v47 = vld [vmem:[#allocation78_spill] sm:$0xff] }
 0x40d   : > { %v3054_v7 = vmul.f32 %v9936_v5, %v9935_v48  ;;  %v4858_v62 = vadd.f32 -0.9189385, %v3241_v10  ;;  %v3172_v17 = vmul.f32 0.6931472, %v5481_v2  ;;  %v3147_v46 = vmul.f32 -0.5, %v3115_v61  ;;  %v9940_v10 = vld [vmem:[#allocation61_spill] sm:$0xff] }
 0x40e   : > { %v3116_v42 = vmul.f32 %v3084_v50, %v3084_v50  ;;  %v5483_v44 = vpop.eup %5482  ;;  %v3129_v23 = vmul.f32 -0.5, %v3097_v4  ;;  %v3048_v1 = vmul.f32 %v9938_v36, %v3002_v54  ;;  %v3304_v63 = vsel %vm1432_vm0, %v4839_v0, 0.0  ;;  %v9946_v36 = vld [vmem:[#allocation36_spill] sm:$0xff] }
 0x40f   : > { %v3101_v43 = vmul.f32 %v3054_v7, %v3054_v7  ;;  %v4840_v22 = vadd.f32 -0.9189385, %v3223_v39  ;;  %v3224_v16 = vsub.f32 %v3128_v31, %v3172_v17  ;;  %v3210_v27 = vmul.f32 0.6931472, %v5479_v11 }
 0x410   : > { %v5485_v20 = vpop.eup %5484  ;;  %3305 = vadd.xlane.f32.xlu0 %v3304_v63  ;;  %3359 = vadd.xlane.f32.xlu1 %v3358_v60  ;;  %v4859_v38 = vadd.f32 -0.9189385, %v3242_v32  ;;  %v3361_v51 = vsel %vm1432_vm0, %v4858_v62, 0.0  ;;  %v3174_v9 = vmul.f32 0.6931472, %v5483_v44  ;;  %v3148_v25 = vmul.f32 -0.5, %v3116_v42 }
 0x411   : > { %v5487_v30 = vpop.eup %5486  ;;  %v3243_v57 = vsub.f32 %v3147_v46, %v3210_v27  ;;  %v3133_v53 = vmul.f32 -0.5, %v3101_v43  ;;  %v3098_v19 = vmul.f32 %v3048_v1, %v3048_v1  ;;  %v3307_v24 = vsel %vm1432_vm0, %v4840_v22, 0.0  ;;  %v9945_v60 = vld [vmem:[#allocation60_spill] sm:$0xff] }
 0x412   : > { %v4841_v55 = vadd.f32 -0.9189385, %v3224_v16  ;;  %v3225_v52 = vsub.f32 %v3129_v23, %v3174_v9  ;;  %v3212_v49 = vmul.f32 0.6931472, %v5485_v20  ;;  %v3364_v14 = vsel %vm1432_vm0, %v4859_v38, 0.0  ;;  %v9947_v27 = vld [vmem:[#allocation80_spill] sm:$0xff] }
 0x413   : > { %v4860_v35 = vadd.f32 -0.9189385, %v3243_v57  ;;  %v3182_v37 = vmul.f32 0.6931472, %v5487_v30  ;;  %5492 = vlog2.f32 %v9931_v13  ;;  %v3130_v59 = vmul.f32 -0.5, %v3098_v19  ;;  %v9948_v20 = vld [vmem:[#allocation79_spill] sm:$0xff] }
 0x414   : > { %3308 = vadd.xlane.f32.xlu0 %v3307_v24  ;;  %3362 = vadd.xlane.f32.xlu1 %v3361_v51  ;;  %v3244_v8 = vsub.f32 %v3148_v25, %v3212_v49  ;;  %5494 = vrcp.f32 %v9939_v29  ;;  %v3310_v6 = vsel %vm1432_vm0, %v4841_v55, 0.0  ;;  %v4842_v26 = vadd.f32 -0.9189385, %v3225_v52  ;;  %v8808_v52 = vpop.xlane.xlu1 %3701 }
 0x415   : > { %v5489_v40 = vpop.eup %5488  ;;  %v3229_v33 = vsub.f32 %v3133_v53, %v3182_v37  ;;  %v3003_v12 = vsub.f32 %v8694_v28, %v9940_v10  ;;  %v3367_v11 = vsel %vm1432_vm0, %v4860_v35, 0.0  ;;  %v3723_v58 = vmul.f32 -0.5, %v9941_v3 }
 0x416   : > { %v4861_v21 = vadd.f32 -0.9189385, %v3244_v8  ;;  %v3313_v50 = vsel %vm1432_vm0, %v4842_v26, 0.0  ;;  %5496 = vlog2.f32 %v9939_v29  ;;  %v9944_v0 = vsub.f32 %v9942_v41, %v9943_v47  ;;  %v8816_v8 = vpop.xlane.xlu0 %3278  ;;  %v9950_v26 = vld [vmem:[#allocation43_spill] sm:$0xff]  ;;  %v9955_v47 = vld [vmem:[#allocation46_spill] sm:$0xff] }
 0x417   : > { %v5491_v45 = vpop.eup %5490  ;;  %v4846_v13 = vadd.f32 -0.9189385, %v3229_v33  ;;  %v3050_v2 = vmul.f32 %v5489_v40, %v3003_v12  ;;  %v3755_v15 = vmul.f32 %v3723_v58, %v9941_v3  ;;  %v3004_v32 = vsub.f32 %v8750_v18, %v9945_v60  ;;  %v9956_v60 = vld [vmem:[#allocation27_spill] sm:$0xff] }
 0x418   : > { %3311 = vadd.xlane.f32.xlu0 %v3310_v6  ;;  %3365 = vadd.xlane.f32.xlu1 %v3364_v14  ;;  %v3176_v61 = vmul.f32 0.6931472, %v5491_v45  ;;  %v3370_v31 = vsel %vm1432_vm0, %v4861_v21, 0.0  ;;  %v4876_v39 = vadd.f32 -0.9189385, %v9944_v0  ;;  %v3724_v1 = vmul.f32 -0.5, %v9946_v36 }
 0x419   : > { %v3325_v56 = vsel %vm1432_vm0, %v4846_v13, 0.0  ;;  %v3099_v48 = vmul.f32 %v3050_v2, %v3050_v2  ;;  %v4908_v46 = vadd.f32 -0.9189385, %v3755_v15  ;;  %v9949_v18 = vsub.f32 %v9947_v27, %v9948_v20  ;;  %v9953_v2 = vld [vmem:[#allocation17_spill] sm:$0xff] }
 0x41a   : > { %v3226_v34 = vsub.f32 %v3130_v59, %v3176_v61  ;;  %v3655_v17 = vsel %vm1432_vm0, %v4876_v39, 0.0  ;;  %v3756_v30 = vmul.f32 %v3724_v1, %v9946_v36  ;;  %v9951_v59 = vld [vmem:[#allocation16_spill] sm:$0xff]  ;;  %v9952_v61 = vld [vmem:[#allocation50_spill] sm:$0xff] }
 0x41b   : > { %v3131_v54 = vmul.f32 -0.5, %v3099_v48  ;;  %v3847_v23 = vsel %vm1432_vm0, %v4908_v46, 0.0  ;;  %v4877_v38 = vadd.f32 -0.9189385, %v9949_v18  ;;  %v9954_v48 = vld [vmem:[#allocation38_spill] sm:$0xff]  ;;  %v9960_v18 = vld [vmem:[#allocation24_spill] sm:$0xff] }
 0x41c   : > { %3314 = vadd.xlane.f32.xlu0 %v3313_v50  ;;  %3368 = vadd.xlane.f32.xlu1 %v3367_v11  ;;  %v4843_v4 = vadd.f32 -0.9189385, %v3226_v34  ;;  %v4909_v25 = vadd.f32 -0.9189385, %v3756_v30 }
 0x41d   : > { %v3658_v57 = vsel %vm1432_vm0, %v4877_v38, 0.0 }
 0x41e   : > { %v3316_v7 = vsel %vm1432_vm0, %v4843_v4, 0.0  ;;  %v3850_v19 = vsel %vm1432_vm0, %v4909_v25, 0.0 }
 0x420   : > { %3326 = vadd.xlane.f32.xlu0 %v3325_v56  ;;  %3371 = vadd.xlane.f32.xlu1 %v3370_v31  ;;  %v5493_v28 = vpop.eup %5492 }
 0x421   : > { %v5495_v5 = vpop.eup %5494  ;;  %v3178_v62 = vmul.f32 0.6931472, %v5493_v28 }
 0x422   : > { %v3052_v44 = vmul.f32 %v5495_v5, %v3004_v32 }
 0x423   : > { %v3227_v42 = vsub.f32 %v3131_v54, %v3178_v62  ;;  %v5497_v22 = vpop.eup %5496 }
 0x424   : > { %3317 = vadd.xlane.f32.xlu0 %v3316_v7  ;;  %v3100_v63 = vmul.f32 %v3052_v44, %v3052_v44  ;;  %v3180_v9 = vmul.f32 0.6931472, %v5497_v22  ;;  %v9957_v44 = vld [vmem:[#allocation22_spill] sm:$0xff] }
 0x425   : > { %v4844_v43 = vadd.f32 -0.9189385, %v3227_v42 }
 0x426   : > { %v3132_v51 = vmul.f32 -0.5, %v3100_v63  ;;  %v9958_v63 = vld [vmem:[#allocation39_spill] sm:$0xff] }
 0x427   : > { %v3319_v16 = vsel %vm1432_vm0, %v4844_v43, 0.0 }
 0x428   : > { %3656 = vadd.xlane.f32.xlu0 %v3655_v17  ;;  %v3228_v53 = vsub.f32 %v3132_v51, %v3180_v9 }
 0x42a   : > { %v4845_v24 = vadd.f32 -0.9189385, %v3228_v53 }
 0x42c   : > { %3848 = vadd.xlane.f32.xlu0 %v3847_v23  ;;  %v3322_v55 = vsel %vm1432_vm0, %v4845_v24, 0.0 }
 0x430   : > { %3320 = vadd.xlane.f32.xlu0 %v3319_v16 }
 0x434   : > { %3659 = vadd.xlane.f32.xlu0 %v3658_v57 }
 0x438   : > { %3851 = vadd.xlane.f32.xlu0 %v3850_v19 }
 0x43c   : > { %3323 = vadd.xlane.f32.xlu0 %v3322_v55 }
 0x459   : > { %v8810_v49 = vpop.xlane.xlu1 %3281 }
 0x45a   : > { %v3934_v33 = vsub.f32 %v8810_v49, %v9950_v26 }
 0x45d   : > { %v3705_v14 = vpop.xlane.xlu1 %3704 }
 0x45f   : > { %v8820_v29 = vpop.xlane.xlu0 %3284 }
 0x460   : > { %v3935_v50 = vsub.f32 %v8820_v29, %v9952_v61 }
 0x461   : > { %v3897_v40 = vpop.xlane.xlu1 %3896 }
 0x462   : > { %v8812_v35 = vsub.f32 %v3705_v14, %v3897_v40 }
 0x463   : > { %v8828_v12 = vpop.xlane.xlu0 %3287 }
 0x464   : > { %v3936_v28 = vsub.f32 %v8828_v12, %v9954_v48 }
 0x465   : > { %v8814_v37 = vpop.xlane.xlu1 %3707 }
 0x469   : > { %v8818_v45 = vpop.xlane.xlu1 %3899 }
 0x46d   : > { %v8822_v6 = vpop.xlane.xlu1 %3329 }
 0x46e   : > { %v3950_v10 = vsub.f32 %v8822_v6, %v9951_v59 }
 0x470   : > { %v8830_v11 = vmax.f32 %v3934_v33, %v3950_v10 }
 0x472   : > { %v8832_v21 = vpop.xlane.xlu1 %3332  ;;  %v3982_v13 = vsub.f32 %v3934_v33, %v8830_v11  ;;  %v4030_v34 = vsub.f32 %v3950_v10, %v8830_v11 }
 0x473   : > { %v3951_v31 = vsub.f32 %v8832_v21, %v9953_v2 }
 0x474   : > { %v3999_v56 = vmul.f32 1.442695, %v3982_v13  ;;  %v4047_v4 = vmul.f32 1.442695, %v4030_v34  ;;  %v9963_v13 = vld [vmem:[#allocation28_spill] sm:$0xff] }
 0x475   : > { %v8840_v3 = vmax.f32 %v3935_v50, %v3951_v31 }
 0x476   : > { %v8842_v58 = vpop.xlane.xlu0 %3290  ;;  %5498 = vpow2.f32 %v3999_v56 }
 0x477   : > { %v8846_v5 = vpop.xlane.xlu1 %3335  ;;  %v3983_v7 = vsub.f32 %v3935_v50, %v8840_v3  ;;  %v4031_v41 = vsub.f32 %v3951_v31, %v8840_v3  ;;  %5500 = vpow2.f32 %v4047_v4  ;;  %v3937_v32 = vsub.f32 %v8842_v58, %v9956_v60  ;;  %v9964_v31 = vld [vmem:[#allocation40_spill] sm:$0xff] }
 0x478   : > { %v3952_v0 = vsub.f32 %v8846_v5, %v9955_v47 }
 0x479   : > { %v4001_v39 = vmul.f32 1.442695, %v3983_v7  ;;  %v4049_v15 = vmul.f32 1.442695, %v4031_v41 }
 0x47a   : > { %v8852_v54 = vmax.f32 %v3936_v28, %v3952_v0  ;;  %v8860_v42 = vpop.xlane.xlu0 %3293 }
 0x47b   : > { %v8856_v62 = vpop.xlane.xlu1 %3338  ;;  %5502 = vpow2.f32 %v4001_v39  ;;  %v3938_v22 = vsub.f32 %v8860_v42, %v9958_v63  ;;  %v9969_v63 = vld [vmem:[#allocation41_spill] sm:$0xff] }
 0x47c   : > { %v3984_v17 = vsub.f32 %v3936_v28, %v8852_v54  ;;  %v4032_v46 = vsub.f32 %v3952_v0, %v8852_v54  ;;  %v3953_v23 = vsub.f32 %v8856_v62, %v9957_v44  ;;  %5504 = vpow2.f32 %v4049_v15 }
 0x47e   : > { %v4003_v43 = vmul.f32 1.442695, %v3984_v17  ;;  %v4051_v36 = vmul.f32 1.442695, %v4032_v46  ;;  %v8864_v1 = vmax.f32 %v3937_v32, %v3953_v23  ;;  %v9967_v46 = vld [vmem:[#allocation49_spill] sm:$0xff] }
 0x480   : > { %v8868_v16 = vpop.xlane.xlu1 %3341  ;;  %5506 = vpow2.f32 %v4003_v43  ;;  %v3985_v27 = vsub.f32 %v3937_v32, %v8864_v1  ;;  %v4033_v20 = vsub.f32 %v3953_v23, %v8864_v1  ;;  %v9966_v32 = vld [vmem:[#allocation58_spill] sm:$0xff] }
 0x481   : > { %9959 = vst [vmem:[#allocation91_spill] sm:$0xff] %v8868_v16  ;;  %v3954_v38 = vsub.f32 %v8868_v16, %v9960_v18  ;;  %5508 = vpow2.f32 %v4051_v36  ;;  %v9968_v36 = vld [vmem:[#allocation37_spill] sm:$0xff]  ;;  %v9998_v16 = vld [vmem:[#allocation62_spill] sm:$0xff] }
 0x482   : > { %v4005_v30 = vmul.f32 1.442695, %v3985_v27  ;;  %v4053_v51 = vmul.f32 1.442695, %v4033_v20  ;;  %v9970_v27 = vld [vmem:[#allocation30_spill] sm:$0xff] }
 0x483   : > { %v8874_v9 = vmax.f32 %v3938_v22, %v3954_v38  ;;  %v5499_v19 = vpop.eup %5498  ;;  %v4418_v20 = vmul.f32 %v9970_v27, %v9951_v59 }
 0x484   : > { %v8876_v57 = vpop.xlane.xlu1 %3344  ;;  %5510 = vpow2.f32 %v4005_v30  ;;  %v5501_v24 = vpop.eup %5500 }
 0x485   : > { %9961 = vst [vmem:[#allocation89_spill] sm:$0xff] %v8876_v57  ;;  %v3986_v25 = vsub.f32 %v3938_v22, %v8874_v9  ;;  %v4034_v53 = vsub.f32 %v3954_v38, %v8874_v9  ;;  %5512 = vpow2.f32 %v4053_v51  ;;  %v4078_v40 = vadd.f32 %v5501_v24, %v5499_v19  ;;  %v9971_v19 = vld [vmem:[#allocation29_spill] sm:$0xff] }
 0x486   : > { %v3955_v34 = vsub.f32 %v8876_v57, %v9963_v13  ;;  %v4417_v22 = vmul.f32 %v9969_v63, %v9968_v36  ;;  %v4419_v24 = vmul.f32 %v9971_v19, %v9953_v2  ;;  %v8922_v2 = vsel %vm4256_vm7, %v4418_v20, 0.0  ;;  %v9986_v57 = vld [vmem:[#allocation71_spill] sm:$0xff] }
 0x487   : > { %v4007_v55 = vmul.f32 1.442695, %v3986_v25  ;;  %v4055_v14 = vmul.f32 1.442695, %v4034_v53 }
 0x488   : > { %v5503_v26 = vpop.eup %5502  ;;  %v8880_v33 = vpop.xlane.xlu1 %3347 }
 0x489   : > { %5514 = vpow2.f32 %v4007_v55  ;;  %9962 = vst [vmem:[#allocation86_spill] sm:$0xff] %v8880_v33  ;;  %v5505_v10 = vpop.eup %5504  ;;  %v3956_v17 = vsub.f32 %v8880_v33, %v9966_v32  ;;  %v9972_v55 = vld [vmem:[#allocation54_spill] sm:$0xff] }
 0x48a   : > { %5516 = vlog2.f32 %v4078_v40  ;;  %v4079_v61 = vadd.f32 %v5505_v10, %v5503_v26 }
 0x48b   : > { %5518 = vpow2.f32 %v4055_v14 }
 0x48c   : > { %5520 = vlog2.f32 %v4079_v61  ;;  %v8890_v41 = vpop.xlane.xlu1 %3350  ;;  %v9974_v61 = vld [vmem:[#allocation15_spill] sm:$0xff] }
 0x48d   : > { %v8882_v50 = vpop.xlane.xlu0 %3296  ;;  %v5507_v4 = vpop.eup %5506  ;;  %9965 = vst [vmem:[#allocation82_spill] sm:$0xff] %v8890_v41  ;;  %v3957_v14 = vsub.f32 %v8890_v41, %v9972_v55 }
 0x48e   : > { %v3939_v56 = vsub.f32 %v8882_v50, %v9964_v31  ;;  %v5509_v48 = vpop.eup %5508 }
 0x48f   : > { %v4080_v7 = vadd.f32 %v5509_v48, %v5507_v4 }
 0x490   : > { %v8888_v28 = vmax.f32 %v3939_v56, %v3955_v34 }
 0x491   : > { %v8892_v0 = vpop.xlane.xlu0 %3299  ;;  %v5511_v60 = vpop.eup %5510  ;;  %5522 = vlog2.f32 %v4080_v7 }
 0x492   : > { %v3987_v39 = vsub.f32 %v3939_v56, %v8888_v28  ;;  %v4035_v15 = vsub.f32 %v3955_v34, %v8888_v28  ;;  %v3940_v23 = vsub.f32 %v8892_v0, %v9967_v46  ;;  %v5513_v43 = vpop.eup %5512  ;;  %v8912_v26 = vpop.xlane.xlu1 %3353  ;;  %v8919_v56 = vsel %vm4256_vm7, %v4417_v22, 0.0  ;;  %v9976_v22 = vld [vmem:[#allocation34_spill] sm:$0xff] }
 0x493   : > { %v4081_v51 = vadd.f32 %v5513_v43, %v5511_v60  ;;  %9973 = vst [vmem:[#allocation76_spill] sm:$0xff] %v8912_v26 }
 0x494   : > { %v4009_v38 = vmul.f32 1.442695, %v3987_v39  ;;  %v4057_v30 = vmul.f32 1.442695, %v4035_v15  ;;  %v8904_v25 = vmax.f32 %v3940_v23, %v3956_v17 }
 0x495   : > { %v8906_v53 = vpop.xlane.xlu0 %3302 }
 0x496   : > { %5524 = vpow2.f32 %v4009_v38  ;;  %v5515_v40 = vpop.eup %5514  ;;  %v3988_v59 = vsub.f32 %v3940_v23, %v8904_v25  ;;  %v4036_v10 = vsub.f32 %v3956_v17, %v8904_v25  ;;  %v3941_v34 = vsub.f32 %v8906_v53, %v9974_v61  ;;  %v9975_v23 = vld [vmem:[#allocation53_spill] sm:$0xff] }
 0x497   : > { %5526 = vlog2.f32 %v4081_v51  ;;  %v5517_v31 = vpop.eup %5516  ;;  %v8929_v17 = vsel %vm4256_vm7, %v4419_v24, 0.0  ;;  %v3958_v43 = vsub.f32 %v8912_v26, %v9975_v23  ;;  %v8952_v26 = vpop.xlane.xlu1 %3356 }
 0x498   : > { %5528 = vpow2.f32 %v4057_v30  ;;  %v5519_v4 = vpop.eup %5518  ;;  %v4096_v48 = vmul.f32 0.6931472, %v5517_v31  ;;  %v4011_v7 = vmul.f32 1.442695, %v3988_v59  ;;  %v4059_v39 = vmul.f32 1.442695, %v4036_v10 }
 0x499   : > { %v8924_v15 = vmax.f32 %v3941_v34, %v3957_v14  ;;  %v8926_v60 = vpop.xlane.xlu0 %3305  ;;  %v4082_v46 = vadd.f32 %v5519_v4, %v5515_v40  ;;  %v5521_v59 = vpop.eup %5520  ;;  %v9978_v10 = vld [vmem:[#allocation32_spill] sm:$0xff]  ;;  %v9979_v40 = vld [vmem:[#allocation42_spill] sm:$0xff]  ;;  %v9980_v4 = vld [vmem:[#allocation19_spill] sm:$0xff]  ;;  %9982 = vst [vmem:[#allocation101_spill] sm:$0xff] %v8952_v26 }
 0x49a   : > { %v3942_v20 = vsub.f32 %v8926_v60, %v9976_v22  ;;  %v8936_v38 = vadd.f32 %v4096_v48, %v8830_v11  ;;  %5530 = vpow2.f32 %v4011_v7  ;;  %v4420_v24 = vmul.f32 %v9978_v10, %v9955_v47 }
 0x49b   : > { %v3989_v30 = vsub.f32 %v3941_v34, %v8924_v15  ;;  %v4037_v51 = vsub.f32 %v3957_v14, %v8924_v15  ;;  %v4421_v61 = vmul.f32 %v9979_v40, %v9957_v44  ;;  %5532 = vlog2.f32 %v4082_v46  ;;  %v9981_v14 = vld [vmem:[#allocation81_spill] sm:$0xff]  ;;  %v9983_v46 = vld [vmem:[#allocation48_spill] sm:$0xff] }
 0x49c   : > { %9977 = vst [vmem:[#allocation96_spill] sm:$0xff] %v8936_v38  ;;  %v8944_v31 = vmax.f32 %v3942_v20, %v3958_v43  ;;  %v4422_v22 = vmul.f32 %v9980_v4, %v9960_v18  ;;  %v4098_v11 = vmul.f32 0.6931472, %v5521_v59  ;;  %5534 = vpow2.f32 %v4059_v39  ;;  %v9987_v38 = vld [vmem:[#allocation44_spill] sm:$0xff] }
 0x49d   : > { %v4013_v48 = vmul.f32 1.442695, %v3989_v30  ;;  %v8948_v7 = vpop.xlane.xlu0 %3308  ;;  %v4423_v34 = vmul.f32 %v9981_v14, %v9963_v13  ;;  %v4061_v47 = vmul.f32 1.442695, %v4037_v51  ;;  %v4424_v33 = vmul.f32 %v9983_v46, %v9966_v32 }
 0x49e   : > { %v3990_v41 = vsub.f32 %v3942_v20, %v8944_v31  ;;  %v4038_v44 = vsub.f32 %v3958_v43, %v8944_v31  ;;  %v4298_v18 = vmul.f32 %v9970_v27, %v8810_v49  ;;  %v8961_v39 = vadd.f32 %v4098_v11, %v8840_v3  ;;  %v5523_v30 = vpop.eup %5522 }
 0x49f   : > { %5536 = vpow2.f32 %v4013_v48  ;;  %v4297_v13 = vmul.f32 %v9969_v63, %v8816_v8  ;;  %v8966_v20 = vsel %vm4256_vm7, %v4420_v24, 0.0  ;;  %v4100_v43 = vmul.f32 0.6931472, %v5523_v30  ;;  %v8982_v24 = vpop.xlane.xlu1 %3359 }
 0x4a0   : > { %9984 = vst [vmem:[#allocation102_spill] sm:$0xff] %v8961_v39  ;;  %5538 = vpow2.f32 %v4061_v47  ;;  %v4015_v51 = vmul.f32 1.442695, %v3990_v41  ;;  %v4063_v59 = vmul.f32 1.442695, %v4038_v44  ;;  %9985 = vst [vmem:[#allocation85_spill] sm:$0xff] %v8966_v20  ;;  %v3959_v32 = vsub.f32 %v8952_v26, %v9986_v57 }
 0x4a1   : > { %v3943_v49 = vsub.f32 %v8948_v7, %v9987_v38  ;;  %v8972_v3 = vpop.xlane.xlu0 %3311  ;;  %v8975_v11 = vsel %vm4256_vm7, %v4421_v61, 0.0  ;;  %v8978_v48 = vsel %vm4256_vm7, %v4422_v22, 0.0  ;;  %v4299_v41 = vmul.f32 %v9971_v19, %v8820_v29  ;;  %9990 = vst [vmem:[#allocation74_spill] sm:$0xff] %v8982_v24 }
 0x4a2   : > { %9988 = vst [vmem:[#allocation100_spill] sm:$0xff] %v8975_v11  ;;  %9989 = vst [vmem:[#allocation83_spill] sm:$0xff] %v8978_v48  ;;  %5540 = vpow2.f32 %v4015_v51  ;;  %v4330_v44 = vsel %vm4256_vm7, %v4298_v18, 0.0  ;;  %v8986_v30 = vadd.f32 %v4100_v43, %v8852_v54  ;;  %v8991_v39 = vsel %vm4256_vm7, %v4423_v34, 0.0  ;;  %v9994_v51 = vld [vmem:[#allocation47_spill] sm:$0xff] }
 0x4a3   : > { %v5525_v47 = vpop.eup %5524  ;;  %5542 = vpow2.f32 %v4063_v59  ;;  %v8988_v38 = vmax.f32 %v3943_v49, %v3959_v32  ;;  %9992 = vst [vmem:[#allocation104_spill] sm:$0xff] %v8991_v39  ;;  %v8994_v22 = vsel %vm4256_vm7, %v4424_v33, 0.0  ;;  %v4329_v29 = vsel %vm4256_vm7, %v4297_v13, 0.0  ;;  %v9995_v59 = vld [vmem:[#allocation14_spill] sm:$0xff] }
 0x4a4   : > { %9991 = vst [vmem:[#allocation20_spill] sm:$0xff] %v8986_v30  ;;  %v5527_v61 = vpop.eup %5526  ;;  %9993 = vst [vmem:[#allocation105_spill] sm:$0xff] %v8994_v22  ;;  %v3944_v26 = vsub.f32 %v8972_v3, %v9994_v51  ;;  %v4300_v54 = vmul.f32 %v9978_v10, %v8828_v12  ;;  %v3960_v43 = vsub.f32 %v8982_v24, %v9995_v59  ;;  %v4332_v33 = vsel %vm4256_vm7, %v4299_v41, 0.0 }
 0x4a5   : > { %v5529_v48 = vpop.eup %5528  ;;  %v4102_v18 = vmul.f32 0.6931472, %v5527_v61  ;;  %v3991_v30 = vsub.f32 %v3943_v49, %v8988_v38  ;;  %v9004_v34 = vpop.xlane.xlu0 %3314  ;;  %v4331_v39 = vadd.f32 %v4330_v44, %v4329_v29  ;;  %v4039_v13 = vsub.f32 %v3959_v32, %v8988_v38  ;;  %v9999_v44 = vld [vmem:[#allocation12_spill] sm:$0xff] }
 0x4a6   : > { %v4083_v22 = vadd.f32 %v5529_v48, %v5525_v47  ;;  %v4301_v51 = vmul.f32 %v9979_v40, %v8842_v58  ;;  %v9013_v61 = vmax.f32 %v3944_v26, %v3960_v43  ;;  %v9017_v49 = vsub.f32 %v8808_v52, %v9998_v16  ;;  %v9021_v58 = vpop.xlane.xlu1 %3362 }
 0x4a7   : > { %v9011_v11 = vadd.f32 %v4102_v18, %v8864_v1  ;;  %v4017_v12 = vmul.f32 1.442695, %v3991_v30  ;;  %v5531_v24 = vpop.eup %5530  ;;  %v4173_v29 = vadd.s32 112, %v9999_v44  ;;  %v4065_v48 = vmul.f32 1.442695, %v4039_v13  ;;  %10000 = vst [vmem:[#allocation90_spill] sm:$0xff] %v9021_v58 }
 0x4a8   : > { %9997 = vst [vmem:[#allocation88_spill] sm:$0xff] %v9013_v61  ;;  %5544 = vlog2.f32 %v4083_v22  ;;  %v5533_v41 = vpop.eup %5532  ;;  %v4333_v32 = vadd.f32 %v4332_v33, %v4331_v39  ;;  %v4334_v47 = vsel %vm4256_vm7, %v4300_v54, 0.0  ;;  %v3992_v1 = vsub.f32 %v3944_v26, %v9013_v61 }
 0x4a9   : > { %9996 = vst [vmem:[#allocation67_spill] sm:$0xff] %v9011_v11  ;;  %5546 = vpow2.f32 %v4017_v12  ;;  %v9024_v30 = vpop.xlane.xlu0 %3326  ;;  %v5535_v18 = vpop.eup %5534  ;;  %v4302_v52 = vmul.f32 %v9980_v4, %v8860_v42  ;;  %v4104_v16 = vmul.f32 0.6931472, %v5533_v41  ;;  %v4040_v22 = vsub.f32 %v3960_v43, %v9013_v61  ;;  %v10002_v11 = vld [vmem:[#allocation21_spill] sm:$0xff]  ;;  %v10003_v42 = vld [vmem:[#allocation63_spill] sm:$0xff]  ;;  %v10004_v43 = vld [vmem:[#allocation26_spill] sm:$0xff] }
 0x4aa   : > { %5548 = vpow2.f32 %v4065_v48  ;;  %v4336_v13 = vsel %vm4256_vm7, %v4301_v51, 0.0  ;;  %v4303_v39 = vmul.f32 %v9981_v14, %v8882_v50  ;;  %v4084_v54 = vadd.f32 %v5535_v18, %v5531_v24  ;;  %v10005_v4 = vld [vmem:[#allocation25_spill] sm:$0xff] }
 0x4ab   : > { %v4019_v33 = vmul.f32 1.442695, %v3992_v1  ;;  %v9033_v26 = vadd.f32 %v4104_v16, %v8874_v9  ;;  %v3961_v20 = vsub.f32 %v9021_v58, %v10002_v11  ;;  %v4067_v40 = vmul.f32 1.442695, %v4040_v22 }
 0x4ac   : > { %v5537_v12 = vpop.eup %5536  ;;  %v3945_v48 = vsub.f32 %v9004_v34, %v10003_v42  ;;  %v3933_v51 = vsub.f32 %v8816_v8, %v10004_v43  ;;  %v4190_v61 = vadd.s32 %v10005_v4, %v4173_v29  ;;  %v4335_v50 = vadd.f32 %v4334_v47, %v4333_v32 }
 0x4ad   : > { %10001 = vst [vmem:[#allocation106_spill] sm:$0xff] %v9033_v26  ;;  %v5539_v41 = vpop.eup %5538  ;;  %5550 = vlog2.f32 %v4084_v54  ;;  %v9042_v24 = vpop.xlane.xlu0 %3317  ;;  %v4338_v9 = vsel %vm4256_vm7, %v4302_v52, 0.0  ;;  %v4340_v42 = vsel %vm4256_vm7, %v4303_v39, 0.0  ;;  %v3949_v8 = vsub.f32 %v9024_v30, %v9968_v36  ;;  %v10007_v36 = vld [vmem:[#allocation23_spill] sm:$0xff] }
 0x4ae   : > { %v4085_v1 = vadd.f32 %v5539_v41, %v5537_v12  ;;  %5552 = vpow2.f32 %v4019_v33  ;;  %v9045_v18 = vmax.f32 %v3945_v48, %v3961_v20  ;;  %v4337_v22 = vadd.f32 %v4336_v13, %v4335_v50  ;;  %v9055_v13 = vpop.xlane.xlu1 %3365 }
 0x4af   : > { %v5541_v16 = vpop.eup %5540  ;;  %5554 = vpow2.f32 %v4067_v40  ;;  %v4304_v29 = vmul.f32 %v9983_v46, %v8892_v0  ;;  %v4174_v52 = vadd.s32 120, %v9999_v44  ;;  %10006 = vst [vmem:[#allocation70_spill] sm:$0xff] %v9055_v13  ;;  %v9057_v39 = vmax.f32 %v3933_v51, %v3949_v8 }
 0x4b0   : > { %v5543_v43 = vpop.eup %5542  ;;  %5556 = vlog2.f32 %v4085_v1  ;;  %v3993_v32 = vsub.f32 %v3945_v48, %v9045_v18  ;;  %v4041_v47 = vsub.f32 %v3961_v20, %v9045_v18  ;;  %v4339_v54 = vadd.f32 %v4338_v9, %v4337_v22 }
 0x4b1   : > { %v4086_v33 = vadd.f32 %v5543_v43, %v5541_v16  ;;  %v3657_v40 = vpop.xlane.xlu0 %3656  ;;  %vm4206_vm0 = vcmp.lt.s32.totalorder %v4190_v61, 200  ;;  %v4305_v12 = vmul.f32 %v10007_v36, %v8906_v53  ;;  %v3981_v48 = vsub.f32 %v3933_v51, %v9057_v39  ;;  %v10008_v16 = vld [vmem:[#allocation57_spill] sm:$0xff]  ;;  %v10014_v61 = vld [vmem:[#allocation51_spill] sm:$0xff] }
 0x4b2   : > { %v4021_v41 = vmul.f32 1.442695, %v3993_v32  ;;  %v4069_v0 = vmul.f32 1.442695, %v4041_v47  ;;  %v4341_v50 = vadd.f32 %v4340_v42, %v4339_v54  ;;  %v4029_v20 = vsub.f32 %v3949_v8, %v9057_v39  ;;  %v10009_v53 = vld [vmem:[#allocation45_spill] sm:$0xff]  ;;  %v9076_v58 = vpop.xlane.xlu1 %3368 }
 0x4b3   : > { %5558 = vlog2.f32 %v4086_v33  ;;  %v4342_v9 = vsel %vm4256_vm7, %v4304_v29, 0.0  ;;  %v3962_v1 = vsub.f32 %v9055_v13, %v9017_v49  ;;  %v3946_v22 = vsub.f32 %v9042_v24, %v10008_v16  ;;  %v10010_v16 = vld [vmem:[#allocation33_spill] sm:$0xff]  ;;  %10011 = vst [vmem:[#allocation18_spill] sm:$0xff] %v9076_v58 }
 0x4b4   : > { %5560 = vpow2.f32 %v4021_v41  ;;  %v4306_v32 = vmul.f32 %v10009_v53, %v8926_v60  ;;  %v3997_v42 = vmul.f32 1.442695, %v3981_v48  ;;  %v4045_v47 = vmul.f32 1.442695, %v4029_v20 }
 0x4b5   : > { %v5545_v43 = vpop.eup %5544  ;;  %5562 = vpow2.f32 %v4069_v0  ;;  %v3849_v54 = vpop.xlane.xlu0 %3848  ;;  %v4191_v8 = vadd.s32 %v10005_v4, %v4174_v52  ;;  %v4344_v29 = vsel %vm4256_vm7, %v4305_v12, 0.0  ;;  %v9072_v44 = vmax.f32 %v3946_v22, %v3962_v1 }
 0x4b6   : > { %v5547_v51 = vpop.eup %5546  ;;  %v4106_v33 = vmul.f32 0.6931472, %v5545_v43  ;;  %v4343_v13 = vadd.f32 %v4342_v9, %v4341_v50  ;;  %v4307_v26 = vmul.f32 %v10010_v16, %v8948_v7  ;;  %5564 = vpow2.f32 %v3997_v42 }
 0x4b7   : > { %v5549_v41 = vpop.eup %5548  ;;  %v3915_v60 = vsub.f32 %v3657_v40, %v3849_v54  ;;  %5566 = vpow2.f32 %v4045_v47  ;;  %v3994_v4 = vsub.f32 %v3946_v22, %v9072_v44  ;;  %v10013_v52 = vmov 0.0  }
 0x4b8   : > { %v9079_v0 = vadd.f32 %v4106_v33, %v8888_v28  ;;  %v4087_v48 = vadd.f32 %v5549_v41, %v5547_v51  ;;  %v9084_v12 = vsel %vm4206_vm0, 1.0, %v10013_v52  ;;  %v4345_v20 = vadd.f32 %v4344_v29, %v4343_v13 }
 0x4b9   : > { %v4346_v50 = vsel %vm4256_vm7, %v4306_v32, 0.0  ;;  %v4042_v7 = vsub.f32 %v3962_v1, %v9072_v44  ;;  %v3321_v9 = vpop.xlane.xlu0 %3320  ;;  %v3963_v28 = vsub.f32 %v9076_v58, %v8812_v35  ;;  %v4023_v40 = vmul.f32 1.442695, %v3994_v4  ;;  %v10015_v4 = vld [vmem:[#allocation59_spill] sm:$0xff] }
 0x4ba   : > { %10012 = vst [vmem:[#allocation93_spill] sm:$0xff] %v9079_v0  ;;  %v5551_v43 = vpop.eup %5550  ;;  %5568 = vlog2.f32 %v4087_v48  ;;  %v3947_v42 = vsub.f32 %v3321_v9, %v3915_v60  ;;  %vm4207_vm6 = vcmp.lt.s32.totalorder %v4191_v8, 200  ;;  %v4308_v54 = vmul.f32 %v10014_v61, %v8972_v3 }
 0x4bb   : > { %v5553_v47 = vpop.eup %5552  ;;  %v4108_v22 = vmul.f32 0.6931472, %v5551_v43  ;;  %v4071_v51 = vmul.f32 1.442695, %v4042_v7  ;;  %v4347_v33 = vadd.f32 %v4346_v50, %v4345_v20  ;;  %v4348_v32 = vsel %vm4256_vm7, %v4307_v26, 0.0  ;;  %v10016_v7 = vld [vmem:[#allocation65_spill] sm:$0xff] }
 0x4bc   : > { %v5555_v13 = vpop.eup %5554  ;;  %5570 = vpow2.f32 %v4023_v40  ;;  %v9093_v1 = vmax.f32 %v3947_v42, %v3963_v28  ;;  %v4309_v58 = vmul.f32 %v10015_v4, %v9004_v34  ;;  %v4415_v3 = vmul.f32 %v9084_v12, %v3915_v60 }
 0x4bd   : > { %v5557_v29 = vpop.eup %5556  ;;  %v9096_v41 = vadd.f32 %v4108_v22, %v8904_v25  ;;  %v4088_v48 = vadd.f32 %v5555_v13, %v5553_v47  ;;  %5572 = vpow2.f32 %v4071_v51  ;;  %v3660_v43 = vpop.xlane.xlu0 %3659  ;;  %v9105_v50 = vmul.f32 %v10007_v36, %v9972_v55 }
 0x4be   : > { %v4110_v0 = vmul.f32 0.6931472, %v5557_v29  ;;  %v3995_v20 = vsub.f32 %v3947_v42, %v9093_v1  ;;  %v4043_v26 = vsub.f32 %v3963_v28, %v9093_v1  ;;  %v4350_v25 = vsel %vm4256_vm7, %v4308_v54, 0.0 }
 0x4bf   : > { %5574 = vlog2.f32 %v4088_v48  ;;  %v4310_v40 = vmul.f32 %v10016_v7, %v9042_v24  ;;  %v4349_v22 = vadd.f32 %v4348_v32, %v4347_v33  ;;  %v9115_v28 = vsel %vm4207_vm6, 1.0, %v10013_v52 }
 0x4c0   : > { %v5559_v34 = vpop.eup %5558  ;;  %v9111_v47 = vadd.f32 %v4110_v0, %v8924_v15  ;;  %v4025_v60 = vmul.f32 1.442695, %v3995_v20  ;;  %v4073_v51 = vmul.f32 1.442695, %v4043_v26  ;;  %v4352_v13 = vsel %vm4256_vm7, %v4309_v58, 0.0  ;;  %v9123_v0 = vpop.xlane.xlu1 %3371 }
 0x4c1   : > { %v5561_v42 = vpop.eup %5560  ;;  %v4112_v55 = vmul.f32 0.6931472, %v5559_v34  ;;  %v4311_v54 = vmul.f32 %v9084_v12, %v3321_v9  ;;  %v3852_v29 = vpop.xlane.xlu0 %3851  ;;  %v9121_v24 = vsub.f32 %v8814_v37, %v8818_v45  ;;  %v4351_v15 = vadd.f32 %v4350_v25, %v4349_v22 }
 0x4c2   : > { %v5563_v48 = vpop.eup %5562  ;;  %v4460_v33 = vsel %vm4256_vm7, %v4415_v3, 0.0  ;;  %v3916_v32 = vsub.f32 %v3660_v43, %v3852_v29  ;;  %v4354_v58 = vsel %vm4256_vm7, %v4310_v40, 0.0  ;;  %5576 = vpow2.f32 %v4025_v60  ;;  %v10017_v3 = vld [vmem:[#allocation68_spill] sm:$0xff] }
 0x4c3   : > { %v9127_v8 = vadd.f32 %v4112_v55, %v8944_v31  ;;  %v4089_v52 = vadd.f32 %v5563_v48, %v5561_v42  ;;  %v5565_v9 = vpop.eup %5564  ;;  %v4426_v20 = vmul.f32 %v10009_v53, %v9975_v23  ;;  %v4353_v26 = vadd.f32 %v4352_v13, %v4351_v15 }
 0x4c4   : > { %5578 = vpow2.f32 %v4073_v51  ;;  %v4416_v37 = vmul.f32 %v9115_v28, %v3916_v32  ;;  %v5567_v45 = vpop.eup %5566  ;;  %v3964_v43 = vsub.f32 %v9123_v0, %v9121_v24  ;;  %v4461_v31 = vadd.f32 %v4460_v33, %v10017_v3 }
 0x4c5   : > { %5580 = vlog2.f32 %v4089_v52  ;;  %v4356_v25 = vsel %vm4256_vm7, %v4311_v54, 0.0  ;;  %v3324_v34 = vpop.xlane.xlu0 %3323  ;;  %v4077_v40 = vadd.f32 %v5567_v45, %v5565_v9  ;;  %v4355_v22 = vadd.f32 %v4354_v58, %v4353_v26 }
 0x4c6   : > { %v4462_v60 = vsel %vm4256_vm7, %v4416_v37, 0.0  ;;  %v3948_v42 = vsub.f32 %v3324_v34, %v3916_v32  ;;  %v4314_v51 = vmul.f32 %v9970_v27, %v8822_v6  ;;  %v4313_v55 = vmul.f32 %v9969_v63, %v9024_v30 }
 0x4c7   : > { %v5569_v23 = vpop.eup %5568  ;;  %v4463_v13 = vadd.f32 %v4462_v60, %v4461_v31  ;;  %v4312_v29 = vmul.f32 %v9115_v28, %v3324_v34  ;;  %5582 = vlog2.f32 %v4077_v40  ;;  %v4357_v15 = vadd.f32 %v4356_v25, %v4355_v22 }
 0x4c8   : > { %v4114_v48 = vmul.f32 0.6931472, %v5569_v23  ;;  %v9143_v54 = vmax.f32 %v3948_v42, %v3964_v43  ;;  %v4427_v52 = vmul.f32 %v10010_v16, %v9986_v57  ;;  %v4428_v32 = vmul.f32 %v10014_v61, %v9995_v59 }
 0x4c9   : > { %v5571_v33 = vpop.eup %5570  ;;  %v4465_v6 = vadd.f32 %v8919_v56, %v4463_v13  ;;  %v4358_v58 = vsel %vm4256_vm7, %v4312_v29, 0.0  ;;  %v4315_v3 = vmul.f32 %v9971_v19, %v8832_v21  ;;  %v4360_v57 = vsel %vm4256_vm7, %v4313_v55, 0.0  ;;  %v10019_v55 = vld [vmem:[#allocation88_spill] sm:$0xff]  ;;  %v10020_v29 = vld [vmem:[#allocation85_spill] sm:$0xff] }
 0x4ca   : > { %v5573_v30 = vpop.eup %5572  ;;  %v9152_v9 = vadd.f32 %v4114_v48, %v8988_v38  ;;  %v3996_v26 = vsub.f32 %v3948_v42, %v9143_v54  ;;  %v4044_v37 = vsub.f32 %v3964_v43, %v9143_v54  ;;  %v4359_v45 = vadd.f32 %v4358_v58, %v4357_v15  ;;  %v10018_v42 = vld [vmem:[#allocation42_spill] sm:$0xff] }
 0x4cb   : > { %v4090_v31 = vadd.f32 %v5573_v30, %v5571_v33  ;;  %v4467_v59 = vadd.f32 %v8922_v2, %v4465_v6  ;;  %v4362_v25 = vsel %vm4256_vm7, %v4314_v51, 0.0  ;;  %v4316_v22 = vmul.f32 %v9978_v10, %v8846_v5  ;;  %v10022_v33 = vld [vmem:[#allocation19_spill] sm:$0xff] }
 0x4cc   : > { %v5575_v56 = vpop.eup %5574  ;;  %v4027_v34 = vmul.f32 1.442695, %v3996_v26  ;;  %v4075_v40 = vmul.f32 1.442695, %v4044_v37  ;;  %v4361_v38 = vadd.f32 %v4360_v57, %v4359_v45  ;;  %v4429_v21 = vmul.f32 %v10015_v4, %v10002_v11  ;;  %v10021_v11 = vld [vmem:[#allocation91_spill] sm:$0xff]  ;;  %v10023_v45 = vld [vmem:[#allocation100_spill] sm:$0xff] }
 0x4cd   : > { %v4116_v60 = vmul.f32 0.6931472, %v5575_v56  ;;  %5584 = vlog2.f32 %v4090_v31  ;;  %v4469_v43 = vadd.f32 %v8929_v17, %v4467_v59  ;;  %v4317_v23 = vmul.f32 %v10018_v42, %v8856_v62  ;;  %v10024_v56 = vld [vmem:[#allocation96_spill] sm:$0xff] }
 0x4ce   : > { %5586 = vpow2.f32 %v4027_v34  ;;  %v4363_v2 = vadd.f32 %v4362_v25, %v4361_v38  ;;  %v4364_v51 = vsel %vm4256_vm7, %v4315_v3, 0.0  ;;  %v4480_v17 = vsel %vm4256_vm7, %v9105_v50, 0.0 }
 0x4cf   : > { %v9170_v13 = vadd.f32 %v4116_v60, %v10019_v55  ;;  %v4471_v48 = vadd.f32 %v10020_v29, %v4469_v43  ;;  %5588 = vpow2.f32 %v4075_v40  ;;  %v5577_v5 = vpop.eup %5576  ;;  %v4482_v15 = vsel %vm4256_vm7, %v4426_v20, 0.0  ;;  %v10026_v40 = vld [vmem:[#allocation83_spill] sm:$0xff]  ;;  %v10027_v60 = vld [vmem:[#allocation86_spill] sm:$0xff]  ;;  %v10029_v55 = vld [vmem:[#allocation76_spill] sm:$0xff] }
 0x4d0   : > { %v4318_v6 = vmul.f32 %v10022_v33, %v10021_v11  ;;  %v4365_v62 = vadd.f32 %v4364_v51, %v4363_v2  ;;  %v4484_v30 = vsel %vm4256_vm7, %v4427_v52, 0.0  ;;  %v9180_v26 = vsel %vm4256_vm7, %v4428_v32, 0.0  ;;  %v10025_v52 = vld [vmem:[#allocation89_spill] sm:$0xff]  ;;  %v10030_v11 = vld [vmem:[#allocation104_spill] sm:$0xff] }
 0x4d1   : > { %v5579_v58 = vpop.eup %5578  ;;  %v4366_v37 = vsel %vm4256_vm7, %v4316_v22, 0.0  ;;  %v4473_v3 = vadd.f32 %v10023_v45, %v4471_v48  ;;  %v9185_v31 = vsel %vm4256_vm7, %v4429_v21, 0.0  ;;  %v4430_v50 = vmul.f32 %v10016_v7, %v9017_v49  ;;  %v10028_v49 = vld [vmem:[#allocation82_spill] sm:$0xff] }
 0x4d2   : > { %v5581_v57 = vpop.eup %5580  ;;  %v4368_v20 = vsel %vm4256_vm7, %v4317_v23, 0.0  ;;  %v4367_v59 = vadd.f32 %v4366_v37, %v4365_v62  ;;  %v4927_v25 = vadd.f32 -0.6931472, %v10024_v56  ;;  %v4319_v32 = vmul.f32 %v9981_v14, %v10025_v52 }
 0x4d3   : > { %v4118_v34 = vmul.f32 0.6931472, %v5581_v57  ;;  %v4475_v38 = vadd.f32 %v10026_v40, %v4473_v3  ;;  %v4370_v22 = vsel %vm4256_vm7, %v4318_v6, 0.0  ;;  %v4320_v43 = vmul.f32 %v9983_v46, %v10027_v60  ;;  %v10031_v6 = vld [vmem:[#allocation101_spill] sm:$0xff] }
 0x4d4   : > { %v4091_v21 = vadd.f32 %v5579_v58, %v5577_v5  ;;  %v4369_v2 = vadd.f32 %v4368_v20, %v4367_v59  ;;  %v5583_v51 = vpop.eup %5582  ;;  %v4321_v23 = vmul.f32 %v10007_v36, %v10028_v49  ;;  %v4322_v29 = vmul.f32 %v10009_v53, %v10029_v55  ;;  %v10032_v59 = vld [vmem:[#allocation105_spill] sm:$0xff] }
 0x4d5   : > { %v9202_v48 = vadd.f32 %v4118_v34, %v9045_v18  ;;  %v4477_v62 = vadd.f32 %v10030_v11, %v4475_v38  ;;  %v4490_v37 = vsel %vm4256_vm7, %v4430_v50, 0.0  ;;  %v4323_v45 = vmul.f32 %v10010_v16, %v10031_v6  ;;  %v10033_v18 = vld [vmem:[#allocation102_spill] sm:$0xff] }
 0x4d6   : > { %v4094_v3 = vmul.f32 0.6931472, %v5583_v51  ;;  %v4371_v5 = vadd.f32 %v4370_v22, %v4369_v2  ;;  %v4431_v58 = vmul.f32 %v9084_v12, %v8812_v35  ;;  %v4241_v57 = vmul.f32 %v9970_v27, %v4927_v25  ;;  %v10034_v2 = vld [vmem:[#allocation20_spill] sm:$0xff] }
 0x4d7   : > { %v4372_v20 = vsel %vm4256_vm7, %v4319_v32, 0.0  ;;  %v4479_v56 = vadd.f32 %v10032_v59, %v4477_v62  ;;  %v4928_v52 = vadd.f32 -0.6931472, %v10033_v18  ;;  %5590 = vlog2.f32 %v4091_v21  ;;  %v10038_v18 = vld [vmem:[#allocation106_spill] sm:$0xff] }
 0x4d8   : > { %v4125_v34 = vadd.f32 %v4094_v3, %v9057_v39  ;;  %v4373_v50 = vadd.f32 %v4372_v20, %v4371_v5  ;;  %v4374_v40 = vsel %vm4256_vm7, %v4320_v43, 0.0  ;;  %v4376_v38 = vsel %vm4256_vm7, %v4321_v23, 0.0  ;;  %v10035_v39 = vld [vmem:[#allocation74_spill] sm:$0xff] }
 0x4d9   : > { %v4378_v22 = vsel %vm4256_vm7, %v4322_v29, 0.0  ;;  %v4481_v60 = vadd.f32 %v4480_v17, %v4479_v56  ;;  %v4929_v27 = vadd.f32 -0.6931472, %v10034_v2  ;;  %v4380_v25 = vsel %vm4256_vm7, %v4323_v45, 0.0  ;;  %v10036_v29 = vld [vmem:[#allocation67_spill] sm:$0xff]  ;;  %v10037_v5 = vld [vmem:[#allocation90_spill] sm:$0xff] }
 0x4da   : > { %v5585_v35 = vpop.eup %5584  ;;  %v4926_v32 = vadd.f32 -0.6931472, %v4125_v34  ;;  %v4375_v51 = vadd.f32 %v4374_v40, %v4373_v50  ;;  %v4258_v55 = vsel %vm4256_vm7, %v4241_v57, 0.0  ;;  %v4324_v21 = vmul.f32 %v10014_v61, %v10035_v39 }
 0x4db   : > { %v5587_v49 = vpop.eup %5586  ;;  %v4120_v11 = vmul.f32 0.6931472, %v5585_v35  ;;  %v4483_v43 = vadd.f32 %v4482_v15, %v4481_v60  ;;  %v4242_v23 = vmul.f32 %v9971_v19, %v4928_v52  ;;  %v4930_v17 = vadd.f32 -0.6931472, %v10036_v29  ;;  %v10039_v52 = vld [vmem:[#allocation93_spill] sm:$0xff]  ;;  %v10040_v35 = vld [vmem:[#allocation70_spill] sm:$0xff] }
 0x4dc   : > { %v5589_v62 = vpop.eup %5588  ;;  %v4240_v6 = vmul.f32 %v9969_v63, %v4926_v32  ;;  %v4377_v3 = vadd.f32 %v4376_v38, %v4375_v51  ;;  %v4325_v45 = vmul.f32 %v10015_v4, %v10037_v5  ;;  %v4243_v56 = vmul.f32 %v9978_v10, %v4929_v27 }
 0x4dd   : > { %v9229_v20 = vadd.f32 %v4120_v11, %v9072_v44  ;;  %v4092_v57 = vadd.f32 %v5589_v62, %v5587_v49  ;;  %v4485_v59 = vadd.f32 %v4484_v30, %v4483_v43  ;;  %v4931_v15 = vadd.f32 -0.6931472, %v10038_v18 }
 0x4de   : > { %v4257_v34 = vsel %vm4256_vm7, %v4240_v6, 0.0  ;;  %v4379_v19 = vadd.f32 %v4378_v22, %v4377_v3  ;;  %v4932_v50 = vadd.f32 -0.6931472, %v10039_v52  ;;  %v4260_v38 = vsel %vm4256_vm7, %v4242_v23, 0.0 }
 0x4df   : > { %v4259_v40 = vadd.f32 %v4258_v55, %v4257_v34  ;;  %5592 = vlog2.f32 %v4092_v57  ;;  %v4487_v63 = vadd.f32 %v9180_v26, %v4485_v59  ;;  %v4244_v44 = vmul.f32 %v10018_v42, %v4930_v17  ;;  %v10041_v55 = vld [vmem:[#allocation18_spill] sm:$0xff] }
 0x4e0   : > { %v4382_v60 = vsel %vm4256_vm7, %v4324_v21, 0.0  ;;  %v4381_v30 = vadd.f32 %v4380_v25, %v4379_v19  ;;  %v4384_v10 = vsel %vm4256_vm7, %v4325_v45, 0.0  ;;  %v4326_v2 = vmul.f32 %v10016_v7, %v10040_v35 }
 0x4e1   : > { %v4261_v27 = vadd.f32 %v4260_v38, %v4259_v40  ;;  %v4489_v22 = vadd.f32 %v9185_v31, %v4487_v63  ;;  %v4262_v32 = vsel %vm4256_vm7, %v4243_v56, 0.0  ;;  %v4245_v51 = vmul.f32 %v10022_v33, %v4931_v15 }
 0x4e2   : > { %v4933_v26 = vadd.f32 -0.6931472, %v9096_v41  ;;  %v4383_v49 = vadd.f32 %v4382_v60, %v4381_v30  ;;  %v4246_v42 = vmul.f32 %v9981_v14, %v4932_v50  ;;  %v4327_v25 = vmul.f32 %v9084_v12, %v10041_v55 }
 0x4e3   : > { %v4263_v39 = vadd.f32 %v4262_v32, %v4261_v27  ;;  %v4491_v21 = vadd.f32 %v4490_v37, %v4489_v22  ;;  %v4492_v11 = vsel %vm4256_vm7, %v4431_v58, 0.0  ;;  %v4264_v43 = vsel %vm4256_vm7, %v4244_v44, 0.0 }
 0x4e4   : > { %v4934_v31 = vadd.f32 -0.6931472, %v9111_v47  ;;  %v4385_v62 = vadd.f32 %v4384_v10, %v4383_v49  ;;  %v5591_v23 = vpop.eup %5590  ;;  %v4386_v33 = vsel %vm4256_vm7, %v4326_v2, 0.0  ;;  %v4328_v41 = vmul.f32 %v9115_v28, %v9123_v0 }
 0x4e5   : > { %v4265_v29 = vadd.f32 %v4264_v43, %v4263_v39  ;;  %v4493_v14 = vadd.f32 %v4492_v11, %v4491_v21  ;;  %v4266_v17 = vsel %vm4256_vm7, %v4245_v51, 0.0  ;;  %v4247_v6 = vmul.f32 %v9983_v46, %v4933_v26 }
 0x4e6   : > { %v4935_v37 = vadd.f32 -0.6931472, %v9127_v8  ;;  %v4387_v58 = vadd.f32 %v4386_v33, %v4385_v62  ;;  %v4268_v3 = vsel %vm4256_vm7, %v4246_v42, 0.0  ;;  %v4388_v47 = vsel %vm4256_vm7, %v4327_v25, 0.0 }
 0x4e7   : > { %v4267_v5 = vadd.f32 %v4266_v17, %v4265_v29  ;;  %v4248_v45 = vmul.f32 %v10007_v36, %v4934_v31  ;;  %v4936_v57 = vadd.f32 -0.6931472, %v9152_v9  ;;  %v4122_v59 = vmul.f32 0.6931472, %v5591_v23 }
 0x4e8   : > { %v4389_v56 = vadd.f32 %v4388_v47, %v4387_v58  ;;  %v4390_v0 = vsel %vm4256_vm7, %v4328_v41, 0.0  ;;  %v4270_v15 = vsel %vm4256_vm7, %v4247_v6, 0.0  ;;  %v4249_v46 = vmul.f32 %v10009_v53, %v4935_v37 }
 0x4e9   : > { %v4269_v18 = vadd.f32 %v4268_v3, %v4267_v5  ;;  %v4937_v8 = vadd.f32 -0.6931472, %v9170_v13  ;;  %v4272_v50 = vsel %vm4256_vm7, %v4248_v45, 0.0  ;;  %v4250_v36 = vmul.f32 %v10010_v16, %v4936_v57  ;;  %v10042_v57 = vld [vmem:[#allocation12_spill] sm:$0xff] }
 0x4ea   : > { %v4391_v34 = vadd.f32 %v4390_v0, %v4389_v56  ;;  %v4938_v9 = vadd.f32 -0.6931472, %v9202_v48  ;;  %v4139_v40 = vadd.f32 %v4122_v59, %v9093_v1  ;;  %v4274_v44 = vsel %vm4256_vm7, %v4249_v46, 0.0 }
 0x4eb   : > { %v4271_v19 = vadd.f32 %v4270_v15, %v4269_v18  ;;  %v4251_v53 = vmul.f32 %v10014_v61, %v4937_v8  ;;  %v4939_v13 = vadd.f32 -0.6931472, %v9229_v20  ;;  %v4276_v10 = vsel %vm4256_vm7, %v4250_v36, 0.0 }
 0x4ec   : > { %v5593_v52 = vpop.eup %5592  ;;  %4392 = vadd.xlane.f32.xlu1 %v4391_v34  ;;  %v4252_v16 = vmul.f32 %v10015_v4, %v4938_v9  ;;  %v4940_v35 = vadd.f32 -0.6931472, %v4139_v40  ;;  %v4432_v55 = vmul.f32 %v9115_v28, %v9121_v24  ;;  %vm4506_vm8 = vcmp.eq.s32.totalorder %v10042_v57, 1 }
 0x4ed   : > { %v4124_v63 = vmul.f32 0.6931472, %v5593_v52  ;;  %v4273_v38 = vadd.f32 %v4272_v50, %v4271_v19  ;;  %v4278_v1 = vsel %vm4256_vm7, %v4251_v53, 0.0  ;;  %v4253_v27 = vmul.f32 %v10016_v7, %v4939_v13 }
 0x4ee   : > { %v4254_v32 = vmul.f32 %v9084_v12, %v4940_v35  ;;  %v4280_v20 = vsel %vm4256_vm7, %v4252_v16, 0.0  ;;  %v4494_v12 = vsel %vm4256_vm7, %v4432_v55, 0.0  ;;  %vm4505_vm9 = vcmp.eq.s32.totalorder %v10042_v57, 0 }
 0x4ef   : > { %v4140_v60 = vadd.f32 %v4124_v63, %v9143_v54  ;;  %v4275_v30 = vadd.f32 %v4274_v44, %v4273_v38  ;;  %v4282_v51 = vsel %vm4256_vm7, %v4253_v27, 0.0  ;;  %v4495_v25 = vadd.f32 %v4494_v12, %v4493_v14 }
 0x4f0   : > { %v4284_v4 = vsel %vm4256_vm7, %v4254_v32, 0.0 }
 0x4f1   : > { %v4941_v48 = vadd.f32 -0.6931472, %v4140_v60  ;;  %v4277_v2 = vadd.f32 %v4276_v10, %v4275_v30 }
 0x4f3   : > { %v4279_v22 = vadd.f32 %v4278_v1, %v4277_v2  ;;  %v4255_v61 = vmul.f32 %v9115_v28, %v4941_v48 }
 0x4f5   : > { %v4281_v54 = vadd.f32 %v4280_v20, %v4279_v22  ;;  %v4286_v49 = vsel %vm4256_vm7, %v4255_v61, 0.0  ;;  %vm4507_vm7 = vcmp.eq.s32.totalorder %v10042_v57, 2 }
 0x4f7   : > { %v4283_v26 = vadd.f32 %v4282_v51, %v4281_v54 }
 0x4f9   : > { %v4285_v42 = vadd.f32 %v4284_v4, %v4283_v26 }
 0x4fb   : > { %v4287_v7 = vadd.f32 %v4286_v49, %v4285_v42 }
 0x4fd   : > { %4288 = vadd.xlane.f32.xlu0 %v4287_v7 }
 0x501   : > { %4496 = vadd.xlane.f32.xlu0 %v4495_v25 }
 0x575   : > { %v4393_v39 = vpop.xlane.xlu1 %4392 }
 0x576   : > { %v4394_v21 = vrot.slane %v4393_v39, 4 }
 0x578   : > { %v4395_v11 = vadd.f32 %v4394_v21, %v4393_v39 }
 0x57a   : > { %v4396_v43 = vrot.slane %v4395_v11, 2 }
 0x57c   : > { %v4397_v33 = vadd.f32 %v4396_v43, %v4395_v11 }
 0x57e   : > { %v4398_v24 = vrot.slane %v4397_v33, 1 }
 0x580   : > { %v4399_v47 = vadd.f32 %v4398_v24, %v4397_v33 }
 0x586   : > { %v4289_v31 = vpop.xlane.xlu0 %4288 }
 0x587   : > { %v4290_v62 = vrot.slane %v4289_v31, 4 }
 0x589   : > { %v4291_v23 = vadd.f32 %v4290_v62, %v4289_v31 }
 0x58a   : > { %v4497_v29 = vpop.xlane.xlu0 %4496 }
 0x58b   : > { %v4292_v41 = vrot.slane %v4291_v23, 2  ;;  %v4498_v17 = vrot.slane %v4497_v29, 4 }
 0x58d   : > { %v4499_v6 = vadd.f32 %v4498_v17, %v4497_v29  ;;  %v4293_v28 = vadd.f32 %v4292_v41, %v4291_v23 }
 0x58f   : > { %v4500_v37 = vrot.slane %v4499_v6, 2  ;;  %v4294_v58 = vrot.slane %v4293_v28, 1 }
 0x591   : > { %v4501_v3 = vadd.f32 %v4500_v37, %v4499_v6  ;;  %v4295_v14 = vadd.f32 %v4294_v58, %v4293_v28 }
 0x593   : > { %5028 = vpush %v4295_v14  ;;  %v4502_v5 = vrot.slane %v4501_v3, 1 }
 0x594   : > { %5030 = vpush %v4399_v47 }
 0x595   : > { %v4503_v45 = vadd.f32 %v4502_v5, %v4501_v3 }
 0x597   : > { %5032 = vpush %v4503_v45 }
 0x5c4   : > { %s5029_s22 = spop %5028 }
 0x5c5   : > { %s5031_s16 = spop %5030  ;;  %v4512_v18 = vstv %s5029_s22 }
 0x5c6   : > { %v4510_v56 = vstv %s5031_s16  ;;  %s5640_s16 = sshll.u32 %s5708_s30, 4  ;;  %s5641_s16 = int_to_ptr.vmem [resolvable:$false] %s5640_s16 }
 0x5c7   : > { %s5642_s22 = scalar_lea.vmem %s5641_s16, 256  ;;  %p5643_p13 = scmp.lt.s32.totalorder %s4555_s14, %s5641_s16 }
 0x5c8   : > { %s5033_s25 = spop %5032  ;;  %p5644_p0 = scmp.lt.s32.totalorder %s5642_s22, %s5636_s15 }
 0x5c9   : > { %v4508_v59 = vstv %s5033_s25 }
 0x5ca   : > { %v4509_v0 = vsel %vm4507_vm7, %v4508_v59, 0.0  ;;  %p5645_p1 = por %p5644_p0, %p5643_p13 }
 0x5cb   : > { %v4511_v15 = vsel %vm4506_vm8, %v4510_v56, %v4509_v0 }
 0x5cc   : > { %v4513_v46 = vsel %vm4505_vm9, %v4512_v18, %v4511_v15  ;;  %p5646_p2 = pnand %p5645_p1, %p5639_p12 }
 0x5cd   : > { %4514 = vst [vmem:[%s576_s12] sm:$0xff] %v4513_v46 }
 0x5ce   : > { %5649 = shalt.err (!%p5646_p2)
}
 0x5cf   : > { %s5650_s21 = scalar_lea.hbm %s9296_s13, 128  ;;  %s5654_s25 = scalar_lea.hbm %s9339_s6, 256 }
 0x5d0   : > { %p5651_p3 = scmp.ne.s32.totalorder %s9296_s13, %s5650_s21  ;;  %p5655_p8 = scmp.lt.s32.totalorder %s9296_s13, %s9339_s6 }
 0x5d1   : > { %p5656_p5 = scmp.lt.s32.totalorder %s5654_s25, %s5650_s21 }
 0x5d2   : > { %p5652_p4 = pnand %p5651_p3, %p10043_p10 }
 0x5d3   : > { %p5657_p6 = por %p5656_p5, %p5655_p8 }
 0x5d4   : > { %p5653_p7 = pneg %p5652_p4 }
 0x5d6   : > { %p5658_p11 = pnand %p5657_p6, %p5653_p7 }
 0x5d8   : > { %5661 = shalt.err (!%p5658_p11)
}
 0x5d9   : > { %5038 = dma.vmem_to_hbm [thread:$0]  (%p10043_p10), %s4555_s14, 128, %s9296_s13, %s4516_s29  }
 0x5da PF: > { %s10044_s26 = sld [smem:[#allocation11_spill]]  ;;  %s4586_s15 = sand.u32 1, %s5688_s17  }
 0x5db   : > { %s4587_s30 = scalar_lea.sflag [#allocation5], %s4586_s15 }
 0x5e0   : > { %p10045_p12 = scmp.ne.s32.totalorder %s10044_s26, 0 }
 0x5e2   : > { %p5045_p13 = pnand %p4791_p9, %p10045_p12 }
 0x5e4   : > { %p5046_p0 = pneg %p5045_p13 }
 0x5e6   : > { %5683 = dma.done.wait (%p5046_p0), %s4587_s30, 128  }
 0x5e7   : > { %5685 = vsyncadd (%p5046_p0), %s4587_s30, 4294967168  ;;  %s10046_s20 = sld [smem:[#allocation9_spill]]  ;;  %s10048_s17 = smov %s5692_s18 }
 0x5e8   : > { %s10047_s16 = sld [smem:[#allocation10_spill]]  ;;  %s10049_s18 = smov %s5696_s19 }
 0x5ed   : > { %p23_p1 = scmp.ge.s32.totalorder %s10046_s20, 4  }
 0x5ee   : > { %s10050_s19 = smov %s10047_s16 }
 0x5ef   :  { %25 = sbr.rel (!%p23_p1) target bundleno = 4 (0x4), region = 195 }
 0x5f4   :  { %4632 = vsyncpa [#allocation4], 1 }
 0x5f5   :  { %4634 = vsyncpa [#allocation4 + $0x1], 1 }
 0x5f6   :  { %4635 = vsyncpa [#allocation5], 1 }
 0x5f7   :  { %4637 = vsyncpa [#allocation5 + $0x1], 1 }

</bundles_post_ra>
